<compile_context>
chip_gen: v7x
topology: tpu7x:2x2x1
jax: 0.10.0
libtpu: 0.0.40
codegen_flags: <defaults>
</compile_context>

<pallas_src>
import functools

import jax
import jax.numpy as jnp
from jax import lax
from jax.experimental import pallas as pl
from jax.experimental.pallas import tpu as pltpu

NBITS = 8
NLEVELS = 1 << NBITS
_INV_LN2 = 1.4426950408889634           # 1 / ln(2)
_COLUMN_UNROLL_MAX_W = 64               # narrow-image (symbols-on-lanes) path


def _fmod2_minus1(y):
    """x = fmod(x + 1, 2) - 1 with C fmod semantics (trunc toward zero)."""
    h = y + 1.0
    q = h * 0.5
    tq = jnp.where(q >= 0.0, jnp.floor(q), jnp.ceil(q))
    return h - 2.0 * tq - 1.0


def _codec_kernel(p_ref, x_ref, ent_ref, z_ref, *, BT, H, W):
    """BT images per grid step.

    p_ref:   SMEM (12,)            f32  learned color-transform params
    x_ref:   VMEM (BT, 3, H, W)    f32  BT input images (NCHW block)
    ent_ref: VMEM (BT, 3, NLEVELS) f32  per-(channel, symbol) entropy terms
    z_ref:   VMEM (3, H, W)        f32  scratch: scaled residuals (reused per image)
    """
    p = [p_ref[i] for i in range(12)]

    # Loop-invariant broadcasts, hoisted out of the per-image loop.
    row0 = lax.broadcasted_iota(jnp.int32, (H, W), 0) == 0   # top row
    col0 = lax.broadcasted_iota(jnp.int32, (H, W), 1) == 0   # leftmost column
    zero = jnp.zeros((H, W), jnp.float32)
    den = 1.0 / float(H * W)
    narrow = W <= _COLUMN_UNROLL_MAX_W
    if narrow:
        syms = lax.broadcasted_iota(
            jnp.int32, (1, 1, NLEVELS), 2).astype(jnp.float32)
    else:
        sym_lane = lax.broadcasted_iota(jnp.int32, (3, NLEVELS), 1)

    for b in range(BT):
        r0 = x_ref[b, 0]
        g0 = x_ref[b, 1]
        b0 = x_ref[b, 2]

        # --- learned reversible color transform (scalar params broadcast) ---
        r1 = r0 + (p[0] * g0 + p[1] * b0)
        g1 = g0 + (p[2] * r1 + p[3] * b0)
        b1 = b0 + (p[4] * r1 + p[5] * g1)
        r2 = r1 + (p[6] * g1 + p[7] * b1)
        g2 = g1 + (p[8] * r2 + p[9] * b1)
        b2 = b1 + (p[10] * r2 + p[11] * g2)

        # --- pred_clampedgrad: one-pixel shifts via XLU roll + boundary masks ---
        for c, yc in enumerate((r2, g2, b2)):
            yc = _fmod2_minus1(yc)
            n_ = jnp.where(row0, zero, pltpu.roll(yc, shift=1, axis=0))   # north
            w_ = jnp.where(col0, zero, pltpu.roll(yc, shift=1, axis=1))   # west
            nw_ = jnp.where(col0, zero, pltpu.roll(n_, shift=1, axis=1))  # north-west
            pred = n_ + w_ - nw_
            pred = jnp.minimum(jnp.maximum(pred, jnp.minimum(n_, w_)),
                               jnp.maximum(n_, w_))
            res = yc - pred
            z_ref[c] = (res + 1.0) * ((NLEVELS - 1) / 2.0)   # z in [0, 255] range

        if narrow:
            # Narrow images: symbols on the lane axis (fully lane-dense), pixels
            # of one column on the sublane axis.  Statically unrolled over W
            # columns; only static ref slices, broadcasts and sublane reductions.
            hist = jnp.zeros((3, NLEVELS), jnp.float32)
            for col in range(W):
                zc = z_ref[:, :, col:col + 1]                     # (3, H, 1)
                t = jnp.maximum(1.0 - jnp.abs(zc - syms), 0.0)    # (3, H, 256) tent
                hist = hist + jnp.sum(t, axis=1)                  # (3, 256)
            prob = hist * den
            safe = jnp.maximum(prob, 1e-30)
            term = jnp.where(prob > 0.0, -prob * jnp.log(safe) * _INV_LN2, 0.0)
            ent_ref[b] = term                                     # lane-dense store
        else:
            # Wide images (W >= 128): per-symbol loop is already lane-dense.
            z = z_ref[...]                                        # (3, H, W)

            def body(sym, ent):
                s = sym.astype(jnp.float32)
                t = jnp.maximum(1.0 - jnp.abs(z - s), 0.0)        # (3, H, W)
                ps = jnp.sum(t, axis=2, keepdims=True)            # (3, H, 1)
                prob = jnp.sum(ps, axis=1) * den                  # (3, 1)
                safe = jnp.maximum(prob, 1e-30)
                term = jnp.where(prob > 0.0,
                                 -prob * jnp.log(safe) * _INV_LN2, 0.0)
                return ent + term

            ent = lax.fori_loop(0, NLEVELS, body,
                                jnp.zeros((3, 1), jnp.float32), unroll=4)
            # place the per-channel entropy in lane 0 of the (3, NLEVELS) output
            ent_ref[b] = jnp.where(sym_lane == 0, ent, 0.0)


def _pick_batch_tile(N, H, W):
    """Largest divisor of N (<= 8) whose image block stays under 512 KiB."""
    img_bytes = 3 * H * W * 4
    budget = 512 * 1024
    bt = 1
    for d in range(1, min(N, 8) + 1):
        if N % d == 0 and d * img_bytes <= budget:
            bt = d
    return bt


def _pick_vmem_limit(BT, H, W):
    block = BT * 3 * H * W * 4                 # BT images, f32 (double buffered)
    tent = 3 * H * NLEVELS * 4                 # (3, H, 256) tent slab
    est = 6 * block + 4 * tent + (4 << 20)
    return int(min(64 * 1024 * 1024, max(16 * 1024 * 1024, est)))


def codec_forward(x, params):
    """x: (N, 3, H, W) float32 NCHW.  params: (12,) float32.  Returns scalar loss."""
    N, C, H, W = x.shape
    assert C == 3
    bt = _pick_batch_tile(N, H, W)
    kernel = functools.partial(_codec_kernel, BT=bt, H=H, W=W)
    ent = pl.pallas_call(
        kernel,
        grid=(N // bt,),
        in_specs=[
            pl.BlockSpec(memory_space=pltpu.MemorySpace.SMEM),       # 12 params
            pl.BlockSpec((bt, 3, H, W), lambda i: (i, 0, 0, 0)),     # bt images
        ],
        out_specs=pl.BlockSpec((bt, 3, NLEVELS), lambda i: (i, 0, 0)),
        out_shape=jax.ShapeDtypeStruct((N, 3, NLEVELS), jnp.float32),
        scratch_shapes=[pltpu.VMEM((3, H, W), jnp.float32)],
        compiler_params=pltpu.CompilerParams(
            dimension_semantics=("parallel",),
            vmem_limit_bytes=_pick_vmem_limit(bt, H, W),
        ),
    )(params.astype(jnp.float32), x.astype(jnp.float32))
    # entropy = mean over (image, channel); loss = entropy / nbits
    return jnp.sum(ent) * (1.0 / (N * C)) * (1.0 / NBITS)


def codec_reference(x, p):
    """Pure-JAX reference mirroring the PyTorch forward (sanity check)."""
    r0, g0, b0 = x[:, 0:1], x[:, 1:2], x[:, 2:3]
    r1 = r0 + (p[0] * g0 + p[1] * b0)
    g1 = g0 + (p[2] * r1 + p[3] * b0)
    b1 = b0 + (p[4] * r1 + p[5] * g1)
    r2 = r1 + (p[6] * g1 + p[7] * b1)
    g2 = g1 + (p[8] * r2 + p[9] * b1)
    b2 = b1 + (p[10] * r2 + p[11] * g2)
    y = jnp.concatenate([r2, g2, b2], axis=1)
    h = y + 1.0
    y = h - 2.0 * jnp.trunc(h * 0.5) - 1.0            # fmod(y + 1, 2) - 1
    n = jnp.pad(y[:, :, :-1, :], ((0, 0), (0, 0), (1, 0), (0, 0)))
    w = jnp.pad(y[:, :, :, :-1], ((0, 0), (0, 0), (0, 0), (1, 0)))
    nw = jnp.pad(y[:, :, :-1, :-1], ((0, 0), (0, 0), (1, 0), (1, 0)))
    pred = jnp.minimum(jnp.maximum(n + w - nw, jnp.minimum(n, w)),
                       jnp.maximum(n, w))
    res = y - pred
    z = (res + 1.0) * ((NLEVELS - 1) / 2.0)
    den = 1.0 / (res.shape[2] * res.shape[3])

    def body(sym, ent):
        prob = jnp.sum(
            jnp.maximum(1.0 - jnp.abs(z - sym.astype(jnp.float32)), 0.0),
            axis=(2, 3)) * den
        term = jnp.where(prob > 0.0, -prob * jnp.log2(jnp.maximum(prob, 1e-30)), 0.0)
        return ent + term

    ent = lax.fori_loop(0, NLEVELS, body, jnp.zeros(res.shape[:2], jnp.float32))
    return jnp.mean(ent) / NBITS


class Codec:
    """Mirror of the PyTorch Codec module (deterministic __init__ params)."""

    def __init__(self):
        self.sum = 0.0
        self.count = 0
        self.params = jnp.array(
            [-1.0, 0.0, 0.5, 0.0, 0.0, -1.0, 0.0, 0.0, 0.0, 0.5, 0.0, 0.0],
            dtype=jnp.float32)
        self._fwd = jax.jit(codec_forward)

    def forward(self, x):
        loss = jax.block_until_ready(self._fwd(x, self.params))
        lv = float(loss)
        # TODO(synk): self.sum/self.count host-side bookkeeping needs a host
        # sync (.item()) each step, exactly like the PyTorch module.
        self.sum += lv
        self.count += 1
        return loss, '%14f' % (1.0 / lv)

    def epoch_start(self):
        self.sum = 0.0
        self.count = 0

    def epoch_end(self):
        loss = self.sum / self.count if self.count else 0.0
        return loss, '%14f' % (1.0 / loss)


if __name__ == "__main__":
    key = jax.random.PRNGKey(0)
    # small shapes consistent with the module: batch=2, channels=3, spatial=16
    x = jax.random.uniform(key, (2, 3, 16, 16), dtype=jnp.float32,
                           minval=-1.0, maxval=1.0)

    codec = Codec()
    loss, msg = codec.forward(x)

    ref = jax.block_until_ready(codec_reference(x, codec.params))
    assert jnp.isfinite(loss), loss
    assert jnp.allclose(loss, ref, rtol=1e-3, atol=1e-4), (float(loss), float(ref))

    print("KERNEL_OK")
</pallas_src>

<mosaic_0001>
module attributes {stable_mosaic.version = 11 : i64} {
  func.func @_codec_kernel(%arg0: i32, %arg1: memref<12xf32, #tpu.memory_space<smem>>, %arg2: memref<2x3x16x16xf32, #tpu.memory_space<vmem>>, %arg3: memref<2x3x256xf32, #tpu.memory_space<vmem>>, %arg4: memref<3x16x16xf32, #tpu.memory_space<vmem>>) attributes {dimension_semantics = [#tpu.dimension_semantics<parallel>], iteration_bounds = array<i64: 1>, scalar_prefetch = 0 : i64, scratch_operands = 1 : i64, tpu.core_type = #tpu.core_type<tc>, window_params = [{transform_indices = @transform_0, window_bounds = array<i64: 12>}, {transform_indices = @transform_1, window_bounds = array<i64: 2, 3, 16, 16>}, {transform_indices = @transform_2, window_bounds = array<i64: 2, 3, 256>}]} {
    %c0 = arith.constant 0 : index
    %0 = memref.load %arg1[%c0] : memref<12xf32, #tpu.memory_space<smem>>
    %c1 = arith.constant 1 : index
    %1 = memref.load %arg1[%c1] : memref<12xf32, #tpu.memory_space<smem>>
    %c2 = arith.constant 2 : index
    %2 = memref.load %arg1[%c2] : memref<12xf32, #tpu.memory_space<smem>>
    %c3 = arith.constant 3 : index
    %3 = memref.load %arg1[%c3] : memref<12xf32, #tpu.memory_space<smem>>
    %c4 = arith.constant 4 : index
    %4 = memref.load %arg1[%c4] : memref<12xf32, #tpu.memory_space<smem>>
    %c5 = arith.constant 5 : index
    %5 = memref.load %arg1[%c5] : memref<12xf32, #tpu.memory_space<smem>>
    %c6 = arith.constant 6 : index
    %6 = memref.load %arg1[%c6] : memref<12xf32, #tpu.memory_space<smem>>
    %c7 = arith.constant 7 : index
    %7 = memref.load %arg1[%c7] : memref<12xf32, #tpu.memory_space<smem>>
    %c8 = arith.constant 8 : index
    %8 = memref.load %arg1[%c8] : memref<12xf32, #tpu.memory_space<smem>>
    %c9 = arith.constant 9 : index
    %9 = memref.load %arg1[%c9] : memref<12xf32, #tpu.memory_space<smem>>
    %c10 = arith.constant 10 : index
    %10 = memref.load %arg1[%c10] : memref<12xf32, #tpu.memory_space<smem>>
    %c11 = arith.constant 11 : index
    %11 = memref.load %arg1[%c11] : memref<12xf32, #tpu.memory_space<smem>>
    %12 = tpu.iota {dimensions = array<i32: 0>} : vector<16x16xi32>
    %c0_i32 = arith.constant 0 : i32
    %13 = vector.broadcast %c0_i32 : i32 to vector<16x16xi32>
    %14 = arith.cmpi eq, %12, %13 : vector<16x16xi32>
    %15 = tpu.iota {dimensions = array<i32: 1>} : vector<16x16xi32>
    %c0_i32_0 = arith.constant 0 : i32
    %16 = vector.broadcast %c0_i32_0 : i32 to vector<16x16xi32>
    %17 = arith.cmpi eq, %15, %16 : vector<16x16xi32>
    %cst = arith.constant 0.000000e+00 : f32
    %18 = vector.broadcast %cst : f32 to vector<16x16xf32>
    %19 = tpu.iota {dimensions = array<i32: 2>} : vector<1x1x256xi32>
    %20 = arith.sitofp %19 : vector<1x1x256xi32> to vector<1x1x256xf32>
    %c0_1 = arith.constant 0 : index
    %c0_2 = arith.constant 0 : index
    %c0_3 = arith.constant 0 : index
    %c0_4 = arith.constant 0 : index
    %21 = vector.load %arg2[%c0_1, %c0_2, %c0_3, %c0_4] : memref<2x3x16x16xf32, #tpu.memory_space<vmem>>, vector<1x1x16x16xf32>
    %22 = vector.shape_cast %21 : vector<1x1x16x16xf32> to vector<16x16xf32>
    %c0_5 = arith.constant 0 : index
    %c1_6 = arith.constant 1 : index
    %c0_7 = arith.constant 0 : index
    %c0_8 = arith.constant 0 : index
    %23 = vector.load %arg2[%c0_5, %c1_6, %c0_7, %c0_8] : memref<2x3x16x16xf32, #tpu.memory_space<vmem>>, vector<1x1x16x16xf32>
    %24 = vector.shape_cast %23 : vector<1x1x16x16xf32> to vector<16x16xf32>
    %c0_9 = arith.constant 0 : index
    %c2_10 = arith.constant 2 : index
    %c0_11 = arith.constant 0 : index
    %c0_12 = arith.constant 0 : index
    %25 = vector.load %arg2[%c0_9, %c2_10, %c0_11, %c0_12] : memref<2x3x16x16xf32, #tpu.memory_space<vmem>>, vector<1x1x16x16xf32>
    %26 = vector.shape_cast %25 : vector<1x1x16x16xf32> to vector<16x16xf32>
    %27 = vector.broadcast %0 : f32 to vector<16x16xf32>
    %28 = arith.mulf %27, %24 : vector<16x16xf32>
    %29 = vector.broadcast %1 : f32 to vector<16x16xf32>
    %30 = arith.mulf %29, %26 : vector<16x16xf32>
    %31 = arith.addf %28, %30 : vector<16x16xf32>
    %32 = arith.addf %22, %31 : vector<16x16xf32>
    %33 = vector.broadcast %2 : f32 to vector<16x16xf32>
    %34 = arith.mulf %33, %32 : vector<16x16xf32>
    %35 = vector.broadcast %3 : f32 to vector<16x16xf32>
    %36 = arith.mulf %35, %26 : vector<16x16xf32>
    %37 = arith.addf %34, %36 : vector<16x16xf32>
    %38 = arith.addf %24, %37 : vector<16x16xf32>
    %39 = vector.broadcast %4 : f32 to vector<16x16xf32>
    %40 = arith.mulf %39, %32 : vector<16x16xf32>
    %41 = vector.broadcast %5 : f32 to vector<16x16xf32>
    %42 = arith.mulf %41, %38 : vector<16x16xf32>
    %43 = arith.addf %40, %42 : vector<16x16xf32>
    %44 = arith.addf %26, %43 : vector<16x16xf32>
    %45 = vector.broadcast %6 : f32 to vector<16x16xf32>
    %46 = arith.mulf %45, %38 : vector<16x16xf32>
    %47 = vector.broadcast %7 : f32 to vector<16x16xf32>
    %48 = arith.mulf %47, %44 : vector<16x16xf32>
    %49 = arith.addf %46, %48 : vector<16x16xf32>
    %50 = arith.addf %32, %49 : vector<16x16xf32>
    %51 = vector.broadcast %8 : f32 to vector<16x16xf32>
    %52 = arith.mulf %51, %50 : vector<16x16xf32>
    %53 = vector.broadcast %9 : f32 to vector<16x16xf32>
    %54 = arith.mulf %53, %44 : vector<16x16xf32>
    %55 = arith.addf %52, %54 : vector<16x16xf32>
    %56 = arith.addf %38, %55 : vector<16x16xf32>
    %57 = vector.broadcast %10 : f32 to vector<16x16xf32>
    %58 = arith.mulf %57, %50 : vector<16x16xf32>
    %59 = vector.broadcast %11 : f32 to vector<16x16xf32>
    %60 = arith.mulf %59, %56 : vector<16x16xf32>
    %61 = arith.addf %58, %60 : vector<16x16xf32>
    %62 = arith.addf %44, %61 : vector<16x16xf32>
    %cst_13 = arith.constant 1.000000e+00 : f32
    %63 = vector.broadcast %cst_13 : f32 to vector<16x16xf32>
    %64 = arith.addf %50, %63 : vector<16x16xf32>
    %cst_14 = arith.constant 5.000000e-01 : f32
    %65 = vector.broadcast %cst_14 : f32 to vector<16x16xf32>
    %66 = arith.mulf %64, %65 : vector<16x16xf32>
    %cst_15 = arith.constant 0.000000e+00 : f32
    %67 = vector.broadcast %cst_15 : f32 to vector<16x16xf32>
    %68 = arith.cmpf oge, %66, %67 : vector<16x16xf32>
    %69 = math.floor %66 : vector<16x16xf32>
    %70 = math.ceil %66 : vector<16x16xf32>
    %71 = arith.select %68, %69, %70 : vector<16x16xi1>, vector<16x16xf32>
    %cst_16 = arith.constant 2.000000e+00 : f32
    %72 = vector.broadcast %cst_16 : f32 to vector<16x16xf32>
    %73 = arith.mulf %72, %71 : vector<16x16xf32>
    %74 = arith.subf %64, %73 : vector<16x16xf32>
    %cst_17 = arith.constant 1.000000e+00 : f32
    %75 = vector.broadcast %cst_17 : f32 to vector<16x16xf32>
    %76 = arith.subf %74, %75 : vector<16x16xf32>
    %c1_i32 = arith.constant 1 : i32
    %77 = tpu.dynamic_rotate %76 by %c1_i32 dim 0 : vector<16x16xf32>, i32 -> vector<16x16xf32>
    %78 = arith.select %14, %18, %77 : vector<16x16xi1>, vector<16x16xf32>
    %c1_i32_18 = arith.constant 1 : i32
    %79 = tpu.dynamic_rotate %76 by %c1_i32_18 dim 1 : vector<16x16xf32>, i32 -> vector<16x16xf32>
    %80 = arith.select %17, %18, %79 : vector<16x16xi1>, vector<16x16xf32>
    %c1_i32_19 = arith.constant 1 : i32
    %81 = tpu.dynamic_rotate %78 by %c1_i32_19 dim 1 : vector<16x16xf32>, i32 -> vector<16x16xf32>
    %82 = arith.select %17, %18, %81 : vector<16x16xi1>, vector<16x16xf32>
    %83 = arith.addf %78, %80 : vector<16x16xf32>
    %84 = arith.subf %83, %82 : vector<16x16xf32>
    %85 = arith.minimumf %78, %80 : vector<16x16xf32>
    %86 = arith.maximumf %84, %85 : vector<16x16xf32>
    %87 = arith.maximumf %78, %80 : vector<16x16xf32>
    %88 = arith.minimumf %86, %87 : vector<16x16xf32>
    %89 = arith.subf %76, %88 : vector<16x16xf32>
    %cst_20 = arith.constant 1.000000e+00 : f32
    %90 = vector.broadcast %cst_20 : f32 to vector<16x16xf32>
    %91 = arith.addf %89, %90 : vector<16x16xf32>
    %cst_21 = arith.constant 1.275000e+02 : f32
    %92 = vector.broadcast %cst_21 : f32 to vector<16x16xf32>
    %93 = arith.mulf %91, %92 : vector<16x16xf32>
    %c0_22 = arith.constant 0 : index
    %c0_23 = arith.constant 0 : index
    %c0_24 = arith.constant 0 : index
    %94 = vector.load %arg4[%c0_22, %c0_23, %c0_24] : memref<3x16x16xf32, #tpu.memory_space<vmem>>, vector<1x16x16xf32>
    %95 = vector.shape_cast %94 : vector<1x16x16xf32> to vector<16x16xf32>
    %96 = vector.shape_cast %93 : vector<16x16xf32> to vector<1x16x16xf32>
    tpu.vector_store %arg4[%c0_22, %c0_23, %c0_24], %96 {strides = array<i32>} : memref<3x16x16xf32, #tpu.memory_space<vmem>>, vector<1x16x16xf32>,
    %cst_25 = arith.constant 1.000000e+00 : f32
    %97 = vector.broadcast %cst_25 : f32 to vector<16x16xf32>
    %98 = arith.addf %56, %97 : vector<16x16xf32>
    %cst_26 = arith.constant 5.000000e-01 : f32
    %99 = vector.broadcast %cst_26 : f32 to vector<16x16xf32>
    %100 = arith.mulf %98, %99 : vector<16x16xf32>
    %cst_27 = arith.constant 0.000000e+00 : f32
    %101 = vector.broadcast %cst_27 : f32 to vector<16x16xf32>
    %102 = arith.cmpf oge, %100, %101 : vector<16x16xf32>
    %103 = math.floor %100 : vector<16x16xf32>
    %104 = math.ceil %100 : vector<16x16xf32>
    %105 = arith.select %102, %103, %104 : vector<16x16xi1>, vector<16x16xf32>
    %cst_28 = arith.constant 2.000000e+00 : f32
    %106 = vector.broadcast %cst_28 : f32 to vector<16x16xf32>
    %107 = arith.mulf %106, %105 : vector<16x16xf32>
    %108 = arith.subf %98, %107 : vector<16x16xf32>
    %cst_29 = arith.constant 1.000000e+00 : f32
    %109 = vector.broadcast %cst_29 : f32 to vector<16x16xf32>
    %110 = arith.subf %108, %109 : vector<16x16xf32>
    %c1_i32_30 = arith.constant 1 : i32
    %111 = tpu.dynamic_rotate %110 by %c1_i32_30 dim 0 : vector<16x16xf32>, i32 -> vector<16x16xf32>
    %112 = arith.select %14, %18, %111 : vector<16x16xi1>, vector<16x16xf32>
    %c1_i32_31 = arith.constant 1 : i32
    %113 = tpu.dynamic_rotate %110 by %c1_i32_31 dim 1 : vector<16x16xf32>, i32 -> vector<16x16xf32>
    %114 = arith.select %17, %18, %113 : vector<16x16xi1>, vector<16x16xf32>
    %c1_i32_32 = arith.constant 1 : i32
    %115 = tpu.dynamic_rotate %112 by %c1_i32_32 dim 1 : vector<16x16xf32>, i32 -> vector<16x16xf32>
    %116 = arith.select %17, %18, %115 : vector<16x16xi1>, vector<16x16xf32>
    %117 = arith.addf %112, %114 : vector<16x16xf32>
    %118 = arith.subf %117, %116 : vector<16x16xf32>
    %119 = arith.minimumf %112, %114 : vector<16x16xf32>
    %120 = arith.maximumf %118, %119 : vector<16x16xf32>
    %121 = arith.maximumf %112, %114 : vector<16x16xf32>
    %122 = arith.minimumf %120, %121 : vector<16x16xf32>
    %123 = arith.subf %110, %122 : vector<16x16xf32>
    %cst_33 = arith.constant 1.000000e+00 : f32
    %124 = vector.broadcast %cst_33 : f32 to vector<16x16xf32>
    %125 = arith.addf %123, %124 : vector<16x16xf32>
    %cst_34 = arith.constant 1.275000e+02 : f32
    %126 = vector.broadcast %cst_34 : f32 to vector<16x16xf32>
    %127 = arith.mulf %125, %126 : vector<16x16xf32>
    %c1_35 = arith.constant 1 : index
    %c0_36 = arith.constant 0 : index
    %c0_37 = arith.constant 0 : index
    %128 = vector.load %arg4[%c1_35, %c0_36, %c0_37] : memref<3x16x16xf32, #tpu.memory_space<vmem>>, vector<1x16x16xf32>
    %129 = vector.shape_cast %128 : vector<1x16x16xf32> to vector<16x16xf32>
    %130 = vector.shape_cast %127 : vector<16x16xf32> to vector<1x16x16xf32>
    tpu.vector_store %arg4[%c1_35, %c0_36, %c0_37], %130 {strides = array<i32>} : memref<3x16x16xf32, #tpu.memory_space<vmem>>, vector<1x16x16xf32>,
    %cst_38 = arith.constant 1.000000e+00 : f32
    %131 = vector.broadcast %cst_38 : f32 to vector<16x16xf32>
    %132 = arith.addf %62, %131 : vector<16x16xf32>
    %cst_39 = arith.constant 5.000000e-01 : f32
    %133 = vector.broadcast %cst_39 : f32 to vector<16x16xf32>
    %134 = arith.mulf %132, %133 : vector<16x16xf32>
    %cst_40 = arith.constant 0.000000e+00 : f32
    %135 = vector.broadcast %cst_40 : f32 to vector<16x16xf32>
    %136 = arith.cmpf oge, %134, %135 : vector<16x16xf32>
    %137 = math.floor %134 : vector<16x16xf32>
    %138 = math.ceil %134 : vector<16x16xf32>
    %139 = arith.select %136, %137, %138 : vector<16x16xi1>, vector<16x16xf32>
    %cst_41 = arith.constant 2.000000e+00 : f32
    %140 = vector.broadcast %cst_41 : f32 to vector<16x16xf32>
    %141 = arith.mulf %140, %139 : vector<16x16xf32>
    %142 = arith.subf %132, %141 : vector<16x16xf32>
    %cst_42 = arith.constant 1.000000e+00 : f32
    %143 = vector.broadcast %cst_42 : f32 to vector<16x16xf32>
    %144 = arith.subf %142, %143 : vector<16x16xf32>
    %c1_i32_43 = arith.constant 1 : i32
    %145 = tpu.dynamic_rotate %144 by %c1_i32_43 dim 0 : vector<16x16xf32>, i32 -> vector<16x16xf32>
    %146 = arith.select %14, %18, %145 : vector<16x16xi1>, vector<16x16xf32>
    %c1_i32_44 = arith.constant 1 : i32
    %147 = tpu.dynamic_rotate %144 by %c1_i32_44 dim 1 : vector<16x16xf32>, i32 -> vector<16x16xf32>
    %148 = arith.select %17, %18, %147 : vector<16x16xi1>, vector<16x16xf32>
    %c1_i32_45 = arith.constant 1 : i32
    %149 = tpu.dynamic_rotate %146 by %c1_i32_45 dim 1 : vector<16x16xf32>, i32 -> vector<16x16xf32>
    %150 = arith.select %17, %18, %149 : vector<16x16xi1>, vector<16x16xf32>
    %151 = arith.addf %146, %148 : vector<16x16xf32>
    %152 = arith.subf %151, %150 : vector<16x16xf32>
    %153 = arith.minimumf %146, %148 : vector<16x16xf32>
    %154 = arith.maximumf %152, %153 : vector<16x16xf32>
    %155 = arith.maximumf %146, %148 : vector<16x16xf32>
    %156 = arith.minimumf %154, %155 : vector<16x16xf32>
    %157 = arith.subf %144, %156 : vector<16x16xf32>
    %cst_46 = arith.constant 1.000000e+00 : f32
    %158 = vector.broadcast %cst_46 : f32 to vector<16x16xf32>
    %159 = arith.addf %157, %158 : vector<16x16xf32>
    %cst_47 = arith.constant 1.275000e+02 : f32
    %160 = vector.broadcast %cst_47 : f32 to vector<16x16xf32>
    %161 = arith.mulf %159, %160 : vector<16x16xf32>
    %c2_48 = arith.constant 2 : index
    %c0_49 = arith.constant 0 : index
    %c0_50 = arith.constant 0 : index
    %162 = vector.load %arg4[%c2_48, %c0_49, %c0_50] : memref<3x16x16xf32, #tpu.memory_space<vmem>>, vector<1x16x16xf32>
    %163 = vector.shape_cast %162 : vector<1x16x16xf32> to vector<16x16xf32>
    %164 = vector.shape_cast %161 : vector<16x16xf32> to vector<1x16x16xf32>
    tpu.vector_store %arg4[%c2_48, %c0_49, %c0_50], %164 {strides = array<i32>} : memref<3x16x16xf32, #tpu.memory_space<vmem>>, vector<1x16x16xf32>,
    %cst_51 = arith.constant 0.000000e+00 : f32
    %165 = vector.broadcast %cst_51 : f32 to vector<3x256xf32>
    %c0_52 = arith.constant 0 : index
    %c0_53 = arith.constant 0 : index
    %c0_54 = arith.constant 0 : index
    %166 = vector.load %arg4[%c0_52, %c0_53, %c0_54] : memref<3x16x16xf32, #tpu.memory_space<vmem>>, vector<3x16x1xf32>
    %167 = vector.broadcast %166 : vector<3x16x1xf32> to vector<3x16x256xf32>
    %168 = vector.broadcast %20 : vector<1x1x256xf32> to vector<3x16x256xf32>
    %169 = arith.subf %167, %168 : vector<3x16x256xf32>
    %170 = math.absf %169 : vector<3x16x256xf32>
    %cst_55 = arith.constant 1.000000e+00 : f32
    %171 = vector.broadcast %cst_55 : f32 to vector<3x16x256xf32>
    %172 = arith.subf %171, %170 : vector<3x16x256xf32>
    %cst_56 = arith.constant 0.000000e+00 : f32
    %173 = vector.broadcast %cst_56 : f32 to vector<3x16x256xf32>
    %174 = arith.maximumf %172, %173 : vector<3x16x256xf32>
    %cst_57 = arith.constant dense<0.000000e+00> : vector<3x256xf32>
    %175 = vector.multi_reduction <add>, %174, %cst_57 [1] : vector<3x16x256xf32> to vector<3x256xf32>
    %176 = arith.addf %165, %175 : vector<3x256xf32>
    %c0_58 = arith.constant 0 : index
    %c0_59 = arith.constant 0 : index
    %c1_60 = arith.constant 1 : index
    %177 = vector.load %arg4[%c0_58, %c0_59, %c1_60] : memref<3x16x16xf32, #tpu.memory_space<vmem>>, vector<3x16x1xf32>
    %178 = vector.broadcast %177 : vector<3x16x1xf32> to vector<3x16x256xf32>
    %179 = vector.broadcast %20 : vector<1x1x256xf32> to vector<3x16x256xf32>
    %180 = arith.subf %178, %179 : vector<3x16x256xf32>
    %181 = math.absf %180 : vector<3x16x256xf32>
    %cst_61 = arith.constant 1.000000e+00 : f32
    %182 = vector.broadcast %cst_61 : f32 to vector<3x16x256xf32>
    %183 = arith.subf %182, %181 : vector<3x16x256xf32>
    %cst_62 = arith.constant 0.000000e+00 : f32
    %184 = vector.broadcast %cst_62 : f32 to vector<3x16x256xf32>
    %185 = arith.maximumf %183, %184 : vector<3x16x256xf32>
    %cst_63 = arith.constant dense<0.000000e+00> : vector<3x256xf32>
    %186 = vector.multi_reduction <add>, %185, %cst_63 [1] : vector<3x16x256xf32> to vector<3x256xf32>
    %187 = arith.addf %176, %186 : vector<3x256xf32>
    %c0_64 = arith.constant 0 : index
    %c0_65 = arith.constant 0 : index
    %c2_66 = arith.constant 2 : index
    %188 = vector.load %arg4[%c0_64, %c0_65, %c2_66] : memref<3x16x16xf32, #tpu.memory_space<vmem>>, vector<3x16x1xf32>
    %189 = vector.broadcast %188 : vector<3x16x1xf32> to vector<3x16x256xf32>
    %190 = vector.broadcast %20 : vector<1x1x256xf32> to vector<3x16x256xf32>
    %191 = arith.subf %189, %190 : vector<3x16x256xf32>
    %192 = math.absf %191 : vector<3x16x256xf32>
    %cst_67 = arith.constant 1.000000e+00 : f32
    %193 = vector.broadcast %cst_67 : f32 to vector<3x16x256xf32>
    %194 = arith.subf %193, %192 : vector<3x16x256xf32>
    %cst_68 = arith.constant 0.000000e+00 : f32
    %195 = vector.broadcast %cst_68 : f32 to vector<3x16x256xf32>
    %196 = arith.maximumf %194, %195 : vector<3x16x256xf32>
    %cst_69 = arith.constant dense<0.000000e+00> : vector<3x256xf32>
    %197 = vector.multi_reduction <add>, %196, %cst_69 [1] : vector<3x16x256xf32> to vector<3x256xf32>
    %198 = arith.addf %187, %197 : vector<3x256xf32>
    %c0_70 = arith.constant 0 : index
    %c0_71 = arith.constant 0 : index
    %c3_72 = arith.constant 3 : index
    %199 = vector.load %arg4[%c0_70, %c0_71, %c3_72] : memref<3x16x16xf32, #tpu.memory_space<vmem>>, vector<3x16x1xf32>
    %200 = vector.broadcast %199 : vector<3x16x1xf32> to vector<3x16x256xf32>
    %201 = vector.broadcast %20 : vector<1x1x256xf32> to vector<3x16x256xf32>
    %202 = arith.subf %200, %201 : vector<3x16x256xf32>
    %203 = math.absf %202 : vector<3x16x256xf32>
    %cst_73 = arith.constant 1.000000e+00 : f32
    %204 = vector.broadcast %cst_73 : f32 to vector<3x16x256xf32>
    %205 = arith.subf %204, %203 : vector<3x16x256xf32>
    %cst_74 = arith.constant 0.000000e+00 : f32
    %206 = vector.broadcast %cst_74 : f32 to vector<3x16x256xf32>
    %207 = arith.maximumf %205, %206 : vector<3x16x256xf32>
    %cst_75 = arith.constant dense<0.000000e+00> : vector<3x256xf32>
    %208 = vector.multi_reduction <add>, %207, %cst_75 [1] : vector<3x16x256xf32> to vector<3x256xf32>
    %209 = arith.addf %198, %208 : vector<3x256xf32>
    %c0_76 = arith.constant 0 : index
    %c0_77 = arith.constant 0 : index
    %c4_78 = arith.constant 4 : index
    %210 = vector.load %arg4[%c0_76, %c0_77, %c4_78] : memref<3x16x16xf32, #tpu.memory_space<vmem>>, vector<3x16x1xf32>
    %211 = vector.broadcast %210 : vector<3x16x1xf32> to vector<3x16x256xf32>
    %212 = vector.broadcast %20 : vector<1x1x256xf32> to vector<3x16x256xf32>
    %213 = arith.subf %211, %212 : vector<3x16x256xf32>
    %214 = math.absf %213 : vector<3x16x256xf32>
    %cst_79 = arith.constant 1.000000e+00 : f32
    %215 = vector.broadcast %cst_79 : f32 to vector<3x16x256xf32>
    %216 = arith.subf %215, %214 : vector<3x16x256xf32>
    %cst_80 = arith.constant 0.000000e+00 : f32
    %217 = vector.broadcast %cst_80 : f32 to vector<3x16x256xf32>
    %218 = arith.maximumf %216, %217 : vector<3x16x256xf32>
    %cst_81 = arith.constant dense<0.000000e+00> : vector<3x256xf32>
    %219 = vector.multi_reduction <add>, %218, %cst_81 [1] : vector<3x16x256xf32> to vector<3x256xf32>
    %220 = arith.addf %209, %219 : vector<3x256xf32>
    %c0_82 = arith.constant 0 : index
    %c0_83 = arith.constant 0 : index
    %c5_84 = arith.constant 5 : index
    %221 = vector.load %arg4[%c0_82, %c0_83, %c5_84] : memref<3x16x16xf32, #tpu.memory_space<vmem>>, vector<3x16x1xf32>
    %222 = vector.broadcast %221 : vector<3x16x1xf32> to vector<3x16x256xf32>
    %223 = vector.broadcast %20 : vector<1x1x256xf32> to vector<3x16x256xf32>
    %224 = arith.subf %222, %223 : vector<3x16x256xf32>
    %225 = math.absf %224 : vector<3x16x256xf32>
    %cst_85 = arith.constant 1.000000e+00 : f32
    %226 = vector.broadcast %cst_85 : f32 to vector<3x16x256xf32>
    %227 = arith.subf %226, %225 : vector<3x16x256xf32>
    %cst_86 = arith.constant 0.000000e+00 : f32
    %228 = vector.broadcast %cst_86 : f32 to vector<3x16x256xf32>
    %229 = arith.maximumf %227, %228 : vector<3x16x256xf32>
    %cst_87 = arith.constant dense<0.000000e+00> : vector<3x256xf32>
    %230 = vector.multi_reduction <add>, %229, %cst_87 [1] : vector<3x16x256xf32> to vector<3x256xf32>
    %231 = arith.addf %220, %230 : vector<3x256xf32>
    %c0_88 = arith.constant 0 : index
    %c0_89 = arith.constant 0 : index
    %c6_90 = arith.constant 6 : index
    %232 = vector.load %arg4[%c0_88, %c0_89, %c6_90] : memref<3x16x16xf32, #tpu.memory_space<vmem>>, vector<3x16x1xf32>
    %233 = vector.broadcast %232 : vector<3x16x1xf32> to vector<3x16x256xf32>
    %234 = vector.broadcast %20 : vector<1x1x256xf32> to vector<3x16x256xf32>
    %235 = arith.subf %233, %234 : vector<3x16x256xf32>
    %236 = math.absf %235 : vector<3x16x256xf32>
    %cst_91 = arith.constant 1.000000e+00 : f32
    %237 = vector.broadcast %cst_91 : f32 to vector<3x16x256xf32>
    %238 = arith.subf %237, %236 : vector<3x16x256xf32>
    %cst_92 = arith.constant 0.000000e+00 : f32
    %239 = vector.broadcast %cst_92 : f32 to vector<3x16x256xf32>
    %240 = arith.maximumf %238, %239 : vector<3x16x256xf32>
    %cst_93 = arith.constant dense<0.000000e+00> : vector<3x256xf32>
    %241 = vector.multi_reduction <add>, %240, %cst_93 [1] : vector<3x16x256xf32> to vector<3x256xf32>
    %242 = arith.addf %231, %241 : vector<3x256xf32>
    %c0_94 = arith.constant 0 : index
    %c0_95 = arith.constant 0 : index
    %c7_96 = arith.constant 7 : index
    %243 = vector.load %arg4[%c0_94, %c0_95, %c7_96] : memref<3x16x16xf32, #tpu.memory_space<vmem>>, vector<3x16x1xf32>
    %244 = vector.broadcast %243 : vector<3x16x1xf32> to vector<3x16x256xf32>
    %245 = vector.broadcast %20 : vector<1x1x256xf32> to vector<3x16x256xf32>
    %246 = arith.subf %244, %245 : vector<3x16x256xf32>
    %247 = math.absf %246 : vector<3x16x256xf32>
    %cst_97 = arith.constant 1.000000e+00 : f32
    %248 = vector.broadcast %cst_97 : f32 to vector<3x16x256xf32>
    %249 = arith.subf %248, %247 : vector<3x16x256xf32>
    %cst_98 = arith.constant 0.000000e+00 : f32
    %250 = vector.broadcast %cst_98 : f32 to vector<3x16x256xf32>
    %251 = arith.maximumf %249, %250 : vector<3x16x256xf32>
    %cst_99 = arith.constant dense<0.000000e+00> : vector<3x256xf32>
    %252 = vector.multi_reduction <add>, %251, %cst_99 [1] : vector<3x16x256xf32> to vector<3x256xf32>
    %253 = arith.addf %242, %252 : vector<3x256xf32>
    %c0_100 = arith.constant 0 : index
    %c0_101 = arith.constant 0 : index
    %c8_102 = arith.constant 8 : index
    %254 = vector.load %arg4[%c0_100, %c0_101, %c8_102] : memref<3x16x16xf32, #tpu.memory_space<vmem>>, vector<3x16x1xf32>
    %255 = vector.broadcast %254 : vector<3x16x1xf32> to vector<3x16x256xf32>
    %256 = vector.broadcast %20 : vector<1x1x256xf32> to vector<3x16x256xf32>
    %257 = arith.subf %255, %256 : vector<3x16x256xf32>
    %258 = math.absf %257 : vector<3x16x256xf32>
    %cst_103 = arith.constant 1.000000e+00 : f32
    %259 = vector.broadcast %cst_103 : f32 to vector<3x16x256xf32>
    %260 = arith.subf %259, %258 : vector<3x16x256xf32>
    %cst_104 = arith.constant 0.000000e+00 : f32
    %261 = vector.broadcast %cst_104 : f32 to vector<3x16x256xf32>
    %262 = arith.maximumf %260, %261 : vector<3x16x256xf32>
    %cst_105 = arith.constant dense<0.000000e+00> : vector<3x256xf32>
    %263 = vector.multi_reduction <add>, %262, %cst_105 [1] : vector<3x16x256xf32> to vector<3x256xf32>
    %264 = arith.addf %253, %263 : vector<3x256xf32>
    %c0_106 = arith.constant 0 : index
    %c0_107 = arith.constant 0 : index
    %c9_108 = arith.constant 9 : index
    %265 = vector.load %arg4[%c0_106, %c0_107, %c9_108] : memref<3x16x16xf32, #tpu.memory_space<vmem>>, vector<3x16x1xf32>
    %266 = vector.broadcast %265 : vector<3x16x1xf32> to vector<3x16x256xf32>
    %267 = vector.broadcast %20 : vector<1x1x256xf32> to vector<3x16x256xf32>
    %268 = arith.subf %266, %267 : vector<3x16x256xf32>
    %269 = math.absf %268 : vector<3x16x256xf32>
    %cst_109 = arith.constant 1.000000e+00 : f32
    %270 = vector.broadcast %cst_109 : f32 to vector<3x16x256xf32>
    %271 = arith.subf %270, %269 : vector<3x16x256xf32>
    %cst_110 = arith.constant 0.000000e+00 : f32
    %272 = vector.broadcast %cst_110 : f32 to vector<3x16x256xf32>
    %273 = arith.maximumf %271, %272 : vector<3x16x256xf32>
    %cst_111 = arith.constant dense<0.000000e+00> : vector<3x256xf32>
    %274 = vector.multi_reduction <add>, %273, %cst_111 [1] : vector<3x16x256xf32> to vector<3x256xf32>
    %275 = arith.addf %264, %274 : vector<3x256xf32>
    %c0_112 = arith.constant 0 : index
    %c0_113 = arith.constant 0 : index
    %c10_114 = arith.constant 10 : index
    %276 = vector.load %arg4[%c0_112, %c0_113, %c10_114] : memref<3x16x16xf32, #tpu.memory_space<vmem>>, vector<3x16x1xf32>
    %277 = vector.broadcast %276 : vector<3x16x1xf32> to vector<3x16x256xf32>
    %278 = vector.broadcast %20 : vector<1x1x256xf32> to vector<3x16x256xf32>
    %279 = arith.subf %277, %278 : vector<3x16x256xf32>
    %280 = math.absf %279 : vector<3x16x256xf32>
    %cst_115 = arith.constant 1.000000e+00 : f32
    %281 = vector.broadcast %cst_115 : f32 to vector<3x16x256xf32>
    %282 = arith.subf %281, %280 : vector<3x16x256xf32>
    %cst_116 = arith.constant 0.000000e+00 : f32
    %283 = vector.broadcast %cst_116 : f32 to vector<3x16x256xf32>
    %284 = arith.maximumf %282, %283 : vector<3x16x256xf32>
    %cst_117 = arith.constant dense<0.000000e+00> : vector<3x256xf32>
    %285 = vector.multi_reduction <add>, %284, %cst_117 [1] : vector<3x16x256xf32> to vector<3x256xf32>
    %286 = arith.addf %275, %285 : vector<3x256xf32>
    %c0_118 = arith.constant 0 : index
    %c0_119 = arith.constant 0 : index
    %c11_120 = arith.constant 11 : index
    %287 = vector.load %arg4[%c0_118, %c0_119, %c11_120] : memref<3x16x16xf32, #tpu.memory_space<vmem>>, vector<3x16x1xf32>
    %288 = vector.broadcast %287 : vector<3x16x1xf32> to vector<3x16x256xf32>
    %289 = vector.broadcast %20 : vector<1x1x256xf32> to vector<3x16x256xf32>
    %290 = arith.subf %288, %289 : vector<3x16x256xf32>
    %291 = math.absf %290 : vector<3x16x256xf32>
    %cst_121 = arith.constant 1.000000e+00 : f32
    %292 = vector.broadcast %cst_121 : f32 to vector<3x16x256xf32>
    %293 = arith.subf %292, %291 : vector<3x16x256xf32>
    %cst_122 = arith.constant 0.000000e+00 : f32
    %294 = vector.broadcast %cst_122 : f32 to vector<3x16x256xf32>
    %295 = arith.maximumf %293, %294 : vector<3x16x256xf32>
    %cst_123 = arith.constant dense<0.000000e+00> : vector<3x256xf32>
    %296 = vector.multi_reduction <add>, %295, %cst_123 [1] : vector<3x16x256xf32> to vector<3x256xf32>
    %297 = arith.addf %286, %296 : vector<3x256xf32>
    %c0_124 = arith.constant 0 : index
    %c0_125 = arith.constant 0 : index
    %c12 = arith.constant 12 : index
    %298 = vector.load %arg4[%c0_124, %c0_125, %c12] : memref<3x16x16xf32, #tpu.memory_space<vmem>>, vector<3x16x1xf32>
    %299 = vector.broadcast %298 : vector<3x16x1xf32> to vector<3x16x256xf32>
    %300 = vector.broadcast %20 : vector<1x1x256xf32> to vector<3x16x256xf32>
    %301 = arith.subf %299, %300 : vector<3x16x256xf32>
    %302 = math.absf %301 : vector<3x16x256xf32>
    %cst_126 = arith.constant 1.000000e+00 : f32
    %303 = vector.broadcast %cst_126 : f32 to vector<3x16x256xf32>
    %304 = arith.subf %303, %302 : vector<3x16x256xf32>
    %cst_127 = arith.constant 0.000000e+00 : f32
    %305 = vector.broadcast %cst_127 : f32 to vector<3x16x256xf32>
    %306 = arith.maximumf %304, %305 : vector<3x16x256xf32>
    %cst_128 = arith.constant dense<0.000000e+00> : vector<3x256xf32>
    %307 = vector.multi_reduction <add>, %306, %cst_128 [1] : vector<3x16x256xf32> to vector<3x256xf32>
    %308 = arith.addf %297, %307 : vector<3x256xf32>
    %c0_129 = arith.constant 0 : index
    %c0_130 = arith.constant 0 : index
    %c13 = arith.constant 13 : index
    %309 = vector.load %arg4[%c0_129, %c0_130, %c13] : memref<3x16x16xf32, #tpu.memory_space<vmem>>, vector<3x16x1xf32>
    %310 = vector.broadcast %309 : vector<3x16x1xf32> to vector<3x16x256xf32>
    %311 = vector.broadcast %20 : vector<1x1x256xf32> to vector<3x16x256xf32>
    %312 = arith.subf %310, %311 : vector<3x16x256xf32>
    %313 = math.absf %312 : vector<3x16x256xf32>
    %cst_131 = arith.constant 1.000000e+00 : f32
    %314 = vector.broadcast %cst_131 : f32 to vector<3x16x256xf32>
    %315 = arith.subf %314, %313 : vector<3x16x256xf32>
    %cst_132 = arith.constant 0.000000e+00 : f32
    %316 = vector.broadcast %cst_132 : f32 to vector<3x16x256xf32>
    %317 = arith.maximumf %315, %316 : vector<3x16x256xf32>
    %cst_133 = arith.constant dense<0.000000e+00> : vector<3x256xf32>
    %318 = vector.multi_reduction <add>, %317, %cst_133 [1] : vector<3x16x256xf32> to vector<3x256xf32>
    %319 = arith.addf %308, %318 : vector<3x256xf32>
    %c0_134 = arith.constant 0 : index
    %c0_135 = arith.constant 0 : index
    %c14 = arith.constant 14 : index
    %320 = vector.load %arg4[%c0_134, %c0_135, %c14] : memref<3x16x16xf32, #tpu.memory_space<vmem>>, vector<3x16x1xf32>
    %321 = vector.broadcast %320 : vector<3x16x1xf32> to vector<3x16x256xf32>
    %322 = vector.broadcast %20 : vector<1x1x256xf32> to vector<3x16x256xf32>
    %323 = arith.subf %321, %322 : vector<3x16x256xf32>
    %324 = math.absf %323 : vector<3x16x256xf32>
    %cst_136 = arith.constant 1.000000e+00 : f32
    %325 = vector.broadcast %cst_136 : f32 to vector<3x16x256xf32>
    %326 = arith.subf %325, %324 : vector<3x16x256xf32>
    %cst_137 = arith.constant 0.000000e+00 : f32
    %327 = vector.broadcast %cst_137 : f32 to vector<3x16x256xf32>
    %328 = arith.maximumf %326, %327 : vector<3x16x256xf32>
    %cst_138 = arith.constant dense<0.000000e+00> : vector<3x256xf32>
    %329 = vector.multi_reduction <add>, %328, %cst_138 [1] : vector<3x16x256xf32> to vector<3x256xf32>
    %330 = arith.addf %319, %329 : vector<3x256xf32>
    %c0_139 = arith.constant 0 : index
    %c0_140 = arith.constant 0 : index
    %c15 = arith.constant 15 : index
    %331 = vector.load %arg4[%c0_139, %c0_140, %c15] : memref<3x16x16xf32, #tpu.memory_space<vmem>>, vector<3x16x1xf32>
    %332 = vector.broadcast %331 : vector<3x16x1xf32> to vector<3x16x256xf32>
    %333 = vector.broadcast %20 : vector<1x1x256xf32> to vector<3x16x256xf32>
    %334 = arith.subf %332, %333 : vector<3x16x256xf32>
    %335 = math.absf %334 : vector<3x16x256xf32>
    %cst_141 = arith.constant 1.000000e+00 : f32
    %336 = vector.broadcast %cst_141 : f32 to vector<3x16x256xf32>
    %337 = arith.subf %336, %335 : vector<3x16x256xf32>
    %cst_142 = arith.constant 0.000000e+00 : f32
    %338 = vector.broadcast %cst_142 : f32 to vector<3x16x256xf32>
    %339 = arith.maximumf %337, %338 : vector<3x16x256xf32>
    %cst_143 = arith.constant dense<0.000000e+00> : vector<3x256xf32>
    %340 = vector.multi_reduction <add>, %339, %cst_143 [1] : vector<3x16x256xf32> to vector<3x256xf32>
    %341 = arith.addf %330, %340 : vector<3x256xf32>
    %cst_144 = arith.constant 3.906250e-03 : f32
    %342 = vector.broadcast %cst_144 : f32 to vector<3x256xf32>
    %343 = arith.mulf %341, %342 : vector<3x256xf32>
    %cst_145 = arith.constant 1.000000e-30 : f32
    %344 = vector.broadcast %cst_145 : f32 to vector<3x256xf32>
    %345 = arith.maximumf %343, %344 : vector<3x256xf32>
    %cst_146 = arith.constant 0.000000e+00 : f32
    %346 = vector.broadcast %cst_146 : f32 to vector<3x256xf32>
    %347 = arith.cmpf ogt, %343, %346 : vector<3x256xf32>
    %cst_147 = arith.constant 0.000000e+00 : f32
    %348 = vector.broadcast %cst_147 : f32 to vector<3x256xf32>
    %349 = arith.subf %348, %343 : vector<3x256xf32>
    %350 = math.log %345 : vector<3x256xf32>
    %351 = arith.mulf %349, %350 : vector<3x256xf32>
    %cst_148 = arith.constant 1.44269502 : f32
    %352 = vector.broadcast %cst_148 : f32 to vector<3x256xf32>
    %353 = arith.mulf %351, %352 : vector<3x256xf32>
    %cst_149 = arith.constant 0.000000e+00 : f32
    %354 = vector.broadcast %cst_149 : f32 to vector<3x256xf32>
    %355 = arith.select %347, %353, %354 : vector<3x256xi1>, vector<3x256xf32>
    %c0_150 = arith.constant 0 : index
    %c0_151 = arith.constant 0 : index
    %c0_152 = arith.constant 0 : index
    %356 = vector.load %arg3[%c0_150, %c0_151, %c0_152] : memref<2x3x256xf32, #tpu.memory_space<vmem>>, vector<1x3x256xf32>
    %357 = vector.shape_cast %356 : vector<1x3x256xf32> to vector<3x256xf32>
    %358 = vector.shape_cast %355 : vector<3x256xf32> to vector<1x3x256xf32>
    tpu.vector_store %arg3[%c0_150, %c0_151, %c0_152], %358 {strides = array<i32>} : memref<2x3x256xf32, #tpu.memory_space<vmem>>, vector<1x3x256xf32>,
    %c1_153 = arith.constant 1 : index
    %c0_154 = arith.constant 0 : index
    %c0_155 = arith.constant 0 : index
    %c0_156 = arith.constant 0 : index
    %359 = vector.load %arg2[%c1_153, %c0_154, %c0_155, %c0_156] : memref<2x3x16x16xf32, #tpu.memory_space<vmem>>, vector<1x1x16x16xf32>
    %360 = vector.shape_cast %359 : vector<1x1x16x16xf32> to vector<16x16xf32>
    %c1_157 = arith.constant 1 : index
    %c1_158 = arith.constant 1 : index
    %c0_159 = arith.constant 0 : index
    %c0_160 = arith.constant 0 : index
    %361 = vector.load %arg2[%c1_157, %c1_158, %c0_159, %c0_160] : memref<2x3x16x16xf32, #tpu.memory_space<vmem>>, vector<1x1x16x16xf32>
    %362 = vector.shape_cast %361 : vector<1x1x16x16xf32> to vector<16x16xf32>
    %c1_161 = arith.constant 1 : index
    %c2_162 = arith.constant 2 : index
    %c0_163 = arith.constant 0 : index
    %c0_164 = arith.constant 0 : index
    %363 = vector.load %arg2[%c1_161, %c2_162, %c0_163, %c0_164] : memref<2x3x16x16xf32, #tpu.memory_space<vmem>>, vector<1x1x16x16xf32>
    %364 = vector.shape_cast %363 : vector<1x1x16x16xf32> to vector<16x16xf32>
    %365 = vector.broadcast %0 : f32 to vector<16x16xf32>
    %366 = arith.mulf %365, %362 : vector<16x16xf32>
    %367 = vector.broadcast %1 : f32 to vector<16x16xf32>
    %368 = arith.mulf %367, %364 : vector<16x16xf32>
    %369 = arith.addf %366, %368 : vector<16x16xf32>
    %370 = arith.addf %360, %369 : vector<16x16xf32>
    %371 = vector.broadcast %2 : f32 to vector<16x16xf32>
    %372 = arith.mulf %371, %370 : vector<16x16xf32>
    %373 = vector.broadcast %3 : f32 to vector<16x16xf32>
    %374 = arith.mulf %373, %364 : vector<16x16xf32>
    %375 = arith.addf %372, %374 : vector<16x16xf32>
    %376 = arith.addf %362, %375 : vector<16x16xf32>
    %377 = vector.broadcast %4 : f32 to vector<16x16xf32>
    %378 = arith.mulf %377, %370 : vector<16x16xf32>
    %379 = vector.broadcast %5 : f32 to vector<16x16xf32>
    %380 = arith.mulf %379, %376 : vector<16x16xf32>
    %381 = arith.addf %378, %380 : vector<16x16xf32>
    %382 = arith.addf %364, %381 : vector<16x16xf32>
    %383 = vector.broadcast %6 : f32 to vector<16x16xf32>
    %384 = arith.mulf %383, %376 : vector<16x16xf32>
    %385 = vector.broadcast %7 : f32 to vector<16x16xf32>
    %386 = arith.mulf %385, %382 : vector<16x16xf32>
    %387 = arith.addf %384, %386 : vector<16x16xf32>
    %388 = arith.addf %370, %387 : vector<16x16xf32>
    %389 = vector.broadcast %8 : f32 to vector<16x16xf32>
    %390 = arith.mulf %389, %388 : vector<16x16xf32>
    %391 = vector.broadcast %9 : f32 to vector<16x16xf32>
    %392 = arith.mulf %391, %382 : vector<16x16xf32>
    %393 = arith.addf %390, %392 : vector<16x16xf32>
    %394 = arith.addf %376, %393 : vector<16x16xf32>
    %395 = vector.broadcast %10 : f32 to vector<16x16xf32>
    %396 = arith.mulf %395, %388 : vector<16x16xf32>
    %397 = vector.broadcast %11 : f32 to vector<16x16xf32>
    %398 = arith.mulf %397, %394 : vector<16x16xf32>
    %399 = arith.addf %396, %398 : vector<16x16xf32>
    %400 = arith.addf %382, %399 : vector<16x16xf32>
    %cst_165 = arith.constant 1.000000e+00 : f32
    %401 = vector.broadcast %cst_165 : f32 to vector<16x16xf32>
    %402 = arith.addf %388, %401 : vector<16x16xf32>
    %cst_166 = arith.constant 5.000000e-01 : f32
    %403 = vector.broadcast %cst_166 : f32 to vector<16x16xf32>
    %404 = arith.mulf %402, %403 : vector<16x16xf32>
    %cst_167 = arith.constant 0.000000e+00 : f32
    %405 = vector.broadcast %cst_167 : f32 to vector<16x16xf32>
    %406 = arith.cmpf oge, %404, %405 : vector<16x16xf32>
    %407 = math.floor %404 : vector<16x16xf32>
    %408 = math.ceil %404 : vector<16x16xf32>
    %409 = arith.select %406, %407, %408 : vector<16x16xi1>, vector<16x16xf32>
    %cst_168 = arith.constant 2.000000e+00 : f32
    %410 = vector.broadcast %cst_168 : f32 to vector<16x16xf32>
    %411 = arith.mulf %410, %409 : vector<16x16xf32>
    %412 = arith.subf %402, %411 : vector<16x16xf32>
    %cst_169 = arith.constant 1.000000e+00 : f32
    %413 = vector.broadcast %cst_169 : f32 to vector<16x16xf32>
    %414 = arith.subf %412, %413 : vector<16x16xf32>
    %c1_i32_170 = arith.constant 1 : i32
    %415 = tpu.dynamic_rotate %414 by %c1_i32_170 dim 0 : vector<16x16xf32>, i32 -> vector<16x16xf32>
    %416 = arith.select %14, %18, %415 : vector<16x16xi1>, vector<16x16xf32>
    %c1_i32_171 = arith.constant 1 : i32
    %417 = tpu.dynamic_rotate %414 by %c1_i32_171 dim 1 : vector<16x16xf32>, i32 -> vector<16x16xf32>
    %418 = arith.select %17, %18, %417 : vector<16x16xi1>, vector<16x16xf32>
    %c1_i32_172 = arith.constant 1 : i32
    %419 = tpu.dynamic_rotate %416 by %c1_i32_172 dim 1 : vector<16x16xf32>, i32 -> vector<16x16xf32>
    %420 = arith.select %17, %18, %419 : vector<16x16xi1>, vector<16x16xf32>
    %421 = arith.addf %416, %418 : vector<16x16xf32>
    %422 = arith.subf %421, %420 : vector<16x16xf32>
    %423 = arith.minimumf %416, %418 : vector<16x16xf32>
    %424 = arith.maximumf %422, %423 : vector<16x16xf32>
    %425 = arith.maximumf %416, %418 : vector<16x16xf32>
    %426 = arith.minimumf %424, %425 : vector<16x16xf32>
    %427 = arith.subf %414, %426 : vector<16x16xf32>
    %cst_173 = arith.constant 1.000000e+00 : f32
    %428 = vector.broadcast %cst_173 : f32 to vector<16x16xf32>
    %429 = arith.addf %427, %428 : vector<16x16xf32>
    %cst_174 = arith.constant 1.275000e+02 : f32
    %430 = vector.broadcast %cst_174 : f32 to vector<16x16xf32>
    %431 = arith.mulf %429, %430 : vector<16x16xf32>
    %c0_175 = arith.constant 0 : index
    %c0_176 = arith.constant 0 : index
    %c0_177 = arith.constant 0 : index
    %432 = vector.load %arg4[%c0_175, %c0_176, %c0_177] : memref<3x16x16xf32, #tpu.memory_space<vmem>>, vector<1x16x16xf32>
    %433 = vector.shape_cast %432 : vector<1x16x16xf32> to vector<16x16xf32>
    %434 = vector.shape_cast %431 : vector<16x16xf32> to vector<1x16x16xf32>
    tpu.vector_store %arg4[%c0_175, %c0_176, %c0_177], %434 {strides = array<i32>} : memref<3x16x16xf32, #tpu.memory_space<vmem>>, vector<1x16x16xf32>,
    %cst_178 = arith.constant 1.000000e+00 : f32
    %435 = vector.broadcast %cst_178 : f32 to vector<16x16xf32>
    %436 = arith.addf %394, %435 : vector<16x16xf32>
    %cst_179 = arith.constant 5.000000e-01 : f32
    %437 = vector.broadcast %cst_179 : f32 to vector<16x16xf32>
    %438 = arith.mulf %436, %437 : vector<16x16xf32>
    %cst_180 = arith.constant 0.000000e+00 : f32
    %439 = vector.broadcast %cst_180 : f32 to vector<16x16xf32>
    %440 = arith.cmpf oge, %438, %439 : vector<16x16xf32>
    %441 = math.floor %438 : vector<16x16xf32>
    %442 = math.ceil %438 : vector<16x16xf32>
    %443 = arith.select %440, %441, %442 : vector<16x16xi1>, vector<16x16xf32>
    %cst_181 = arith.constant 2.000000e+00 : f32
    %444 = vector.broadcast %cst_181 : f32 to vector<16x16xf32>
    %445 = arith.mulf %444, %443 : vector<16x16xf32>
    %446 = arith.subf %436, %445 : vector<16x16xf32>
    %cst_182 = arith.constant 1.000000e+00 : f32
    %447 = vector.broadcast %cst_182 : f32 to vector<16x16xf32>
    %448 = arith.subf %446, %447 : vector<16x16xf32>
    %c1_i32_183 = arith.constant 1 : i32
    %449 = tpu.dynamic_rotate %448 by %c1_i32_183 dim 0 : vector<16x16xf32>, i32 -> vector<16x16xf32>
    %450 = arith.select %14, %18, %449 : vector<16x16xi1>, vector<16x16xf32>
    %c1_i32_184 = arith.constant 1 : i32
    %451 = tpu.dynamic_rotate %448 by %c1_i32_184 dim 1 : vector<16x16xf32>, i32 -> vector<16x16xf32>
    %452 = arith.select %17, %18, %451 : vector<16x16xi1>, vector<16x16xf32>
    %c1_i32_185 = arith.constant 1 : i32
    %453 = tpu.dynamic_rotate %450 by %c1_i32_185 dim 1 : vector<16x16xf32>, i32 -> vector<16x16xf32>
    %454 = arith.select %17, %18, %453 : vector<16x16xi1>, vector<16x16xf32>
    %455 = arith.addf %450, %452 : vector<16x16xf32>
    %456 = arith.subf %455, %454 : vector<16x16xf32>
    %457 = arith.minimumf %450, %452 : vector<16x16xf32>
    %458 = arith.maximumf %456, %457 : vector<16x16xf32>
    %459 = arith.maximumf %450, %452 : vector<16x16xf32>
    %460 = arith.minimumf %458, %459 : vector<16x16xf32>
    %461 = arith.subf %448, %460 : vector<16x16xf32>
    %cst_186 = arith.constant 1.000000e+00 : f32
    %462 = vector.broadcast %cst_186 : f32 to vector<16x16xf32>
    %463 = arith.addf %461, %462 : vector<16x16xf32>
    %cst_187 = arith.constant 1.275000e+02 : f32
    %464 = vector.broadcast %cst_187 : f32 to vector<16x16xf32>
    %465 = arith.mulf %463, %464 : vector<16x16xf32>
    %c1_188 = arith.constant 1 : index
    %c0_189 = arith.constant 0 : index
    %c0_190 = arith.constant 0 : index
    %466 = vector.load %arg4[%c1_188, %c0_189, %c0_190] : memref<3x16x16xf32, #tpu.memory_space<vmem>>, vector<1x16x16xf32>
    %467 = vector.shape_cast %466 : vector<1x16x16xf32> to vector<16x16xf32>
    %468 = vector.shape_cast %465 : vector<16x16xf32> to vector<1x16x16xf32>
    tpu.vector_store %arg4[%c1_188, %c0_189, %c0_190], %468 {strides = array<i32>} : memref<3x16x16xf32, #tpu.memory_space<vmem>>, vector<1x16x16xf32>,
    %cst_191 = arith.constant 1.000000e+00 : f32
    %469 = vector.broadcast %cst_191 : f32 to vector<16x16xf32>
    %470 = arith.addf %400, %469 : vector<16x16xf32>
    %cst_192 = arith.constant 5.000000e-01 : f32
    %471 = vector.broadcast %cst_192 : f32 to vector<16x16xf32>
    %472 = arith.mulf %470, %471 : vector<16x16xf32>
    %cst_193 = arith.constant 0.000000e+00 : f32
    %473 = vector.broadcast %cst_193 : f32 to vector<16x16xf32>
    %474 = arith.cmpf oge, %472, %473 : vector<16x16xf32>
    %475 = math.floor %472 : vector<16x16xf32>
    %476 = math.ceil %472 : vector<16x16xf32>
    %477 = arith.select %474, %475, %476 : vector<16x16xi1>, vector<16x16xf32>
    %cst_194 = arith.constant 2.000000e+00 : f32
    %478 = vector.broadcast %cst_194 : f32 to vector<16x16xf32>
    %479 = arith.mulf %478, %477 : vector<16x16xf32>
    %480 = arith.subf %470, %479 : vector<16x16xf32>
    %cst_195 = arith.constant 1.000000e+00 : f32
    %481 = vector.broadcast %cst_195 : f32 to vector<16x16xf32>
    %482 = arith.subf %480, %481 : vector<16x16xf32>
    %c1_i32_196 = arith.constant 1 : i32
    %483 = tpu.dynamic_rotate %482 by %c1_i32_196 dim 0 : vector<16x16xf32>, i32 -> vector<16x16xf32>
    %484 = arith.select %14, %18, %483 : vector<16x16xi1>, vector<16x16xf32>
    %c1_i32_197 = arith.constant 1 : i32
    %485 = tpu.dynamic_rotate %482 by %c1_i32_197 dim 1 : vector<16x16xf32>, i32 -> vector<16x16xf32>
    %486 = arith.select %17, %18, %485 : vector<16x16xi1>, vector<16x16xf32>
    %c1_i32_198 = arith.constant 1 : i32
    %487 = tpu.dynamic_rotate %484 by %c1_i32_198 dim 1 : vector<16x16xf32>, i32 -> vector<16x16xf32>
    %488 = arith.select %17, %18, %487 : vector<16x16xi1>, vector<16x16xf32>
    %489 = arith.addf %484, %486 : vector<16x16xf32>
    %490 = arith.subf %489, %488 : vector<16x16xf32>
    %491 = arith.minimumf %484, %486 : vector<16x16xf32>
    %492 = arith.maximumf %490, %491 : vector<16x16xf32>
    %493 = arith.maximumf %484, %486 : vector<16x16xf32>
    %494 = arith.minimumf %492, %493 : vector<16x16xf32>
    %495 = arith.subf %482, %494 : vector<16x16xf32>
    %cst_199 = arith.constant 1.000000e+00 : f32
    %496 = vector.broadcast %cst_199 : f32 to vector<16x16xf32>
    %497 = arith.addf %495, %496 : vector<16x16xf32>
    %cst_200 = arith.constant 1.275000e+02 : f32
    %498 = vector.broadcast %cst_200 : f32 to vector<16x16xf32>
    %499 = arith.mulf %497, %498 : vector<16x16xf32>
    %c2_201 = arith.constant 2 : index
    %c0_202 = arith.constant 0 : index
    %c0_203 = arith.constant 0 : index
    %500 = vector.load %arg4[%c2_201, %c0_202, %c0_203] : memref<3x16x16xf32, #tpu.memory_space<vmem>>, vector<1x16x16xf32>
    %501 = vector.shape_cast %500 : vector<1x16x16xf32> to vector<16x16xf32>
    %502 = vector.shape_cast %499 : vector<16x16xf32> to vector<1x16x16xf32>
    tpu.vector_store %arg4[%c2_201, %c0_202, %c0_203], %502 {strides = array<i32>} : memref<3x16x16xf32, #tpu.memory_space<vmem>>, vector<1x16x16xf32>,
    %cst_204 = arith.constant 0.000000e+00 : f32
    %503 = vector.broadcast %cst_204 : f32 to vector<3x256xf32>
    %c0_205 = arith.constant 0 : index
    %c0_206 = arith.constant 0 : index
    %c0_207 = arith.constant 0 : index
    %504 = vector.load %arg4[%c0_205, %c0_206, %c0_207] : memref<3x16x16xf32, #tpu.memory_space<vmem>>, vector<3x16x1xf32>
    %505 = vector.broadcast %504 : vector<3x16x1xf32> to vector<3x16x256xf32>
    %506 = vector.broadcast %20 : vector<1x1x256xf32> to vector<3x16x256xf32>
    %507 = arith.subf %505, %506 : vector<3x16x256xf32>
    %508 = math.absf %507 : vector<3x16x256xf32>
    %cst_208 = arith.constant 1.000000e+00 : f32
    %509 = vector.broadcast %cst_208 : f32 to vector<3x16x256xf32>
    %510 = arith.subf %509, %508 : vector<3x16x256xf32>
    %cst_209 = arith.constant 0.000000e+00 : f32
    %511 = vector.broadcast %cst_209 : f32 to vector<3x16x256xf32>
    %512 = arith.maximumf %510, %511 : vector<3x16x256xf32>
    %cst_210 = arith.constant dense<0.000000e+00> : vector<3x256xf32>
    %513 = vector.multi_reduction <add>, %512, %cst_210 [1] : vector<3x16x256xf32> to vector<3x256xf32>
    %514 = arith.addf %503, %513 : vector<3x256xf32>
    %c0_211 = arith.constant 0 : index
    %c0_212 = arith.constant 0 : index
    %c1_213 = arith.constant 1 : index
    %515 = vector.load %arg4[%c0_211, %c0_212, %c1_213] : memref<3x16x16xf32, #tpu.memory_space<vmem>>, vector<3x16x1xf32>
    %516 = vector.broadcast %515 : vector<3x16x1xf32> to vector<3x16x256xf32>
    %517 = vector.broadcast %20 : vector<1x1x256xf32> to vector<3x16x256xf32>
    %518 = arith.subf %516, %517 : vector<3x16x256xf32>
    %519 = math.absf %518 : vector<3x16x256xf32>
    %cst_214 = arith.constant 1.000000e+00 : f32
    %520 = vector.broadcast %cst_214 : f32 to vector<3x16x256xf32>
    %521 = arith.subf %520, %519 : vector<3x16x256xf32>
    %cst_215 = arith.constant 0.000000e+00 : f32
    %522 = vector.broadcast %cst_215 : f32 to vector<3x16x256xf32>
    %523 = arith.maximumf %521, %522 : vector<3x16x256xf32>
    %cst_216 = arith.constant dense<0.000000e+00> : vector<3x256xf32>
    %524 = vector.multi_reduction <add>, %523, %cst_216 [1] : vector<3x16x256xf32> to vector<3x256xf32>
    %525 = arith.addf %514, %524 : vector<3x256xf32>
    %c0_217 = arith.constant 0 : index
    %c0_218 = arith.constant 0 : index
    %c2_219 = arith.constant 2 : index
    %526 = vector.load %arg4[%c0_217, %c0_218, %c2_219] : memref<3x16x16xf32, #tpu.memory_space<vmem>>, vector<3x16x1xf32>
    %527 = vector.broadcast %526 : vector<3x16x1xf32> to vector<3x16x256xf32>
    %528 = vector.broadcast %20 : vector<1x1x256xf32> to vector<3x16x256xf32>
    %529 = arith.subf %527, %528 : vector<3x16x256xf32>
    %530 = math.absf %529 : vector<3x16x256xf32>
    %cst_220 = arith.constant 1.000000e+00 : f32
    %531 = vector.broadcast %cst_220 : f32 to vector<3x16x256xf32>
    %532 = arith.subf %531, %530 : vector<3x16x256xf32>
    %cst_221 = arith.constant 0.000000e+00 : f32
    %533 = vector.broadcast %cst_221 : f32 to vector<3x16x256xf32>
    %534 = arith.maximumf %532, %533 : vector<3x16x256xf32>
    %cst_222 = arith.constant dense<0.000000e+00> : vector<3x256xf32>
    %535 = vector.multi_reduction <add>, %534, %cst_222 [1] : vector<3x16x256xf32> to vector<3x256xf32>
    %536 = arith.addf %525, %535 : vector<3x256xf32>
    %c0_223 = arith.constant 0 : index
    %c0_224 = arith.constant 0 : index
    %c3_225 = arith.constant 3 : index
    %537 = vector.load %arg4[%c0_223, %c0_224, %c3_225] : memref<3x16x16xf32, #tpu.memory_space<vmem>>, vector<3x16x1xf32>
    %538 = vector.broadcast %537 : vector<3x16x1xf32> to vector<3x16x256xf32>
    %539 = vector.broadcast %20 : vector<1x1x256xf32> to vector<3x16x256xf32>
    %540 = arith.subf %538, %539 : vector<3x16x256xf32>
    %541 = math.absf %540 : vector<3x16x256xf32>
    %cst_226 = arith.constant 1.000000e+00 : f32
    %542 = vector.broadcast %cst_226 : f32 to vector<3x16x256xf32>
    %543 = arith.subf %542, %541 : vector<3x16x256xf32>
    %cst_227 = arith.constant 0.000000e+00 : f32
    %544 = vector.broadcast %cst_227 : f32 to vector<3x16x256xf32>
    %545 = arith.maximumf %543, %544 : vector<3x16x256xf32>
    %cst_228 = arith.constant dense<0.000000e+00> : vector<3x256xf32>
    %546 = vector.multi_reduction <add>, %545, %cst_228 [1] : vector<3x16x256xf32> to vector<3x256xf32>
    %547 = arith.addf %536, %546 : vector<3x256xf32>
    %c0_229 = arith.constant 0 : index
    %c0_230 = arith.constant 0 : index
    %c4_231 = arith.constant 4 : index
    %548 = vector.load %arg4[%c0_229, %c0_230, %c4_231] : memref<3x16x16xf32, #tpu.memory_space<vmem>>, vector<3x16x1xf32>
    %549 = vector.broadcast %548 : vector<3x16x1xf32> to vector<3x16x256xf32>
    %550 = vector.broadcast %20 : vector<1x1x256xf32> to vector<3x16x256xf32>
    %551 = arith.subf %549, %550 : vector<3x16x256xf32>
    %552 = math.absf %551 : vector<3x16x256xf32>
    %cst_232 = arith.constant 1.000000e+00 : f32
    %553 = vector.broadcast %cst_232 : f32 to vector<3x16x256xf32>
    %554 = arith.subf %553, %552 : vector<3x16x256xf32>
    %cst_233 = arith.constant 0.000000e+00 : f32
    %555 = vector.broadcast %cst_233 : f32 to vector<3x16x256xf32>
    %556 = arith.maximumf %554, %555 : vector<3x16x256xf32>
    %cst_234 = arith.constant dense<0.000000e+00> : vector<3x256xf32>
    %557 = vector.multi_reduction <add>, %556, %cst_234 [1] : vector<3x16x256xf32> to vector<3x256xf32>
    %558 = arith.addf %547, %557 : vector<3x256xf32>
    %c0_235 = arith.constant 0 : index
    %c0_236 = arith.constant 0 : index
    %c5_237 = arith.constant 5 : index
    %559 = vector.load %arg4[%c0_235, %c0_236, %c5_237] : memref<3x16x16xf32, #tpu.memory_space<vmem>>, vector<3x16x1xf32>
    %560 = vector.broadcast %559 : vector<3x16x1xf32> to vector<3x16x256xf32>
    %561 = vector.broadcast %20 : vector<1x1x256xf32> to vector<3x16x256xf32>
    %562 = arith.subf %560, %561 : vector<3x16x256xf32>
    %563 = math.absf %562 : vector<3x16x256xf32>
    %cst_238 = arith.constant 1.000000e+00 : f32
    %564 = vector.broadcast %cst_238 : f32 to vector<3x16x256xf32>
    %565 = arith.subf %564, %563 : vector<3x16x256xf32>
    %cst_239 = arith.constant 0.000000e+00 : f32
    %566 = vector.broadcast %cst_239 : f32 to vector<3x16x256xf32>
    %567 = arith.maximumf %565, %566 : vector<3x16x256xf32>
    %cst_240 = arith.constant dense<0.000000e+00> : vector<3x256xf32>
    %568 = vector.multi_reduction <add>, %567, %cst_240 [1] : vector<3x16x256xf32> to vector<3x256xf32>
    %569 = arith.addf %558, %568 : vector<3x256xf32>
    %c0_241 = arith.constant 0 : index
    %c0_242 = arith.constant 0 : index
    %c6_243 = arith.constant 6 : index
    %570 = vector.load %arg4[%c0_241, %c0_242, %c6_243] : memref<3x16x16xf32, #tpu.memory_space<vmem>>, vector<3x16x1xf32>
    %571 = vector.broadcast %570 : vector<3x16x1xf32> to vector<3x16x256xf32>
    %572 = vector.broadcast %20 : vector<1x1x256xf32> to vector<3x16x256xf32>
    %573 = arith.subf %571, %572 : vector<3x16x256xf32>
    %574 = math.absf %573 : vector<3x16x256xf32>
    %cst_244 = arith.constant 1.000000e+00 : f32
    %575 = vector.broadcast %cst_244 : f32 to vector<3x16x256xf32>
    %576 = arith.subf %575, %574 : vector<3x16x256xf32>
    %cst_245 = arith.constant 0.000000e+00 : f32
    %577 = vector.broadcast %cst_245 : f32 to vector<3x16x256xf32>
    %578 = arith.maximumf %576, %577 : vector<3x16x256xf32>
    %cst_246 = arith.constant dense<0.000000e+00> : vector<3x256xf32>
    %579 = vector.multi_reduction <add>, %578, %cst_246 [1] : vector<3x16x256xf32> to vector<3x256xf32>
    %580 = arith.addf %569, %579 : vector<3x256xf32>
    %c0_247 = arith.constant 0 : index
    %c0_248 = arith.constant 0 : index
    %c7_249 = arith.constant 7 : index
    %581 = vector.load %arg4[%c0_247, %c0_248, %c7_249] : memref<3x16x16xf32, #tpu.memory_space<vmem>>, vector<3x16x1xf32>
    %582 = vector.broadcast %581 : vector<3x16x1xf32> to vector<3x16x256xf32>
    %583 = vector.broadcast %20 : vector<1x1x256xf32> to vector<3x16x256xf32>
    %584 = arith.subf %582, %583 : vector<3x16x256xf32>
    %585 = math.absf %584 : vector<3x16x256xf32>
    %cst_250 = arith.constant 1.000000e+00 : f32
    %586 = vector.broadcast %cst_250 : f32 to vector<3x16x256xf32>
    %587 = arith.subf %586, %585 : vector<3x16x256xf32>
    %cst_251 = arith.constant 0.000000e+00 : f32
    %588 = vector.broadcast %cst_251 : f32 to vector<3x16x256xf32>
    %589 = arith.maximumf %587, %588 : vector<3x16x256xf32>
    %cst_252 = arith.constant dense<0.000000e+00> : vector<3x256xf32>
    %590 = vector.multi_reduction <add>, %589, %cst_252 [1] : vector<3x16x256xf32> to vector<3x256xf32>
    %591 = arith.addf %580, %590 : vector<3x256xf32>
    %c0_253 = arith.constant 0 : index
    %c0_254 = arith.constant 0 : index
    %c8_255 = arith.constant 8 : index
    %592 = vector.load %arg4[%c0_253, %c0_254, %c8_255] : memref<3x16x16xf32, #tpu.memory_space<vmem>>, vector<3x16x1xf32>
    %593 = vector.broadcast %592 : vector<3x16x1xf32> to vector<3x16x256xf32>
    %594 = vector.broadcast %20 : vector<1x1x256xf32> to vector<3x16x256xf32>
    %595 = arith.subf %593, %594 : vector<3x16x256xf32>
    %596 = math.absf %595 : vector<3x16x256xf32>
    %cst_256 = arith.constant 1.000000e+00 : f32
    %597 = vector.broadcast %cst_256 : f32 to vector<3x16x256xf32>
    %598 = arith.subf %597, %596 : vector<3x16x256xf32>
    %cst_257 = arith.constant 0.000000e+00 : f32
    %599 = vector.broadcast %cst_257 : f32 to vector<3x16x256xf32>
    %600 = arith.maximumf %598, %599 : vector<3x16x256xf32>
    %cst_258 = arith.constant dense<0.000000e+00> : vector<3x256xf32>
    %601 = vector.multi_reduction <add>, %600, %cst_258 [1] : vector<3x16x256xf32> to vector<3x256xf32>
    %602 = arith.addf %591, %601 : vector<3x256xf32>
    %c0_259 = arith.constant 0 : index
    %c0_260 = arith.constant 0 : index
    %c9_261 = arith.constant 9 : index
    %603 = vector.load %arg4[%c0_259, %c0_260, %c9_261] : memref<3x16x16xf32, #tpu.memory_space<vmem>>, vector<3x16x1xf32>
    %604 = vector.broadcast %603 : vector<3x16x1xf32> to vector<3x16x256xf32>
    %605 = vector.broadcast %20 : vector<1x1x256xf32> to vector<3x16x256xf32>
    %606 = arith.subf %604, %605 : vector<3x16x256xf32>
    %607 = math.absf %606 : vector<3x16x256xf32>
    %cst_262 = arith.constant 1.000000e+00 : f32
    %608 = vector.broadcast %cst_262 : f32 to vector<3x16x256xf32>
    %609 = arith.subf %608, %607 : vector<3x16x256xf32>
    %cst_263 = arith.constant 0.000000e+00 : f32
    %610 = vector.broadcast %cst_263 : f32 to vector<3x16x256xf32>
    %611 = arith.maximumf %609, %610 : vector<3x16x256xf32>
    %cst_264 = arith.constant dense<0.000000e+00> : vector<3x256xf32>
    %612 = vector.multi_reduction <add>, %611, %cst_264 [1] : vector<3x16x256xf32> to vector<3x256xf32>
    %613 = arith.addf %602, %612 : vector<3x256xf32>
    %c0_265 = arith.constant 0 : index
    %c0_266 = arith.constant 0 : index
    %c10_267 = arith.constant 10 : index
    %614 = vector.load %arg4[%c0_265, %c0_266, %c10_267] : memref<3x16x16xf32, #tpu.memory_space<vmem>>, vector<3x16x1xf32>
    %615 = vector.broadcast %614 : vector<3x16x1xf32> to vector<3x16x256xf32>
    %616 = vector.broadcast %20 : vector<1x1x256xf32> to vector<3x16x256xf32>
    %617 = arith.subf %615, %616 : vector<3x16x256xf32>
    %618 = math.absf %617 : vector<3x16x256xf32>
    %cst_268 = arith.constant 1.000000e+00 : f32
    %619 = vector.broadcast %cst_268 : f32 to vector<3x16x256xf32>
    %620 = arith.subf %619, %618 : vector<3x16x256xf32>
    %cst_269 = arith.constant 0.000000e+00 : f32
    %621 = vector.broadcast %cst_269 : f32 to vector<3x16x256xf32>
    %622 = arith.maximumf %620, %621 : vector<3x16x256xf32>
    %cst_270 = arith.constant dense<0.000000e+00> : vector<3x256xf32>
    %623 = vector.multi_reduction <add>, %622, %cst_270 [1] : vector<3x16x256xf32> to vector<3x256xf32>
    %624 = arith.addf %613, %623 : vector<3x256xf32>
    %c0_271 = arith.constant 0 : index
    %c0_272 = arith.constant 0 : index
    %c11_273 = arith.constant 11 : index
    %625 = vector.load %arg4[%c0_271, %c0_272, %c11_273] : memref<3x16x16xf32, #tpu.memory_space<vmem>>, vector<3x16x1xf32>
    %626 = vector.broadcast %625 : vector<3x16x1xf32> to vector<3x16x256xf32>
    %627 = vector.broadcast %20 : vector<1x1x256xf32> to vector<3x16x256xf32>
    %628 = arith.subf %626, %627 : vector<3x16x256xf32>
    %629 = math.absf %628 : vector<3x16x256xf32>
    %cst_274 = arith.constant 1.000000e+00 : f32
    %630 = vector.broadcast %cst_274 : f32 to vector<3x16x256xf32>
    %631 = arith.subf %630, %629 : vector<3x16x256xf32>
    %cst_275 = arith.constant 0.000000e+00 : f32
    %632 = vector.broadcast %cst_275 : f32 to vector<3x16x256xf32>
    %633 = arith.maximumf %631, %632 : vector<3x16x256xf32>
    %cst_276 = arith.constant dense<0.000000e+00> : vector<3x256xf32>
    %634 = vector.multi_reduction <add>, %633, %cst_276 [1] : vector<3x16x256xf32> to vector<3x256xf32>
    %635 = arith.addf %624, %634 : vector<3x256xf32>
    %c0_277 = arith.constant 0 : index
    %c0_278 = arith.constant 0 : index
    %c12_279 = arith.constant 12 : index
    %636 = vector.load %arg4[%c0_277, %c0_278, %c12_279] : memref<3x16x16xf32, #tpu.memory_space<vmem>>, vector<3x16x1xf32>
    %637 = vector.broadcast %636 : vector<3x16x1xf32> to vector<3x16x256xf32>
    %638 = vector.broadcast %20 : vector<1x1x256xf32> to vector<3x16x256xf32>
    %639 = arith.subf %637, %638 : vector<3x16x256xf32>
    %640 = math.absf %639 : vector<3x16x256xf32>
    %cst_280 = arith.constant 1.000000e+00 : f32
    %641 = vector.broadcast %cst_280 : f32 to vector<3x16x256xf32>
    %642 = arith.subf %641, %640 : vector<3x16x256xf32>
    %cst_281 = arith.constant 0.000000e+00 : f32
    %643 = vector.broadcast %cst_281 : f32 to vector<3x16x256xf32>
    %644 = arith.maximumf %642, %643 : vector<3x16x256xf32>
    %cst_282 = arith.constant dense<0.000000e+00> : vector<3x256xf32>
    %645 = vector.multi_reduction <add>, %644, %cst_282 [1] : vector<3x16x256xf32> to vector<3x256xf32>
    %646 = arith.addf %635, %645 : vector<3x256xf32>
    %c0_283 = arith.constant 0 : index
    %c0_284 = arith.constant 0 : index
    %c13_285 = arith.constant 13 : index
    %647 = vector.load %arg4[%c0_283, %c0_284, %c13_285] : memref<3x16x16xf32, #tpu.memory_space<vmem>>, vector<3x16x1xf32>
    %648 = vector.broadcast %647 : vector<3x16x1xf32> to vector<3x16x256xf32>
    %649 = vector.broadcast %20 : vector<1x1x256xf32> to vector<3x16x256xf32>
    %650 = arith.subf %648, %649 : vector<3x16x256xf32>
    %651 = math.absf %650 : vector<3x16x256xf32>
    %cst_286 = arith.constant 1.000000e+00 : f32
    %652 = vector.broadcast %cst_286 : f32 to vector<3x16x256xf32>
    %653 = arith.subf %652, %651 : vector<3x16x256xf32>
    %cst_287 = arith.constant 0.000000e+00 : f32
    %654 = vector.broadcast %cst_287 : f32 to vector<3x16x256xf32>
    %655 = arith.maximumf %653, %654 : vector<3x16x256xf32>
    %cst_288 = arith.constant dense<0.000000e+00> : vector<3x256xf32>
    %656 = vector.multi_reduction <add>, %655, %cst_288 [1] : vector<3x16x256xf32> to vector<3x256xf32>
    %657 = arith.addf %646, %656 : vector<3x256xf32>
    %c0_289 = arith.constant 0 : index
    %c0_290 = arith.constant 0 : index
    %c14_291 = arith.constant 14 : index
    %658 = vector.load %arg4[%c0_289, %c0_290, %c14_291] : memref<3x16x16xf32, #tpu.memory_space<vmem>>, vector<3x16x1xf32>
    %659 = vector.broadcast %658 : vector<3x16x1xf32> to vector<3x16x256xf32>
    %660 = vector.broadcast %20 : vector<1x1x256xf32> to vector<3x16x256xf32>
    %661 = arith.subf %659, %660 : vector<3x16x256xf32>
    %662 = math.absf %661 : vector<3x16x256xf32>
    %cst_292 = arith.constant 1.000000e+00 : f32
    %663 = vector.broadcast %cst_292 : f32 to vector<3x16x256xf32>
    %664 = arith.subf %663, %662 : vector<3x16x256xf32>
    %cst_293 = arith.constant 0.000000e+00 : f32
    %665 = vector.broadcast %cst_293 : f32 to vector<3x16x256xf32>
    %666 = arith.maximumf %664, %665 : vector<3x16x256xf32>
    %cst_294 = arith.constant dense<0.000000e+00> : vector<3x256xf32>
    %667 = vector.multi_reduction <add>, %666, %cst_294 [1] : vector<3x16x256xf32> to vector<3x256xf32>
    %668 = arith.addf %657, %667 : vector<3x256xf32>
    %c0_295 = arith.constant 0 : index
    %c0_296 = arith.constant 0 : index
    %c15_297 = arith.constant 15 : index
    %669 = vector.load %arg4[%c0_295, %c0_296, %c15_297] : memref<3x16x16xf32, #tpu.memory_space<vmem>>, vector<3x16x1xf32>
    %670 = vector.broadcast %669 : vector<3x16x1xf32> to vector<3x16x256xf32>
    %671 = vector.broadcast %20 : vector<1x1x256xf32> to vector<3x16x256xf32>
    %672 = arith.subf %670, %671 : vector<3x16x256xf32>
    %673 = math.absf %672 : vector<3x16x256xf32>
    %cst_298 = arith.constant 1.000000e+00 : f32
    %674 = vector.broadcast %cst_298 : f32 to vector<3x16x256xf32>
    %675 = arith.subf %674, %673 : vector<3x16x256xf32>
    %cst_299 = arith.constant 0.000000e+00 : f32
    %676 = vector.broadcast %cst_299 : f32 to vector<3x16x256xf32>
    %677 = arith.maximumf %675, %676 : vector<3x16x256xf32>
    %cst_300 = arith.constant dense<0.000000e+00> : vector<3x256xf32>
    %678 = vector.multi_reduction <add>, %677, %cst_300 [1] : vector<3x16x256xf32> to vector<3x256xf32>
    %679 = arith.addf %668, %678 : vector<3x256xf32>
    %cst_301 = arith.constant 3.906250e-03 : f32
    %680 = vector.broadcast %cst_301 : f32 to vector<3x256xf32>
    %681 = arith.mulf %679, %680 : vector<3x256xf32>
    %cst_302 = arith.constant 1.000000e-30 : f32
    %682 = vector.broadcast %cst_302 : f32 to vector<3x256xf32>
    %683 = arith.maximumf %681, %682 : vector<3x256xf32>
    %cst_303 = arith.constant 0.000000e+00 : f32
    %684 = vector.broadcast %cst_303 : f32 to vector<3x256xf32>
    %685 = arith.cmpf ogt, %681, %684 : vector<3x256xf32>
    %cst_304 = arith.constant 0.000000e+00 : f32
    %686 = vector.broadcast %cst_304 : f32 to vector<3x256xf32>
    %687 = arith.subf %686, %681 : vector<3x256xf32>
    %688 = math.log %683 : vector<3x256xf32>
    %689 = arith.mulf %687, %688 : vector<3x256xf32>
    %cst_305 = arith.constant 1.44269502 : f32
    %690 = vector.broadcast %cst_305 : f32 to vector<3x256xf32>
    %691 = arith.mulf %689, %690 : vector<3x256xf32>
    %cst_306 = arith.constant 0.000000e+00 : f32
    %692 = vector.broadcast %cst_306 : f32 to vector<3x256xf32>
    %693 = arith.select %685, %691, %692 : vector<3x256xi1>, vector<3x256xf32>
    %c1_307 = arith.constant 1 : index
    %c0_308 = arith.constant 0 : index
    %c0_309 = arith.constant 0 : index
    %694 = vector.load %arg3[%c1_307, %c0_308, %c0_309] : memref<2x3x256xf32, #tpu.memory_space<vmem>>, vector<1x3x256xf32>
    %695 = vector.shape_cast %694 : vector<1x3x256xf32> to vector<3x256xf32>
    %696 = vector.shape_cast %693 : vector<3x256xf32> to vector<1x3x256xf32>
    tpu.vector_store %arg3[%c1_307, %c0_308, %c0_309], %696 {strides = array<i32>} : memref<2x3x256xf32, #tpu.memory_space<vmem>>, vector<1x3x256xf32>,
    return
  }
  func.func @transform_0(%arg0: i32) -> i32 {
    %c0_i32 = arith.constant 0 : i32
    %c0_i32_0 = arith.constant 0 : i32
    return %c0_i32 : i32
  }
  func.func @transform_1(%arg0: i32) -> (i32, i32, i32, i32) {
    %c0_i32 = arith.constant 0 : i32
    %c0_i32_0 = arith.constant 0 : i32
    %c0_i32_1 = arith.constant 0 : i32
    %c0_i32_2 = arith.constant 0 : i32
    return %arg0, %c0_i32, %c0_i32_0, %c0_i32_1 : i32, i32, i32, i32
  }
  func.func @transform_2(%arg0: i32) -> (i32, i32, i32) {
    %c0_i32 = arith.constant 0 : i32
    %c0_i32_0 = arith.constant 0 : i32
    %c0_i32_1 = arith.constant 0 : i32
    return %arg0, %c0_i32, %c0_i32_0 : i32, i32, i32
  }
}

</mosaic_0001>

<bundles_post_ra>
// kernel: codec_forward.1
= control target key start
LH: loop header
LB: loop body
LE: loop exit
PB: predicated region body
PF: predicated region fallthrough
CT: control target
= control target key end

     0   :  { %7 = vsyncpa [#allocation5], 0  ;;  %s7777_s0 = inlined_call_operand.vmem [shape: f32[12], index: 0, kind: input, shape index: {}]   ;;  %s7778_s1 = inlined_call_operand.hbm [shape: f32[2,3,16,16], index: 1, kind: input, shape index: {}]   ;;  %s7779_s2 = inlined_call_operand.vmem [shape: f32[2,3,256], index: 2, kind: output, shape index: {}]  }
   0x1   :  { %s15_s11 = sshll.u32 %s7777_s0, 4  ;;  %s16_s11 = int_to_ptr.vmem [resolvable:$true] %s15_s11 }
   0x2   :  { %8 = vsyncpa [#allocation4], 0  ;;  %s4953_s12 = scalar_lea.vmem %s16_s11, 16  ;;  %p4958_p1 = scmp.lt.s32.totalorder %s16_s11, %s16_s11 }
   0x3   :  { %p4954_p0 = scmp.ne.s32.totalorder %s16_s11, %s4953_s12  ;;  %p4959_p2 = scmp.lt.s32.totalorder %s4953_s12, %s4953_s12 }
   0x5   :  { %p4960_p3 = por %p4959_p2, %p4958_p1 }
   0x7   :  { %p4961_p4 = pnand %p4960_p3, %p4954_p0 }
   0x9   :  { %4964 = shalt.err (!%p4961_p4)
}
   0xa   :  { %s4991_s13 = smov [#allocation3]   ;;  %s4992_s14 = smov [#allocation6]  }
   0xb   :  { %18 = dma.vmem_to_smem %s16_s11, 16, %s4991_s13, [#allocation5]  }
   0xc   :  { %s24_s15 = sshll.u32 %s4992_s14, 4  ;;  %s4965_s18 = scalar_lea.hbm %s7778_s1, 1536  ;;  %s25_s15 = int_to_ptr.vmem [resolvable:$true] %s24_s15 }
   0xd   :  { %p4966_p5 = scmp.ne.s32.totalorder %s7778_s1, %s4965_s18  ;;  %p4969_p6 = scmp.lt.u32.totalorder %s4965_s18, %s7778_s1 }
   0xf   :  { %p4971_p7 = pnand %p4969_p6, %p4966_p5 }
  0x11   :  { %4974 = shalt.err (!%p4971_p7)
}
  0x12   :  { %s4975_s22 = scalar_lea.vmem %s25_s15, 1536  ;;  %p4980_p9 = scmp.lt.s32.totalorder %s25_s15, %s25_s15 }
  0x13   :  { %p4976_p8 = scmp.ne.s32.totalorder %s25_s15, %s4975_s22  ;;  %p4981_p10 = scmp.lt.s32.totalorder %s4975_s22, %s4975_s22 }
  0x15   :  { %p4982_p11 = por %p4981_p10, %p4980_p9 }
  0x17   :  { %p4983_p12 = pnand %p4982_p11, %p4976_p8 }
  0x19   :  { %4986 = shalt.err (!%p4983_p12)
}
  0x1a   :  { %s4993_s23 = smov 128   ;;  %s4994_s24 = smov 8  }
  0x1b   :  { %30 = dma.hbm_to_vmem [thread:$0]  %s7778_s1, 1536, %s25_s15, [#allocation4], %s4993_s23, %s4993_s23, %s4994_s24  }
  0x1c   :  { %4987 = dma.done.wait [#allocation5], 16  }
  0x1d   :  { %4988 = vsyncadd [#allocation5], 4294967280 }
  0x1e   :  { %4989 = dma.done.wait [#allocation4], 1536  }
  0x1f   :  { %4990 = vsyncadd [#allocation4], 4294965760 }
  0x20   :  { %37 = sfence }
  0x21   :  { %s38_s27 = sld [smem:[#allocation3]]  ;;  %s4736_s28 = sld [smem:[#allocation3 + $0x1]]  ;;  %v64_v0 = vld [vmem:[#allocation6 + $0x10] sm:$0xff]  ;;  %v5043_v1 = vld [vmem:[#allocation6 + $0x20] sm:$0xff]  ;;  %v65_v2 = vld [vmem:[#allocation6 + $0x18] sm:$0xff]  ;;  %v50_v63 = vlaneseq  ;;  %vm154_vm14 = vcmask 1047680  }
  0x22   :  { %s4738_s29 = sld [smem:[#allocation3 + $0x3]]  ;;  %s4737_s30 = sld [smem:[#allocation3 + $0x2]]  ;;  %v5047_v5 = vld [vmem:[#allocation6 + $0x28] sm:$0xff]  ;;  %v5050_v9 = vld [vmem:[#allocation6 + $0x58] sm:$0xff]  ;;  %v61_v10 = vld [vmem:[#allocation6] sm:$0xff] }
  0x23   :  { %s5045_s3 = sld [smem:[#allocation3 + $0x4]]  ;;  %v2410_v8 = vld [vmem:[#allocation6 + $0x48] sm:$0xff]  ;;  %s5052_s1 = sld [smem:[#allocation3 + $0x5]]  ;;  %v2409_v13 = vld [vmem:[#allocation6 + $0x40] sm:$0xff]  ;;  %v5055_v16 = vld [vmem:[#allocation6 + $0x50] sm:$0xff] }
  0x24   :  { %v62_v18 = vld [vmem:[#allocation6 + $0x8] sm:$0xff]  ;;  %v2407_v24 = vld [vmem:[#allocation6 + $0x38] sm:$0xff]  ;;  %s4741_s4 = sld [smem:[#allocation3 + $0x6]]  ;;  %v2406_v31 = vld [vmem:[#allocation6 + $0x30] sm:$0xff]  ;;  %s4742_s5 = sld [smem:[#allocation3 + $0x7]] }
  0x25   :  { %s4744_s6 = sld [smem:[#allocation3 + $0x9]]  ;;  %s4743_s7 = sld [smem:[#allocation3 + $0x8]] }
  0x26   :  { %s4746_s8 = sld [smem:[#allocation3 + $0xb]]  ;;  %s4745_s9 = sld [smem:[#allocation3 + $0xa]] }
  0x27   :  { %v69_v3 = vstv %s38_s27  ;;  %v72_v4 = vstv %s4736_s28  ;;  %s4995_s10 = smov 16   ;;  %s4996_s11 = smov 113  }
  0x28   :  { %v70_v6 = vmul.f32 %v69_v3, %v64_v0  ;;  %v73_v7 = vmul.f32 %v72_v4, %v5043_v1  ;;  %v82_v11 = vstv %s4738_s29  ;;  %v71_v12 = vmul.f32 %v69_v3, %v65_v2 }
  0x29   :  { %v74_v15 = vmul.f32 %v72_v4, %v5047_v5  ;;  %v79_v17 = vstv %s4737_s30  ;;  %v2415_v19 = vmul.f32 %v2410_v8, %v69_v3  ;;  %v2417_v20 = vmul.f32 %v5050_v9, %v72_v4 }
  0x2a   :  { %v75_v14 = vadd.f32 %v73_v7, %v70_v6  ;;  %v83_v22 = vmul.f32 %v82_v11, %v5043_v1  ;;  %v2414_v25 = vmul.f32 %v2409_v13, %v69_v3  ;;  %v2416_v27 = vmul.f32 %v5055_v16, %v72_v4 }
  0x2b   :  { %v76_v23 = vadd.f32 %v74_v15, %v71_v12  ;;  %v2419_v26 = vadd.f32 %v2417_v20, %v2415_v19  ;;  %v84_v30 = vmul.f32 %v82_v11, %v5047_v5  ;;  %v89_v32 = vstv %s5045_s3 }
  0x2c   :  { %v5058_v21 = vadd.f32 %v75_v14, %v61_v10  ;;  %v2425_v34 = vmul.f32 %v5050_v9, %v82_v11  ;;  %v2418_v35 = vadd.f32 %v2416_v27, %v2414_v25  ;;  %v92_v38 = vstv %s5052_s1 }
  0x2d   :  { %v5063_v29 = vadd.f32 %v76_v23, %v62_v18  ;;  %v2421_v33 = vadd.f32 %v2419_v26, %v2407_v24  ;;  %v2424_v41 = vmul.f32 %v5055_v16, %v82_v11  ;;  %v99_v50 = vstv %s4741_s4 }
  0x2e   :  { %v80_v28 = vmul.f32 %v79_v17, %v5058_v21  ;;  %v5070_v40 = vadd.f32 %v2418_v35, %v2406_v31  ;;  %v90_v43 = vmul.f32 %v89_v32, %v5058_v21  ;;  %v102_v56 = vstv %s4742_s5 }
  0x2f   :  { %v81_v37 = vmul.f32 %v79_v17, %v5063_v29  ;;  %v2423_v39 = vmul.f32 %v2421_v33, %v79_v17  ;;  %v91_v49 = vmul.f32 %v89_v32, %v5063_v29  ;;  %v2431_v52 = vmul.f32 %v2421_v33, %v89_v32 }
  0x30   :  { %v85_v36 = vadd.f32 %v83_v22, %v80_v28  ;;  %v2422_v46 = vmul.f32 %v5070_v40, %v79_v17  ;;  %v2430_v59 = vmul.f32 %v5070_v40, %v89_v32  ;;  %v5104_v12 = vshrl.u32 %v50_v63, 7 }
  0x31   :  { %v86_v44 = vadd.f32 %v84_v30, %v81_v37  ;;  %v2427_v45 = vadd.f32 %v2425_v34, %v2423_v39  ;;  %v112_v15 = vstv %s4744_s6  ;;  %v109_v17 = vstv %s4743_s7 }
  0x32   :  { %v5073_v42 = vadd.f32 %v85_v36, %v64_v0  ;;  %v2426_v53 = vadd.f32 %v2424_v41, %v2422_v46  ;;  %v5112_v19 = vstv %s4746_s8  ;;  %v5116_v24 = vstv %s4745_s9 }
  0x33   :  { %v5078_v48 = vadd.f32 %v86_v44, %v65_v2  ;;  %v5081_v51 = vadd.f32 %v2427_v45, %v2410_v8  ;;  %vm149_vm2 = vcmp.lt.s32.totalorder %v5104_v12, 1  ;;  %vm53_vm4 = vcmp.eq.s32.totalorder %v5104_v12, 0 }
  0x34   :  { %v93_v47 = vmul.f32 %v92_v38, %v5073_v42  ;;  %v5085_v58 = vadd.f32 %v2426_v53, %v2409_v13  ;;  %v100_v61 = vmul.f32 %v99_v50, %v5073_v42 }
  0x35   :  { %v94_v55 = vmul.f32 %v92_v38, %v5078_v48  ;;  %v2433_v57 = vmul.f32 %v5081_v51, %v92_v38  ;;  %v101_v6 = vmul.f32 %v99_v50, %v5078_v48 }
  0x36   :  { %v95_v54 = vadd.f32 %v93_v47, %v90_v43  ;;  %v2432_v2 = vmul.f32 %v5085_v58, %v92_v38 }
  0x37   :  { %v96_v62 = vadd.f32 %v94_v55, %v91_v49  ;;  %v2435_v0 = vadd.f32 %v2433_v57, %v2431_v52 }
  0x38   :  { %v5089_v60 = vadd.f32 %v95_v54, %v5043_v1  ;;  %v2439_v1 = vmul.f32 %v5081_v51, %v99_v50  ;;  %v2434_v8 = vadd.f32 %v2432_v2, %v2430_v59 }
  0x39   :  { %v5095_v4 = vadd.f32 %v96_v62, %v5047_v5  ;;  %v5099_v7 = vadd.f32 %v2435_v0, %v5050_v9  ;;  %v2438_v5 = vmul.f32 %v5085_v58, %v99_v50 }
  0x3a   :  { %v103_v3 = vmul.f32 %v102_v56, %v5089_v60  ;;  %v5108_v14 = vadd.f32 %v2434_v8, %v5055_v16  ;;  %v113_v23 = vmul.f32 %v112_v15, %v5089_v60 }
  0x3b   :  { %v104_v11 = vmul.f32 %v102_v56, %v5095_v4  ;;  %v2441_v13 = vmul.f32 %v5099_v7, %v102_v56  ;;  %v114_v27 = vmul.f32 %v112_v15, %v5095_v4  ;;  %v2449_v31 = vmul.f32 %v5099_v7, %v112_v15 }
  0x3c   :  { %v105_v10 = vadd.f32 %v103_v3, %v100_v61  ;;  %v2440_v22 = vmul.f32 %v5108_v14, %v102_v56  ;;  %v2448_v30 = vmul.f32 %v5108_v14, %v112_v15 }
  0x3d   :  { %v106_v18 = vadd.f32 %v104_v11, %v101_v6  ;;  %v2443_v20 = vadd.f32 %v2441_v13, %v2439_v1 }
  0x3e   :  { %v107_v9 = vadd.f32 %v105_v10, %v5058_v21  ;;  %v2442_v21 = vadd.f32 %v2440_v22, %v2438_v5 }
  0x3f   :  { %v108_v16 = vadd.f32 %v106_v18, %v5063_v29  ;;  %v5120_v28 = vadd.f32 %v2443_v20, %v2421_v33 }
  0x40   :  { %v129_v25 = vadd.f32 1.0, %v107_v9  ;;  %v110_v26 = vmul.f32 %v109_v17, %v107_v9  ;;  %v5125_v36 = vmul.f32 %v5116_v24, %v107_v9  ;;  %v5129_v38 = vadd.f32 %v2442_v21, %v5070_v40 }
  0x41   :  { %v130_v34 = vadd.f32 1.0, %v108_v16  ;;  %v111_v35 = vmul.f32 %v109_v17, %v108_v16  ;;  %v2463_v37 = vadd.f32 1.0, %v5120_v28  ;;  %v2447_v33 = vmul.f32 %v5120_v28, %v109_v17 }
  0x42   :  { %v131_v32 = vmul.f32 0.5, %v129_v25  ;;  %v115_v29 = vadd.f32 %v113_v23, %v110_v26  ;;  %v2446_v45 = vmul.f32 %v5129_v38, %v109_v17  ;;  %v2462_v46 = vadd.f32 1.0, %v5129_v38 }
  0x43   :  { %v132_v43 = vmul.f32 0.5, %v130_v34  ;;  %v2465_v44 = vmul.f32 0.5, %v2463_v37  ;;  %v116_v47 = vadd.f32 %v114_v27, %v111_v35  ;;  %v121_v13 = vmul.f32 %v5116_v24, %v108_v16 }
  0x44   :  { %vm133_vm0 = vcmp.ge.f32.partialorder %v131_v32, 0.0  ;;  %v135_v39 = vfloor.f32 %v131_v32  ;;  %v137_v41 = vceil.f32 %v131_v32  ;;  %v2464_v56 = vmul.f32 0.5, %v2462_v46 }
  0x45   :  { %vm134_vm1 = vcmp.ge.f32.partialorder %v132_v43, 0.0  ;;  %v136_v50 = vfloor.f32 %v132_v43  ;;  %v138_v52 = vceil.f32 %v132_v43  ;;  %vm2467_vm3 = vcmp.ge.f32.partialorder %v2465_v44, 0.0 }
  0x46   :  { %v139_v49 = vsel %vm133_vm0, %v135_v39, %v137_v41  ;;  %v2469_v53 = vfloor.f32 %v2465_v44  ;;  %v2471_v54 = vceil.f32 %v2465_v44  ;;  %v118_v57 = vadd.f32 %v116_v47, %v5078_v48 }
  0x47   :  { %v141_v40 = vmul.f32 2.0, %v139_v49  ;;  %v140_v55 = vsel %vm134_vm1, %v136_v50, %v138_v52  ;;  %v2450_v59 = vadd.f32 %v2448_v30, %v2446_v45  ;;  %v117_v2 = vadd.f32 %v115_v29, %v5073_v42 }
  0x48   :  { %v142_v62 = vmul.f32 2.0, %v140_v55  ;;  %v2473_v0 = vsel %vm2467_vm3, %v2469_v53, %v2471_v54  ;;  %vm2466_vm5 = vcmp.ge.f32.partialorder %v2464_v56, 0.0  ;;  %v2468_v6 = vfloor.f32 %v2464_v56 }
  0x49   :  { %v143_v61 = vsub.f32 %v129_v25, %v141_v40  ;;  %v2475_v3 = vmul.f32 2.0, %v2473_v0  ;;  %v2470_v1 = vceil.f32 %v2464_v56  ;;  %v221_v11 = vadd.f32 1.0, %v118_v57 }
  0x4a   :  { %v144_v10 = vsub.f32 %v130_v34, %v142_v62  ;;  %v124_v48 = vmul.f32 %v5112_v19, %v118_v57  ;;  %v2452_v9 = vadd.f32 %v2450_v59, %v5085_v58  ;;  %v123_v23 = vmul.f32 %v5112_v19, %v117_v2 }
  0x4b   :  { %v5138_v8 = vadd.f32 -1.0, %v143_v61  ;;  %v2477_v5 = vsub.f32 %v2463_v37, %v2475_v3  ;;  %v2472_v15 = vsel %vm2466_vm5, %v2468_v6, %v2470_v1  ;;  %v223_v20 = vmul.f32 0.5, %v221_v11 }
  0x4c   :  { %v5145_v42 = vadd.f32 -1.0, %v144_v10  ;;  %v2474_v17 = vmul.f32 2.0, %v2472_v15  ;;  %v2451_v25 = vadd.f32 %v2449_v31, %v2447_v33  ;;  %v220_v26 = vadd.f32 1.0, %v117_v2 }
  0x4d   :  { %155 = vrot.lane.b32.xlu0 %v5138_v8, %s4995_s10  ;;  %v147_v18 = vrot.slane %v5138_v8, 7  ;;  %v5148_v22 = vadd.f32 -1.0, %v2477_v5  ;;  %vm225_vm6 = vcmp.ge.f32.partialorder %v223_v20, 0.0  ;;  %v227_v58 = vfloor.f32 %v223_v20 }
  0x4e   :  { %v2476_v16 = vsub.f32 %v2462_v46, %v2474_v17  ;;  %v148_v27 = vrot.slane %v5145_v42, 7  ;;  %v229_v30 = vceil.f32 %v223_v20  ;;  %v2453_v32 = vadd.f32 %v2451_v25, %v5081_v51 }
  0x4f   :  { %2489 = vrot.lane.b32.xlu1 %v5148_v22, %s4995_s10  ;;  %v2481_v21 = vrot.slane %v5148_v22, 7  ;;  %v222_v34 = vmul.f32 0.5, %v220_v26  ;;  %v2550_v29 = vadd.f32 1.0, %v2452_v9  ;;  %v2456_v51 = vmul.f32 %v2452_v9, %v5112_v19 }
  0x50   :  { %v5158_v35 = vadd.f32 -1.0, %v2476_v16  ;;  %v151_v31 = vsel %vm149_vm2, %v148_v27, %v147_v18  ;;  %v5164_v37 = vsel %vm149_vm2, %v147_v18, %v148_v27  ;;  %v231_v39 = vsel %vm225_vm6, %v227_v58, %v229_v30 }
  0x51   :  { %158 = vrot.lane.b32.xlu0 %v5145_v42, %s4995_s10  ;;  %v5168_v33 = vsel %vm53_vm4, 0.0, %v151_v31  ;;  %v2551_v41 = vadd.f32 1.0, %v2453_v32  ;;  %v233_v44 = vmul.f32 2.0, %v231_v39  ;;  %vm224_vm7 = vcmp.ge.f32.partialorder %v222_v34, 0.0 }
  0x52   :  { %v2480_v43 = vrot.slane %v5158_v35, 7  ;;  %v226_v45 = vfloor.f32 %v222_v34  ;;  %v228_v47 = vceil.f32 %v222_v34  ;;  %v2552_v49 = vmul.f32 0.5, %v2550_v29 }
  0x53   :  { %180 = vrot.lane.b32.xlu1 %v5164_v37, %s4995_s10  ;;  %v2553_v46 = vmul.f32 0.5, %v2551_v41  ;;  %v126_v50 = vadd.f32 %v124_v48, %v121_v13  ;;  %v235_v40 = vsub.f32 %v221_v11, %v233_v44  ;;  %v2457_v53 = vmul.f32 %v2453_v32, %v5112_v19 }
  0x54   :  { %v5178_v52 = vsel %vm149_vm2, %v2480_v43, %v2481_v21  ;;  %v2454_v54 = vmul.f32 %v5129_v38, %v5116_v24  ;;  %v2483_v57 = vsel %vm149_vm2, %v2481_v21, %v2480_v43  ;;  %v230_v61 = vsel %vm224_vm7, %v226_v45, %v228_v47 }
  0x55   :  { %2486 = vrot.lane.b32.xlu0 %v5158_v35, %s4995_s10  ;;  %vm2555_vm8 = vcmp.ge.f32.partialorder %v2553_v46, 0.0  ;;  %v2557_v55 = vfloor.f32 %v2553_v46  ;;  %v2559_v56 = vceil.f32 %v2553_v46  ;;  %v5185_v59 = vadd.f32 -1.0, %v235_v40 }
  0x56   :  { %vm2554_vm9 = vcmp.ge.f32.partialorder %v2552_v49, 0.0  ;;  %v2556_v62 = vfloor.f32 %v2552_v49  ;;  %v232_v19 = vmul.f32 2.0, %v230_v61  ;;  %v2558_v2 = vceil.f32 %v2552_v49 }
  0x57   :  { %2511 = vrot.lane.b32.xlu1 %v5178_v52, %s4995_s10  ;;  %v2561_v0 = vsel %vm2555_vm8, %v2557_v55, %v2559_v56  ;;  %v128_v38 = vadd.f32 %v126_v50, %v5095_v4  ;;  %v5195_v6 = vsel %vm53_vm4, 0.0, %v2483_v57  ;;  %v2458_v1 = vadd.f32 %v2456_v51, %v2454_v54 }
  0x58   :  { %v2563_v3 = vmul.f32 2.0, %v2561_v0  ;;  %v125_v10 = vadd.f32 %v123_v23, %v5125_v36  ;;  %v234_v11 = vsub.f32 %v220_v26, %v232_v19  ;;  %v2560_v13 = vsel %vm2554_vm9, %v2556_v62, %v2558_v2 }
  0x59   :  { %177 = vrot.lane.b32.xlu0 %v5168_v33, %s4995_s10  ;;  %v310_v5 = vadd.f32 1.0, %v128_v38  ;;  %v2455_v15 = vmul.f32 %v5120_v28, %v5116_v24  ;;  %v2562_v9 = vmul.f32 2.0, %v2560_v13  ;;  %v2460_v17 = vadd.f32 %v2458_v1, %v5108_v14 }
  0x5a   :  { %v2565_v48 = vsub.f32 %v2551_v41, %v2563_v3  ;;  %v127_v4 = vadd.f32 %v125_v10, %v5089_v60  ;;  %v5204_v18 = vadd.f32 -1.0, %v234_v11  ;;  %v239_v20 = vrot.slane %v5185_v59, 7 }
  0x5b   :  { %247 = vrot.lane.b32.xlu1 %v5185_v59, %s4995_s10  ;;  %v312_v36 = vmul.f32 0.5, %v310_v5  ;;  %v2459_v23 = vadd.f32 %v2457_v53, %v2455_v15  ;;  %v2564_v24 = vsub.f32 %v2550_v29, %v2562_v9  ;;  %v2638_v26 = vadd.f32 1.0, %v2460_v17 }
  0x5c   :  { %v5207_v25 = vadd.f32 -1.0, %v2565_v48  ;;  %v309_v28 = vadd.f32 1.0, %v127_v4  ;;  %v238_v60 = vrot.slane %v5204_v18, 7  ;;  %vm217_vm0 = vcmask 130048  }
  0x5d   :  { %2508 = vrot.lane.b32.xlu0 %v5195_v6, %s4995_s10  ;;  %vm314_vm10 = vcmp.ge.f32.partialorder %v312_v36, 0.0  ;;  %v316_v14 = vfloor.f32 %v312_v36  ;;  %v318_v16 = vceil.f32 %v312_v36  ;;  %v5212_v27 = vadd.f32 -1.0, %v2564_v24 }
  0x5e   :  { %v2461_v58 = vadd.f32 %v2459_v23, %v5099_v7  ;;  %v311_v21 = vmul.f32 0.5, %v309_v28  ;;  %v2569_v30 = vrot.slane %v5207_v25, 7  ;;  %v2640_v34 = vmul.f32 0.5, %v2638_v26 }
  0x5f   :  { %2577 = vrot.lane.b32.xlu1 %v5207_v25, %s4995_s10  ;;  %v320_v32 = vsel %vm314_vm10, %v316_v14, %v318_v16  ;;  %v5220_v31 = vsel %vm149_vm2, %v238_v60, %v239_v20  ;;  %v2568_v29 = vrot.slane %v5212_v27, 7  ;;  %v241_v44 = vsel %vm149_vm2, %v239_v20, %v238_v60 }
  0x60   :  { %v322_v39 = vmul.f32 2.0, %v320_v32  ;;  %v2639_v51 = vadd.f32 1.0, %v2461_v58  ;;  %vm313_vm11 = vcmp.ge.f32.partialorder %v311_v21, 0.0  ;;  %v315_v7 = vfloor.f32 %v311_v21 }
  0x61   :  { %244 = vrot.lane.b32.xlu0 %v5204_v18, %s4995_s10  ;;  %v317_v41 = vceil.f32 %v311_v21  ;;  %vm2642_vm12 = vcmp.ge.f32.partialorder %v2640_v34, 0.0  ;;  %v2644_v47 = vfloor.f32 %v2640_v34  ;;  %v2646_v49 = vceil.f32 %v2640_v34 }
  0x62   :  { %v2641_v43 = vmul.f32 0.5, %v2639_v51  ;;  %v324_v45 = vsub.f32 %v310_v5, %v322_v39  ;;  %v5231_v50 = vsel %vm149_vm2, %v2568_v29, %v2569_v30  ;;  %v5237_v54 = vsel %vm53_vm4, 0.0, %v241_v44 }
  0x63   :  { %269 = vrot.lane.b32.xlu1 %v5220_v31, %s4995_s10  ;;  %v319_v46 = vsel %vm313_vm11, %v315_v7, %v317_v41  ;;  %v2648_v56 = vsel %vm2642_vm12, %v2644_v47, %v2646_v49  ;;  %v2571_v61 = vsel %vm149_vm2, %v2569_v30, %v2568_v29  ;;  %vm2394_vm5 = vcmask 1041409  }
  0x64   :  { %vm2643_vm13 = vcmp.ge.f32.partialorder %v2641_v43, 0.0  ;;  %v2645_v40 = vfloor.f32 %v2641_v43  ;;  %v2647_v53 = vceil.f32 %v2641_v43  ;;  %v321_v55 = vmul.f32 2.0, %v319_v46 }
  0x65   :  { %2574 = vrot.lane.b32.xlu0 %v5212_v27, %s4995_s10  ;;  %v2650_v62 = vmul.f32 2.0, %v2648_v56  ;;  %v5243_v0 = vadd.f32 -1.0, %v324_v45  ;;  %v5251_v10 = vsel %vm53_vm4, 0.0, %v2571_v61  ;;  %vm2396_vm6 = vcmask 1045509  }
  0x66   :  { %v2649_v57 = vsel %vm2643_vm13, %v2645_v40, %v2647_v53  ;;  %v323_v2 = vsub.f32 %v309_v28, %v321_v55  ;;  %vm2399_vm9 = vcmask 1042434   ;;  %vm2401_vm10 = vcmask 1046534  }
  0x67   :  { %2599 = vrot.lane.b32.xlu1 %v5231_v50, %s4995_s10  ;;  %v2651_v19 = vmul.f32 2.0, %v2649_v57  ;;  %v2652_v38 = vsub.f32 %v2638_v26, %v2650_v62  ;;  %v328_v5 = vrot.slane %v5243_v0, 7 }
  0x68   :  { %v5247_v1 = vadd.f32 -1.0, %v323_v2 }
  0x69   :  { %266 = vrot.lane.b32.xlu0 %v5237_v54, %s4995_s10  ;;  %v2653_v3 = vsub.f32 %v2639_v51, %v2651_v19  ;;  %v5261_v15 = vadd.f32 -1.0, %v2652_v38 }
  0x6a   :  { %v327_v13 = vrot.slane %v5247_v1, 7 }
  0x6b   :  { %336 = vrot.lane.b32.xlu1 %v5243_v0, %s4995_s10  ;;  %v5255_v11 = vadd.f32 -1.0, %v2653_v3  ;;  %v2656_v9 = vrot.slane %v5261_v15, 7 }
  0x6c   :  { %v5267_v48 = vsel %vm149_vm2, %v327_v13, %v328_v5  ;;  %v330_v17 = vsel %vm149_vm2, %v328_v5, %v327_v13 }
  0x6d   :  { %2596 = vrot.lane.b32.xlu0 %v5251_v10, %s4995_s10  ;;  %v2657_v4 = vrot.slane %v5255_v11, 7  ;;  %v5285_v36 = vsel %vm53_vm4, 0.0, %v330_v17 }
  0x6f   :  { %2665 = vrot.lane.b32.xlu1 %v5255_v11, %s4995_s10  ;;  %v5279_v20 = vsel %vm149_vm2, %v2656_v9, %v2657_v4  ;;  %v2659_v23 = vsel %vm149_vm2, %v2657_v4, %v2656_v9 }
  0x70   :  { %v5295_v24 = vsel %vm53_vm4, 0.0, %v2659_v23 }
  0x71   :  { %333 = vrot.lane.b32.xlu0 %v5247_v1, %s4995_s10 }
  0x73   :  { %358 = vrot.lane.b32.xlu1 %v5267_v48, %s4995_s10 }
  0x75   :  { %2662 = vrot.lane.b32.xlu0 %v5261_v15, %s4995_s10 }
  0x77   :  { %2687 = vrot.lane.b32.xlu1 %v5279_v20, %s4995_s10 }
  0x79   :  { %355 = vrot.lane.b32.xlu0 %v5285_v36, %s4995_s10 }
  0x7d   :  { %2684 = vrot.lane.b32.xlu0 %v5295_v24, %s4995_s10 }
  0xbf   :  { %v156_v28 = vpop.permute.xlu0 %155 }
  0xc0   :  { %v157_v26 = vsel %vm154_vm14, %v156_v28, %v5138_v8 }
  0xc1   :  { %161 = vrot.lane.b32.xlu1 %v157_v26, %s4995_s10  ;;  %v2490_v60 = vpop.permute.xlu1 %2489 }
  0xc2   :  { %v2491_v12 = vsel %vm154_vm14, %v2490_v60, %v5148_v22 }
  0xc3   :  { %v159_v14 = vpop.permute.xlu0 %158 }
  0xc4   :  { %v160_v16 = vsel %vm154_vm14, %v159_v14, %v5145_v42 }
  0xc5   :  { %163 = vrot.lane.b32.xlu1 %v160_v16, %s4995_s10  ;;  %v181_v58 = vpop.permute.xlu1 %180 }
  0xc6   :  { %v182_v32 = vsel %vm154_vm14, %v181_v58, %v5164_v37 }
  0xc7   :  { %v2487_v21 = vpop.permute.xlu0 %2486 }
  0xc8   :  { %v2488_v30 = vsel %vm154_vm14, %v2487_v21, %v5158_v35 }
  0xc9   :  { %2492 = vrot.lane.b32.xlu0 %v2488_v30, %s4995_s10  ;;  %2494 = vrot.lane.b32.xlu1 %v2491_v12, %s4995_s10  ;;  %v2512_v34 = vpop.permute.xlu1 %2511 }
  0xca   :  { %v2513_v51 = vsel %vm154_vm14, %v2512_v34, %v5178_v52 }
  0xcb   :  { %v178_v29 = vpop.permute.xlu0 %177 }
  0xcc   :  { %v179_v39 = vsel %vm154_vm14, %v178_v29, %v5168_v33 }
  0xcd   :  { %183 = vrot.lane.b32.xlu0 %v179_v39, %s4995_s10  ;;  %185 = vrot.lane.b32.xlu1 %v182_v32, %s4995_s10  ;;  %v248_v7 = vpop.permute.xlu1 %247 }
  0xce   :  { %v249_v44 = vsel %vm154_vm14, %v248_v7, %v5185_v59 }
  0xcf   :  { %v2509_v41 = vpop.permute.xlu0 %2508 }
  0xd0   :  { %v2510_v43 = vsel %vm154_vm14, %v2509_v41, %v5195_v6 }
  0xd1   :  { %2516 = vrot.lane.b32.xlu1 %v2513_v51, %s4995_s10  ;;  %2514 = vrot.lane.b32.xlu0 %v2510_v43, %s4995_s10  ;;  %v2578_v45 = vpop.permute.xlu1 %2577 }
  0xd2   :  { %v2579_v49 = vsel %vm154_vm14, %v2578_v45, %v5207_v25 }
  0xd3   :  { %v245_v46 = vpop.permute.xlu0 %244 }
  0xd4   :  { %v246_v47 = vsel %vm154_vm14, %v245_v46, %v5204_v18 }
  0xd5   :  { %252 = vrot.lane.b32.xlu1 %v249_v44, %s4995_s10  ;;  %250 = vrot.lane.b32.xlu0 %v246_v47, %s4995_s10  ;;  %v270_v40 = vpop.permute.xlu1 %269 }
  0xd6   :  { %v271_v56 = vsel %vm154_vm14, %v270_v40, %v5220_v31 }
  0xd7   :  { %v2575_v53 = vpop.permute.xlu0 %2574 }
  0xd8   :  { %v2576_v55 = vsel %vm154_vm14, %v2575_v53, %v5212_v27 }
  0xd9   :  { %2582 = vrot.lane.b32.xlu1 %v2579_v49, %s4995_s10  ;;  %2580 = vrot.lane.b32.xlu0 %v2576_v55, %s4995_s10  ;;  %v2600_v57 = vpop.permute.xlu1 %2599 }
  0xda   :  { %v2601_v19 = vsel %vm154_vm14, %v2600_v57, %v5231_v50 }
  0xdb   :  { %v267_v61 = vpop.permute.xlu0 %266 }
  0xdc   :  { %v268_v62 = vsel %vm154_vm14, %v267_v61, %v5237_v54 }
  0xdd   :  { %274 = vrot.lane.b32.xlu1 %v271_v56, %s4995_s10  ;;  %272 = vrot.lane.b32.xlu0 %v268_v62, %s4995_s10  ;;  %v337_v2 = vpop.permute.xlu1 %336 }
  0xde   :  { %v338_v13 = vsel %vm154_vm14, %v337_v2, %v5243_v0  ;;  %v7790_v2 = vmov 0  }
  0xdf   :  { %v2597_v38 = vpop.permute.xlu0 %2596  ;;  %4782 = vset.pattern.permute.xlu1 %v7790_v2 }
  0xe0   :  { %v2598_v3 = vsel %vm154_vm14, %v2597_v38, %v5251_v10 }
  0xe1   :  { %2604 = vrot.lane.b32.xlu1 %v2601_v19, %s4995_s10  ;;  %2602 = vrot.lane.b32.xlu0 %v2598_v3, %s4995_s10  ;;  %v2666_v5 = vpop.permute.xlu1 %2665  ;;  %v7782_v19 = vmov 1  }
  0xe2   :  { %v2667_v17 = vsel %vm154_vm14, %v2666_v5, %v5255_v11  ;;  %4783 = vset.pattern.permute.xlu0 %v7782_v19 }
  0xe3   :  { %v334_v9 = vpop.permute.xlu0 %333 }
  0xe4   :  { %v335_v4 = vsel %vm154_vm14, %v334_v9, %v5247_v1 }
  0xe5   :  { %341 = vrot.lane.b32.xlu1 %v338_v13, %s4995_s10  ;;  %339 = vrot.lane.b32.xlu0 %v335_v4, %s4995_s10  ;;  %v359_v23 = vpop.permute.xlu1 %358 }
  0xe6   :  { %v360_v60 = vsel %vm154_vm14, %v359_v23, %v5267_v48 }
  0xe7   :  { %v2663_v28 = vpop.permute.xlu0 %2662 }
  0xe8   :  { %v2664_v26 = vsel %vm154_vm14, %v2663_v28, %v5261_v15 }
  0xe9   :  { %2670 = vrot.lane.b32.xlu1 %v2667_v17, %s4995_s10  ;;  %2668 = vrot.lane.b32.xlu0 %v2664_v26, %s4995_s10  ;;  %v2688_v14 = vpop.permute.xlu1 %2687 }
  0xea   :  { %v2689_v58 = vsel %vm154_vm14, %v2688_v14, %v5279_v20 }
  0xeb   :  { %v356_v16 = vpop.permute.xlu0 %355 }
  0xec   :  { %v357_v12 = vsel %vm154_vm14, %v356_v16, %v5285_v36 }
  0xed   :  { %363 = vrot.lane.b32.xlu1 %v360_v60, %s4995_s10  ;;  %361 = vrot.lane.b32.xlu0 %v357_v12, %s4995_s10 }
  0xef   :  { %v2685_v21 = vpop.permute.xlu0 %2684 }
  0xf0   :  { %v2686_v30 = vsel %vm154_vm14, %v2685_v21, %v5295_v24 }
  0xf1   :  { %2692 = vrot.lane.b32.xlu1 %v2689_v58, %s4995_s10  ;;  %2690 = vrot.lane.b32.xlu0 %v2686_v30, %s4995_s10 }
 0x133   :  { %v162_v32 = vpop.permute.xlu1 %161 }
 0x134   :  { %v165_v34 = vsel %vm154_vm14, %v162_v32, %v5138_v8 }
 0x135   :  { %169 = vrot.lane.b32.xlu0 %v165_v34, %s4996_s11 }
 0x137   :  { %v164_v29 = vpop.permute.xlu1 %163 }
 0x138   :  { %v166_v39 = vsel %vm154_vm14, %v164_v29, %v5145_v42 }
 0x139   :  { %171 = vrot.lane.b32.xlu1 %v166_v39, %s4996_s11 }
 0x13b   :  { %v2493_v51 = vpop.permute.xlu0 %2492  ;;  %v2495_v7 = vpop.permute.xlu1 %2494 }
 0x13c   :  { %v2496_v41 = vsel %vm154_vm14, %v2493_v51, %v5158_v35  ;;  %v2497_v43 = vsel %vm154_vm14, %v2495_v7, %v5148_v22 }
 0x13d   :  { %2500 = vrot.lane.b32.xlu0 %v2496_v41, %s4996_s11  ;;  %2502 = vrot.lane.b32.xlu1 %v2497_v43, %s4996_s11 }
 0x13f   :  { %v184_v44 = vpop.permute.xlu0 %183  ;;  %v186_v45 = vpop.permute.xlu1 %185 }
 0x140   :  { %v187_v46 = vsel %vm154_vm14, %v184_v44, %v5168_v33  ;;  %v188_v47 = vsel %vm154_vm14, %v186_v45, %v5164_v37 }
 0x141   :  { %191 = vrot.lane.b32.xlu0 %v187_v46, %s4996_s11  ;;  %193 = vrot.lane.b32.xlu1 %v188_v47, %s4996_s11  ;;  %v5446_v47 = vand.u32 127, %v50_v63 }
 0x143   :  { %v2517_v49 = vpop.permute.xlu1 %2516  ;;  %v2515_v40 = vpop.permute.xlu0 %2514  ;;  %vm57_vm15 = vcmp.eq.s32.totalorder %v5446_v47, 0 }
 0x144   :  { %v2519_v53 = vsel %vm154_vm14, %v2517_v49, %v5178_v52  ;;  %v2518_v55 = vsel %vm154_vm14, %v2515_v40, %v5195_v6 }
 0x145   :  { %2524 = vrot.lane.b32.xlu1 %v2519_v53, %s4996_s11  ;;  %2522 = vrot.lane.b32.xlu0 %v2518_v55, %s4996_s11 }
 0x147   :  { %v253_v56 = vpop.permute.xlu1 %252  ;;  %v251_v57 = vpop.permute.xlu0 %250 }
 0x148   :  { %v255_v61 = vsel %vm154_vm14, %v253_v56, %v5185_v59  ;;  %v254_v62 = vsel %vm154_vm14, %v251_v57, %v5204_v18 }
 0x149   :  { %260 = vrot.lane.b32.xlu1 %v255_v61, %s4996_s11  ;;  %258 = vrot.lane.b32.xlu0 %v254_v62, %s4996_s11 }
 0x14b   :  { %v2583_v38 = vpop.permute.xlu1 %2582  ;;  %v2581_v3 = vpop.permute.xlu0 %2580 }
 0x14c   :  { %v2585_v13 = vsel %vm154_vm14, %v2583_v38, %v5207_v25  ;;  %v2584_v5 = vsel %vm154_vm14, %v2581_v3, %v5212_v27 }
 0x14d   :  { %2590 = vrot.lane.b32.xlu1 %v2585_v13, %s4996_s11  ;;  %2588 = vrot.lane.b32.xlu0 %v2584_v5, %s4996_s11 }
 0x14f   :  { %v275_v9 = vpop.permute.xlu1 %274  ;;  %v273_v4 = vpop.permute.xlu0 %272 }
 0x150   :  { %v277_v17 = vsel %vm154_vm14, %v275_v9, %v5220_v31  ;;  %v276_v23 = vsel %vm154_vm14, %v273_v4, %v5237_v54 }
 0x151   :  { %282 = vrot.lane.b32.xlu1 %v277_v17, %s4996_s11  ;;  %280 = vrot.lane.b32.xlu0 %v276_v23, %s4996_s11 }
 0x153   :  { %v2605_v28 = vpop.permute.xlu1 %2604  ;;  %v2603_v26 = vpop.permute.xlu0 %2602 }
 0x154   :  { %v2607_v60 = vsel %vm154_vm14, %v2605_v28, %v5231_v50  ;;  %v2606_v14 = vsel %vm154_vm14, %v2603_v26, %v5251_v10 }
 0x155   :  { %2612 = vrot.lane.b32.xlu1 %v2607_v60, %s4996_s11  ;;  %2610 = vrot.lane.b32.xlu0 %v2606_v14, %s4996_s11 }
 0x157   :  { %v342_v16 = vpop.permute.xlu1 %341  ;;  %v340_v12 = vpop.permute.xlu0 %339 }
 0x158   :  { %v344_v58 = vsel %vm154_vm14, %v342_v16, %v5243_v0  ;;  %v343_v21 = vsel %vm154_vm14, %v340_v12, %v5247_v1 }
 0x159   :  { %349 = vrot.lane.b32.xlu1 %v344_v58, %s4996_s11  ;;  %347 = vrot.lane.b32.xlu0 %v343_v21, %s4996_s11 }
 0x15b   :  { %v2671_v30 = vpop.permute.xlu1 %2670  ;;  %v2669_v32 = vpop.permute.xlu0 %2668 }
 0x15c   :  { %v2673_v34 = vsel %vm154_vm14, %v2671_v30, %v5255_v11  ;;  %v2672_v29 = vsel %vm154_vm14, %v2669_v32, %v5261_v15 }
 0x15d   :  { %2678 = vrot.lane.b32.xlu1 %v2673_v34, %s4996_s11  ;;  %2676 = vrot.lane.b32.xlu0 %v2672_v29, %s4996_s11 }
 0x15f   :  { %v364_v39 = vpop.permute.xlu1 %363  ;;  %v362_v51 = vpop.permute.xlu0 %361 }
 0x160   :  { %v366_v7 = vsel %vm154_vm14, %v364_v39, %v5267_v48  ;;  %v365_v41 = vsel %vm154_vm14, %v362_v51, %v5285_v36 }
 0x161   :  { %371 = vrot.lane.b32.xlu1 %v366_v7, %s4996_s11  ;;  %369 = vrot.lane.b32.xlu0 %v365_v41, %s4996_s11 }
 0x163   :  { %v2693_v43 = vpop.permute.xlu1 %2692  ;;  %v2691_v44 = vpop.permute.xlu0 %2690 }
 0x164   :  { %v2695_v45 = vsel %vm154_vm14, %v2693_v43, %v5279_v20  ;;  %v2694_v46 = vsel %vm154_vm14, %v2691_v44, %v5295_v24 }
 0x165   :  { %2700 = vrot.lane.b32.xlu1 %v2695_v45, %s4996_s11  ;;  %2698 = vrot.lane.b32.xlu0 %v2694_v46, %s4996_s11 }
 0x1a7   :  { %v170_v49 = vpop.permute.xlu0 %169 }
 0x1a8   :  { %v175_v56 = vsel %vm57_vm15, 0.0, %v170_v49 }
 0x1a9   :  { %v199_v62 = vadd.f32 %v175_v56, %v5168_v33  ;;  %v203_v13 = vmin.f32 %v5168_v33, %v175_v56  ;;  %v207_v60 = vmax.f32 %v5168_v33, %v175_v56 }
 0x1ab   :  { %v172_v40 = vpop.permute.xlu1 %171 }
 0x1ac   :  { %v176_v57 = vsel %vm57_vm15, 0.0, %v172_v40 }
 0x1ad   :  { %v200_v63 = vadd.f32 %v176_v57, %v5164_v37  ;;  %v204_v17 = vmin.f32 %v5164_v37, %v176_v57  ;;  %v208_v14 = vmax.f32 %v5164_v37, %v176_v57 }
 0x1af   :  { %v2501_v53 = vpop.permute.xlu0 %2500  ;;  %v2503_v55 = vpop.permute.xlu1 %2502 }
 0x1b0   :  { %v2506_v61 = vsel %vm57_vm15, 0.0, %v2501_v53  ;;  %v2507_v5 = vsel %vm57_vm15, 0.0, %v2503_v55 }
 0x1b1   :  { %v2530_v23 = vadd.f32 %v2506_v61, %v5195_v6  ;;  %v2534_v16 = vmin.f32 %v5195_v6, %v2506_v61  ;;  %v2531_v12 = vadd.f32 %v2507_v5, %v5178_v52  ;;  %v2535_v34 = vmin.f32 %v5178_v52, %v2507_v5 }
 0x1b2   :  { %v2538_v41 = vmax.f32 %v5195_v6, %v2506_v61  ;;  %v2539_v43 = vmax.f32 %v5178_v52, %v2507_v5 }
 0x1b3   :  { %v192_v38 = vpop.permute.xlu0 %191  ;;  %v194_v3 = vpop.permute.xlu1 %193 }
 0x1b4   :  { %v197_v9 = vsel %vm57_vm15, 0.0, %v192_v38  ;;  %v198_v4 = vsel %vm57_vm15, 0.0, %v194_v3 }
 0x1b5   :  { %v201_v28 = vsub.f32 %v199_v62, %v197_v9  ;;  %v202_v26 = vsub.f32 %v200_v63, %v198_v4 }
 0x1b7   :  { %v205_v58 = vmax.f32 %v201_v28, %v203_v13  ;;  %v206_v21 = vmax.f32 %v202_v26, %v204_v17  ;;  %v2525_v30 = vpop.permute.xlu1 %2524  ;;  %v2523_v32 = vpop.permute.xlu0 %2522 }
 0x1b8   :  { %v2529_v29 = vsel %vm57_vm15, 0.0, %v2525_v30  ;;  %v2528_v39 = vsel %vm57_vm15, 0.0, %v2523_v32 }
 0x1b9   :  { %v209_v51 = vmin.f32 %v205_v58, %v207_v60  ;;  %v210_v33 = vmin.f32 %v206_v21, %v208_v14  ;;  %v2533_v7 = vsub.f32 %v2531_v12, %v2529_v29  ;;  %v2532_v37 = vsub.f32 %v2530_v23, %v2528_v39 }
 0x1bb   :  { %v211_v44 = vsub.f32 %v5138_v8, %v209_v51  ;;  %v212_v45 = vsub.f32 %v5145_v42, %v210_v33  ;;  %v2537_v46 = vmax.f32 %v2533_v7, %v2535_v34  ;;  %v261_v49 = vpop.permute.xlu1 %260  ;;  %v2536_v40 = vmax.f32 %v2532_v37, %v2534_v16  ;;  %v259_v53 = vpop.permute.xlu0 %258 }
 0x1bc   :  { %v265_v62 = vsel %vm57_vm15, 0.0, %v261_v49  ;;  %v264_v6 = vsel %vm57_vm15, 0.0, %v259_v53 }
 0x1bd   :  { %v213_v55 = vadd.f32 1.0, %v211_v44  ;;  %v214_v56 = vadd.f32 1.0, %v212_v45  ;;  %v2541_v57 = vmin.f32 %v2537_v46, %v2539_v43  ;;  %v2540_v63 = vmin.f32 %v2536_v40, %v2538_v41 }
 0x1be   :  { %v289_v13 = vadd.f32 %v265_v62, %v5220_v31  ;;  %v288_v5 = vadd.f32 %v264_v6, %v5237_v54  ;;  %v293_v23 = vmin.f32 %v5220_v31, %v265_v62  ;;  %v292_v28 = vmin.f32 %v5237_v54, %v264_v6 }
 0x1bf   :  { %v215_v52 = vmul.f32 127.5, %v213_v55  ;;  %v216_v61 = vmul.f32 127.5, %v214_v56  ;;  %v2543_v8 = vsub.f32 %v5148_v22, %v2541_v57  ;;  %v2591_v42 = vpop.permute.xlu1 %2590  ;;  %v2589_v38 = vpop.permute.xlu0 %2588  ;;  %v2542_v3 = vsub.f32 %v5158_v35, %v2540_v63 }
 0x1c0   :  { %v2595_v9 = vsel %vm57_vm15, 0.0, %v2591_v42  ;;  %v2594_v35 = vsel %vm57_vm15, 0.0, %v2589_v38  ;;  %v297_v60 = vmax.f32 %v5220_v31, %v265_v62  ;;  %v296_v16 = vmax.f32 %v5237_v54, %v264_v6 }
 0x1c1   :  { %218 = vst.msk [vmem:[#allocation2] sm:$0xff] %vm217_vm0, %v215_v52  ;;  %219 = vst.msk [vmem:[#allocation2 + $0x8] sm:$0xff] %vm217_vm0, %v216_v61  ;;  %v2544_v4 = vadd.f32 1.0, %v2542_v3  ;;  %v2545_v17 = vadd.f32 1.0, %v2543_v8  ;;  %v2619_v58 = vadd.f32 %v2595_v9, %v5231_v50  ;;  %v2618_v34 = vadd.f32 %v2594_v35, %v5251_v10 }
 0x1c2   :  { %v2623_v39 = vmin.f32 %v5231_v50, %v2595_v9  ;;  %v2627_v41 = vmax.f32 %v5231_v50, %v2595_v9  ;;  %v2622_v44 = vmin.f32 %v5251_v10, %v2594_v35  ;;  %v2626_v50 = vmax.f32 %v5251_v10, %v2594_v35 }
 0x1c3   :  { %v283_v22 = vpop.permute.xlu1 %282  ;;  %v281_v26 = vpop.permute.xlu0 %280  ;;  %v2546_v21 = vmul.f32 127.5, %v2544_v4  ;;  %v2547_v29 = vmul.f32 127.5, %v2545_v17  ;;  %v7780_v52 = vmov 3   ;;  %v7788_v61 = vmov 2  }
 0x1c4   :  { %v287_v14 = vsel %vm57_vm15, 0.0, %v283_v22  ;;  %v286_v12 = vsel %vm57_vm15, 0.0, %v281_v26  ;;  %v7786_v26 = vmov 4  }
 0x1c5   :  { %v291_v30 = vsub.f32 %v289_v13, %v287_v14  ;;  %v290_v32 = vsub.f32 %v288_v5, %v286_v12 }
 0x1c7   :  { %v295_v51 = vmax.f32 %v291_v30, %v293_v23  ;;  %v2613_v31 = vpop.permute.xlu1 %2612  ;;  %v294_v33 = vmax.f32 %v290_v32, %v292_v28  ;;  %v2611_v7 = vpop.permute.xlu0 %2610 }
 0x1c8   :  { %v5504_v37 = vld [vmem:[#allocation2] sm:$0xff]  ;;  %v5506_v54 = vld [vmem:[#allocation2 + $0x8] sm:$0xff]  ;;  %v2617_v43 = vsel %vm57_vm15, 0.0, %v2613_v31  ;;  %v2616_v45 = vsel %vm57_vm15, 0.0, %v2611_v7  ;;  %v7802_v7 = vmov 6  }
 0x1c9   :  { %2549 = vst.msk [vmem:[#allocation2 + $0x8] sm:$0xff] %vm217_vm0, %v2547_v29  ;;  %535 = vperm.xlu0 %4783, %v5506_v54   ;;  %411 = vperm.xlu1 %4782, %v5506_v54   ;;  %2548 = vst.msk [vmem:[#allocation2] sm:$0xff] %vm217_vm0, %v2546_v21  ;;  %v299_v46 = vmin.f32 %v295_v51, %v297_v60  ;;  %v2621_v49 = vsub.f32 %v2619_v58, %v2617_v43 }
 0x1ca   :  { %v298_v40 = vmin.f32 %v294_v33, %v296_v16  ;;  %v2620_v53 = vsub.f32 %v2618_v34, %v2616_v45 }
 0x1cb   :  { %v301_v55 = vsub.f32 %v5185_v59, %v299_v46  ;;  %v2625_v56 = vmax.f32 %v2621_v49, %v2623_v39  ;;  %v350_v57 = vpop.permute.xlu1 %349  ;;  %v348_v63 = vpop.permute.xlu0 %347 }
 0x1cc   :  { %v300_v62 = vsub.f32 %v5204_v18, %v298_v40  ;;  %v2624_v6 = vmax.f32 %v2620_v53, %v2622_v44  ;;  %v354_v59 = vsel %vm57_vm15, 0.0, %v350_v57  ;;  %v353_v18 = vsel %vm57_vm15, 0.0, %v348_v63 }
 0x1cd   :  { %4785 = vset.pattern.permute.xlu0 %v7780_v52  ;;  %4784 = vset.pattern.permute.xlu1 %v7788_v61  ;;  %v303_v8 = vadd.f32 1.0, %v301_v55  ;;  %v2629_v42 = vmin.f32 %v2625_v56, %v2627_v41  ;;  %v378_v22 = vadd.f32 %v354_v59, %v5267_v48  ;;  %v377_v35 = vadd.f32 %v353_v18, %v5285_v36 }
 0x1ce   :  { %775 = vperm.xlu0 %4785, %v5506_v54   ;;  %655 = vperm.xlu1 %4784, %v5506_v54   ;;  %v302_v10 = vadd.f32 1.0, %v300_v62  ;;  %v2628_v38 = vmin.f32 %v2624_v6, %v2626_v50  ;;  %v382_v60 = vmin.f32 %v5267_v48, %v354_v59  ;;  %v386_v14 = vmax.f32 %v5267_v48, %v354_v59 }
 0x1cf   :  { %v305_v3 = vmul.f32 127.5, %v303_v8  ;;  %v2631_v13 = vsub.f32 %v5207_v25, %v2629_v42  ;;  %v2679_v5 = vpop.permute.xlu1 %2678  ;;  %v2677_v9 = vpop.permute.xlu0 %2676  ;;  %v381_v12 = vmin.f32 %v5285_v36, %v353_v18  ;;  %v385_v32 = vmax.f32 %v5285_v36, %v353_v18 }
 0x1d0   :  { %v304_v4 = vmul.f32 127.5, %v302_v10  ;;  %v2630_v17 = vsub.f32 %v5212_v27, %v2628_v38  ;;  %v2683_v28 = vsel %vm57_vm15, 0.0, %v2679_v5  ;;  %v2682_v27 = vsel %vm57_vm15, 0.0, %v2677_v9 }
 0x1d1   :  { %308 = vst.msk [vmem:[#allocation2 + $0x18] sm:$0xff] %vm217_vm0, %v305_v3  ;;  %v2633_v23 = vadd.f32 1.0, %v2631_v13  ;;  %v2707_v21 = vadd.f32 %v2683_v28, %v5279_v20  ;;  %v2706_v51 = vadd.f32 %v2682_v27, %v5295_v24  ;;  %v2711_v48 = vmin.f32 %v5279_v20, %v2683_v28 }
 0x1d2   :  { %4792 = vset.pattern.permute.xlu0 %v7790_v2  ;;  %4786 = vset.pattern.permute.xlu1 %v7786_v26  ;;  %307 = vst.msk [vmem:[#allocation2 + $0x10] sm:$0xff] %vm217_vm0, %v304_v4  ;;  %v2632_v25 = vadd.f32 1.0, %v2630_v17  ;;  %v2710_v36 = vmin.f32 %v5295_v24, %v2682_v27  ;;  %v2715_v49 = vmax.f32 %v5279_v20, %v2683_v28  ;;  %v7792_v5 = vmov 10  }
 0x1d3   :  { %406 = vperm.xlu0 %4792, %v5504_v37   ;;  %895 = vperm.xlu1 %4786, %v5506_v54   ;;  %v372_v16 = vpop.permute.xlu1 %371  ;;  %v370_v58 = vpop.permute.xlu0 %369  ;;  %v2635_v29 = vmul.f32 127.5, %v2633_v23  ;;  %v2714_v50 = vmax.f32 %v5295_v24, %v2682_v27  ;;  %v7810_v24 = vmov 8   ;;  %v7806_v28 = vmov 14   ;;  %v5615_v27 = vld [vmem:[#allocation2 + $0x8] sm:$0xff] }
 0x1d4   :  { %v376_v30 = vsel %vm57_vm15, 0.0, %v372_v16  ;;  %v375_v34 = vsel %vm57_vm15, 0.0, %v370_v58  ;;  %v2634_v33 = vmul.f32 127.5, %v2632_v25  ;;  %v7784_v25 = vmov 7   ;;  %v5625_v16 = vld [vmem:[#allocation2] sm:$0xff] }
 0x1d5   :  { %v380_v39 = vsub.f32 %v378_v22, %v376_v30  ;;  %v379_v31 = vsub.f32 %v377_v35, %v375_v34  ;;  %v7796_v35 = vmov 5   ;;  %v7808_v58 = vmov 15  }
 0x1d6   :  { %v58_v30 = vadd.s32 128, %v5446_v47 }
 0x1d7   :  { %4794 = vset.pattern.permute.xlu0 %v7788_v61  ;;  %4787 = vset.pattern.permute.xlu1 %v7802_v7  ;;  %v384_v41 = vmax.f32 %v380_v39, %v382_v60  ;;  %v2701_v43 = vpop.permute.xlu1 %2700  ;;  %v383_v44 = vmax.f32 %v379_v31, %v381_v12  ;;  %v2699_v45 = vpop.permute.xlu0 %2698  ;;  %v7794_v60 = vmov 9   ;;  %v7804_v12 = vmov 13  }
 0x1d8   :  { %v5557_v46 = vld [vmem:[#allocation2 + $0x18] sm:$0xff]  ;;  %651 = vperm.xlu0 %4794, %v5504_v37   ;;  %1135 = vperm.xlu1 %4787, %v5506_v54   ;;  %v2705_v40 = vsel %vm57_vm15, 0.0, %v2701_v43  ;;  %v2704_v53 = vsel %vm57_vm15, 0.0, %v2699_v45  ;;  %v5681_v39 = vcvt.s32.f32 %v58_v30 }
 0x1d9   :  { %2637 = vst.msk [vmem:[#allocation2 + $0x18] sm:$0xff] %vm217_vm0, %v2635_v29  ;;  %v388_v55 = vmin.f32 %v384_v41, %v386_v14  ;;  %v2709_v56 = vsub.f32 %v2707_v21, %v2705_v40  ;;  %v5568_v57 = vld [vmem:[#allocation2 + $0x10] sm:$0xff]  ;;  %v387_v62 = vmin.f32 %v383_v44, %v385_v32  ;;  %v2708_v63 = vsub.f32 %v2706_v51, %v2704_v53 }
 0x1da   :  { %2636 = vst.msk [vmem:[#allocation2 + $0x10] sm:$0xff] %vm217_vm0, %v2634_v33  ;;  %v7798_v14 = vmov 11   ;;  %v5679_v32 = vcvt.s32.f32 %v5446_v47 }
 0x1db   :  { %v390_v20 = vsub.f32 %v5243_v0, %v388_v55  ;;  %v2713_v6 = vmax.f32 %v2709_v56, %v2711_v48  ;;  %v389_v8 = vsub.f32 %v5247_v1, %v387_v62  ;;  %v2712_v42 = vmax.f32 %v2708_v63, %v2710_v36 }
 0x1dc   :  { %4796 = vset.pattern.permute.xlu0 %v7786_v26  ;;  %4788 = vset.pattern.permute.xlu1 %v7810_v24 }
 0x1dd   :  { %891 = vperm.xlu0 %4796, %v5504_v37   ;;  %1375 = vperm.xlu1 %4788, %v5506_v54   ;;  %v392_v59 = vadd.f32 1.0, %v390_v20  ;;  %v2717_v10 = vmin.f32 %v2713_v6, %v2715_v49  ;;  %v391_v38 = vadd.f32 1.0, %v389_v8  ;;  %v2716_v18 = vmin.f32 %v2712_v42, %v2714_v50 }
 0x1df   :  { %v394_v3 = vmul.f32 127.5, %v392_v59  ;;  %v2719_v0 = vsub.f32 %v5255_v11, %v2717_v10  ;;  %v393_v13 = vmul.f32 127.5, %v391_v38  ;;  %v2718_v1 = vsub.f32 %v5261_v15, %v2716_v18 }
 0x1e0   :  { %v7800_v15 = vmov 12   ;;  %v5667_v21 = vld [vmem:[#allocation2 + $0x18] sm:$0xff] }
 0x1e1   :  { %4798 = vset.pattern.permute.xlu0 %v7802_v7  ;;  %4789 = vset.pattern.permute.xlu1 %v7792_v5  ;;  %397 = vst.msk [vmem:[#allocation2 + $0x28] sm:$0xff] %vm217_vm0, %v394_v3  ;;  %v2721_v9 = vadd.f32 1.0, %v2719_v0  ;;  %396 = vst.msk [vmem:[#allocation2 + $0x20] sm:$0xff] %vm217_vm0, %v393_v13  ;;  %v2720_v4 = vadd.f32 1.0, %v2718_v1 }
 0x1e2   :  { %1131 = vperm.xlu0 %4798, %v5504_v37   ;;  %1615 = vperm.xlu1 %4789, %v5506_v54  }
 0x1e3   :  { %v2723_v17 = vmul.f32 127.5, %v2721_v9  ;;  %v2722_v11 = vmul.f32 127.5, %v2720_v4 }
 0x1e6   :  { %4801 = vset.pattern.permute.xlu0 %v7792_v5  ;;  %4790 = vset.pattern.permute.xlu1 %v7800_v15 }
 0x1e7   :  { %1611 = vperm.xlu0 %4801, %v5504_v37   ;;  %1855 = vperm.xlu1 %4790, %v5506_v54  }
 0x1e8   :  { %v5589_v23 = vld [vmem:[#allocation2 + $0x28] sm:$0xff]  ;;  %v5591_v22 = vld [vmem:[#allocation2 + $0x20] sm:$0xff] }
 0x1e9   :  { %2725 = vst.msk [vmem:[#allocation2 + $0x28] sm:$0xff] %vm217_vm0, %v2723_v17  ;;  %2724 = vst.msk [vmem:[#allocation2 + $0x20] sm:$0xff] %vm217_vm0, %v2722_v11 }
 0x1eb   :  { %4805 = vset.pattern.permute.xlu0 %v7790_v2  ;;  %4791 = vset.pattern.permute.xlu1 %v7806_v28 }
 0x1ec   :  { %2095 = vperm.xlu1 %4791, %v5506_v54   ;;  %421 = vperm.xlu0 %4805, %v5557_v46  }
 0x1f0   :  { %4793 = vset.pattern.permute.xlu1 %v7782_v19  ;;  %4807 = vset.pattern.permute.xlu0 %v7788_v61  ;;  %v5691_v33 = vld [vmem:[#allocation2 + $0x28] sm:$0xff] }
 0x1f1   :  { %531 = vperm.xlu1 %4793, %v5504_v37   ;;  %663 = vperm.xlu0 %4807, %v5557_v46  }
 0x1f5   :  { %4795 = vset.pattern.permute.xlu1 %v7780_v52  ;;  %4809 = vset.pattern.permute.xlu0 %v7786_v26 }
 0x1f6   :  { %771 = vperm.xlu1 %4795, %v5504_v37   ;;  %903 = vperm.xlu0 %4809, %v5557_v46  }
 0x1fa   :  { %4797 = vset.pattern.permute.xlu1 %v7796_v35  ;;  %4811 = vset.pattern.permute.xlu0 %v7802_v7 }
 0x1fb   :  { %1011 = vperm.xlu1 %4797, %v5504_v37   ;;  %1143 = vperm.xlu0 %4811, %v5557_v46  }
 0x1ff   :  { %4799 = vset.pattern.permute.xlu1 %v7784_v25  ;;  %4814 = vset.pattern.permute.xlu0 %v7792_v5 }
 0x200   :  { %1251 = vperm.xlu1 %4799, %v5504_v37   ;;  %1623 = vperm.xlu0 %4814, %v5557_v46  }
 0x204   :  { %4800 = vset.pattern.permute.xlu1 %v7794_v60  ;;  %4835 = vset.pattern.permute.xlu0 %v7782_v19 }
 0x205   :  { %1491 = vperm.xlu1 %4800, %v5504_v37   ;;  %2863 = vperm.xlu0 %4835, %v5615_v27  }
 0x209   :  { %4802 = vset.pattern.permute.xlu1 %v7798_v14  ;;  %4837 = vset.pattern.permute.xlu0 %v7780_v52 }
 0x20a   :  { %1731 = vperm.xlu1 %4802, %v5504_v37   ;;  %3103 = vperm.xlu0 %4837, %v5615_v27  }
 0x20e   :  { %4803 = vset.pattern.permute.xlu1 %v7804_v12  ;;  %4839 = vset.pattern.permute.xlu0 %v7790_v2 }
 0x20f   :  { %1971 = vperm.xlu1 %4803, %v5504_v37   ;;  %2734 = vperm.xlu0 %4839, %v5625_v16  }
 0x213   :  { %4804 = vset.pattern.permute.xlu1 %v7808_v58  ;;  %4841 = vset.pattern.permute.xlu0 %v7788_v61 }
 0x214   :  { %2211 = vperm.xlu1 %4804, %v5504_v37   ;;  %2979 = vperm.xlu0 %4841, %v5625_v16  }
 0x218   :  { %4806 = vset.pattern.permute.xlu1 %v7782_v19  ;;  %4843 = vset.pattern.permute.xlu0 %v7786_v26 }
 0x219   :  { %543 = vperm.xlu1 %4806, %v5557_v46   ;;  %3219 = vperm.xlu0 %4843, %v5625_v16  }
 0x21d   :  { %4808 = vset.pattern.permute.xlu1 %v7780_v52  ;;  %4845 = vset.pattern.permute.xlu0 %v7790_v2 }
 0x21e   :  { %783 = vperm.xlu1 %4808, %v5557_v46   ;;  %431 = vperm.xlu0 %4845, %v5589_v23  }
 0x222   :  { %4810 = vset.pattern.permute.xlu1 %v7796_v35  ;;  %4847 = vset.pattern.permute.xlu0 %v7788_v61 }
 0x223   :  { %1023 = vperm.xlu1 %4810, %v5557_v46   ;;  %671 = vperm.xlu0 %4847, %v5589_v23  }
 0x227   :  { %4812 = vset.pattern.permute.xlu1 %v7784_v25  ;;  %4849 = vset.pattern.permute.xlu0 %v7786_v26 }
 0x228   :  { %1263 = vperm.xlu1 %4812, %v5557_v46   ;;  %911 = vperm.xlu0 %4849, %v5589_v23  }
 0x22c   :  { %4813 = vset.pattern.permute.xlu1 %v7794_v60  ;;  %4851 = vset.pattern.permute.xlu0 %v7802_v7 }
 0x22d   :  { %1503 = vperm.xlu1 %4813, %v5557_v46   ;;  %1151 = vperm.xlu0 %4851, %v5589_v23  }
 0x231   :  { %4815 = vset.pattern.permute.xlu1 %v7798_v14  ;;  %4854 = vset.pattern.permute.xlu0 %v7792_v5 }
 0x232   :  { %1743 = vperm.xlu1 %4815, %v5557_v46   ;;  %1631 = vperm.xlu0 %4854, %v5589_v23  }
 0x236   :  { %4816 = vset.pattern.permute.xlu1 %v7804_v12  ;;  %4859 = vset.pattern.permute.xlu0 %v7782_v19 }
 0x237   :  { %1983 = vperm.xlu1 %4816, %v5557_v46   ;;  %547 = vperm.xlu0 %4859, %v5591_v22  }
 0x23b   :  { %4817 = vset.pattern.permute.xlu1 %v7808_v58  ;;  %4861 = vset.pattern.permute.xlu0 %v7780_v52 }
 0x23c   :  { %2223 = vperm.xlu1 %4817, %v5557_v46   ;;  %787 = vperm.xlu0 %4861, %v5591_v22  }
 0x240   :  { %4818 = vset.pattern.permute.xlu1 %v7790_v2  ;;  %4868 = vset.pattern.permute.xlu0 %v7790_v2 }
 0x241   :  { %416 = vperm.xlu1 %4818, %v5568_v57   ;;  %2749 = vperm.xlu0 %4868, %v5667_v21  }
 0x245   :  { %4819 = vset.pattern.permute.xlu1 %v7782_v19  ;;  %4870 = vset.pattern.permute.xlu0 %v7788_v61 }
 0x246   :  { %539 = vperm.xlu1 %4819, %v5568_v57   ;;  %2991 = vperm.xlu0 %4870, %v5667_v21  }
 0x248   :  { %v536_v34 = vpop.permute.xlu0 %535  ;;  %v412_v29 = vpop.permute.xlu1 %411 }
 0x249   :  { %v436_v51 = vsub.f32 %v412_v29, %v5679_v32  ;;  %v437_v47 = vsub.f32 %v412_v29, %v5681_v39  ;;  %v556_v43 = vsub.f32 %v536_v34, %v5679_v32  ;;  %v557_v50 = vsub.f32 %v536_v34, %v5681_v39 }
 0x24a   :  { %4820 = vset.pattern.permute.xlu1 %v7788_v61  ;;  %4872 = vset.pattern.permute.xlu0 %v7786_v26 }
 0x24b   :  { %659 = vperm.xlu1 %4820, %v5568_v57   ;;  %3231 = vperm.xlu0 %4872, %v5667_v21   ;;  %v448_v41 = vand.u32 2147483647, %v436_v51  ;;  %v449_v36 = vand.u32 2147483647, %v437_v47  ;;  %v5706_v63 = vand.u32 2147483647, %v556_v43 }
 0x24c   :  { %v5710_v18 = vand.u32 2147483647, %v557_v50 }
 0x24d   :  { %v5688_v31 = vpop.permute.xlu0 %775  ;;  %v656_v48 = vpop.permute.xlu1 %655  ;;  %v460_v53 = vsub.f32 1.0, %v448_v41  ;;  %v461_v20 = vsub.f32 1.0, %v449_v36  ;;  %v580_v47 = vsub.f32 1.0, %v5706_v63 }
 0x24e   :  { %v676_v55 = vsub.f32 %v656_v48, %v5679_v32  ;;  %v677_v6 = vsub.f32 %v656_v48, %v5681_v39 }
 0x24f   :  { %4821 = vset.pattern.permute.xlu1 %v7780_v52  ;;  %4878 = vset.pattern.permute.xlu0 %v7790_v2  ;;  %v472_v3 = vmax.f32 %v460_v53, 0.0  ;;  %v473_v11 = vmax.f32 %v461_v20, 0.0  ;;  %v5723_v53 = vld [vmem:[#allocation2 + $0x20] sm:$0xff]  ;;  %v796_v20 = vsub.f32 %v5688_v31, %v5679_v32 }
 0x250   :  { %779 = vperm.xlu1 %4821, %v5568_v57   ;;  %2759 = vperm.xlu0 %4878, %v5691_v33   ;;  %v688_v1 = vand.u32 2147483647, %v676_v55  ;;  %v689_v29 = vand.u32 2147483647, %v677_v6  ;;  %v581_v55 = vsub.f32 1.0, %v5710_v18 }
 0x252   :  { %v407_v44 = vpop.permute.xlu0 %406  ;;  %v896_v45 = vpop.permute.xlu1 %895  ;;  %v701_v6 = vsub.f32 1.0, %v689_v29  ;;  %v5739_v29 = vand.u32 2147483647, %v796_v20 }
 0x253   :  { %v434_v49 = vsub.f32 %v407_v44, %v5679_v32  ;;  %v435_v40 = vsub.f32 %v407_v44, %v5681_v39  ;;  %v916_v59 = vsub.f32 %v896_v45, %v5679_v32  ;;  %v917_v17 = vsub.f32 %v896_v45, %v5681_v39 }
 0x254   :  { %4822 = vset.pattern.permute.xlu1 %v7786_v26  ;;  %4880 = vset.pattern.permute.xlu0 %v7788_v61  ;;  %v700_v45 = vsub.f32 1.0, %v688_v1 }
 0x255   :  { %v446_v56 = vand.u32 2147483647, %v434_v49  ;;  %v447_v62 = vand.u32 2147483647, %v435_v40  ;;  %899 = vperm.xlu1 %4822, %v5568_v57   ;;  %2999 = vperm.xlu0 %4880, %v5691_v33   ;;  %v928_v48 = vand.u32 2147483647, %v916_v59 }
 0x256   :  { %v929_v49 = vand.u32 2147483647, %v917_v17 }
 0x257   :  { %v458_v8 = vsub.f32 1.0, %v446_v56  ;;  %v459_v42 = vsub.f32 1.0, %v447_v62  ;;  %v652_v10 = vpop.permute.xlu0 %651  ;;  %v1136_v38 = vpop.permute.xlu1 %1135 }
 0x258   :  { %v674_v0 = vsub.f32 %v652_v10, %v5679_v32  ;;  %v675_v13 = vsub.f32 %v652_v10, %v5681_v39  ;;  %v1156_v50 = vsub.f32 %v1136_v38, %v5679_v32  ;;  %v1157_v56 = vsub.f32 %v1136_v38, %v5681_v39 }
 0x259   :  { %v470_v9 = vmax.f32 %v458_v8, 0.0  ;;  %v471_v4 = vmax.f32 %v459_v42, 0.0  ;;  %4823 = vset.pattern.permute.xlu1 %v7796_v35  ;;  %4882 = vset.pattern.permute.xlu0 %v7786_v26  ;;  %v940_v42 = vsub.f32 1.0, %v928_v48  ;;  %v713_v48 = vmax.f32 %v701_v6, 0.0 }
 0x25a   :  { %v686_v30 = vand.u32 2147483647, %v674_v0  ;;  %v687_v34 = vand.u32 2147483647, %v675_v13  ;;  %1019 = vperm.xlu1 %4823, %v5568_v57   ;;  %3239 = vperm.xlu0 %4882, %v5691_v33   ;;  %v712_v0 = vmax.f32 %v700_v45, 0.0  ;;  %v941_v13 = vsub.f32 1.0, %v929_v49 }
 0x25b   :  { %v482_v51 = vadd.f32 %v472_v3, %v470_v9  ;;  %v489_v41 = vadd.f32 %v473_v11, %v471_v4  ;;  %v797_v3 = vsub.f32 %v5688_v31, %v5681_v39  ;;  %v1168_v17 = vand.u32 2147483647, %v1156_v50 }
 0x25c   :  { %v698_v43 = vsub.f32 1.0, %v686_v30  ;;  %v892_v36 = vpop.permute.xlu0 %891  ;;  %v5720_v44 = vpop.permute.xlu1 %1375  ;;  %v699_v40 = vsub.f32 1.0, %v687_v34  ;;  %v1169_v11 = vand.u32 2147483647, %v1157_v56  ;;  %v953_v50 = vmax.f32 %v941_v13, 0.0 }
 0x25d   :  { %v914_v62 = vsub.f32 %v892_v36, %v5679_v32  ;;  %v915_v63 = vsub.f32 %v892_v36, %v5681_v39  ;;  %v483_v8 = vrot.slane %v482_v51, 4  ;;  %v490_v59 = vrot.slane %v489_v41, 4 }
 0x25e   :  { %4824 = vset.pattern.permute.xlu1 %v7802_v7  ;;  %4884 = vset.pattern.permute.xlu0 %v7782_v19  ;;  %v710_v10 = vmax.f32 %v698_v43, 0.0  ;;  %v711_v1 = vmax.f32 %v699_v40, 0.0  ;;  %v952_v43 = vmax.f32 %v940_v42, 0.0  ;;  %v5751_v42 = vand.u32 2147483647, %v797_v3 }
 0x25f   :  { %1139 = vperm.xlu1 %4824, %v5568_v57   ;;  %2875 = vperm.xlu0 %4884, %v5723_v53   ;;  %v926_v38 = vand.u32 2147483647, %v914_v62  ;;  %v927_v18 = vand.u32 2147483647, %v915_v63  ;;  %v484_v36 = vadd.f32 %v483_v8, %v482_v51  ;;  %v491_v31 = vadd.f32 %v490_v59, %v489_v41 }
 0x260   :  { %v722_v45 = vadd.f32 %v712_v0, %v710_v10  ;;  %v729_v56 = vadd.f32 %v713_v48, %v711_v1  ;;  %v1180_v62 = vsub.f32 1.0, %v1168_v17  ;;  %v1181_v63 = vsub.f32 1.0, %v1169_v11 }
 0x261   :  { %v1132_v9 = vpop.permute.xlu0 %1131  ;;  %v5737_v4 = vpop.permute.xlu1 %1615  ;;  %v938_v30 = vsub.f32 1.0, %v926_v38  ;;  %v939_v34 = vsub.f32 1.0, %v927_v18  ;;  %v5747_v51 = vmax.f32 %v580_v47, 0.0  ;;  %v5749_v8 = vmax.f32 %v581_v55, 0.0 }
 0x262   :  { %v820_v10 = vsub.f32 1.0, %v5739_v29  ;;  %v485_v38 = vrot.slane %v484_v36, 2  ;;  %v492_v18 = vrot.slane %v491_v31, 2  ;;  %v723_v0 = vrot.slane %v722_v45, 4 }
 0x263   :  { %4825 = vset.pattern.permute.xlu1 %v7784_v25  ;;  %4886 = vset.pattern.permute.xlu0 %v7780_v52  ;;  %v950_v49 = vmax.f32 %v938_v30, 0.0  ;;  %v951_v40 = vmax.f32 %v939_v34, 0.0  ;;  %v730_v13 = vrot.slane %v729_v56, 4  ;;  %v1154_v1 = vsub.f32 %v1132_v9, %v5679_v32 }
 0x264   :  { %1259 = vperm.xlu1 %4825, %v5568_v57   ;;  %3115 = vperm.xlu0 %4886, %v5723_v53   ;;  %v1155_v47 = vsub.f32 %v1132_v9, %v5681_v39  ;;  %v1636_v55 = vsub.f32 %v5737_v4, %v5679_v32  ;;  %v1192_v3 = vmax.f32 %v1180_v62, 0.0  ;;  %v1193_v17 = vmax.f32 %v1181_v63, 0.0 }
 0x265   :  { %v962_v20 = vadd.f32 %v952_v43, %v950_v49  ;;  %v969_v41 = vadd.f32 %v953_v50, %v951_v40  ;;  %v1396_v30 = vsub.f32 %v5720_v44, %v5679_v32  ;;  %v1166_v29 = vand.u32 2147483647, %v1154_v1 }
 0x266   :  { %v5745_v6 = vpop.permute.xlu1 %1855  ;;  %v1612_v59 = vpop.permute.xlu0 %1611  ;;  %v1167_v48 = vand.u32 2147483647, %v1155_v47  ;;  %v486_v40 = vadd.f32 %v485_v38, %v484_v36  ;;  %v493_v50 = vadd.f32 %v492_v18, %v491_v31  ;;  %v724_v52 = vadd.f32 %v723_v0, %v722_v45 }
 0x267   :  { %v963_v11 = vrot.slane %v962_v20, 4  ;;  %v970_v34 = vrot.slane %v969_v41, 4  ;;  %v1634_v43 = vsub.f32 %v1612_v59, %v5679_v32  ;;  %v1397_v62 = vsub.f32 %v5720_v44, %v5681_v39 }
 0x268   :  { %4826 = vset.pattern.permute.xlu1 %v7810_v24  ;;  %4889 = vset.pattern.permute.xlu0 %v7802_v7  ;;  %v731_v63 = vadd.f32 %v730_v13, %v729_v56  ;;  %v1178_v19 = vsub.f32 1.0, %v1166_v29  ;;  %v1179_v25 = vsub.f32 1.0, %v1167_v48  ;;  %v1648_v26 = vand.u32 2147483647, %v1636_v55 }
 0x269   :  { %1379 = vperm.xlu1 %4826, %v5568_v57   ;;  %3459 = vperm.xlu0 %4889, %v5625_v16   ;;  %v964_v1 = vadd.f32 %v963_v11, %v962_v20  ;;  %v1637_v47 = vsub.f32 %v5737_v4, %v5681_v39  ;;  %v1635_v61 = vsub.f32 %v1612_v59, %v5681_v39  ;;  %v1646_v2 = vand.u32 2147483647, %v1634_v43 }
 0x26a   :  { %v971_v36 = vadd.f32 %v970_v34, %v969_v41  ;;  %v1408_v31 = vand.u32 2147483647, %v1396_v30  ;;  %v1190_v44 = vmax.f32 %v1178_v19, 0.0  ;;  %v1191_v45 = vmax.f32 %v1179_v25, 0.0 }
 0x26b   :  { %v5765_v49 = vpop.permute.xlu1 %2095  ;;  %v5767_v9 = vpop.permute.xlu0 %421  ;;  %v821_v56 = vsub.f32 1.0, %v5751_v42  ;;  %v1409_v38 = vand.u32 2147483647, %v1397_v62  ;;  %v1647_v18 = vand.u32 2147483647, %v1635_v61  ;;  %v1658_v0 = vsub.f32 1.0, %v1646_v2 }
 0x26c   :  { %v725_v4 = vrot.slane %v724_v52, 2  ;;  %v1202_v59 = vadd.f32 %v1192_v3, %v1190_v44  ;;  %v1209_v55 = vadd.f32 %v1193_v17, %v1191_v45  ;;  %v1660_v11 = vsub.f32 1.0, %v1648_v26 }
 0x26d   :  { %4827 = vset.pattern.permute.xlu1 %v7794_v60  ;;  %3471 = vperm.xlu0 %4889, %v5667_v21   ;;  %v487_v29 = vrot.slane %v486_v40, 1  ;;  %v732_v48 = vrot.slane %v731_v63, 2  ;;  %v965_v43 = vrot.slane %v964_v1, 2  ;;  %v1649_v41 = vand.u32 2147483647, %v1637_v47 }
 0x26e   :  { %1499 = vperm.xlu1 %4827, %v5568_v57   ;;  %v5784_v19 = vmax.f32 %v820_v10, 0.0  ;;  %v494_v61 = vrot.slane %v493_v50, 1  ;;  %v972_v2 = vrot.slane %v971_v36, 2  ;;  %v1670_v25 = vmax.f32 %v1658_v0, 0.0 }
 0x26f   :  { %v1420_v42 = vsub.f32 1.0, %v1408_v31  ;;  %v1421_v3 = vsub.f32 1.0, %v1409_v38  ;;  %v1659_v26 = vsub.f32 1.0, %v1647_v18  ;;  %v1876_v17 = vsub.f32 %v5745_v6, %v5679_v32 }
 0x270   :  { %v5778_v20 = vpop.permute.xlu1 %531  ;;  %v5780_v13 = vpop.permute.xlu0 %663  ;;  %v726_v30 = vadd.f32 %v725_v4, %v724_v52  ;;  %v1203_v34 = vrot.slane %v1202_v59, 4  ;;  %v1210_v62 = vrot.slane %v1209_v55, 4  ;;  %v1672_v47 = vmax.f32 %v1660_v11, 0.0 }
 0x271   :  { %4891 = vset.pattern.permute.xlu0 %v7796_v35  ;;  %v5794_v45 = vadd.f32 %v487_v29, %v486_v40  ;;  %v733_v0 = vadd.f32 %v732_v48, %v731_v63  ;;  %v1661_v60 = vsub.f32 1.0, %v1649_v41  ;;  %v5796_v35 = vmax.f32 %v821_v56, 0.0 }
 0x272   :  { %4828 = vset.pattern.permute.xlu1 %v7792_v5  ;;  %1015 = vperm.xlu0 %4891, %v5506_v54   ;;  %v966_v5 = vadd.f32 %v965_v43, %v964_v1  ;;  %v973_v31 = vadd.f32 %v972_v2, %v971_v36  ;;  %v1682_v38 = vadd.f32 %v1672_v47, %v1670_v25  ;;  %v5804_v4 = vmax.f32 %v1420_v42, 0.0 }
 0x273   :  { %1619 = vperm.xlu1 %4828, %v5568_v57   ;;  %v1877_v18 = vsub.f32 %v5745_v6, %v5681_v39  ;;  %v5802_v52 = vadd.f32 %v494_v61, %v493_v50  ;;  %v1671_v40 = vmax.f32 %v1659_v26, 0.0  ;;  %v1888_v11 = vand.u32 2147483647, %v1876_v17 }
 0x274   :  { %7817 = vst [vmem:[#allocation9_spill] sm:$0xff] %v5804_v4  ;;  %v727_v63 = vrot.slane %v726_v30, 1  ;;  %v1204_v1 = vadd.f32 %v1203_v34, %v1202_v59  ;;  %v1211_v56 = vadd.f32 %v1210_v62, %v1209_v55  ;;  %v2116_v36 = vsub.f32 %v5765_v49, %v5679_v32 }
 0x275   :  { %v5790_v44 = vpop.permute.xlu1 %771  ;;  %v5792_v10 = vpop.permute.xlu0 %903  ;;  %v734_v29 = vrot.slane %v733_v0, 1  ;;  %v5809_v6 = vmax.f32 %v1421_v3, 0.0  ;;  %v1673_v48 = vmax.f32 %v1661_v60, 0.0  ;;  %v2117_v50 = vsub.f32 %v5765_v49, %v5681_v39 }
 0x276   :  { %1027 = vperm.xlu0 %4891, %v5591_v22   ;;  %v967_v61 = vrot.slane %v966_v5, 1  ;;  %v974_v2 = vrot.slane %v973_v31, 1  ;;  %v1683_v25 = vrot.slane %v1682_v38, 4  ;;  %v1889_v42 = vand.u32 2147483647, %v1877_v18 }
 0x277   :  { %4829 = vset.pattern.permute.xlu1 %v7798_v14  ;;  %7818 = vst [vmem:[#allocation10_spill] sm:$0xff] %v5809_v6  ;;  %v1689_v59 = vadd.f32 %v1673_v48, %v1671_v40  ;;  %v1900_v55 = vsub.f32 1.0, %v1888_v11  ;;  %v554_v3 = vsub.f32 %v5778_v20, %v5679_v32  ;;  %v555_v60 = vsub.f32 %v5778_v20, %v5681_v39 }
 0x278   :  { %1739 = vperm.xlu1 %4829, %v5568_v57   ;;  %v5823_v49 = vadd.f32 %v727_v63, %v726_v30  ;;  %v1205_v26 = vrot.slane %v1204_v1, 2  ;;  %v1212_v17 = vrot.slane %v1211_v56, 2  ;;  %v2128_v34 = vand.u32 2147483647, %v2116_v36 }
 0x279   :  { %v5826_v62 = vadd.f32 %v734_v29, %v733_v0  ;;  %v2129_v47 = vand.u32 2147483647, %v2117_v50  ;;  %v566_v18 = vand.u32 2147483647, %v554_v3  ;;  %v567_v40 = vand.u32 2147483647, %v555_v60 }
 0x27a   :  { %v5813_v43 = vpop.permute.xlu1 %1011  ;;  %v5815_v41 = vpop.permute.xlu0 %1143  ;;  %3343 = vperm.xlu0 %4891, %v5615_v27   ;;  %v5828_v11 = vadd.f32 %v967_v61, %v966_v5  ;;  %v5830_v48 = vadd.f32 %v974_v2, %v973_v31  ;;  %v1684_v14 = vadd.f32 %v1683_v25, %v1682_v38  ;;  %v1901_v20 = vsub.f32 1.0, %v1889_v42 }
 0x27b   :  { %v1690_v36 = vrot.slane %v1689_v59, 4  ;;  %v578_v0 = vsub.f32 1.0, %v566_v18  ;;  %v579_v29 = vsub.f32 1.0, %v567_v40  ;;  %v1206_v50 = vadd.f32 %v1205_v26, %v1204_v1 }
 0x27c   :  { %4830 = vset.pattern.permute.xlu1 %v7800_v15  ;;  %7819 = vst [vmem:[#allocation11_spill] sm:$0xff] %v5828_v11  ;;  %7820 = vst [vmem:[#allocation12_spill] sm:$0xff] %v5830_v48  ;;  %v5837_v15 = vmax.f32 %v1900_v55, 0.0  ;;  %v1213_v3 = vadd.f32 %v1212_v17, %v1211_v56  ;;  %v2140_v60 = vsub.f32 1.0, %v2128_v34  ;;  %v794_v5 = vsub.f32 %v5790_v44, %v5679_v32 }
 0x27d   :  { %1859 = vperm.xlu1 %4830, %v5568_v57   ;;  %v2141_v31 = vsub.f32 1.0, %v2129_v47  ;;  %v590_v38 = vmax.f32 %v578_v0, 0.0  ;;  %v591_v61 = vmax.f32 %v579_v29, 0.0  ;;  %v795_v2 = vsub.f32 %v5790_v44, %v5681_v39 }
 0x27e   :  { %3355 = vperm.xlu0 %4891, %v5723_v53   ;;  %7821 = vst [vmem:[#allocation13_spill] sm:$0xff] %v5837_v15  ;;  %v1685_v25 = vrot.slane %v1684_v14, 2  ;;  %v5845_v42 = vmax.f32 %v1901_v20, 0.0  ;;  %v440_v1 = vsub.f32 %v5767_v9, %v5679_v32  ;;  %v806_v56 = vand.u32 2147483647, %v794_v5 }
 0x27f   :  { %v5833_v30 = vpop.permute.xlu1 %1251  ;;  %v5835_v63 = vpop.permute.xlu0 %1623  ;;  %v1691_v55 = vadd.f32 %v1690_v36, %v1689_v59  ;;  %v602_v26 = vadd.f32 %v5747_v51, %v590_v38  ;;  %v609_v17 = vadd.f32 %v5749_v8, %v591_v61  ;;  %v807_v34 = vand.u32 2147483647, %v795_v2 }
 0x280   :  { %7822 = vst [vmem:[#allocation14_spill] sm:$0xff] %v5845_v42  ;;  %v1207_v18 = vrot.slane %v1206_v50, 1  ;;  %v1214_v40 = vrot.slane %v1213_v3, 1  ;;  %v5857_v20 = vmax.f32 %v2140_v60, 0.0  ;;  %v818_v0 = vsub.f32 1.0, %v806_v56 }
 0x281   :  { %4831 = vset.pattern.permute.xlu1 %v7804_v12  ;;  %v5859_v29 = vmax.f32 %v2141_v31, 0.0  ;;  %v603_v5 = vrot.slane %v602_v26, 4  ;;  %v610_v59 = vrot.slane %v609_v17, 4  ;;  %v819_v36 = vsub.f32 1.0, %v807_v34 }
 0x282   :  { %1979 = vperm.xlu1 %4831, %v5568_v57   ;;  %4892 = vset.pattern.permute.xlu0 %v7802_v7  ;;  %7823 = vst [vmem:[#allocation15_spill] sm:$0xff] %v5857_v20  ;;  %v1686_v51 = vadd.f32 %v1685_v25, %v1684_v14  ;;  %v441_v8 = vsub.f32 %v5767_v9, %v5681_v39  ;;  %v452_v38 = vand.u32 2147483647, %v440_v1  ;;  %v830_v61 = vmax.f32 %v818_v0, 0.0 }
 0x283   :  { %3479 = vperm.xlu0 %4892, %v5691_v33   ;;  %7824 = vst [vmem:[#allocation16_spill] sm:$0xff] %v5859_v29  ;;  %v1692_v2 = vrot.slane %v1691_v55, 2  ;;  %v604_v7 = vadd.f32 %v603_v5, %v602_v26  ;;  %v611_v60 = vadd.f32 %v610_v59, %v609_v17  ;;  %v831_v12 = vmax.f32 %v819_v36, 0.0 }
 0x284   :  { %v5853_v44 = vpop.permute.xlu0 %2863  ;;  %v5855_v47 = vpop.permute.xlu1 %1491  ;;  %v5866_v31 = vadd.f32 %v1207_v18, %v1206_v50  ;;  %v5868_v56 = vadd.f32 %v1214_v40, %v1213_v3  ;;  %v680_v14 = vsub.f32 %v5780_v13, %v5679_v32  ;;  %v842_v25 = vadd.f32 %v5784_v19, %v830_v61 }
 0x285   :  { %v605_v26 = vrot.slane %v604_v7, 2  ;;  %v612_v17 = vrot.slane %v611_v60, 2  ;;  %v681_v34 = vsub.f32 %v5780_v13, %v5681_v39  ;;  %v849_v50 = vadd.f32 %v5796_v35, %v831_v12 }
 0x286   :  { %4832 = vset.pattern.permute.xlu1 %v7806_v28  ;;  %7825 = vst [vmem:[#allocation17_spill] sm:$0xff] %v5866_v31  ;;  %7826 = vst [vmem:[#allocation18_spill] sm:$0xff] %v5868_v56  ;;  %v453_v3 = vand.u32 2147483647, %v441_v8  ;;  %v464_v18 = vsub.f32 1.0, %v452_v38  ;;  %v843_v40 = vrot.slane %v842_v25, 4  ;;  %v920_v0 = vsub.f32 %v5792_v10, %v5679_v32 }
 0x287   :  { %2099 = vperm.xlu1 %4832, %v5568_v57   ;;  %4893 = vset.pattern.permute.xlu0 %v7810_v24  ;;  %v1687_v19 = vrot.slane %v1686_v51, 1  ;;  %v606_v5 = vadd.f32 %v605_v26, %v604_v7  ;;  %v921_v59 = vsub.f32 %v5792_v10, %v5681_v39  ;;  %v1034_v36 = vsub.f32 %v5813_v43, %v5679_v32 }
 0x288   :  { %1371 = vperm.xlu0 %4893, %v5504_v37   ;;  %v1693_v13 = vadd.f32 %v1692_v2, %v1691_v55  ;;  %v692_v35 = vand.u32 2147483647, %v680_v14  ;;  %v1035_v12 = vsub.f32 %v5813_v43, %v5681_v39  ;;  %v1160_v8 = vsub.f32 %v5815_v41, %v5679_v32 }
 0x289   :  { %v5874_v9 = vpop.permute.xlu0 %3103  ;;  %v5876_v1 = vpop.permute.xlu1 %1731  ;;  %v613_v38 = vadd.f32 %v612_v17, %v611_v60  ;;  %v693_v7 = vand.u32 2147483647, %v681_v34  ;;  %v850_v61 = vrot.slane %v849_v50, 4  ;;  %v1161_v10 = vsub.f32 %v5815_v41, %v5681_v39 }
 0x28a   :  { %v465_v28 = vsub.f32 1.0, %v453_v3  ;;  %v844_v55 = vadd.f32 %v843_v40, %v842_v25  ;;  %v932_v2 = vand.u32 2147483647, %v920_v0  ;;  %v5902_v43 = vadd.f32 %v1687_v19, %v1686_v51 }
 0x28b   :  { %4833 = vset.pattern.permute.xlu1 %v7808_v58  ;;  %v607_v58 = vrot.slane %v606_v5, 1  ;;  %v933_v24 = vand.u32 2147483647, %v921_v59  ;;  %v1046_v29 = vand.u32 2147483647, %v1034_v36  ;;  %v7828_v60 = vmov 0  }
 0x28c   :  { %2219 = vperm.xlu1 %4833, %v5568_v57   ;;  %1383 = vperm.xlu0 %4893, %v5557_v46   ;;  %v5898_v57 = vmax.f32 %v464_v18, 0.0  ;;  %7827 = vst [vmem:[#allocation19_spill] sm:$0xff] %v5902_v43  ;;  %v1694_v17 = vrot.slane %v1693_v13, 1  ;;  %v704_v34 = vsub.f32 1.0, %v692_v35  ;;  %v1047_v20 = vand.u32 2147483647, %v1035_v12 }
 0x28d   :  { %v1172_v41 = vand.u32 2147483647, %v1160_v8  ;;  %v614_v3 = vrot.slane %v613_v38, 1  ;;  %v705_v25 = vsub.f32 1.0, %v693_v7  ;;  %v851_v18 = vadd.f32 %v850_v61, %v849_v50 }
 0x28e   :  { %v5896_v26 = vpop.permute.xlu1 %1971  ;;  %v5900_v14 = vpop.permute.xlu0 %2734  ;;  %v1173_v40 = vand.u32 2147483647, %v1161_v10  ;;  %v845_v0 = vrot.slane %v844_v55, 2  ;;  %v944_v51 = vsub.f32 1.0, %v932_v2  ;;  %v1274_v19 = vsub.f32 %v5833_v30, %v5679_v32 }
 0x28f   :  { %v1275_v59 = vsub.f32 %v5833_v30, %v5681_v39  ;;  %v5913_v35 = vmax.f32 %v465_v28, 0.0  ;;  %v608_v12 = vadd.f32 %v607_v58, %v606_v5  ;;  %v945_v8 = vsub.f32 1.0, %v933_v24 }
 0x290   :  { %4834 = vset.pattern.permute.xlu1 %v7828_v60  ;;  %1391 = vperm.xlu0 %4893, %v5589_v23   ;;  %v1058_v42 = vsub.f32 1.0, %v1046_v29  ;;  %v5915_v15 = vadd.f32 %v1694_v17, %v1693_v13  ;;  %v5917_v7 = vmax.f32 %v704_v34, 0.0  ;;  %v1059_v50 = vsub.f32 1.0, %v1047_v20 }
 0x291   :  { %2739 = vperm.xlu1 %4834, %v5615_v27   ;;  %v1184_v61 = vsub.f32 1.0, %v1172_v41  ;;  %v7830_v2 = vmov 2   ;;  %v615_v30 = vadd.f32 %v614_v3, %v613_v38  ;;  %v5923_v43 = vmax.f32 %v705_v25, 0.0 }
 0x292   :  { %7829 = vst [vmem:[#allocation20_spill] sm:$0xff] %v5915_v15  ;;  %v852_v28 = vrot.slane %v851_v18, 2  ;;  %v1185_v56 = vsub.f32 1.0, %v1173_v40  ;;  %v846_v24 = vadd.f32 %v845_v0, %v844_v55  ;;  %v5926_v58 = vmax.f32 %v944_v51, 0.0 }
 0x293   :  { %v5911_v36 = vpop.permute.xlu1 %2211  ;;  %v5919_v10 = vpop.permute.xlu0 %2979  ;;  %v1286_v29 = vand.u32 2147483647, %v1274_v19  ;;  %v1287_v5 = vand.u32 2147483647, %v1275_v59  ;;  %v644_v20 = vadd.f32 %v608_v12, %v5794_v45  ;;  %v5929_v13 = vmax.f32 %v945_v8, 0.0 }
 0x294   :  { %3699 = vperm.xlu0 %4893, %v5625_v16   ;;  %v5931_v17 = vmax.f32 %v1058_v42, 0.0  ;;  %v1640_v38 = vsub.f32 %v5835_v63, %v5679_v32  ;;  %v5937_v41 = vmax.f32 %v1059_v50, 0.0  ;;  %v5939_v3 = vmax.f32 %v1184_v61, 0.0 }
 0x295   :  { %4836 = vset.pattern.permute.xlu1 %v7830_v2  ;;  %v1641_v55 = vsub.f32 %v5835_v63, %v5681_v39  ;;  %v2884_v25 = vsub.f32 %v5853_v44, %v5679_v32  ;;  %v645_v45 = vadd.f32 %v615_v30, %v5802_v52  ;;  %v853_v42 = vadd.f32 %v852_v28, %v851_v18 }
 0x296   :  { %2983 = vperm.xlu1 %4836, %v5615_v27   ;;  %7831 = vst [vmem:[#allocation21_spill] sm:$0xff] %v5931_v17  ;;  %7832 = vst [vmem:[#allocation22_spill] sm:$0xff] %v5937_v41  ;;  %v5947_v40 = vmax.f32 %v1185_v56, 0.0  ;;  %v2885_v0 = vsub.f32 %v5853_v44, %v5681_v39  ;;  %v7833_v51 = vmov 4   ;;  %v847_v19 = vrot.slane %v846_v24, 1 }
 0x297   :  { %v1298_v59 = vsub.f32 1.0, %v1286_v29  ;;  %v1299_v12 = vsub.f32 1.0, %v1287_v5  ;;  %v1514_v63 = vsub.f32 %v5855_v47, %v5679_v32  ;;  %v1652_v52 = vand.u32 2147483647, %v1640_v38 }
 0x298   :  { %v5935_v34 = vpop.permute.xlu1 %543  ;;  %3711 = vperm.xlu0 %4893, %v5667_v21   ;;  %v5954_v8 = vpop.permute.xlu0 %3219  ;;  %v764_v21 = vadd.f32 %v5823_v49, %v644_v20  ;;  %v1515_v56 = vsub.f32 %v5855_v47, %v5681_v39  ;;  %v3124_v44 = vsub.f32 %v5874_v9, %v5679_v32  ;;  %v1653_v18 = vand.u32 2147483647, %v1641_v55 }
 0x299   :  { %v2896_v50 = vand.u32 2147483647, %v2884_v25  ;;  %v3125_v61 = vsub.f32 %v5874_v9, %v5681_v39  ;;  %v1754_v30 = vsub.f32 %v5876_v1, %v5679_v32  ;;  %v7834_v28 = vmov 7  }
 0x29a   :  { %4838 = vset.pattern.permute.xlu1 %v7833_v51  ;;  %v5970_v49 = vadd.f32 %v5826_v62, %v645_v45  ;;  %v854_v5 = vrot.slane %v853_v42, 1  ;;  %v2897_v47 = vand.u32 2147483647, %v2885_v0  ;;  %v1755_v20 = vsub.f32 %v5876_v1, %v5681_v39 }
 0x29b   :  { %3223 = vperm.xlu1 %4838, %v5615_v27   ;;  %v848_v38 = vadd.f32 %v847_v19, %v846_v24  ;;  %v5975_v55 = vmax.f32 %v1298_v59, 0.0  ;;  %v5977_v9 = vmax.f32 %v1299_v12, 0.0  ;;  %v1526_v25 = vand.u32 2147483647, %v1514_v63 }
 0x29c   :  { %4896 = vset.pattern.permute.xlu0 %v7834_v28  ;;  %v7837_v31 = vmov 1   ;;  %v1664_v6 = vsub.f32 1.0, %v1652_v52  ;;  %v1527_v62 = vand.u32 2147483647, %v1515_v56  ;;  %v3136_v45 = vand.u32 2147483647, %v3124_v44 }
 0x29d   :  { %v5967_v29 = vpop.permute.xlu1 %783  ;;  %1255 = vperm.xlu0 %4896, %v5506_v54   ;;  %7835 = vst [vmem:[#allocation23_spill] sm:$0xff] %v5975_v55  ;;  %7836 = vst [vmem:[#allocation24_spill] sm:$0xff] %v5977_v9  ;;  %v5979_v15 = vpop.permute.xlu0 %431  ;;  %v2762_v0 = vsub.f32 %v5900_v14, %v5679_v32  ;;  %v1665_v1 = vsub.f32 1.0, %v1653_v18  ;;  %v2908_v4 = vsub.f32 1.0, %v2896_v50  ;;  %v3137_v24 = vand.u32 2147483647, %v3125_v61 }
 0x29e   :  { %v1766_v19 = vand.u32 2147483647, %v1754_v30  ;;  %v2909_v59 = vsub.f32 1.0, %v2897_v47  ;;  %v1767_v12 = vand.u32 2147483647, %v1755_v20  ;;  %v2763_v63 = vsub.f32 %v5900_v14, %v5681_v39 }
 0x29f   :  { %4840 = vset.pattern.permute.xlu1 %v7837_v31  ;;  %v1994_v9 = vsub.f32 %v5896_v26, %v5679_v32  ;;  %v5992_v56 = vadd.f32 %v854_v5, %v853_v42  ;;  %v5994_v44 = vadd.f32 %v848_v38, %v764_v21  ;;  %v1538_v18 = vsub.f32 1.0, %v1526_v25 }
 0x2a0   :  { %2859 = vperm.xlu1 %4840, %v5625_v16   ;;  %v1995_v50 = vsub.f32 %v5896_v26, %v5681_v39  ;;  %v5998_v61 = vmax.f32 %v1664_v6, 0.0  ;;  %v1539_v30 = vsub.f32 1.0, %v1527_v62  ;;  %v3148_v47 = vsub.f32 1.0, %v3136_v45 }
 0x2a1   :  { %1267 = vperm.xlu0 %4896, %v5591_v22   ;;  %7838 = vst [vmem:[#allocation25_spill] sm:$0xff] %v5994_v44  ;;  %v2774_v14 = vand.u32 2147483647, %v2762_v0  ;;  %v7840_v20 = vmov 3   ;;  %v6001_v55 = vmax.f32 %v1665_v1, 0.0  ;;  %v6003_v48 = vmax.f32 %v2908_v4, 0.0 }
 0x2a2   :  { %v5990_v52 = vpop.permute.xlu1 %1023  ;;  %7839 = vst [vmem:[#allocation26_spill] sm:$0xff] %v5998_v61  ;;  %v3149_v11 = vsub.f32 1.0, %v3137_v24  ;;  %v1778_v42 = vsub.f32 1.0, %v1766_v19  ;;  %v6005_v5 = vpop.permute.xlu0 %671  ;;  %v6008_v21 = vmax.f32 %v2909_v59, 0.0  ;;  %v1779_v26 = vsub.f32 1.0, %v1767_v12 }
 0x2a3   :  { %7841 = vst [vmem:[#allocation27_spill] sm:$0xff] %v6001_v55  ;;  %7842 = vst [vmem:[#allocation28_spill] sm:$0xff] %v6003_v48  ;;  %v2775_v6 = vand.u32 2147483647, %v2763_v63  ;;  %v2006_v38 = vand.u32 2147483647, %v1994_v9  ;;  %v3002_v4 = vsub.f32 %v5919_v10, %v5679_v32  ;;  %v3003_v45 = vsub.f32 %v5919_v10, %v5681_v39 }
 0x2a4   :  { %4842 = vset.pattern.permute.xlu1 %v7840_v20  ;;  %7843 = vst [vmem:[#allocation29_spill] sm:$0xff] %v6008_v21  ;;  %v6011_v25 = vmax.f32 %v1538_v18, 0.0  ;;  %v2007_v62 = vand.u32 2147483647, %v1995_v50  ;;  %v6019_v1 = vmax.f32 %v1539_v30, 0.0  ;;  %v6021_v24 = vmax.f32 %v3148_v47, 0.0 }
 0x2a5   :  { %3099 = vperm.xlu1 %4842, %v5625_v16   ;;  %3583 = vperm.xlu0 %4896, %v5615_v27   ;;  %v2786_v19 = vsub.f32 1.0, %v2774_v14  ;;  %v2234_v9 = vsub.f32 %v5911_v36, %v5679_v32  ;;  %v6025_v27 = vmax.f32 %v3149_v11, 0.0  ;;  %v6027_v59 = vmax.f32 %v1778_v42, 0.0 }
 0x2a6   :  { %7844 = vst [vmem:[#allocation30_spill] sm:$0xff] %v6011_v25  ;;  %7845 = vst [vmem:[#allocation31_spill] sm:$0xff] %v6019_v1  ;;  %v2235_v12 = vsub.f32 %v5911_v36, %v5681_v39  ;;  %v3242_v10 = vsub.f32 %v5954_v8, %v5679_v32  ;;  %v7849_v63 = vmov 5   ;;  %v6034_v18 = vmax.f32 %v1779_v26, 0.0 }
 0x2a7   :  { %v6017_v0 = vpop.permute.xlu1 %1263  ;;  %7846 = vst [vmem:[#allocation32_spill] sm:$0xff] %v6021_v24  ;;  %7847 = vst [vmem:[#allocation33_spill] sm:$0xff] %v6025_v27  ;;  %v2787_v50 = vsub.f32 1.0, %v2775_v6  ;;  %v2018_v30 = vsub.f32 1.0, %v2006_v38  ;;  %v3243_v47 = vsub.f32 %v5954_v8, %v5681_v39  ;;  %v2019_v11 = vsub.f32 1.0, %v2007_v62 }
 0x2a8   :  { %7848 = vst [vmem:[#allocation34_spill] sm:$0xff] %v6027_v59  ;;  %7850 = vst [vmem:[#allocation35_spill] sm:$0xff] %v6034_v18  ;;  %v3014_v14 = vand.u32 2147483647, %v3002_v4  ;;  %v3015_v42 = vand.u32 2147483647, %v3003_v45  ;;  %v560_v36 = vsub.f32 %v5935_v34, %v5679_v32  ;;  %v6042_v59 = vpop.permute.xlu0 %911  ;;  %v561_v6 = vsub.f32 %v5935_v34, %v5681_v39 }
 0x2a9   :  { %4844 = vset.pattern.permute.xlu1 %v7849_v63  ;;  %3595 = vperm.xlu0 %4896, %v5723_v53   ;;  %v6044_v1 = vmax.f32 %v2786_v19, 0.0  ;;  %v2246_v26 = vand.u32 2147483647, %v2234_v9  ;;  %v800_v8 = vsub.f32 %v5967_v29, %v5679_v32  ;;  %v3254_v62 = vand.u32 2147483647, %v3242_v10 }
 0x2aa   :  { %3339 = vperm.xlu1 %4844, %v5625_v16   ;;  %v2247_v16 = vand.u32 2147483647, %v2235_v12  ;;  %v801_v4 = vsub.f32 %v5967_v29, %v5681_v39  ;;  %v444_v45 = vsub.f32 %v5979_v15, %v5679_v32  ;;  %v6056_v18 = vmax.f32 %v2787_v50, 0.0 }
 0x2ab   :  { %7851 = vst [vmem:[#allocation36_spill] sm:$0xff] %v6044_v1  ;;  %v6058_v19 = vmax.f32 %v2018_v30, 0.0  ;;  %v3255_v9 = vand.u32 2147483647, %v3243_v47  ;;  %v445_v34 = vsub.f32 %v5979_v15, %v5681_v39  ;;  %v7854_v25 = vmov 8  }
 0x2ac   :  { %v6050_v38 = vpop.permute.xlu1 %1503  ;;  %7852 = vst [vmem:[#allocation37_spill] sm:$0xff] %v6056_v18  ;;  %v6064_v12 = vmax.f32 %v2019_v11, 0.0  ;;  %v3026_v10 = vsub.f32 1.0, %v3014_v14  ;;  %v3027_v27 = vsub.f32 1.0, %v3015_v42  ;;  %v572_v29 = vand.u32 2147483647, %v560_v36  ;;  %v6070_v18 = vpop.permute.xlu0 %1151 }
 0x2ad   :  { %7853 = vst [vmem:[#allocation38_spill] sm:$0xff] %v6058_v19  ;;  %4897 = vset.pattern.permute.xlu0 %v7854_v25  ;;  %v2258_v50 = vsub.f32 1.0, %v2246_v26  ;;  %v573_v30 = vand.u32 2147483647, %v561_v6  ;;  %v812_v19 = vand.u32 2147483647, %v800_v8  ;;  %v684_v47 = vsub.f32 %v6005_v5, %v5679_v32 }
 0x2ae   :  { %4846 = vset.pattern.permute.xlu1 %v7837_v31  ;;  %7855 = vst [vmem:[#allocation39_spill] sm:$0xff] %v6064_v12  ;;  %3719 = vperm.xlu0 %4897, %v5691_v33   ;;  %v2259_v15 = vsub.f32 1.0, %v2247_v16  ;;  %v3266_v24 = vsub.f32 1.0, %v3254_v62  ;;  %v813_v21 = vand.u32 2147483647, %v801_v4  ;;  %v3267_v14 = vsub.f32 1.0, %v3255_v9 }
 0x2af   :  { %551 = vperm.xlu1 %4846, %v5589_v23   ;;  %v456_v48 = vand.u32 2147483647, %v444_v45  ;;  %v457_v42 = vand.u32 2147483647, %v445_v34  ;;  %v685_v33 = vsub.f32 %v6005_v5, %v5681_v39  ;;  %v1040_v36 = vsub.f32 %v5990_v52, %v5679_v32 }
 0x2b0   :  { %v6078_v26 = vmax.f32 %v3026_v10, 0.0  ;;  %v6080_v6 = vmax.f32 %v3027_v27, 0.0  ;;  %v584_v8 = vsub.f32 1.0, %v572_v29  ;;  %v1041_v16 = vsub.f32 %v5990_v52, %v5681_v39 }
 0x2b1   :  { %v6072_v11 = vpop.permute.xlu1 %1743  ;;  %v7858_v62 = vmov 9   ;;  %v6086_v4 = vmax.f32 %v2258_v50, 0.0  ;;  %v585_v45 = vsub.f32 1.0, %v573_v30  ;;  %v824_v9 = vsub.f32 1.0, %v812_v19 }
 0x2b2   :  { %7856 = vst [vmem:[#allocation40_spill] sm:$0xff] %v6078_v26  ;;  %7857 = vst [vmem:[#allocation41_spill] sm:$0xff] %v6080_v6  ;;  %4898 = vset.pattern.permute.xlu0 %v7858_v62  ;;  %v696_v5 = vand.u32 2147483647, %v684_v47  ;;  %v6090_v34 = vmax.f32 %v2259_v15, 0.0  ;;  %v6092_v27 = vmax.f32 %v3266_v24, 0.0  ;;  %v924_v47 = vsub.f32 %v6042_v59, %v5679_v32  ;;  %v1632_v24 = vpop.permute.xlu0 %1631 }
 0x2b3   :  { %4848 = vset.pattern.permute.xlu1 %v7840_v20  ;;  %7859 = vst [vmem:[#allocation42_spill] sm:$0xff] %v6086_v4  ;;  %1495 = vperm.xlu0 %4898, %v5506_v54   ;;  %v825_v10 = vsub.f32 1.0, %v813_v21  ;;  %v468_v29 = vsub.f32 1.0, %v456_v48  ;;  %v6094_v52 = vmax.f32 %v3267_v14, 0.0  ;;  %v469_v12 = vsub.f32 1.0, %v457_v42 }
 0x2b4   :  { %791 = vperm.xlu1 %4848, %v5589_v23   ;;  %7860 = vst [vmem:[#allocation43_spill] sm:$0xff] %v6090_v34  ;;  %7861 = vst [vmem:[#allocation44_spill] sm:$0xff] %v6092_v27  ;;  %v697_v6 = vand.u32 2147483647, %v685_v33  ;;  %v1052_v26 = vand.u32 2147483647, %v1040_v36  ;;  %v925_v15 = vsub.f32 %v6042_v59, %v5681_v39  ;;  %v1280_v14 = vsub.f32 %v6017_v0, %v5679_v32 }
 0x2b5   :  { %7862 = vst [vmem:[#allocation45_spill] sm:$0xff] %v6094_v52  ;;  %v6098_v30 = vmax.f32 %v584_v8, 0.0  ;;  %v1053_v19 = vand.u32 2147483647, %v1041_v16  ;;  %v6104_v34 = vmax.f32 %v585_v45, 0.0  ;;  %v6106_v48 = vmax.f32 %v824_v9, 0.0 }
 0x2b6   :  { %v6096_v50 = vpop.permute.xlu1 %1983  ;;  %v708_v21 = vsub.f32 1.0, %v696_v5  ;;  %v6112_v42 = vmax.f32 %v825_v10, 0.0  ;;  %v6114_v33 = vmax.f32 %v468_v29, 0.0  ;;  %v1281_v59 = vsub.f32 %v6017_v0, %v5681_v39 }
 0x2b7   :  { %1507 = vperm.xlu0 %4898, %v5591_v22   ;;  %v1164_v36 = vsub.f32 %v6070_v18, %v5679_v32  ;;  %v6121_v8 = vmax.f32 %v469_v12, 0.0  ;;  %v709_v16 = vsub.f32 1.0, %v697_v6  ;;  %v1064_v45 = vsub.f32 1.0, %v1052_v26  ;;  %v6132_v6 = vld [vmem:[#allocation2 + $0x8] sm:$0xff] }
 0x2b8   :  { %4850 = vset.pattern.permute.xlu1 %v7849_v63  ;;  %7863 = vst [vmem:[#allocation46_spill] sm:$0xff] %v6114_v33  ;;  %v1165_v9 = vsub.f32 %v6070_v18, %v5681_v39  ;;  %v1065_v5 = vsub.f32 1.0, %v1053_v19  ;;  %v936_v10 = vand.u32 2147483647, %v924_v47  ;;  %v937_v4 = vand.u32 2147483647, %v925_v15  ;;  %v548_v33 = vpop.permute.xlu0 %547 }
 0x2b9   :  { %1031 = vperm.xlu1 %4850, %v5589_v23   ;;  %7864 = vst [vmem:[#allocation47_spill] sm:$0xff] %v6121_v8  ;;  %v1520_v29 = vsub.f32 %v6050_v38, %v5679_v32  ;;  %v6127_v0 = vmax.f32 %v708_v21, 0.0  ;;  %v1292_v52 = vand.u32 2147483647, %v1280_v14  ;;  %v1521_v27 = vsub.f32 %v6050_v38, %v5681_v39 }
 0x2ba   :  { %v1644_v12 = vsub.f32 %v1632_v24, %v5679_v32  ;;  %v1293_v26 = vand.u32 2147483647, %v1281_v59  ;;  %v1176_v19 = vand.u32 2147483647, %v1164_v36  ;;  %v1645_v47 = vsub.f32 %v1632_v24, %v5681_v39 }
 0x2bb   :  { %7865 = vst [vmem:[#allocation48_spill] sm:$0xff] %v6127_v0  ;;  %3823 = vperm.xlu0 %4898, %v6132_v6   ;;  %v6135_v18 = vpop.permute.xlu1 %2223  ;;  %v1760_v15 = vsub.f32 %v6072_v11, %v5679_v32  ;;  %v6141_v21 = vmax.f32 %v709_v16, 0.0  ;;  %v6143_v38 = vmax.f32 %v1064_v45, 0.0  ;;  %v1177_v14 = vand.u32 2147483647, %v1165_v9 }
 0x2bc   :  { %v1761_v0 = vsub.f32 %v6072_v11, %v5681_v39  ;;  %v6148_v8 = vmax.f32 %v1065_v5, 0.0  ;;  %v948_v59 = vsub.f32 1.0, %v936_v10  ;;  %v949_v36 = vsub.f32 1.0, %v937_v4  ;;  %v6153_v11 = vpop.permute.xlu0 %787 }
 0x2bd   :  { %4852 = vset.pattern.permute.xlu1 %v7834_v28  ;;  %7866 = vst [vmem:[#allocation49_spill] sm:$0xff] %v6141_v21  ;;  %v1532_v24 = vand.u32 2147483647, %v1520_v29  ;;  %v1304_v1 = vsub.f32 1.0, %v1292_v52  ;;  %v1533_v63 = vand.u32 2147483647, %v1521_v27  ;;  %v2000_v16 = vsub.f32 %v6096_v50, %v5679_v32 }
 0x2be   :  { %1271 = vperm.xlu1 %4852, %v5589_v23   ;;  %v1656_v44 = vand.u32 2147483647, %v1644_v12  ;;  %v1305_v45 = vsub.f32 1.0, %v1293_v26  ;;  %v1188_v9 = vsub.f32 1.0, %v1176_v19  ;;  %v1657_v21 = vand.u32 2147483647, %v1645_v47 }
 0x2bf   :  { %3835 = vperm.xlu0 %4898, %v5723_v53   ;;  %v1772_v28 = vand.u32 2147483647, %v1760_v15  ;;  %v1189_v55 = vsub.f32 1.0, %v1177_v14  ;;  %v1773_v5 = vand.u32 2147483647, %v1761_v0  ;;  %v2001_v4 = vsub.f32 %v6096_v50, %v5681_v39 }
 0x2c0   :  { %v562_v52 = vsub.f32 %v548_v33, %v5679_v32  ;;  %v417_v27 = vpop.permute.xlu1 %416  ;;  %v6159_v10 = vmax.f32 %v948_v59, 0.0  ;;  %v6161_v29 = vmax.f32 %v949_v36, 0.0  ;;  %v1544_v53 = vsub.f32 1.0, %v1532_v24  ;;  %v4937_v36 = vld [vmem:[#allocation2] sm:$0xff] }
 0x2c1   :  { %v563_v12 = vsub.f32 %v548_v33, %v5681_v39  ;;  %v6165_v26 = vmax.f32 %v1304_v1, 0.0  ;;  %v1545_v0 = vsub.f32 1.0, %v1533_v63  ;;  %v1668_v19 = vsub.f32 1.0, %v1656_v44  ;;  %v6176_v44 = vpop.permute.xlu0 %2749 }
 0x2c2   :  { %4853 = vset.pattern.permute.xlu1 %v7858_v62  ;;  %7867 = vst [vmem:[#allocation50_spill] sm:$0xff] %v6159_v10  ;;  %7868 = vst [vmem:[#allocation51_spill] sm:$0xff] %v6161_v29  ;;  %v2012_v47 = vand.u32 2147483647, %v2000_v16  ;;  %v7869_v50 = vmov 10   ;;  %v6168_v15 = vmax.f32 %v1305_v45, 0.0  ;;  %v438_v16 = vsub.f32 %v417_v27, %v5679_v32 }
 0x2c3   :  { %1511 = vperm.xlu1 %4853, %v5589_v23   ;;  %4900 = vset.pattern.permute.xlu0 %v7869_v50  ;;  %v6170_v14 = vmax.f32 %v1188_v9, 0.0  ;;  %v1669_v59 = vsub.f32 1.0, %v1657_v21  ;;  %v1784_v10 = vsub.f32 1.0, %v1772_v28  ;;  %v6172_v24 = vmax.f32 %v1189_v55, 0.0 }
 0x2c4   :  { %3939 = vperm.xlu0 %4900, %v4937_v36   ;;  %v1785_v33 = vsub.f32 1.0, %v1773_v5  ;;  %v2013_v29 = vand.u32 2147483647, %v2001_v4  ;;  %v574_v62 = vand.u32 2147483647, %v562_v52  ;;  %v6174_v1 = vmax.f32 %v1544_v53, 0.0 }
 0x2c5   :  { %7870 = vst [vmem:[#allocation52_spill] sm:$0xff] %v6170_v14  ;;  %7871 = vst [vmem:[#allocation53_spill] sm:$0xff] %v6172_v24  ;;  %v575_v63 = vand.u32 2147483647, %v563_v12  ;;  %v439_v45 = vsub.f32 %v417_v27, %v5681_v39  ;;  %v7873_v9 = vmov 11   ;;  %v6181_v21 = vmax.f32 %v1545_v0, 0.0  ;;  %v540_v4 = vpop.permute.xlu1 %539 }
 0x2c6   :  { %7872 = vst [vmem:[#allocation54_spill] sm:$0xff] %v6174_v1  ;;  %v6183_v28 = vmax.f32 %v1668_v19, 0.0  ;;  %v2024_v55 = vsub.f32 1.0, %v2012_v47  ;;  %v2240_v5 = vsub.f32 %v6135_v18, %v5679_v32  ;;  %v6188_v52 = vmax.f32 %v1669_v59, 0.0  ;;  %v6192_v27 = vld [vmem:[#allocation2 + $0x18] sm:$0xff] }
 0x2c7   :  { %4855 = vset.pattern.permute.xlu1 %v7873_v9  ;;  %7874 = vst [vmem:[#allocation55_spill] sm:$0xff] %v6181_v21  ;;  %v6190_v53 = vmax.f32 %v1784_v10, 0.0  ;;  %v450_v12 = vand.u32 2147483647, %v438_v16  ;;  %v451_v36 = vand.u32 2147483647, %v439_v45  ;;  %v558_v59 = vsub.f32 %v540_v4, %v5679_v32 }
 0x2c8   :  { %7875 = vst [vmem:[#allocation56_spill] sm:$0xff] %v6183_v28  ;;  %1751 = vperm.xlu1 %4855, %v5589_v23   ;;  %7876 = vst [vmem:[#allocation57_spill] sm:$0xff] %v6188_v52  ;;  %3951 = vperm.xlu0 %4900, %v6192_v27   ;;  %v6195_v0 = vmax.f32 %v1785_v33, 0.0  ;;  %v2025_v19 = vsub.f32 1.0, %v2013_v29  ;;  %v586_v47 = vsub.f32 1.0, %v574_v62  ;;  %v2241_v28 = vsub.f32 %v6135_v18, %v5681_v39 }
 0x2c9   :  { %7877 = vst [vmem:[#allocation58_spill] sm:$0xff] %v6190_v53  ;;  %v587_v24 = vsub.f32 1.0, %v575_v63  ;;  %v462_v14 = vsub.f32 1.0, %v450_v12  ;;  %v463_v61 = vsub.f32 1.0, %v451_v36  ;;  %v6200_v10 = vmax.f32 %v2024_v55, 0.0  ;;  %v6208_v63 = vpop.permute.xlu0 %2991  ;;  %v6210_v36 = vld [vmem:[#allocation2 + $0x28] sm:$0xff] }
 0x2ca   :  { %7878 = vst [vmem:[#allocation59_spill] sm:$0xff] %v6195_v0  ;;  %v2252_v16 = vand.u32 2147483647, %v2240_v5  ;;  %v802_v45 = vsub.f32 %v6153_v11, %v5679_v32  ;;  %v559_v52 = vsub.f32 %v540_v4, %v5681_v39  ;;  %v7880_v33 = vmov 13   ;;  %v660_v0 = vpop.permute.xlu1 %659 }
 0x2cb   :  { %7879 = vst [vmem:[#allocation60_spill] sm:$0xff] %v6200_v10  ;;  %v803_v62 = vsub.f32 %v6153_v11, %v5681_v39  ;;  %v474_v29 = vmax.f32 %v462_v14, 0.0  ;;  %v475_v18 = vmax.f32 %v463_v61, 0.0  ;;  %v570_v12 = vand.u32 2147483647, %v558_v59 }
 0x2cc   :  { %4856 = vset.pattern.permute.xlu1 %v7880_v33  ;;  %3959 = vperm.xlu0 %4900, %v6210_v36   ;;  %v6214_v55 = vmax.f32 %v2025_v19, 0.0  ;;  %v2253_v5 = vand.u32 2147483647, %v2241_v28  ;;  %v2768_v4 = vsub.f32 %v6176_v44, %v5679_v32  ;;  %v571_v10 = vand.u32 2147483647, %v559_v52 }
 0x2cd   :  { %1991 = vperm.xlu1 %4856, %v5589_v23   ;;  %v2769_v61 = vsub.f32 %v6176_v44, %v5681_v39  ;;  %v496_v11 = vadd.f32 %v5898_v57, %v474_v29  ;;  %v503_v14 = vadd.f32 %v5913_v35, %v475_v18  ;;  %v582_v59 = vsub.f32 1.0, %v570_v12 }
 0x2ce   :  { %7881 = vst [vmem:[#allocation61_spill] sm:$0xff] %v6214_v55  ;;  %v6222_v53 = vmax.f32 %v586_v47, 0.0  ;;  %v6224_v41 = vmax.f32 %v587_v24, 0.0  ;;  %v2264_v19 = vsub.f32 1.0, %v2252_v16  ;;  %v583_v55 = vsub.f32 1.0, %v571_v10  ;;  %v3232_v16 = vpop.permute.xlu0 %3231 }
 0x2cf   :  { %v814_v28 = vand.u32 2147483647, %v802_v45  ;;  %v815_v17 = vand.u32 2147483647, %v803_v62  ;;  %v594_v21 = vmax.f32 %v582_v59, 0.0  ;;  %v678_v52 = vsub.f32 %v660_v0, %v5679_v32 }
 0x2d0   :  { %7882 = vst [vmem:[#allocation62_spill] sm:$0xff] %v6222_v53  ;;  %7883 = vst [vmem:[#allocation63_spill] sm:$0xff] %v6224_v41  ;;  %4902 = vset.pattern.permute.xlu0 %v7873_v9  ;;  %v7884_v1 = vmov 15   ;;  %v497_v44 = vrot.slane %v496_v11, 4  ;;  %v504_v57 = vrot.slane %v503_v14, 4  ;;  %v595_v29 = vmax.f32 %v583_v55, 0.0 }
 0x2d1   :  { %4857 = vset.pattern.permute.xlu1 %v7884_v1  ;;  %v679_v35 = vsub.f32 %v660_v0, %v5681_v39  ;;  %1735 = vperm.xlu0 %4902, %v5506_v54   ;;  %v6234_v24 = vadd.f32 %v5992_v56, %v5970_v49  ;;  %v2780_v47 = vand.u32 2147483647, %v2768_v4  ;;  %v2781_v10 = vand.u32 2147483647, %v2769_v61 }
 0x2d2   :  { %2231 = vperm.xlu1 %4857, %v5589_v23   ;;  %v690_v45 = vand.u32 2147483647, %v678_v52  ;;  %v2265_v62 = vsub.f32 1.0, %v2253_v5  ;;  %v3008_v18 = vsub.f32 %v6208_v63, %v5679_v32  ;;  %v616_v12 = vadd.f32 %v6098_v30, %v594_v21 }
 0x2d3   :  { %v691_v55 = vand.u32 2147483647, %v679_v35  ;;  %v826_v0 = vsub.f32 1.0, %v814_v28  ;;  %v827_v59 = vsub.f32 1.0, %v815_v17  ;;  %v623_v9 = vadd.f32 %v6104_v34, %v595_v29  ;;  %v780_v35 = vpop.permute.xlu1 %779 }
 0x2d4   :  { %v702_v41 = vsub.f32 1.0, %v690_v45  ;;  %v498_v53 = vadd.f32 %v497_v44, %v496_v11  ;;  %v505_v1 = vadd.f32 %v504_v57, %v503_v14  ;;  %v3009_v49 = vsub.f32 %v6208_v63, %v5681_v39  ;;  %v2760_v44 = vpop.permute.xlu0 %2759 }
 0x2d5   :  { %v703_v56 = vsub.f32 1.0, %v691_v55  ;;  %1747 = vperm.xlu0 %4902, %v5591_v22   ;;  %v6244_v5 = vmax.f32 %v2264_v19, 0.0  ;;  %v2792_v4 = vsub.f32 1.0, %v2780_v47  ;;  %v2793_v30 = vsub.f32 1.0, %v2781_v10 }
 0x2d6   :  { %4858 = vset.pattern.permute.xlu1 %v7828_v60  ;;  %v714_v21 = vmax.f32 %v702_v41, 0.0  ;;  %v3020_v17 = vand.u32 2147483647, %v3008_v18  ;;  %v617_v34 = vrot.slane %v616_v12, 4  ;;  %v3248_v61 = vsub.f32 %v3232_v16, %v5679_v32 }
 0x2d7   :  { %7885 = vst [vmem:[#allocation64_spill] sm:$0xff] %v6244_v5  ;;  %426 = vperm.xlu1 %4858, %v5591_v22   ;;  %v715_v11 = vmax.f32 %v703_v56, 0.0  ;;  %v6248_v14 = vmax.f32 %v2265_v62, 0.0  ;;  %v6250_v63 = vmax.f32 %v826_v0, 0.0  ;;  %v624_v28 = vrot.slane %v623_v9, 4 }
 0x2d8   :  { %v3249_v52 = vsub.f32 %v3232_v16, %v5681_v39  ;;  %v6253_v19 = vmax.f32 %v827_v59, 0.0  ;;  %v499_v57 = vrot.slane %v498_v53, 2  ;;  %v506_v29 = vrot.slane %v505_v1, 2 }
 0x2d9   :  { %7886 = vst [vmem:[#allocation65_spill] sm:$0xff] %v6248_v14  ;;  %7887 = vst [vmem:[#allocation66_spill] sm:$0xff] %v6250_v63  ;;  %v3021_v41 = vand.u32 2147483647, %v3009_v49  ;;  %4071 = vperm.xlu0 %4902, %v6192_v27   ;;  %v6256_v47 = vmax.f32 %v2792_v4, 0.0  ;;  %v6258_v10 = vmax.f32 %v2793_v30, 0.0  ;;  %v736_v45 = vadd.f32 %v5917_v7, %v714_v21 }
 0x2da   :  { %7888 = vst [vmem:[#allocation67_spill] sm:$0xff] %v6253_v19  ;;  %v743_v62 = vadd.f32 %v5923_v43, %v715_v11  ;;  %v3032_v16 = vsub.f32 1.0, %v3020_v17  ;;  %v618_v18 = vadd.f32 %v617_v34, %v616_v12  ;;  %v3260_v55 = vand.u32 2147483647, %v3248_v61  ;;  %v6268_v21 = vld [vmem:[#allocation2 + $0x20] sm:$0xff] }
 0x2db   :  { %7889 = vst [vmem:[#allocation68_spill] sm:$0xff] %v6256_v47  ;;  %7890 = vst [vmem:[#allocation69_spill] sm:$0xff] %v6258_v10  ;;  %4860 = vset.pattern.permute.xlu1 %v7830_v2  ;;  %v2772_v0 = vsub.f32 %v2760_v44, %v5679_v32  ;;  %v625_v59 = vadd.f32 %v624_v28, %v623_v9  ;;  %v3261_v49 = vand.u32 2147483647, %v3249_v52  ;;  %v3033_v7 = vsub.f32 1.0, %v3021_v41  ;;  %v900_v47 = vpop.permute.xlu1 %899 }
 0x2dc   :  { %667 = vperm.xlu1 %4860, %v5591_v22   ;;  %v798_v56 = vsub.f32 %v780_v35, %v5679_v32  ;;  %v799_v4 = vsub.f32 %v780_v35, %v5681_v39  ;;  %v500_v30 = vadd.f32 %v499_v57, %v498_v53  ;;  %v507_v10 = vadd.f32 %v506_v29, %v505_v1 }
 0x2dd   :  { %v2773_v43 = vsub.f32 %v2760_v44, %v5681_v39  ;;  %4075 = vperm.xlu0 %4902, %v6268_v21   ;;  %v737_v12 = vrot.slane %v736_v45, 4  ;;  %v744_v17 = vrot.slane %v743_v62, 4  ;;  %v6271_v11 = vmax.f32 %v3032_v16, 0.0 }
 0x2de   :  { %v810_v34 = vand.u32 2147483647, %v798_v56  ;;  %v811_v61 = vand.u32 2147483647, %v799_v4  ;;  %v619_v9 = vrot.slane %v618_v18, 2  ;;  %v3272_v28 = vsub.f32 1.0, %v3260_v55 }
 0x2df   :  { %7891 = vst [vmem:[#allocation70_spill] sm:$0xff] %v6271_v11  ;;  %v2784_v52 = vand.u32 2147483647, %v2772_v0  ;;  %v626_v1 = vrot.slane %v625_v59, 2  ;;  %v3273_v53 = vsub.f32 1.0, %v3261_v49  ;;  %v501_v29 = vrot.slane %v500_v30, 1 }
 0x2e0   :  { %4862 = vset.pattern.permute.xlu1 %v7833_v51  ;;  %v822_v57 = vsub.f32 1.0, %v810_v34  ;;  %v823_v44 = vsub.f32 1.0, %v811_v61  ;;  %v508_v41 = vrot.slane %v507_v10, 1  ;;  %v6275_v35 = vmax.f32 %v3033_v7, 0.0  ;;  %v3000_v61 = vpop.permute.xlu0 %2999 }
 0x2e1   :  { %907 = vperm.xlu1 %4862, %v5591_v22   ;;  %v2785_v56 = vand.u32 2147483647, %v2773_v43  ;;  %v7893_v4 = vmov 12   ;;  %v738_v16 = vadd.f32 %v737_v12, %v736_v45  ;;  %v745_v11 = vadd.f32 %v744_v17, %v743_v62 }
 0x2e2   :  { %7892 = vst [vmem:[#allocation71_spill] sm:$0xff] %v6275_v35  ;;  %4904 = vset.pattern.permute.xlu0 %v7893_v4  ;;  %v834_v55 = vmax.f32 %v822_v57, 0.0  ;;  %v918_v0 = vsub.f32 %v900_v47, %v5679_v32  ;;  %v620_v19 = vadd.f32 %v619_v9, %v618_v18  ;;  %v2796_v49 = vsub.f32 1.0, %v2784_v52  ;;  %v1020_v57 = vpop.permute.xlu1 %1019 }
 0x2e3   :  { %1851 = vperm.xlu0 %4904, %v5504_v37   ;;  %v835_v34 = vmax.f32 %v823_v44, 0.0  ;;  %v919_v63 = vsub.f32 %v900_v47, %v5681_v39  ;;  %v627_v14 = vadd.f32 %v626_v1, %v625_v59  ;;  %v6281_v5 = vmax.f32 %v3272_v28, 0.0 }
 0x2e4   :  { %v6283_v7 = vmax.f32 %v3273_v53, 0.0  ;;  %v930_v43 = vand.u32 2147483647, %v918_v0  ;;  %v7896_v35 = vmov 6   ;;  %v502_v45 = vadd.f32 %v501_v29, %v500_v30 }
 0x2e5   :  { %7894 = vst [vmem:[#allocation72_spill] sm:$0xff] %v6281_v5  ;;  %4863 = vset.pattern.permute.xlu1 %v7896_v35  ;;  %v2797_v62 = vsub.f32 1.0, %v2785_v56  ;;  %v856_v12 = vadd.f32 %v6106_v48, %v834_v55  ;;  %v931_v17 = vand.u32 2147483647, %v919_v63  ;;  %v509_v18 = vadd.f32 %v508_v41, %v507_v10  ;;  %v3240_v56 = vpop.permute.xlu0 %3239 }
 0x2e6   :  { %7895 = vst [vmem:[#allocation73_spill] sm:$0xff] %v6283_v7  ;;  %1147 = vperm.xlu1 %4863, %v5591_v22   ;;  %v739_v9 = vrot.slane %v738_v16, 2  ;;  %v746_v52 = vrot.slane %v745_v11, 2  ;;  %v942_v47 = vsub.f32 1.0, %v930_v43  ;;  %v621_v59 = vrot.slane %v620_v19, 1 }
 0x2e7   :  { %1863 = vperm.xlu0 %4904, %v5557_v46   ;;  %v6289_v28 = vmax.f32 %v2796_v49, 0.0  ;;  %v863_v1 = vadd.f32 %v6112_v42, %v835_v34  ;;  %v943_v53 = vsub.f32 1.0, %v931_v17  ;;  %v628_v30 = vrot.slane %v627_v14, 1 }
 0x2e8   :  { %v3012_v44 = vsub.f32 %v3000_v61, %v5679_v32  ;;  %v954_v48 = vmax.f32 %v942_v47, 0.0  ;;  %v1038_v63 = vsub.f32 %v1020_v57, %v5679_v32  ;;  %v857_v29 = vrot.slane %v856_v12, 4 }
 0x2e9   :  { %7897 = vst [vmem:[#allocation74_spill] sm:$0xff] %v6289_v28  ;;  %v3013_v10 = vsub.f32 %v3000_v61, %v5681_v39  ;;  %v955_v41 = vmax.f32 %v943_v53, 0.0  ;;  %v1039_v55 = vsub.f32 %v1020_v57, %v5681_v39  ;;  %v740_v0 = vadd.f32 %v739_v9, %v738_v16  ;;  %v6304_v16 = vld [vmem:[#allocation2 + $0x10] sm:$0xff] }
 0x2ea   :  { %4864 = vset.pattern.permute.xlu1 %v7854_v25  ;;  %v747_v49 = vadd.f32 %v746_v52, %v745_v11  ;;  %v976_v42 = vadd.f32 %v5926_v58, %v954_v48  ;;  %v1050_v34 = vand.u32 2147483647, %v1038_v63  ;;  %v6300_v43 = vmax.f32 %v2797_v62, 0.0 }
 0x2eb   :  { %1871 = vperm.xlu0 %4904, %v5589_v23   ;;  %1387 = vperm.xlu1 %4864, %v5591_v22   ;;  %v864_v17 = vrot.slane %v863_v1, 4  ;;  %v983_v61 = vadd.f32 %v5929_v13, %v955_v41  ;;  %v1051_v47 = vand.u32 2147483647, %v1039_v55  ;;  %v622_v53 = vadd.f32 %v621_v59, %v620_v19 }
 0x2ec   :  { %7898 = vst [vmem:[#allocation75_spill] sm:$0xff] %v6300_v43  ;;  %v3024_v28 = vand.u32 2147483647, %v3012_v44  ;;  %v3252_v57 = vsub.f32 %v3240_v56, %v5679_v32  ;;  %v1062_v7 = vsub.f32 1.0, %v1050_v34  ;;  %v858_v11 = vadd.f32 %v857_v29, %v856_v12 }
 0x2ed   :  { %v3025_v58 = vand.u32 2147483647, %v3013_v10  ;;  %v977_v9 = vrot.slane %v976_v42, 4  ;;  %v1063_v52 = vsub.f32 1.0, %v1051_v47  ;;  %v629_v48 = vadd.f32 %v628_v30, %v627_v14  ;;  %v2876_v14 = vpop.permute.xlu0 %2875  ;;  %v1140_v47 = vpop.permute.xlu1 %1139 }
 0x2ee   :  { %v741_v63 = vrot.slane %v740_v0, 1  ;;  %v748_v5 = vrot.slane %v747_v49, 1  ;;  %v1074_v62 = vmax.f32 %v1062_v7, 0.0  ;;  %v865_v13 = vadd.f32 %v864_v17, %v863_v1 }
 0x2ef   :  { %4187 = vperm.xlu0 %4904, %v6304_v16   ;;  %4865 = vset.pattern.permute.xlu1 %v7869_v50  ;;  %v984_v19 = vrot.slane %v983_v61, 4  ;;  %v3253_v59 = vsub.f32 %v3240_v56, %v5681_v39  ;;  %v1075_v44 = vmax.f32 %v1063_v52, 0.0  ;;  %v646_v41 = vadd.f32 %v622_v53, %v502_v45 }
 0x2f0   :  { %1627 = vperm.xlu1 %4865, %v5591_v22   ;;  %v3036_v12 = vsub.f32 1.0, %v3024_v28  ;;  %v3264_v29 = vand.u32 2147483647, %v3252_v57  ;;  %v1096_v10 = vadd.f32 %v6143_v38, %v1074_v62  ;;  %v859_v30 = vrot.slane %v858_v11, 2 }
 0x2f1   :  { %v3037_v55 = vsub.f32 1.0, %v3025_v58  ;;  %v978_v7 = vadd.f32 %v977_v9, %v976_v42  ;;  %v1103_v34 = vadd.f32 %v6148_v8, %v1075_v44  ;;  %v647_v43 = vadd.f32 %v629_v48, %v509_v18  ;;  %v3116_v48 = vpop.permute.xlu0 %3115  ;;  %v1260_v44 = vpop.permute.xlu1 %1259 }
 0x2f2   :  { %v742_v1 = vadd.f32 %v741_v63, %v740_v0  ;;  %v749_v17 = vadd.f32 %v748_v5, %v747_v49  ;;  %v1097_v50 = vrot.slane %v1096_v10, 4  ;;  %v866_v56 = vrot.slane %v865_v13, 2 }
 0x2f3   :  { %4183 = vperm.xlu0 %4904, %v6132_v6   ;;  %v985_v52 = vadd.f32 %v984_v19, %v983_v61  ;;  %v3265_v45 = vand.u32 2147483647, %v3253_v59  ;;  %v1104_v28 = vrot.slane %v1103_v34, 4  ;;  %v6314_v38 = vmax.f32 %v3036_v12, 0.0 }
 0x2f4   :  { %4866 = vset.pattern.permute.xlu1 %v7893_v4  ;;  %v3276_v53 = vsub.f32 1.0, %v3264_v29  ;;  %v1158_v42 = vsub.f32 %v1140_v47, %v5679_v32  ;;  %v1159_v8 = vsub.f32 %v1140_v47, %v5681_v39  ;;  %v860_v18 = vadd.f32 %v859_v30, %v858_v11 }
 0x2f5   :  { %7899 = vst [vmem:[#allocation76_spill] sm:$0xff] %v6314_v38  ;;  %1867 = vperm.xlu1 %4866, %v5591_v22   ;;  %v6319_v5 = vmax.f32 %v3037_v55, 0.0  ;;  %v979_v0 = vrot.slane %v978_v7, 2  ;;  %v1098_v49 = vadd.f32 %v1097_v50, %v1096_v10  ;;  %v766_v57 = vadd.f32 %v742_v1, %v646_v41 }
 0x2f6   :  { %v1105_v61 = vadd.f32 %v1104_v28, %v1103_v34  ;;  %v1170_v58 = vand.u32 2147483647, %v1158_v42  ;;  %v1171_v9 = vand.u32 2147483647, %v1159_v8  ;;  %v6322_v63 = vadd.f32 %v749_v17, %v647_v43  ;;  %v3460_v8 = vpop.permute.xlu0 %3459 }
 0x2f7   :  { %7900 = vst [vmem:[#allocation77_spill] sm:$0xff] %v6319_v5  ;;  %4199 = vperm.xlu0 %4904, %v6210_v36   ;;  %v867_v62 = vadd.f32 %v866_v56, %v865_v13  ;;  %v986_v19 = vrot.slane %v985_v52, 2  ;;  %v3277_v59 = vsub.f32 1.0, %v3265_v45  ;;  %v6324_v12 = vmax.f32 %v3276_v53, 0.0 }
 0x2f8   :  { %v2890_v11 = vsub.f32 %v2876_v14, %v5679_v32  ;;  %v1182_v29 = vsub.f32 1.0, %v1170_v58  ;;  %v1183_v30 = vsub.f32 1.0, %v1171_v9  ;;  %v7902_v50 = vmov 14  }
 0x2f9   :  { %7901 = vst [vmem:[#allocation78_spill] sm:$0xff] %v6324_v12  ;;  %4867 = vset.pattern.permute.xlu1 %v7902_v50  ;;  %v861_v41 = vrot.slane %v860_v18, 1  ;;  %v980_v10 = vadd.f32 %v979_v0, %v978_v7  ;;  %v1099_v55 = vrot.slane %v1098_v49, 2  ;;  %v2891_v34 = vsub.f32 %v2876_v14, %v5681_v39 }
 0x2fa   :  { %2107 = vperm.xlu1 %4867, %v5591_v22   ;;  %v1106_v43 = vrot.slane %v1105_v61, 2  ;;  %v1194_v13 = vmax.f32 %v1182_v29, 0.0  ;;  %v1195_v47 = vmax.f32 %v1183_v30, 0.0  ;;  %v1278_v1 = vsub.f32 %v1260_v44, %v5679_v32 }
 0x2fb   :  { %4906 = vset.pattern.permute.xlu0 %v7880_v33  ;;  %v868_v17 = vrot.slane %v867_v62, 1  ;;  %v987_v56 = vadd.f32 %v986_v19, %v985_v52  ;;  %v6332_v45 = vmax.f32 %v3277_v59, 0.0  ;;  %v1279_v28 = vsub.f32 %v1260_v44, %v5681_v39 }
 0x2fc   :  { %1975 = vperm.xlu0 %4906, %v5506_v54   ;;  %v2902_v7 = vand.u32 2147483647, %v2890_v11  ;;  %v1216_v14 = vadd.f32 %v5939_v3, %v1194_v13  ;;  %v1223_v53 = vadd.f32 %v5947_v40, %v1195_v47  ;;  %v1290_v42 = vand.u32 2147483647, %v1278_v1 }
 0x2fd   :  { %7903 = vst [vmem:[#allocation79_spill] sm:$0xff] %v6332_v45  ;;  %v862_v0 = vadd.f32 %v861_v41, %v860_v18  ;;  %v2903_v58 = vand.u32 2147483647, %v2891_v34  ;;  %v3130_v9 = vsub.f32 %v3116_v48, %v5679_v32  ;;  %v3131_v29 = vsub.f32 %v3116_v48, %v5681_v39  ;;  %v6344_v18 = vpop.permute.xlu1 %1379 }
 0x2fe   :  { %4869 = vset.pattern.permute.xlu1 %v7837_v31  ;;  %v981_v52 = vrot.slane %v980_v10, 1  ;;  %v1100_v19 = vadd.f32 %v1099_v55, %v1098_v49  ;;  %v1107_v59 = vadd.f32 %v1106_v43, %v1105_v61  ;;  %v1291_v44 = vand.u32 2147483647, %v1279_v28 }
 0x2ff   :  { %2871 = vperm.xlu1 %4869, %v6192_v27   ;;  %v988_v11 = vrot.slane %v987_v56, 1  ;;  %v1302_v3 = vsub.f32 1.0, %v1290_v42  ;;  %v3482_v40 = vsub.f32 %v3460_v8, %v5679_v32  ;;  %v3483_v30 = vsub.f32 %v3460_v8, %v5681_v39 }
 0x300   :  { %1987 = vperm.xlu0 %4906, %v5591_v22   ;;  %v869_v41 = vadd.f32 %v868_v17, %v867_v62  ;;  %v2914_v48 = vsub.f32 1.0, %v2902_v7  ;;  %v1217_v34 = vrot.slane %v1216_v14, 4  ;;  %v1224_v13 = vrot.slane %v1223_v53, 4 }
 0x301   :  { %v886_v47 = vadd.f32 %v862_v0, %v766_v57  ;;  %v2915_v49 = vsub.f32 1.0, %v2903_v58  ;;  %v3142_v61 = vand.u32 2147483647, %v3130_v9  ;;  %v3143_v55 = vand.u32 2147483647, %v3131_v29  ;;  %v1500_v29 = vpop.permute.xlu1 %1499 }
 0x302   :  { %v982_v43 = vadd.f32 %v981_v52, %v980_v10  ;;  %v1101_v1 = vrot.slane %v1100_v19, 1  ;;  %v1108_v28 = vrot.slane %v1107_v59, 1  ;;  %v1303_v42 = vsub.f32 1.0, %v1291_v44  ;;  %v6353_v10 = vpop.permute.xlu0 %3471 }
 0x303   :  { %4871 = vset.pattern.permute.xlu1 %v7840_v20  ;;  %v989_v45 = vadd.f32 %v988_v11, %v987_v56  ;;  %v1314_v8 = vmax.f32 %v1302_v3, 0.0  ;;  %v3494_v12 = vand.u32 2147483647, %v3482_v40  ;;  %v3495_v5 = vand.u32 2147483647, %v3483_v30 }
 0x304   :  { %4311 = vperm.xlu0 %4906, %v6192_v27   ;;  %3111 = vperm.xlu1 %4871, %v6192_v27   ;;  %v887_v62 = vadd.f32 %v869_v41, %v6322_v63  ;;  %v6351_v57 = vmax.f32 %v2914_v48, 0.0  ;;  %v1218_v17 = vadd.f32 %v1217_v34, %v1216_v14  ;;  %v1225_v7 = vadd.f32 %v1224_v13, %v1223_v53 }
 0x305   :  { %v6355_v0 = vmax.f32 %v2915_v49, 0.0  ;;  %v3154_v58 = vsub.f32 1.0, %v3142_v61  ;;  %v3155_v9 = vsub.f32 1.0, %v3143_v55  ;;  %v1398_v56 = vsub.f32 %v6344_v18, %v5679_v32 }
 0x306   :  { %7904 = vst [vmem:[#allocation80_spill] sm:$0xff] %v6351_v57  ;;  %v1006_v52 = vadd.f32 %v982_v43, %v886_v47  ;;  %v1102_v44 = vadd.f32 %v1101_v1, %v1100_v19  ;;  %v1109_v11 = vadd.f32 %v1108_v28, %v1107_v59  ;;  %v1315_v3 = vmax.f32 %v1303_v42, 0.0  ;;  %v1016_v49 = vpop.permute.xlu0 %1015  ;;  %v1620_v1 = vpop.permute.xlu1 %1619 }
 0x307   :  { %7905 = vst [vmem:[#allocation81_spill] sm:$0xff] %v6355_v0  ;;  %v1007_v40 = vadd.f32 %v989_v45, %v887_v62  ;;  %v1336_v63 = vadd.f32 %v6165_v26, %v1314_v8  ;;  %v3506_v30 = vsub.f32 1.0, %v3494_v12  ;;  %v3507_v14 = vsub.f32 1.0, %v3495_v5 }
 0x308   :  { %4315 = vperm.xlu0 %4906, %v6268_v21   ;;  %4873 = vset.pattern.permute.xlu1 %v7828_v60  ;;  %v1219_v53 = vrot.slane %v1218_v17, 2  ;;  %v1226_v41 = vrot.slane %v1225_v7, 2  ;;  %v1399_v48 = vsub.f32 %v6344_v18, %v5681_v39  ;;  %v1518_v34 = vsub.f32 %v1500_v29, %v5679_v32 }
 0x309   :  { %2744 = vperm.xlu1 %4873, %v6304_v16   ;;  %v6366_v19 = vmax.f32 %v3154_v58, 0.0  ;;  %v6368_v45 = vmax.f32 %v3155_v9, 0.0  ;;  %v1410_v26 = vand.u32 2147483647, %v1398_v56  ;;  %v1519_v5 = vsub.f32 %v1500_v29, %v5681_v39 }
 0x30a   :  { %v6371_v12 = vadd.f32 %v1102_v44, %v1006_v52  ;;  %v6373_v59 = vadd.f32 %v1109_v11, %v1007_v40  ;;  %v1343_v13 = vadd.f32 %v6168_v15, %v1315_v3  ;;  %v1530_v47 = vand.u32 2147483647, %v1518_v34 }
 0x30b   :  { %7906 = vst [vmem:[#allocation82_spill] sm:$0xff] %v6366_v19  ;;  %7907 = vst [vmem:[#allocation83_spill] sm:$0xff] %v6368_v45  ;;  %v1337_v18 = vrot.slane %v1336_v63, 4  ;;  %v6376_v61 = vmax.f32 %v3506_v30, 0.0  ;;  %v6378_v55 = vmax.f32 %v3507_v14, 0.0  ;;  %v1220_v28 = vadd.f32 %v1219_v53, %v1218_v17 }
 0x30c   :  { %v1531_v43 = vand.u32 2147483647, %v1519_v5  ;;  %4908 = vset.pattern.permute.xlu0 %v7902_v50  ;;  %v6381_v42 = vadd.f32 %v1226_v41, %v1225_v7  ;;  %v1411_v8 = vand.u32 2147483647, %v1399_v48  ;;  %v1542_v62 = vsub.f32 1.0, %v1530_v47  ;;  %v7910_v48 = vld [vmem:[#allocation54_spill] sm:$0xff] }
 0x30d   :  { %7908 = vst [vmem:[#allocation84_spill] sm:$0xff] %v6376_v61  ;;  %7909 = vst [vmem:[#allocation85_spill] sm:$0xff] %v6378_v55  ;;  %2091 = vperm.xlu0 %4908, %v5504_v37   ;;  %4874 = vset.pattern.permute.xlu1 %v7837_v31  ;;  %v1422_v15 = vsub.f32 1.0, %v1410_v26  ;;  %v1036_v9 = vsub.f32 %v1016_v49, %v5679_v32  ;;  %v1037_v56 = vsub.f32 %v1016_v49, %v5681_v39  ;;  %v7911_v47 = vld [vmem:[#allocation55_spill] sm:$0xff] }
 0x30e   :  { %v1543_v58 = vsub.f32 1.0, %v1531_v43  ;;  %2867 = vperm.xlu1 %4874, %v6304_v16   ;;  %v1344_v29 = vrot.slane %v1343_v13, 4  ;;  %v1554_v52 = vmax.f32 %v1542_v62, 0.0  ;;  %v1638_v17 = vsub.f32 %v1620_v1, %v5679_v32 }
 0x30f   :  { %v1639_v7 = vsub.f32 %v1620_v1, %v5681_v39  ;;  %v1338_v44 = vadd.f32 %v1337_v18, %v1336_v63  ;;  %v1048_v3 = vand.u32 2147483647, %v1036_v9  ;;  %v1049_v37 = vand.u32 2147483647, %v1037_v56 }
 0x310   :  { %v1555_v11 = vmax.f32 %v1543_v58, 0.0  ;;  %v1423_v40 = vsub.f32 1.0, %v1411_v8  ;;  %v3488_v30 = vsub.f32 %v6353_v10, %v5679_v32  ;;  %v1650_v14 = vand.u32 2147483647, %v1638_v17  ;;  %v1028_v58 = vpop.permute.xlu0 %1027 }
 0x311   :  { %v1651_v53 = vand.u32 2147483647, %v1639_v7  ;;  %2103 = vperm.xlu0 %4908, %v5557_v46   ;;  %v3489_v41 = vsub.f32 %v6353_v10, %v5681_v39  ;;  %v1576_v34 = vadd.f32 %v7910_v48, %v1554_v52  ;;  %v1060_v26 = vsub.f32 1.0, %v1048_v3 }
 0x312   :  { %v1061_v5 = vsub.f32 1.0, %v1049_v37  ;;  %4875 = vset.pattern.permute.xlu1 %v7830_v2  ;;  %v1221_v63 = vrot.slane %v1220_v28, 1  ;;  %v1583_v49 = vadd.f32 %v7911_v47, %v1555_v11  ;;  %v1662_v18 = vsub.f32 1.0, %v1650_v14  ;;  %v7912_v11 = vld [vmem:[#allocation21_spill] sm:$0xff]  ;;  %v7913_v37 = vld [vmem:[#allocation22_spill] sm:$0xff] }
 0x313   :  { %v1663_v43 = vsub.f32 1.0, %v1651_v53  ;;  %2987 = vperm.xlu1 %4875, %v6304_v16   ;;  %v1339_v1 = vrot.slane %v1338_v44, 2  ;;  %v1345_v8 = vadd.f32 %v1344_v29, %v1343_v13  ;;  %v1072_v62 = vmax.f32 %v1060_v26, 0.0  ;;  %v7914_v13 = vld [vmem:[#allocation26_spill] sm:$0xff]  ;;  %v7915_v26 = vld [vmem:[#allocation27_spill] sm:$0xff] }
 0x314   :  { %v1073_v46 = vmax.f32 %v1061_v5, 0.0  ;;  %v1228_v10 = vrot.slane %v6381_v42, 1  ;;  %v6400_v9 = vmax.f32 %v1422_v15, 0.0  ;;  %v1674_v56 = vmax.f32 %v1662_v18, 0.0 }
 0x315   :  { %v1675_v52 = vmax.f32 %v1663_v43, 0.0  ;;  %2111 = vperm.xlu0 %4908, %v5589_v23   ;;  %v3500_v17 = vand.u32 2147483647, %v3488_v30  ;;  %v1577_v7 = vrot.slane %v1576_v34, 4  ;;  %v1082_v3 = vadd.f32 %v1072_v62, %v7912_v11  ;;  %v1740_v23 = vpop.permute.xlu1 %1739 }
 0x316   :  { %v1089_v14 = vadd.f32 %v1073_v46, %v7913_v37  ;;  %v3501_v53 = vand.u32 2147483647, %v3489_v41  ;;  %v1584_v48 = vrot.slane %v1583_v49, 4  ;;  %v1696_v29 = vadd.f32 %v7914_v13, %v1674_v56 }
 0x317   :  { %v1703_v5 = vadd.f32 %v7915_v26, %v1675_v52  ;;  %4876 = vset.pattern.permute.xlu1 %v7840_v20  ;;  %v1340_v15 = vadd.f32 %v1339_v1, %v1338_v44  ;;  %v1346_v47 = vrot.slane %v1345_v8, 2  ;;  %v6408_v18 = vmax.f32 %v1423_v40, 0.0  ;;  %v6415_v1 = vpop.permute.xlu0 %3343 }
 0x318   :  { %v1083_v43 = vrot.slane %v1082_v3, 4  ;;  %3107 = vperm.xlu1 %4876, %v6304_v16   ;;  %v1222_v30 = vadd.f32 %v1221_v63, %v1220_v28  ;;  %v1090_v62 = vrot.slane %v1089_v14, 4  ;;  %v1697_v11 = vrot.slane %v1696_v29, 4 }
 0x319   :  { %v1042_v41 = vsub.f32 %v1028_v58, %v5679_v32  ;;  %4427 = vperm.xlu0 %4908, %v6304_v16   ;;  %v1229_v46 = vadd.f32 %v1228_v10, %v6381_v42  ;;  %v3512_v56 = vsub.f32 1.0, %v3500_v17  ;;  %v1578_v52 = vadd.f32 %v1577_v7, %v1576_v34 }
 0x31a   :  { %v1043_v44 = vsub.f32 %v1028_v58, %v5681_v39  ;;  %v3513_v40 = vsub.f32 1.0, %v3501_v53  ;;  %v1585_v37 = vadd.f32 %v1584_v48, %v1583_v49  ;;  %v1704_v13 = vrot.slane %v1703_v5, 4  ;;  %v6423_v53 = vpop.permute.xlu1 %1859 }
 0x31b   :  { %v1758_v26 = vsub.f32 %v1740_v23, %v5679_v32  ;;  %v1341_v28 = vrot.slane %v1340_v15, 1  ;;  %v1347_v63 = vadd.f32 %v1346_v47, %v1345_v8  ;;  %v1084_v55 = vadd.f32 %v1083_v43, %v1082_v3 }
 0x31c   :  { %v1759_v61 = vsub.f32 %v1740_v23, %v5681_v39  ;;  %4877 = vset.pattern.permute.xlu1 %v7833_v51  ;;  %v1091_v38 = vadd.f32 %v1090_v62, %v1089_v14  ;;  %v1698_v42 = vadd.f32 %v1697_v11, %v1696_v29  ;;  %v1054_v10 = vand.u32 2147483647, %v1042_v41  ;;  %v6426_v62 = vpop.permute.xlu0 %3355 }
 0x31d   :  { %v1770_v34 = vand.u32 2147483647, %v1758_v26  ;;  %4423 = vperm.xlu0 %4908, %v6132_v6   ;;  %3227 = vperm.xlu1 %4877, %v6304_v16   ;;  %v1246_v49 = vadd.f32 %v1222_v30, %v6371_v12  ;;  %v1579_v58 = vrot.slane %v1578_v52, 2  ;;  %v1055_v17 = vand.u32 2147483647, %v1043_v44  ;;  %v7919_v44 = vld [vmem:[#allocation11_spill] sm:$0xff] }
 0x31e   :  { %v1771_v7 = vand.u32 2147483647, %v1759_v61  ;;  %v1247_v8 = vadd.f32 %v1229_v46, %v6373_v59  ;;  %v1586_v3 = vrot.slane %v1585_v37, 2  ;;  %v1705_v48 = vadd.f32 %v1704_v13, %v1703_v5  ;;  %v7918_v46 = vld [vmem:[#allocation25_spill] sm:$0xff] }
 0x31f   :  { %v1782_v47 = vsub.f32 1.0, %v1770_v34  ;;  %v1342_v14 = vadd.f32 %v1341_v28, %v1340_v15  ;;  %v1348_v29 = vrot.slane %v1347_v63, 1  ;;  %v1085_v43 = vrot.slane %v1084_v55, 2  ;;  %v7920_v34 = vld [vmem:[#allocation12_spill] sm:$0xff] }
 0x320   :  { %v1783_v23 = vsub.f32 1.0, %v1771_v7  ;;  %v1092_v6 = vrot.slane %v1091_v38, 2  ;;  %v1699_v11 = vrot.slane %v1698_v42, 2  ;;  %v1066_v41 = vsub.f32 1.0, %v1054_v10 }
 0x321   :  { %v1794_v12 = vmax.f32 %v1782_v47, 0.0  ;;  %4439 = vperm.xlu0 %4908, %v6210_v36   ;;  %4879 = vset.pattern.permute.xlu1 %v7837_v31  ;;  %v6430_v61 = vmax.f32 %v3512_v56, 0.0  ;;  %v6432_v59 = vmax.f32 %v3513_v40, 0.0  ;;  %v1580_v5 = vadd.f32 %v1579_v58, %v1578_v52  ;;  %v7921_v56 = vld [vmem:[#allocation58_spill] sm:$0xff]  ;;  %v1980_v47 = vpop.permute.xlu1 %1979 }
 0x322   :  { %v1067_v30 = vsub.f32 1.0, %v1055_v17  ;;  %2879 = vperm.xlu1 %4879, %v6210_v36   ;;  %v1587_v15 = vadd.f32 %v1586_v3, %v1585_v37  ;;  %v6437_v13 = vadd.f32 %v7919_v44, %v7918_v46  ;;  %v1706_v26 = vrot.slane %v1705_v48, 2 }
 0x323   :  { %7916 = vst [vmem:[#allocation54_spill] sm:$0xff] %v6430_v61  ;;  %7917 = vst [vmem:[#allocation55_spill] sm:$0xff] %v6432_v59  ;;  %v1795_v28 = vmax.f32 %v1783_v23, 0.0  ;;  %v1349_v10 = vadd.f32 %v1348_v29, %v1347_v63  ;;  %v6441_v7 = vadd.f32 %v7920_v34, %v6234_v24  ;;  %v1086_v31 = vadd.f32 %v1085_v43, %v1084_v55  ;;  %v6455_v55 = vpop.permute.xlu0 %3479 }
 0x324   :  { %v1816_v40 = vadd.f32 %v7921_v56, %v1794_v12  ;;  %v6444_v52 = vadd.f32 %v1342_v14, %v1246_v49  ;;  %v1093_v58 = vadd.f32 %v1092_v6, %v1091_v38  ;;  %v1700_v17 = vadd.f32 %v1699_v11, %v1698_v42  ;;  %v7923_v49 = vld [vmem:[#allocation59_spill] sm:$0xff] }
 0x325   :  { %v6446_v37 = vmax.f32 %v1066_v41, 0.0  ;;  %v7922_v3 = vmov 15   ;;  %v1581_v46 = vrot.slane %v1580_v5, 1  ;;  %v6449_v44 = vmax.f32 %v1067_v30, 0.0 }
 0x326   :  { %4910 = vset.pattern.permute.xlu0 %v7922_v3  ;;  %v3364_v63 = vsub.f32 %v6415_v1, %v5679_v32  ;;  %v3365_v24 = vsub.f32 %v6415_v1, %v5681_v39  ;;  %4881 = vset.pattern.permute.xlu1 %v7840_v20  ;;  %v1588_v38 = vrot.slane %v1587_v15, 1  ;;  %v1707_v42 = vadd.f32 %v1706_v26, %v1705_v48 }
 0x327   :  { %2215 = vperm.xlu0 %4910, %v5506_v54   ;;  %v1823_v14 = vadd.f32 %v7923_v49, %v1795_v28  ;;  %v1998_v29 = vsub.f32 %v1980_v47, %v5679_v32  ;;  %3119 = vperm.xlu1 %4881, %v6210_v36   ;;  %v1087_v43 = vrot.slane %v1086_v31, 1  ;;  %v1817_v23 = vrot.slane %v1816_v40, 4 }
 0x328   :  { %v1878_v6 = vsub.f32 %v6423_v53, %v5679_v32  ;;  %v1999_v1 = vsub.f32 %v1980_v47, %v5681_v39  ;;  %v1094_v11 = vrot.slane %v1093_v58, 1  ;;  %v1701_v41 = vrot.slane %v1700_v17, 1 }
 0x329   :  { %v1879_v54 = vsub.f32 %v6423_v53, %v5681_v39  ;;  %v2010_v20 = vand.u32 2147483647, %v1998_v29  ;;  %v6467_v48 = vadd.f32 %v1349_v10, %v1247_v8  ;;  %v3376_v12 = vand.u32 2147483647, %v3364_v63  ;;  %v1372_v10 = vpop.permute.xlu0 %1371 }
 0x32a   :  { %v3377_v30 = vand.u32 2147483647, %v3365_v24  ;;  %v2011_v26 = vand.u32 2147483647, %v1999_v1  ;;  %v1708_v36 = vrot.slane %v1707_v42, 1  ;;  %v1824_v28 = vrot.slane %v1823_v14, 4  ;;  %v6478_v1 = vpop.permute.xlu1 %2099 }
 0x32b   :  { %2227 = vperm.xlu0 %4910, %v5591_v22   ;;  %v3370_v34 = vsub.f32 %v6426_v62, %v5679_v32  ;;  %v2022_v56 = vsub.f32 1.0, %v2010_v20  ;;  %4883 = vset.pattern.permute.xlu1 %v7828_v60  ;;  %v1818_v47 = vadd.f32 %v1817_v23, %v1816_v40  ;;  %v1890_v49 = vand.u32 2147483647, %v1878_v6 }
 0x32c   :  { %v3371_v53 = vsub.f32 %v6426_v62, %v5681_v39  ;;  %v2023_v8 = vsub.f32 1.0, %v2011_v26  ;;  %2754 = vperm.xlu1 %4883, %v6268_v21   ;;  %v6476_v63 = vadd.f32 %v1581_v46, %v1580_v5  ;;  %v1088_v22 = vadd.f32 %v1087_v43, %v1086_v31  ;;  %v7926_v43 = vld [vmem:[#allocation60_spill] sm:$0xff] }
 0x32d   :  { %v1095_v24 = vadd.f32 %v1094_v11, %v1093_v58  ;;  %v1891_v29 = vand.u32 2147483647, %v1879_v54  ;;  %v6480_v59 = vadd.f32 %v1588_v38, %v1587_v15  ;;  %v3388_v20 = vsub.f32 1.0, %v3376_v12  ;;  %v7927_v54 = vld [vmem:[#allocation61_spill] sm:$0xff] }
 0x32e   :  { %v3389_v60 = vsub.f32 1.0, %v3377_v30  ;;  %v2034_v40 = vmax.f32 %v2022_v56, 0.0  ;;  %v6483_v23 = vadd.f32 %v1701_v41, %v1700_v17  ;;  %v1825_v62 = vadd.f32 %v1824_v28, %v1823_v14 }
 0x32f   :  { %4551 = vperm.xlu0 %4910, %v6192_v27   ;;  %v6485_v6 = vand.u32 2147483647, %v3370_v34  ;;  %v2035_v26 = vmax.f32 %v2023_v8, 0.0  ;;  %v6487_v5 = vadd.f32 %v1708_v36, %v1707_v42  ;;  %v1819_v31 = vrot.slane %v1818_v47, 2  ;;  %v2220_v36 = vpop.permute.xlu1 %2219 }
 0x330   :  { %7924 = vst [vmem:[#allocation21_spill] sm:$0xff] %v6483_v23  ;;  %v1902_v58 = vsub.f32 1.0, %v1890_v49  ;;  %v6489_v46 = vand.u32 2147483647, %v3371_v53  ;;  %4885 = vset.pattern.permute.xlu1 %v7830_v2  ;;  %v6493_v15 = vadd.f32 %v1088_v22, %v6437_v13  ;;  %v6496_v38 = vadd.f32 %v1095_v24, %v6441_v7  ;;  %v1384_v2 = vpop.permute.xlu0 %1383 }
 0x331   :  { %7925 = vst [vmem:[#allocation22_spill] sm:$0xff] %v6487_v5  ;;  %v1903_v27 = vsub.f32 1.0, %v1891_v29  ;;  %v1394_v17 = vsub.f32 %v1372_v10, %v5679_v32  ;;  %2995 = vperm.xlu1 %4885, %v6268_v21   ;;  %v6500_v14 = vmax.f32 %v3388_v20, 0.0  ;;  %v6502_v42 = vmax.f32 %v3389_v60, 0.0 }
 0x332   :  { %v2056_v11 = vadd.f32 %v7926_v43, %v2034_v40  ;;  %v1395_v41 = vsub.f32 %v1372_v10, %v5681_v39  ;;  %v1826_v13 = vrot.slane %v1825_v62, 2  ;;  %v3394_v7 = vsub.f32 1.0, %v6485_v6 }
 0x333   :  { %4555 = vperm.xlu0 %4910, %v6268_v21   ;;  %v2063_v12 = vadd.f32 %v7927_v54, %v2035_v26  ;;  %v1406_v30 = vand.u32 2147483647, %v1394_v17  ;;  %v1820_v28 = vadd.f32 %v1819_v31, %v1818_v47  ;;  %v6509_v34 = vmax.f32 %v1902_v58, 0.0 }
 0x334   :  { %v3395_v56 = vsub.f32 1.0, %v6489_v46  ;;  %v1407_v49 = vand.u32 2147483647, %v1395_v41  ;;  %v6512_v53 = vmax.f32 %v1903_v27, 0.0  ;;  %v1400_v10 = vsub.f32 %v1384_v2, %v5679_v32 }
 0x335   :  { %7928 = vst [vmem:[#allocation26_spill] sm:$0xff] %v6509_v34  ;;  %v1418_v8 = vsub.f32 1.0, %v1406_v30  ;;  %v1401_v22 = vsub.f32 %v1384_v2, %v5681_v39  ;;  %4887 = vset.pattern.permute.xlu1 %v7833_v51  ;;  %v2057_v24 = vrot.slane %v2056_v11, 4  ;;  %v2238_v20 = vsub.f32 %v2220_v36, %v5679_v32 }
 0x336   :  { %7929 = vst [vmem:[#allocation27_spill] sm:$0xff] %v6512_v53  ;;  %v1419_v29 = vsub.f32 1.0, %v1407_v49  ;;  %v2239_v47 = vsub.f32 %v2220_v36, %v5681_v39  ;;  %3235 = vperm.xlu1 %4887, %v6268_v21   ;;  %v1827_v60 = vadd.f32 %v1826_v13, %v1825_v62  ;;  %v2064_v40 = vrot.slane %v2063_v12, 4 }
 0x337   :  { %v1412_v6 = vand.u32 2147483647, %v1400_v10  ;;  %v1413_v26 = vand.u32 2147483647, %v1401_v22  ;;  %v1821_v31 = vrot.slane %v1820_v28, 1  ;;  %v1430_v58 = vmax.f32 %v1418_v8, 0.0 }
 0x338   :  { %v2250_v46 = vand.u32 2147483647, %v2238_v20  ;;  %v2251_v27 = vand.u32 2147483647, %v2239_v47  ;;  %v3492_v17 = vsub.f32 %v6455_v55, %v5679_v32  ;;  %v1431_v51 = vmax.f32 %v1419_v29, 0.0  ;;  %v7931_v22 = vld [vmem:[#allocation9_spill] sm:$0xff] }
 0x339   :  { %v1424_v43 = vsub.f32 1.0, %v1412_v6  ;;  %v1425_v41 = vsub.f32 1.0, %v1413_v26  ;;  %v2058_v2 = vadd.f32 %v2057_v24, %v2056_v11  ;;  %v3493_v54 = vsub.f32 %v6455_v55, %v5681_v39  ;;  %v7932_v20 = vld [vmem:[#allocation10_spill] sm:$0xff] }
 0x33a   :  { %v2262_v30 = vsub.f32 1.0, %v2250_v46  ;;  %v2263_v21 = vsub.f32 1.0, %v2251_v27  ;;  %v7930_v62 = vmov 5   ;;  %v2065_v13 = vadd.f32 %v2064_v40, %v2063_v12  ;;  %v7933_v27 = vld [vmem:[#allocation64_spill] sm:$0xff] }
 0x33b   :  { %4888 = vset.pattern.permute.xlu1 %v7930_v62  ;;  %v2118_v36 = vsub.f32 %v6478_v1, %v5679_v32  ;;  %v1436_v49 = vmax.f32 %v1424_v43, 0.0  ;;  %v1437_v8 = vmax.f32 %v1425_v41, 0.0  ;;  %v2119_v10 = vsub.f32 %v6478_v1, %v5681_v39  ;;  %v7934_v1 = vld [vmem:[#allocation65_spill] sm:$0xff] }
 0x33c   :  { %3347 = vperm.xlu1 %4888, %v6304_v16   ;;  %v1442_v11 = vadd.f32 %v7931_v22, %v1430_v58  ;;  %v2274_v24 = vmax.f32 %v2262_v30, 0.0  ;;  %v2275_v29 = vmax.f32 %v2263_v21, 0.0  ;;  %v1828_v55 = vrot.slane %v1827_v60, 1  ;;  %v6536_v58 = vld [vmem:[#allocation2 + $0x18] sm:$0xff]  ;;  %v1392_v22 = vpop.permute.xlu0 %1391 }
 0x33d   :  { %v1449_v47 = vadd.f32 %v7932_v20, %v1431_v51  ;;  %v1456_v6 = vadd.f32 %v1436_v49, %v6400_v9  ;;  %v1463_v12 = vadd.f32 %v1437_v8, %v6408_v18  ;;  %v2059_v40 = vrot.slane %v2058_v2, 2  ;;  %v2740_v18 = vpop.permute.xlu1 %2739 }
 0x33e   :  { %v3504_v26 = vand.u32 2147483647, %v3492_v17  ;;  %v3505_v46 = vand.u32 2147483647, %v3493_v54  ;;  %v2296_v43 = vadd.f32 %v7933_v27, %v2274_v24  ;;  %v2066_v41 = vrot.slane %v2065_v13, 2 }
 0x33f   :  { %v1457_v62 = vrot.slane %v1456_v6, 4  ;;  %v1464_v61 = vrot.slane %v1463_v12, 4  ;;  %v2303_v45 = vadd.f32 %v7934_v1, %v2275_v29  ;;  %v6539_v30 = vmax.f32 %v3394_v7, 0.0 }
 0x340   :  { %3351 = vperm.xlu1 %4888, %v6536_v58   ;;  %v2130_v51 = vand.u32 2147483647, %v2118_v36  ;;  %v2131_v9 = vand.u32 2147483647, %v2119_v10  ;;  %v1443_v21 = vrot.slane %v1442_v11, 4  ;;  %v6541_v49 = vadd.f32 %v1821_v31, %v1820_v28  ;;  %v6547_v36 = vld [vmem:[#allocation2 + $0x28] sm:$0xff] }
 0x341   :  { %7935 = vst [vmem:[#allocation25_spill] sm:$0xff] %v6539_v30  ;;  %v6543_v17 = vmax.f32 %v3395_v56, 0.0  ;;  %v1450_v54 = vrot.slane %v1449_v47, 4  ;;  %v2297_v8 = vrot.slane %v2296_v43, 4  ;;  %v6545_v24 = vadd.f32 %v1828_v55, %v1827_v60 }
 0x342   :  { %7936 = vst [vmem:[#allocation11_spill] sm:$0xff] %v6541_v49  ;;  %v2060_v29 = vadd.f32 %v2059_v40, %v2058_v2  ;;  %v3516_v20 = vsub.f32 1.0, %v3504_v26  ;;  %v1458_v27 = vadd.f32 %v1457_v62, %v1456_v6  ;;  %v2067_v1 = vadd.f32 %v2066_v41, %v2065_v13 }
 0x343   :  { %7937 = vst [vmem:[#allocation12_spill] sm:$0xff] %v6543_v17  ;;  %7938 = vst [vmem:[#allocation58_spill] sm:$0xff] %v6545_v24  ;;  %v3517_v19 = vsub.f32 1.0, %v3505_v46  ;;  %v1465_v7 = vadd.f32 %v1464_v61, %v1463_v12  ;;  %v2304_v30 = vrot.slane %v2303_v45, 4  ;;  %v2142_v28 = vsub.f32 1.0, %v2130_v51  ;;  %v2984_v12 = vpop.permute.xlu1 %2983  ;;  %v6559_v51 = vld [vmem:[#allocation2 + $0x8] sm:$0xff] }
 0x344   :  { %3359 = vperm.xlu1 %4888, %v6547_v36   ;;  %v2143_v31 = vsub.f32 1.0, %v2131_v9  ;;  %v1444_v56 = vadd.f32 %v1443_v21, %v1442_v11  ;;  %v1404_v10 = vsub.f32 %v1392_v22, %v5679_v32  ;;  %v1451_v17 = vadd.f32 %v1450_v54, %v1449_v47 }
 0x345   :  { %v2298_v0 = vadd.f32 %v2297_v8, %v2296_v43  ;;  %v1405_v60 = vsub.f32 %v1392_v22, %v5681_v39  ;;  %v2764_v2 = vsub.f32 %v2740_v18, %v5679_v32  ;;  %v2061_v55 = vrot.slane %v2060_v29, 1 }
 0x346   :  { %v6553_v13 = vmax.f32 %v3516_v20, 0.0  ;;  %v1459_v61 = vrot.slane %v1458_v27, 2  ;;  %v2765_v6 = vsub.f32 %v2740_v18, %v5681_v39  ;;  %v2068_v40 = vrot.slane %v2067_v1, 1 }
 0x347   :  { %v1466_v26 = vrot.slane %v1465_v7, 2  ;;  %v2305_v46 = vadd.f32 %v2304_v30, %v2303_v45  ;;  %v2776_v41 = vand.u32 2147483647, %v2764_v2  ;;  %v6557_v11 = vmax.f32 %v3517_v19, 0.0 }
 0x348   :  { %7939 = vst [vmem:[#allocation59_spill] sm:$0xff] %v6553_v13  ;;  %4890 = vset.pattern.permute.xlu1 %v7896_v35  ;;  %v1445_v47 = vrot.slane %v1444_v56, 2  ;;  %v1416_v43 = vand.u32 2147483647, %v1404_v10  ;;  %v2777_v62 = vand.u32 2147483647, %v2765_v6  ;;  %v1460_v45 = vadd.f32 %v1459_v61, %v1458_v27  ;;  %v3700_v35 = vpop.permute.xlu0 %3699 }
 0x349   :  { %7940 = vst [vmem:[#allocation60_spill] sm:$0xff] %v6557_v11  ;;  %3463 = vperm.xlu1 %4890, %v6559_v51   ;;  %v1452_v9 = vrot.slane %v1451_v17, 2  ;;  %v2299_v21 = vrot.slane %v2298_v0, 2  ;;  %v1417_v54 = vand.u32 2147483647, %v1405_v60  ;;  %v2788_v18 = vsub.f32 1.0, %v2776_v41  ;;  %v3224_v41 = vpop.permute.xlu1 %3223 }
 0x34a   :  { %v6562_v8 = vmax.f32 %v2142_v28, 0.0  ;;  %v6564_v22 = vmax.f32 %v2143_v31, 0.0  ;;  %v2789_v30 = vsub.f32 1.0, %v2777_v62  ;;  %v6566_v19 = vadd.f32 %v2061_v55, %v2060_v29 }
 0x34b   :  { %v6568_v20 = vadd.f32 %v2068_v40, %v2067_v1  ;;  %v1467_v10 = vadd.f32 %v1466_v26, %v1465_v7  ;;  %v2306_v2 = vrot.slane %v2305_v46, 2  ;;  %v1446_v6 = vadd.f32 %v1445_v47, %v1444_v56  ;;  %v7945_v47 = vld [vmem:[#allocation36_spill] sm:$0xff] }
 0x34c   :  { %7941 = vst [vmem:[#allocation61_spill] sm:$0xff] %v6562_v8  ;;  %7942 = vst [vmem:[#allocation9_spill] sm:$0xff] %v6564_v22  ;;  %v2800_v11 = vmax.f32 %v2788_v18, 0.0  ;;  %v3004_v13 = vsub.f32 %v2984_v12, %v5679_v32  ;;  %v3005_v60 = vsub.f32 %v2984_v12, %v5681_v39  ;;  %v1453_v28 = vadd.f32 %v1452_v9, %v1451_v17 }
 0x34d   :  { %7943 = vst [vmem:[#allocation10_spill] sm:$0xff] %v6566_v19  ;;  %7944 = vst [vmem:[#allocation64_spill] sm:$0xff] %v6568_v20  ;;  %3467 = vperm.xlu1 %4890, %v6304_v16   ;;  %v2300_v31 = vadd.f32 %v2299_v21, %v2298_v0  ;;  %v1428_v27 = vsub.f32 1.0, %v1416_v43  ;;  %v1429_v61 = vsub.f32 1.0, %v1417_v54  ;;  %v1461_v62 = vrot.slane %v1460_v45, 1  ;;  %v3712_v20 = vpop.permute.xlu0 %3711  ;;  %v6577_v0 = vld [vmem:[#allocation2 + $0x20] sm:$0xff] }
 0x34e   :  { %v2801_v29 = vmax.f32 %v2789_v30, 0.0  ;;  %v3016_v55 = vand.u32 2147483647, %v3004_v13  ;;  %v3017_v1 = vand.u32 2147483647, %v3005_v60  ;;  %v1468_v40 = vrot.slane %v1467_v10, 1 }
 0x34f   :  { %v2307_v7 = vadd.f32 %v2306_v2, %v2305_v46  ;;  %v3722_v56 = vsub.f32 %v3700_v35, %v5679_v32  ;;  %v3244_v26 = vsub.f32 %v3224_v41, %v5679_v32  ;;  %v2810_v18 = vadd.f32 %v2800_v11, %v7945_v47  ;;  %v7946_v21 = vld [vmem:[#allocation37_spill] sm:$0xff] }
 0x350   :  { %v3028_v12 = vsub.f32 1.0, %v3016_v55  ;;  %v3029_v57 = vsub.f32 1.0, %v3017_v1  ;;  %v3245_v16 = vsub.f32 %v3224_v41, %v5681_v39  ;;  %v1447_v17 = vrot.slane %v1446_v6, 1 }
 0x351   :  { %3475 = vperm.xlu1 %4890, %v6577_v0   ;;  %v1454_v13 = vrot.slane %v1453_v28, 1  ;;  %v3723_v43 = vsub.f32 %v3700_v35, %v5681_v39  ;;  %v3256_v46 = vand.u32 2147483647, %v3244_v26  ;;  %v1462_v9 = vadd.f32 %v1461_v62, %v1460_v45 }
 0x352   :  { %v2817_v54 = vadd.f32 %v2801_v29, %v7946_v21  ;;  %v3040_v30 = vmax.f32 %v3028_v12, 0.0  ;;  %v3041_v2 = vmax.f32 %v3029_v57, 0.0  ;;  %v1469_v11 = vadd.f32 %v1468_v40, %v1467_v10  ;;  %v6595_v10 = vld [vmem:[#allocation2] sm:$0xff]  ;;  %v7950_v29 = vld [vmem:[#allocation40_spill] sm:$0xff]  ;;  %v1256_v12 = vpop.permute.xlu0 %1255 }
 0x353   :  { %v2301_v60 = vrot.slane %v2300_v31, 1  ;;  %v2308_v55 = vrot.slane %v2307_v7, 1  ;;  %v3257_v1 = vand.u32 2147483647, %v3245_v16  ;;  %v6582_v47 = vmax.f32 %v1428_v27, 0.0 }
 0x354   :  { %v6584_v41 = vmax.f32 %v1429_v61, 0.0  ;;  %v2811_v19 = vrot.slane %v2810_v18, 4  ;;  %v6586_v22 = vand.u32 2147483647, %v3722_v56  ;;  %v7949_v8 = vmov 7   ;;  %v7951_v56 = vld [vmem:[#allocation41_spill] sm:$0xff] }
 0x355   :  { %7947 = vst [vmem:[#allocation65_spill] sm:$0xff] %v6582_v47  ;;  %4894 = vset.pattern.permute.xlu1 %v7949_v8  ;;  %v6589_v35 = vadd.f32 %v1447_v17, %v1446_v6  ;;  %v6591_v45 = vadd.f32 %v1454_v13, %v1453_v28  ;;  %v6593_v62 = vand.u32 2147483647, %v3723_v43  ;;  %v3268_v57 = vsub.f32 1.0, %v3256_v46  ;;  %v2860_v46 = vpop.permute.xlu1 %2859 }
 0x356   :  { %7948 = vst [vmem:[#allocation36_spill] sm:$0xff] %v6584_v41  ;;  %3579 = vperm.xlu1 %4894, %v6595_v10   ;;  %v1486_v27 = vadd.f32 %v1462_v9, %v6444_v52  ;;  %v2818_v61 = vrot.slane %v2817_v54, 4  ;;  %v3050_v40 = vadd.f32 %v3040_v30, %v7950_v29  ;;  %v3057_v26 = vadd.f32 %v3041_v2, %v7951_v56  ;;  %v7955_v29 = vld [vmem:[#allocation44_spill] sm:$0xff] }
 0x357   :  { %v1487_v8 = vadd.f32 %v1469_v11, %v6467_v48  ;;  %v6602_v6 = vadd.f32 %v2301_v60, %v2300_v31  ;;  %v6604_v28 = vadd.f32 %v2308_v55, %v2307_v7  ;;  %v3269_v16 = vsub.f32 1.0, %v3257_v1  ;;  %v6612_v31 = vld [vmem:[#allocation2 + $0x10] sm:$0xff] }
 0x358   :  { %v2812_v17 = vadd.f32 %v2811_v19, %v2810_v18  ;;  %v3746_v13 = vsub.f32 1.0, %v6586_v22  ;;  %v3728_v43 = vsub.f32 %v3712_v20, %v5679_v32  ;;  %v3729_v52 = vsub.f32 %v3712_v20, %v5681_v39 }
 0x359   :  { %7952 = vst [vmem:[#allocation37_spill] sm:$0xff] %v6602_v6  ;;  %7953 = vst [vmem:[#allocation40_spill] sm:$0xff] %v6604_v28  ;;  %v3747_v9 = vsub.f32 1.0, %v6593_v62  ;;  %v3280_v21 = vmax.f32 %v3268_v57, 0.0  ;;  %v1276_v30 = vsub.f32 %v1256_v12, %v5679_v32  ;;  %v1277_v48 = vsub.f32 %v1256_v12, %v5681_v39 }
 0x35a   :  { %3587 = vperm.xlu1 %4894, %v6612_v31   ;;  %v6616_v19 = vadd.f32 %v6476_v63, %v1486_v27  ;;  %v2819_v22 = vadd.f32 %v2818_v61, %v2817_v54  ;;  %v3051_v7 = vrot.slane %v3050_v40, 4  ;;  %v3058_v18 = vrot.slane %v3057_v26, 4 }
 0x35b   :  { %v3281_v2 = vmax.f32 %v3269_v16, 0.0  ;;  %v1288_v20 = vand.u32 2147483647, %v1276_v30  ;;  %v1289_v11 = vand.u32 2147483647, %v1277_v48  ;;  %v2882_v60 = vsub.f32 %v2860_v46, %v5679_v32  ;;  %v7956_v16 = vld [vmem:[#allocation45_spill] sm:$0xff] }
 0x35c   :  { %7954 = vst [vmem:[#allocation41_spill] sm:$0xff] %v6616_v19  ;;  %v2813_v55 = vrot.slane %v2812_v17, 2  ;;  %v3740_v1 = vand.u32 2147483647, %v3728_v43  ;;  %v3741_v62 = vand.u32 2147483647, %v3729_v52  ;;  %v2883_v57 = vsub.f32 %v2860_v46, %v5681_v39 }
 0x35d   :  { %v3290_v56 = vadd.f32 %v3280_v21, %v7955_v29  ;;  %v1300_v12 = vsub.f32 1.0, %v1288_v20  ;;  %v1301_v28 = vsub.f32 1.0, %v1289_v11  ;;  %v2894_v6 = vand.u32 2147483647, %v2882_v60  ;;  %v7958_v11 = vld [vmem:[#allocation23_spill] sm:$0xff]  ;;  %v7959_v29 = vld [vmem:[#allocation24_spill] sm:$0xff] }
 0x35e   :  { %3591 = vperm.xlu1 %4894, %v6536_v58   ;;  %v2820_v63 = vrot.slane %v2819_v22, 2  ;;  %v3052_v54 = vadd.f32 %v3051_v7, %v3050_v40  ;;  %v3059_v27 = vadd.f32 %v3058_v18, %v3057_v26  ;;  %v2895_v61 = vand.u32 2147483647, %v2883_v57  ;;  %v7963_v57 = vld [vmem:[#allocation29_spill] sm:$0xff] }
 0x35f   :  { %v3297_v30 = vadd.f32 %v3281_v2, %v7956_v16  ;;  %v1312_v48 = vmax.f32 %v1300_v12, 0.0  ;;  %v1313_v24 = vmax.f32 %v1301_v28, 0.0  ;;  %v2906_v49 = vsub.f32 1.0, %v2894_v6 }
 0x360   :  { %v6624_v43 = vadd.f32 %v6480_v59, %v1487_v8  ;;  %v2814_v52 = vadd.f32 %v2813_v55, %v2812_v17  ;;  %v3752_v46 = vsub.f32 1.0, %v3740_v1  ;;  %v2907_v21 = vsub.f32 1.0, %v2895_v61  ;;  %v7962_v55 = vld [vmem:[#allocation28_spill] sm:$0xff] }
 0x361   :  { %v3291_v20 = vrot.slane %v3290_v56, 4  ;;  %v1322_v60 = vadd.f32 %v1312_v48, %v7958_v11  ;;  %v1329_v41 = vadd.f32 %v1313_v24, %v7959_v29  ;;  %v2918_v47 = vmax.f32 %v2906_v49, 0.0  ;;  %v1268_v24 = vpop.permute.xlu0 %1267  ;;  %v3100_v29 = vpop.permute.xlu1 %3099 }
 0x362   :  { %7957 = vst [vmem:[#allocation44_spill] sm:$0xff] %v6624_v43  ;;  %3599 = vperm.xlu1 %4894, %v6547_v36   ;;  %v2821_v40 = vadd.f32 %v2820_v63, %v2819_v22  ;;  %v3053_v26 = vrot.slane %v3052_v54, 2  ;;  %v3753_v7 = vsub.f32 1.0, %v3741_v62  ;;  %v2919_v18 = vmax.f32 %v2907_v21, 0.0 }
 0x363   :  { %v3060_v28 = vrot.slane %v3059_v27, 2  ;;  %v3298_v6 = vrot.slane %v3297_v30, 4  ;;  %v1323_v2 = vrot.slane %v1322_v60, 4  ;;  %v1330_v59 = vrot.slane %v1329_v41, 4 }
 0x364   :  { %v6629_v8 = vmax.f32 %v3746_v13, 0.0  ;;  %v6631_v17 = vmax.f32 %v3747_v9, 0.0  ;;  %v2930_v1 = vadd.f32 %v7962_v55, %v2918_v47  ;;  %v2937_v12 = vadd.f32 %v7963_v57, %v2919_v18  ;;  %v7966_v18 = vld [vmem:[#allocation17_spill] sm:$0xff] }
 0x365   :  { %v2815_v49 = vrot.slane %v2814_v52, 1  ;;  %v3292_v61 = vadd.f32 %v3291_v20, %v3290_v56  ;;  %v1324_v16 = vadd.f32 %v1323_v2, %v1322_v60  ;;  %v1331_v22 = vadd.f32 %v1330_v59, %v1329_v41  ;;  %v7967_v41 = vld [vmem:[#allocation18_spill] sm:$0xff] }
 0x366   :  { %7960 = vst [vmem:[#allocation45_spill] sm:$0xff] %v6629_v8  ;;  %7961 = vst [vmem:[#allocation23_spill] sm:$0xff] %v6631_v17  ;;  %4895 = vset.pattern.permute.xlu1 %v7854_v25  ;;  %v2822_v62 = vrot.slane %v2821_v40, 1  ;;  %v3054_v63 = vadd.f32 %v3053_v26, %v3052_v54  ;;  %v6636_v48 = vmax.f32 %v3752_v46, 0.0  ;;  %v6638_v21 = vmax.f32 %v3753_v7, 0.0 }
 0x367   :  { %3703 = vperm.xlu1 %4895, %v6559_v51   ;;  %v3061_v13 = vadd.f32 %v3060_v28, %v3059_v27  ;;  %v3299_v9 = vadd.f32 %v3298_v6, %v3297_v30  ;;  %v1325_v47 = vrot.slane %v1324_v16, 2  ;;  %v1332_v11 = vrot.slane %v1331_v22, 2  ;;  %v3584_v30 = vpop.permute.xlu0 %3583 }
 0x368   :  { %7964 = vst [vmem:[#allocation24_spill] sm:$0xff] %v6636_v48  ;;  %7965 = vst [vmem:[#allocation28_spill] sm:$0xff] %v6638_v21  ;;  %v1244_v56 = vadd.f32 %v7966_v18, %v6493_v15  ;;  %v1245_v20 = vadd.f32 %v7967_v41, %v6496_v38  ;;  %v2931_v25 = vrot.slane %v2930_v1, 4  ;;  %v2938_v60 = vrot.slane %v2937_v12, 4 }
 0x369   :  { %v6645_v54 = vadd.f32 %v2815_v49, %v2814_v52  ;;  %v3293_v46 = vrot.slane %v3292_v61, 2  ;;  %v1326_v26 = vadd.f32 %v1325_v47, %v1324_v16  ;;  %v1333_v7 = vadd.f32 %v1332_v11, %v1331_v22  ;;  %v3340_v47 = vpop.permute.xlu1 %3339 }
 0x36a   :  { %v6647_v2 = vadd.f32 %v2822_v62, %v2821_v40  ;;  %v3055_v27 = vrot.slane %v3054_v63, 1  ;;  %v3122_v28 = vsub.f32 %v3100_v29, %v5679_v32  ;;  %v3123_v6 = vsub.f32 %v3100_v29, %v5681_v39 }
 0x36b   :  { %3707 = vperm.xlu1 %4895, %v6612_v31   ;;  %v3062_v15 = vrot.slane %v3061_v13, 1  ;;  %v3300_v59 = vrot.slane %v3299_v9, 2  ;;  %v1327_v38 = vrot.slane %v1326_v26, 1  ;;  %v1334_v55 = vrot.slane %v1333_v7, 1 }
 0x36c   :  { %v2932_v57 = vadd.f32 %v2931_v25, %v2930_v1  ;;  %v2939_v52 = vadd.f32 %v2938_v60, %v2937_v12  ;;  %v3134_v49 = vand.u32 2147483647, %v3122_v28  ;;  %v3135_v18 = vand.u32 2147483647, %v3123_v6 }
 0x36d   :  { %v3294_v16 = vadd.f32 %v3293_v46, %v3292_v61  ;;  %v1328_v22 = vadd.f32 %v1327_v38, %v1326_v26  ;;  %v1335_v40 = vadd.f32 %v1334_v55, %v1333_v7  ;;  %v1282_v62 = vsub.f32 %v1268_v24, %v5679_v32  ;;  %v6661_v26 = vpop.permute.xlu0 %3595  ;;  %v7969_v38 = vld [vmem:[#allocation33_spill] sm:$0xff] }
 0x36e   :  { %v1283_v11 = vsub.f32 %v1268_v24, %v5681_v39  ;;  %v3604_v29 = vsub.f32 %v3584_v30, %v5679_v32  ;;  %v3146_v41 = vsub.f32 1.0, %v3134_v49  ;;  %v3147_v21 = vsub.f32 1.0, %v3135_v18 }
 0x36f   :  { %3715 = vperm.xlu1 %4895, %v6577_v0   ;;  %v3301_v48 = vadd.f32 %v3300_v59, %v3299_v9  ;;  %v6656_v17 = vadd.f32 %v1328_v22, %v1244_v56  ;;  %v6658_v1 = vadd.f32 %v1335_v40, %v1245_v20  ;;  %v3605_v12 = vsub.f32 %v3584_v30, %v5681_v39  ;;  %v7968_v59 = vld [vmem:[#allocation32_spill] sm:$0xff] }
 0x370   :  { %v2933_v61 = vrot.slane %v2932_v57, 2  ;;  %v2940_v25 = vrot.slane %v2939_v52, 2  ;;  %v3158_v60 = vmax.f32 %v3146_v41, 0.0  ;;  %v3159_v46 = vmax.f32 %v3147_v21, 0.0 }
 0x371   :  { %v6663_v24 = vadd.f32 %v3055_v27, %v3054_v63  ;;  %v1294_v7 = vand.u32 2147483647, %v1282_v62  ;;  %v3362_v28 = vsub.f32 %v3340_v47, %v5679_v32  ;;  %v3363_v6 = vsub.f32 %v3340_v47, %v5681_v39  ;;  %v552_v63 = vpop.permute.xlu1 %551 }
 0x372   :  { %v1295_v9 = vand.u32 2147483647, %v1283_v11  ;;  %v3616_v56 = vand.u32 2147483647, %v3604_v29  ;;  %v3170_v20 = vadd.f32 %v7968_v59, %v3158_v60  ;;  %v3177_v55 = vadd.f32 %v7969_v38, %v3159_v46  ;;  %v3720_v38 = vpop.permute.xlu0 %3719 }
 0x373   :  { %v7970_v30 = vmov 9   ;;  %v6670_v49 = vadd.f32 %v3062_v15, %v3061_v13  ;;  %v3617_v21 = vand.u32 2147483647, %v3605_v12  ;;  %v3374_v18 = vand.u32 2147483647, %v3362_v28 }
 0x374   :  { %4899 = vset.pattern.permute.xlu1 %v7970_v30  ;;  %v3375_v22 = vand.u32 2147483647, %v3363_v6  ;;  %v3295_v27 = vrot.slane %v3294_v16, 1  ;;  %v3302_v40 = vrot.slane %v3301_v48, 1  ;;  %v2934_v62 = vadd.f32 %v2933_v61, %v2932_v57 }
 0x375   :  { %3819 = vperm.xlu1 %4899, %v6595_v10   ;;  %v2941_v47 = vadd.f32 %v2940_v25, %v2939_v52  ;;  %v3171_v11 = vrot.slane %v3170_v20, 4  ;;  %v3178_v29 = vrot.slane %v3177_v55, 4  ;;  %v3386_v41 = vsub.f32 1.0, %v3374_v18 }
 0x376   :  { %v3387_v60 = vsub.f32 1.0, %v3375_v22  ;;  %v1306_v59 = vsub.f32 1.0, %v1294_v7  ;;  %v1307_v46 = vsub.f32 1.0, %v1295_v9  ;;  %v564_v13 = vsub.f32 %v552_v63, %v5679_v32 }
 0x377   :  { %v565_v15 = vsub.f32 %v552_v63, %v5681_v39  ;;  %v3628_v12 = vsub.f32 1.0, %v3616_v56  ;;  %v3629_v28 = vsub.f32 1.0, %v3617_v21  ;;  %v3398_v6 = vmax.f32 %v3386_v41, 0.0 }
 0x378   :  { %v3399_v30 = vmax.f32 %v3387_v60, 0.0  ;;  %v6676_v8 = vadd.f32 %v3295_v27, %v3294_v16  ;;  %v6678_v57 = vadd.f32 %v3302_v40, %v3301_v48  ;;  %v576_v52 = vand.u32 2147483647, %v564_v13  ;;  %v1496_v27 = vpop.permute.xlu0 %1495 }
 0x379   :  { %3827 = vperm.xlu1 %4899, %v6612_v31   ;;  %v577_v61 = vand.u32 2147483647, %v565_v15  ;;  %v2935_v25 = vrot.slane %v2934_v62, 1  ;;  %v2942_v7 = vrot.slane %v2941_v47, 1  ;;  %v3172_v9 = vadd.f32 %v3171_v11, %v3170_v20 }
 0x37a   :  { %v3179_v18 = vadd.f32 %v3178_v29, %v3177_v55  ;;  %v3410_v22 = vadd.f32 %v6500_v14, %v3398_v6  ;;  %v3417_v63 = vadd.f32 %v6502_v42, %v3399_v30  ;;  %v588_v56 = vsub.f32 1.0, %v576_v52 }
 0x37b   :  { %v589_v21 = vsub.f32 1.0, %v577_v61  ;;  %v6682_v41 = vmax.f32 %v1306_v59, 0.0  ;;  %v6684_v60 = vmax.f32 %v1307_v46, 0.0  ;;  %v6686_v16 = vmax.f32 %v3628_v12, 0.0 }
 0x37c   :  { %v6688_v48 = vmax.f32 %v3629_v28, 0.0  ;;  %v3610_v20 = vsub.f32 %v6661_v26, %v5679_v32  ;;  %v3611_v14 = vsub.f32 %v6661_v26, %v5681_v39  ;;  %v600_v55 = vmax.f32 %v588_v56, 0.0  ;;  %v7973_v28 = vld [vmem:[#allocation62_spill] sm:$0xff]  ;;  %v7974_v26 = vld [vmem:[#allocation63_spill] sm:$0xff]  ;;  %v792_v56 = vpop.permute.xlu1 %791 }
 0x37d   :  { %7971 = vst [vmem:[#allocation29_spill] sm:$0xff] %v6686_v16  ;;  %3831 = vperm.xlu1 %4899, %v6536_v58   ;;  %v601_v42 = vmax.f32 %v589_v21, 0.0  ;;  %v3173_v40 = vrot.slane %v3172_v9, 2  ;;  %v3180_v11 = vrot.slane %v3179_v18, 2  ;;  %v6697_v29 = vadd.f32 %v6589_v35, %v6656_v17 }
 0x37e   :  { %7972 = vst [vmem:[#allocation17_spill] sm:$0xff] %v6688_v48  ;;  %v6701_v59 = vadd.f32 %v6591_v45, %v6658_v1  ;;  %v2936_v46 = vadd.f32 %v2935_v25, %v2934_v62  ;;  %v2943_v13 = vadd.f32 %v2942_v7, %v2941_v47  ;;  %v3411_v15 = vrot.slane %v3410_v22, 4 }
 0x37f   :  { %v3418_v12 = vrot.slane %v3417_v63, 4  ;;  %v630_v6 = vadd.f32 %v600_v55, %v7973_v28  ;;  %v637_v30 = vadd.f32 %v601_v42, %v7974_v26  ;;  %v1516_v52 = vsub.f32 %v1496_v27, %v5679_v32 }
 0x380   :  { %v1517_v61 = vsub.f32 %v1496_v27, %v5681_v39  ;;  %v6708_v35 = vand.u32 2147483647, %v3610_v20  ;;  %v6710_v17 = vand.u32 2147483647, %v3611_v14  ;;  %v3732_v45 = vsub.f32 %v3720_v38, %v5679_v32 }
 0x381   :  { %3839 = vperm.xlu1 %4899, %v6547_v36   ;;  %v3733_v1 = vsub.f32 %v3720_v38, %v5681_v39  ;;  %v3174_v62 = vadd.f32 %v3173_v40, %v3172_v9  ;;  %v3181_v47 = vadd.f32 %v3180_v11, %v3179_v18  ;;  %v1528_v25 = vand.u32 2147483647, %v1516_v52  ;;  %v1032_v40 = vpop.permute.xlu1 %1031 }
 0x382   :  { %v1529_v7 = vand.u32 2147483647, %v1517_v61  ;;  %v2972_v21 = vadd.f32 %v2936_v46, %v6645_v54  ;;  %v2973_v55 = vadd.f32 %v2943_v13, %v6647_v2  ;;  %v3412_v42 = vadd.f32 %v3411_v15, %v3410_v22  ;;  %v7976_v61 = vld [vmem:[#allocation30_spill] sm:$0xff] }
 0x383   :  { %v3419_v27 = vadd.f32 %v3418_v12, %v3417_v63  ;;  %v631_v28 = vrot.slane %v630_v6, 4  ;;  %v638_v26 = vrot.slane %v637_v30, 4  ;;  %v1540_v20 = vsub.f32 1.0, %v1528_v25  ;;  %v1508_v63 = vpop.permute.xlu0 %1507 }
 0x384   :  { %v1541_v48 = vsub.f32 1.0, %v1529_v7  ;;  %v7975_v14 = vmov 10   ;;  %v6717_v16 = vand.u32 2147483647, %v3732_v45  ;;  %v6719_v5 = vand.u32 2147483647, %v3733_v1 }
 0x385   :  { %4901 = vset.pattern.permute.xlu1 %v7975_v14  ;;  %v804_v38 = vsub.f32 %v792_v56, %v5679_v32  ;;  %v805_v9 = vsub.f32 %v792_v56, %v5681_v39  ;;  %v3175_v54 = vrot.slane %v3174_v62, 1  ;;  %v3182_v2 = vrot.slane %v3181_v47, 1  ;;  %v7977_v1 = vld [vmem:[#allocation31_spill] sm:$0xff] }
 0x386   :  { %3943 = vperm.xlu1 %4901, %v6559_v51   ;;  %v1552_v18 = vmax.f32 %v1540_v20, 0.0  ;;  %v1553_v22 = vmax.f32 %v1541_v48, 0.0  ;;  %v3413_v11 = vrot.slane %v3412_v42, 2  ;;  %v3420_v46 = vrot.slane %v3419_v27, 2 }
 0x387   :  { %v816_v13 = vand.u32 2147483647, %v804_v38  ;;  %v817_v15 = vand.u32 2147483647, %v805_v9  ;;  %v632_v12 = vadd.f32 %v631_v28, %v630_v6  ;;  %v639_v52 = vadd.f32 %v638_v26, %v637_v30 }
 0x388   :  { %v1562_v45 = vadd.f32 %v1552_v18, %v7976_v61  ;;  %v1569_v25 = vadd.f32 %v1553_v22, %v7977_v1  ;;  %v3092_v56 = vadd.f32 %v6663_v24, %v2972_v21  ;;  %v3093_v7 = vadd.f32 %v6670_v49, %v2973_v55  ;;  %v6733_v55 = vpop.permute.xlu0 %3823 }
 0x389   :  { %v3634_v14 = vsub.f32 1.0, %v6708_v35  ;;  %v3635_v48 = vsub.f32 1.0, %v6710_v17  ;;  %v3176_v20 = vadd.f32 %v3175_v54, %v3174_v62  ;;  %v3183_v43 = vadd.f32 %v3182_v2, %v3181_v47  ;;  %v6735_v35 = vpop.permute.xlu1 %1271 }
 0x38a   :  { %3947 = vperm.xlu1 %4901, %v6612_v31   ;;  %v828_v38 = vsub.f32 1.0, %v816_v13  ;;  %v829_v9 = vsub.f32 1.0, %v817_v15  ;;  %v3414_v6 = vadd.f32 %v3413_v11, %v3412_v42  ;;  %v3421_v30 = vadd.f32 %v3420_v46, %v3419_v27 }
 0x38b   :  { %v3756_v28 = vsub.f32 1.0, %v6717_v16  ;;  %v3757_v26 = vsub.f32 1.0, %v6719_v5  ;;  %v633_v18 = vrot.slane %v632_v12, 2  ;;  %v640_v24 = vrot.slane %v639_v52, 2 }
 0x38c   :  { %v1563_v21 = vrot.slane %v1562_v45, 4  ;;  %v1570_v49 = vrot.slane %v1569_v25, 4  ;;  %v1522_v17 = vsub.f32 %v1508_v63, %v5679_v32  ;;  %v1523_v62 = vsub.f32 %v1508_v63, %v5681_v39 }
 0x38d   :  { %v1044_v47 = vsub.f32 %v1032_v40, %v5679_v32  ;;  %v1045_v42 = vsub.f32 %v1032_v40, %v5681_v39  ;;  %v3212_v16 = vadd.f32 %v3176_v20, %v3092_v56  ;;  %v3213_v5 = vadd.f32 %v3183_v43, %v3093_v7  ;;  %v7979_v56 = vld [vmem:[#allocation66_spill] sm:$0xff]  ;;  %v7980_v20 = vld [vmem:[#allocation67_spill] sm:$0xff] }
 0x38e   :  { %3955 = vperm.xlu1 %4901, %v6577_v0   ;;  %v840_v27 = vmax.f32 %v828_v38, 0.0  ;;  %v841_v54 = vmax.f32 %v829_v9, 0.0  ;;  %v3415_v2 = vrot.slane %v3414_v6, 1  ;;  %v3422_v22 = vrot.slane %v3421_v30, 1  ;;  %v6747_v9 = vpop.permute.xlu0 %3835 }
 0x38f   :  { %v1056_v11 = vand.u32 2147483647, %v1044_v47  ;;  %v1057_v46 = vand.u32 2147483647, %v1045_v42  ;;  %v634_v13 = vadd.f32 %v633_v18, %v632_v12  ;;  %v641_v15 = vadd.f32 %v640_v24, %v639_v52  ;;  %v1512_v12 = vpop.permute.xlu1 %1511 }
 0x390   :  { %v1564_v61 = vadd.f32 %v1563_v21, %v1562_v45  ;;  %v1571_v1 = vadd.f32 %v1570_v49, %v1569_v25  ;;  %v1534_v23 = vand.u32 2147483647, %v1522_v17  ;;  %v1535_v63 = vand.u32 2147483647, %v1523_v62 }
 0x391   :  { %v1068_v19 = vsub.f32 1.0, %v1056_v11  ;;  %v1069_v53 = vsub.f32 1.0, %v1057_v46  ;;  %v7978_v34 = vmov 11   ;;  %v3332_v40 = vadd.f32 %v6676_v8, %v3212_v16 }
 0x392   :  { %4903 = vset.pattern.permute.xlu1 %v7978_v34  ;;  %v3333_v43 = vadd.f32 %v6678_v57, %v3213_v5  ;;  %v870_v7 = vadd.f32 %v840_v27, %v7979_v56  ;;  %v877_v38 = vadd.f32 %v841_v54, %v7980_v20  ;;  %v3416_v52 = vadd.f32 %v3415_v2, %v3414_v6 }
 0x393   :  { %4067 = vperm.xlu1 %4903, %v6612_v31   ;;  %v3423_v45 = vadd.f32 %v3422_v22, %v3421_v30  ;;  %v1080_v25 = vmax.f32 %v1068_v19, 0.0  ;;  %v1081_v18 = vmax.f32 %v1069_v53, 0.0  ;;  %v6750_v24 = vmax.f32 %v3634_v14, 0.0  ;;  %v6771_v27 = vpop.permute.xlu1 %1751 }
 0x394   :  { %v6752_v34 = vmax.f32 %v3635_v48, 0.0  ;;  %v1565_v8 = vrot.slane %v1564_v61, 2  ;;  %v1572_v21 = vrot.slane %v1571_v1, 2  ;;  %v635_v57 = vrot.slane %v634_v13, 1 }
 0x395   :  { %7981 = vst [vmem:[#allocation18_spill] sm:$0xff] %v6750_v24  ;;  %v642_v49 = vrot.slane %v641_v15, 1  ;;  %v1546_v17 = vsub.f32 1.0, %v1534_v23  ;;  %v1547_v62 = vsub.f32 1.0, %v1535_v63  ;;  %v6754_v47 = vmax.f32 %v3756_v28, 0.0 }
 0x396   :  { %7982 = vst [vmem:[#allocation32_spill] sm:$0xff] %v6752_v34  ;;  %v6756_v42 = vmax.f32 %v3757_v26, 0.0  ;;  %v871_v16 = vrot.slane %v870_v7, 4  ;;  %v878_v5 = vrot.slane %v877_v38, 4  ;;  %v6759_v19 = vadd.f32 %v3416_v52, %v3332_v40  ;;  %v6769_v26 = vpop.permute.xlu0 %3939 }
 0x397   :  { %7983 = vst [vmem:[#allocation33_spill] sm:$0xff] %v6754_v47  ;;  %4059 = vperm.xlu1 %4903, %v6595_v10   ;;  %v6761_v53 = vadd.f32 %v3423_v45, %v3333_v43  ;;  %v1110_v14 = vadd.f32 %v1080_v25, %v6446_v37  ;;  %v1117_v48 = vadd.f32 %v1081_v18, %v6449_v44  ;;  %v1558_v22 = vmax.f32 %v1546_v17, 0.0 }
 0x398   :  { %7984 = vst [vmem:[#allocation62_spill] sm:$0xff] %v6756_v42  ;;  %7985 = vst [vmem:[#allocation63_spill] sm:$0xff] %v6759_v19  ;;  %v1566_v6 = vadd.f32 %v1565_v8, %v1564_v61  ;;  %v1573_v30 = vadd.f32 %v1572_v21, %v1571_v1  ;;  %v1284_v23 = vsub.f32 %v6735_v35, %v5679_v32  ;;  %v1559_v37 = vmax.f32 %v1547_v62, 0.0 }
 0x399   :  { %7986 = vst [vmem:[#allocation30_spill] sm:$0xff] %v6761_v53  ;;  %v1285_v28 = vsub.f32 %v6735_v35, %v5681_v39  ;;  %v6773_v54 = vadd.f32 %v635_v57, %v634_v13  ;;  %v6775_v2 = vadd.f32 %v642_v49, %v641_v15  ;;  %v872_v11 = vadd.f32 %v871_v16, %v870_v7  ;;  %v6784_v57 = vpop.permute.xlu1 %1991 }
 0x39a   :  { %v879_v44 = vadd.f32 %v878_v5, %v877_v38  ;;  %v1296_v46 = vand.u32 2147483647, %v1284_v23  ;;  %v1111_v1 = vrot.slane %v1110_v14, 4  ;;  %v1118_v63 = vrot.slane %v1117_v48, 4  ;;  %v3952_v21 = vpop.permute.xlu0 %3951 }
 0x39b   :  { %v1297_v61 = vand.u32 2147483647, %v1285_v28  ;;  %4063 = vperm.xlu1 %4903, %v6559_v51   ;;  %v1524_v35 = vsub.f32 %v1512_v12, %v5679_v32  ;;  %v1525_v40 = vsub.f32 %v1512_v12, %v5681_v39  ;;  %v1567_v43 = vrot.slane %v1566_v6, 1 }
 0x39c   :  { %v1574_v56 = vrot.slane %v1573_v30, 1  ;;  %v1308_v13 = vsub.f32 1.0, %v1296_v46  ;;  %v3844_v15 = vsub.f32 %v6733_v55, %v5679_v32  ;;  %v3845_v7 = vsub.f32 %v6733_v55, %v5681_v39 }
 0x39d   :  { %v1309_v20 = vsub.f32 1.0, %v1297_v61  ;;  %v1536_v38 = vand.u32 2147483647, %v1524_v35  ;;  %v1537_v52 = vand.u32 2147483647, %v1525_v40  ;;  %v873_v45 = vrot.slane %v872_v11, 2 }
 0x39e   :  { %v880_v25 = vrot.slane %v879_v44, 2  ;;  %v1320_v18 = vmax.f32 %v1308_v13, 0.0  ;;  %v1112_v12 = vadd.f32 %v1111_v1, %v1110_v14  ;;  %v1119_v49 = vadd.f32 %v1118_v63, %v1117_v48 }
 0x39f   :  { %v1321_v8 = vmax.f32 %v1309_v20, 0.0  ;;  %4079 = vperm.xlu1 %4903, %v6547_v36   ;;  %v1548_v17 = vsub.f32 1.0, %v1536_v38  ;;  %v1549_v62 = vsub.f32 1.0, %v1537_v52  ;;  %v1568_v16 = vadd.f32 %v1567_v43, %v1566_v6  ;;  %v6799_v43 = vpop.permute.xlu0 %3959 }
 0x3a0   :  { %v1575_v5 = vadd.f32 %v1574_v56, %v1573_v30  ;;  %v1350_v23 = vadd.f32 %v1320_v18, %v6682_v41  ;;  %v3856_v28 = vand.u32 2147483647, %v3844_v15  ;;  %v3857_v46 = vand.u32 2147483647, %v3845_v7  ;;  %v6801_v56 = vpop.permute.xlu1 %2231 }
 0x3a1   :  { %v1357_v55 = vadd.f32 %v1321_v8, %v6684_v60  ;;  %v1560_v61 = vmax.f32 %v1548_v17, 0.0  ;;  %v1561_v35 = vmax.f32 %v1549_v62, 0.0  ;;  %v3850_v20 = vsub.f32 %v6747_v9, %v5679_v32 }
 0x3a2   :  { %v1351_v40 = vrot.slane %v1350_v23, 4  ;;  %v3851_v36 = vsub.f32 %v6747_v9, %v5681_v39  ;;  %v1113_v14 = vrot.slane %v1112_v12, 2  ;;  %v1120_v48 = vrot.slane %v1119_v49, 2 }
 0x3a3   :  { %v1358_v13 = vrot.slane %v1357_v55, 4  ;;  %4905 = vset.pattern.permute.xlu1 %v7893_v4  ;;  %v1590_v6 = vadd.f32 %v1560_v61, %v1558_v22  ;;  %v1597_v41 = vadd.f32 %v1561_v35, %v1559_v37  ;;  %v3962_v1 = vsub.f32 %v6769_v26, %v5679_v32 }
 0x3a4   :  { %4191 = vperm.xlu1 %4905, %v6536_v58   ;;  %v1352_v60 = vadd.f32 %v1351_v40, %v1350_v23  ;;  %v3963_v63 = vsub.f32 %v6769_v26, %v5681_v39  ;;  %v874_v9 = vadd.f32 %v873_v45, %v872_v11  ;;  %v881_v4 = vadd.f32 %v880_v25, %v879_v44  ;;  %v6812_v61 = vpop.permute.xlu1 %426 }
 0x3a5   :  { %v1359_v30 = vadd.f32 %v1358_v13, %v1357_v55  ;;  %v3968_v15 = vsub.f32 %v3952_v21, %v5679_v32  ;;  %v3969_v22 = vsub.f32 %v3952_v21, %v5681_v39  ;;  %v6806_v58 = vadd.f32 %v1568_v16, %v6697_v29  ;;  %v1736_v55 = vpop.permute.xlu0 %1735 }
 0x3a6   :  { %v6809_v37 = vadd.f32 %v1575_v5, %v6701_v59  ;;  %v1591_v7 = vrot.slane %v1590_v6, 4  ;;  %v1598_v38 = vrot.slane %v1597_v41, 4  ;;  %v1114_v52 = vadd.f32 %v1113_v14, %v1112_v12 }
 0x3a7   :  { %v1121_v26 = vadd.f32 %v1120_v48, %v1119_v49  ;;  %v3862_v18 = vand.u32 2147483647, %v3850_v20  ;;  %v3863_v8 = vand.u32 2147483647, %v3851_v36  ;;  %v1353_v11 = vrot.slane %v1352_v60, 2 }
 0x3a8   :  { %4179 = vperm.xlu1 %4905, %v6595_v10   ;;  %v1360_v44 = vrot.slane %v1359_v30, 2  ;;  %v3974_v45 = vand.u32 2147483647, %v3962_v1  ;;  %v3975_v25 = vand.u32 2147483647, %v3963_v63  ;;  %v3868_v17 = vsub.f32 1.0, %v3856_v28 }
 0x3a9   :  { %v3869_v21 = vsub.f32 1.0, %v3857_v46  ;;  %v3980_v62 = vand.u32 2147483647, %v3968_v15  ;;  %v3981_v29 = vand.u32 2147483647, %v3969_v22  ;;  %v875_v16 = vrot.slane %v874_v9, 1 }
 0x3aa   :  { %v882_v23 = vrot.slane %v881_v4, 1  ;;  %v1592_v59 = vadd.f32 %v1591_v7, %v1590_v6  ;;  %v1599_v5 = vadd.f32 %v1598_v38, %v1597_v41  ;;  %v1115_v12 = vrot.slane %v1114_v52, 1 }
 0x3ab   :  { %v1122_v49 = vrot.slane %v1121_v26, 1  ;;  %v3874_v35 = vsub.f32 1.0, %v3862_v18  ;;  %v3875_v40 = vsub.f32 1.0, %v3863_v8  ;;  %v1354_v13 = vadd.f32 %v1353_v11, %v1352_v60  ;;  %v6836_v8 = vpop.permute.xlu1 %667 }
 0x3ac   :  { %4195 = vperm.xlu1 %4905, %v6577_v0   ;;  %v1361_v20 = vadd.f32 %v1360_v44, %v1359_v30  ;;  %v3986_v36 = vsub.f32 1.0, %v3974_v45  ;;  %v3987_v28 = vsub.f32 1.0, %v3975_v25  ;;  %v6815_v46 = vmax.f32 %v3868_v17, 0.0 }
 0x3ad   :  { %v6817_v14 = vmax.f32 %v3869_v21, 0.0  ;;  %v3992_v48 = vsub.f32 1.0, %v3980_v62  ;;  %v3993_v6 = vsub.f32 1.0, %v3981_v29  ;;  %v6819_v41 = vadd.f32 %v875_v16, %v874_v9 }
 0x3ae   :  { %7987 = vst [vmem:[#allocation31_spill] sm:$0xff] %v6815_v46  ;;  %v6821_v1 = vadd.f32 %v882_v23, %v881_v4  ;;  %v1593_v63 = vrot.slane %v1592_v59, 2  ;;  %v1600_v15 = vrot.slane %v1599_v5, 2  ;;  %v6823_v22 = vadd.f32 %v1115_v12, %v1114_v52  ;;  %v1748_v4 = vpop.permute.xlu0 %1747 }
 0x3af   :  { %7988 = vst [vmem:[#allocation66_spill] sm:$0xff] %v6817_v14  ;;  %v6825_v7 = vadd.f32 %v1122_v49, %v1121_v26  ;;  %v6827_v0 = vmax.f32 %v3874_v35, 0.0  ;;  %v6829_v60 = vmax.f32 %v3875_v40, 0.0  ;;  %v1355_v30 = vrot.slane %v1354_v13, 1 }
 0x3b0   :  { %4907 = vset.pattern.permute.xlu1 %v7880_v33  ;;  %v1362_v38 = vrot.slane %v1361_v20, 1  ;;  %v6832_v18 = vmax.f32 %v3986_v36, 0.0  ;;  %v6834_v9 = vmax.f32 %v3987_v28, 0.0  ;;  %v6839_v52 = vmax.f32 %v3992_v48, 0.0 }
 0x3b1   :  { %7989 = vst [vmem:[#allocation67_spill] sm:$0xff] %v6827_v0  ;;  %7990 = vst [vmem:[#allocation86_spill] sm:$0xff] %v6829_v60  ;;  %4307 = vperm.xlu1 %4907, %v6612_v31   ;;  %v6841_v26 = vmax.f32 %v3993_v6, 0.0  ;;  %v1764_v11 = vsub.f32 %v6771_v27, %v5679_v32  ;;  %v1765_v33 = vsub.f32 %v6771_v27, %v5681_v39 }
 0x3b2   :  { %7991 = vst [vmem:[#allocation87_spill] sm:$0xff] %v6832_v18  ;;  %7992 = vst [vmem:[#allocation88_spill] sm:$0xff] %v6834_v9  ;;  %v1594_v44 = vadd.f32 %v1593_v63, %v1592_v59  ;;  %v1601_v45 = vadd.f32 %v1600_v15, %v1599_v5  ;;  %v1756_v25 = vsub.f32 %v1736_v55, %v5679_v32 }
 0x3b3   :  { %7993 = vst [vmem:[#allocation89_spill] sm:$0xff] %v6839_v52  ;;  %7994 = vst [vmem:[#allocation90_spill] sm:$0xff] %v6841_v26  ;;  %v1757_v17 = vsub.f32 %v1736_v55, %v5681_v39  ;;  %v3972_v21 = vsub.f32 %v6799_v43, %v5679_v32  ;;  %v3973_v31 = vsub.f32 %v6799_v43, %v5681_v39  ;;  %v1776_v5 = vand.u32 2147483647, %v1764_v11  ;;  %v7998_v52 = vld [vmem:[#allocation46_spill] sm:$0xff] }
 0x3b4   :  { %v1762_v62 = vsub.f32 %v1748_v4, %v5679_v32  ;;  %v1763_v29 = vsub.f32 %v1748_v4, %v5681_v39  ;;  %v6855_v16 = vadd.f32 %v1355_v30, %v1354_v13  ;;  %v6857_v23 = vadd.f32 %v1362_v38, %v1361_v20  ;;  %v6864_v13 = vpop.permute.xlu1 %907 }
 0x3b5   :  { %v1768_v27 = vand.u32 2147483647, %v1756_v25  ;;  %v1769_v59 = vand.u32 2147483647, %v1757_v17  ;;  %4299 = vperm.xlu1 %4907, %v6595_v10   ;;  %v1777_v55 = vand.u32 2147483647, %v1765_v33  ;;  %v442_v49 = vsub.f32 %v6812_v61, %v5679_v32 }
 0x3b6   :  { %v1774_v12 = vand.u32 2147483647, %v1762_v62  ;;  %v1775_v40 = vand.u32 2147483647, %v1763_v29  ;;  %v443_v36 = vsub.f32 %v6812_v61, %v5681_v39  ;;  %v1595_v20 = vrot.slane %v1594_v44, 1 }
 0x3b7   :  { %v1780_v35 = vsub.f32 1.0, %v1768_v27  ;;  %v1781_v43 = vsub.f32 1.0, %v1769_v59  ;;  %v3984_v28 = vand.u32 2147483647, %v3972_v21  ;;  %v454_v6 = vand.u32 2147483647, %v442_v49 }
 0x3b8   :  { %v1786_v48 = vsub.f32 1.0, %v1774_v12  ;;  %v1602_v63 = vrot.slane %v1601_v45, 1  ;;  %v455_v38 = vand.u32 2147483647, %v443_v36  ;;  %v1788_v4 = vsub.f32 1.0, %v1776_v5  ;;  %v7995_v59 = vld [vmem:[#allocation34_spill] sm:$0xff]  ;;  %v6879_v36 = vpop.permute.xlu1 %1147 }
 0x3b9   :  { %v1792_v15 = vmax.f32 %v1780_v35, 0.0  ;;  %v1793_v30 = vmax.f32 %v1781_v43, 0.0  ;;  %4303 = vperm.xlu1 %4907, %v6559_v51   ;;  %v3985_v11 = vand.u32 2147483647, %v3973_v31  ;;  %v2004_v33 = vsub.f32 %v6784_v57, %v5679_v32  ;;  %v7996_v31 = vld [vmem:[#allocation35_spill] sm:$0xff] }
 0x3ba   :  { %v466_v25 = vsub.f32 1.0, %v454_v6  ;;  %v2005_v61 = vsub.f32 %v6784_v57, %v5681_v39  ;;  %v2244_v17 = vsub.f32 %v6801_v56, %v5679_v32  ;;  %v1787_v21 = vsub.f32 1.0, %v1775_v40  ;;  %v6881_v57 = vld [vmem:[#allocation2 + $0x28] sm:$0xff] }
 0x3bb   :  { %v467_v62 = vsub.f32 1.0, %v455_v38  ;;  %v1789_v29 = vsub.f32 1.0, %v1777_v55  ;;  %v3996_v27 = vsub.f32 1.0, %v3984_v28  ;;  %v1802_v12 = vadd.f32 %v1792_v15, %v7995_v59  ;;  %v4072_v15 = vpop.permute.xlu0 %4071 }
 0x3bc   :  { %v1798_v49 = vmax.f32 %v1786_v48, 0.0  ;;  %v6874_v51 = vadd.f32 %v1595_v20, %v1594_v44  ;;  %v1809_v5 = vadd.f32 %v1793_v30, %v7996_v31  ;;  %v2245_v35 = vsub.f32 %v6801_v56, %v5681_v39 }
 0x3bd   :  { %v478_v43 = vmax.f32 %v466_v25, 0.0  ;;  %4319 = vperm.xlu1 %4907, %v6881_v57   ;;  %v1800_v40 = vmax.f32 %v1788_v4, 0.0  ;;  %v3997_v55 = vsub.f32 1.0, %v3985_v11  ;;  %v2016_v28 = vand.u32 2147483647, %v2004_v33 }
 0x3be   :  { %v479_v6 = vmax.f32 %v467_v62, 0.0  ;;  %v6884_v48 = vadd.f32 %v1602_v63, %v1601_v45  ;;  %v2017_v44 = vand.u32 2147483647, %v2005_v61  ;;  %v2256_v20 = vand.u32 2147483647, %v2244_v17  ;;  %v8000_v63 = vld [vmem:[#allocation19_spill] sm:$0xff] }
 0x3bf   :  { %v1799_v30 = vmax.f32 %v1787_v21, 0.0  ;;  %v1801_v38 = vmax.f32 %v1789_v29, 0.0  ;;  %v6886_v59 = vmax.f32 %v3996_v27, 0.0  ;;  %v1803_v56 = vrot.slane %v1802_v12, 4  ;;  %v8001_v61 = vld [vmem:[#allocation47_spill] sm:$0xff]  ;;  %v4948_v21 = vld [vmem:[#allocation2 + $0x18] sm:$0xff] }
 0x3c0   :  { %v1830_v25 = vadd.f32 %v1800_v40, %v1798_v49  ;;  %v1810_v31 = vrot.slane %v1809_v5, 4  ;;  %v2257_v26 = vand.u32 2147483647, %v2245_v35  ;;  %v510_v9 = vadd.f32 %v7998_v52, %v478_v43  ;;  %v6899_v49 = vpop.permute.xlu1 %1387 }
 0x3c1   :  { %7997 = vst [vmem:[#allocation34_spill] sm:$0xff] %v6886_v59  ;;  %v4088_v4 = vsub.f32 %v4072_v15, %v5679_v32  ;;  %4909 = vset.pattern.permute.xlu1 %v7902_v50  ;;  %v6891_v11 = vmax.f32 %v3997_v55, 0.0  ;;  %v2028_v45 = vsub.f32 1.0, %v2016_v28  ;;  %v6895_v33 = vadd.f32 %v8000_v63, %v6806_v58  ;;  %v4949_v59 = vld [vmem:[#allocation2 + $0x20] sm:$0xff] }
 0x3c2   :  { %v517_v17 = vadd.f32 %v8001_v61, %v479_v6  ;;  %4431 = vperm.xlu1 %4909, %v4948_v21   ;;  %v2029_v62 = vsub.f32 1.0, %v2017_v44  ;;  %v2268_v29 = vsub.f32 1.0, %v2256_v20  ;;  %v1837_v27 = vadd.f32 %v1801_v38, %v1799_v30  ;;  %v6907_v44 = vpop.permute.xlu0 %4075  ;;  %v8002_v20 = vld [vmem:[#allocation20_spill] sm:$0xff] }
 0x3c3   :  { %7999 = vst [vmem:[#allocation35_spill] sm:$0xff] %v6891_v11  ;;  %v4089_v52 = vsub.f32 %v4072_v15, %v5681_v39  ;;  %v1804_v35 = vadd.f32 %v1803_v56, %v1802_v12  ;;  %v1831_v50 = vrot.slane %v1830_v25, 4  ;;  %v682_v43 = vsub.f32 %v6836_v8, %v5679_v32 }
 0x3c4   :  { %v683_v58 = vsub.f32 %v6836_v8, %v5681_v39  ;;  %v1811_v40 = vadd.f32 %v1810_v31, %v1809_v5  ;;  %v2269_v55 = vsub.f32 1.0, %v2257_v26  ;;  %v511_v28 = vrot.slane %v510_v9, 4 }
 0x3c5   :  { %v6905_v6 = vand.u32 2147483647, %v4088_v4  ;;  %v6911_v15 = vadd.f32 %v8002_v20, %v6809_v37  ;;  %v518_v30 = vrot.slane %v517_v17, 4  ;;  %v694_v12 = vand.u32 2147483647, %v682_v43 }
 0x3c6   :  { %v695_v38 = vand.u32 2147483647, %v683_v58  ;;  %4419 = vperm.xlu1 %4909, %v6595_v10   ;;  %v6914_v56 = vmax.f32 %v2028_v45, 0.0  ;;  %v6916_v63 = vmax.f32 %v2029_v62, 0.0  ;;  %v1838_v8 = vrot.slane %v1837_v27, 4  ;;  %v6924_v58 = vpop.permute.xlu1 %1627 }
 0x3c7   :  { %v6918_v26 = vand.u32 2147483647, %v4089_v52  ;;  %v1805_v5 = vrot.slane %v1804_v35, 2  ;;  %v1832_v31 = vadd.f32 %v1831_v50, %v1830_v25  ;;  %v706_v4 = vsub.f32 1.0, %v694_v12  ;;  %v8003_v12 = vld [vmem:[#allocation48_spill] sm:$0xff] }
 0x3c8   :  { %v707_v61 = vsub.f32 1.0, %v695_v38  ;;  %v1812_v21 = vrot.slane %v1811_v40, 2  ;;  %v6920_v11 = vmax.f32 %v2268_v29, 0.0  ;;  %v6922_v37 = vmax.f32 %v2269_v55, 0.0  ;;  %v1852_v55 = vpop.permute.xlu0 %1851 }
 0x3c9   :  { %v512_v43 = vadd.f32 %v511_v28, %v510_v9  ;;  %v519_v10 = vadd.f32 %v518_v30, %v517_v17  ;;  %v718_v62 = vmax.f32 %v706_v4, 0.0  ;;  %v1839_v52 = vadd.f32 %v1838_v8, %v1837_v27  ;;  %v8004_v30 = vld [vmem:[#allocation49_spill] sm:$0xff] }
 0x3ca   :  { %v719_v20 = vmax.f32 %v707_v61, 0.0  ;;  %4435 = vperm.xlu1 %4909, %v4949_v59   ;;  %v922_v50 = vsub.f32 %v6864_v13, %v5679_v32  ;;  %v923_v29 = vsub.f32 %v6864_v13, %v5681_v39  ;;  %v1806_v9 = vadd.f32 %v1805_v5, %v1804_v35  ;;  %v6937_v5 = vpop.permute.xlu1 %1867 }
 0x3cb   :  { %v1833_v28 = vrot.slane %v1832_v31, 2  ;;  %v750_v17 = vadd.f32 %v8003_v12, %v718_v62  ;;  %v1813_v4 = vadd.f32 %v1812_v21, %v1811_v40  ;;  %v513_v61 = vrot.slane %v512_v43, 2  ;;  %v4950_v62 = vld [vmem:[#allocation2 + $0x10] sm:$0xff] }
 0x3cc   :  { %v757_v38 = vadd.f32 %v8004_v30, %v719_v20  ;;  %v934_v45 = vand.u32 2147483647, %v922_v50  ;;  %v935_v59 = vand.u32 2147483647, %v923_v29  ;;  %v520_v27 = vrot.slane %v519_v10, 2  ;;  %v1864_v19 = vpop.permute.xlu0 %1863 }
 0x3cd   :  { %v751_v8 = vrot.slane %v750_v17, 4  ;;  %v1874_v18 = vsub.f32 %v1852_v55, %v5679_v32  ;;  %v1840_v60 = vrot.slane %v1839_v52, 2  ;;  %v1875_v35 = vsub.f32 %v1852_v55, %v5681_v39  ;;  %v8006_v55 = vld [vmem:[#allocation51_spill] sm:$0xff] }
 0x3ce   :  { %v758_v25 = vrot.slane %v757_v38, 4  ;;  %4911 = vset.pattern.permute.xlu1 %v7922_v3  ;;  %v946_v13 = vsub.f32 1.0, %v934_v45  ;;  %v947_v0 = vsub.f32 1.0, %v935_v59  ;;  %v1834_v40 = vadd.f32 %v1833_v28, %v1832_v31  ;;  %v8005_v59 = vld [vmem:[#allocation50_spill] sm:$0xff] }
 0x3cf   :  { %4547 = vperm.xlu1 %4911, %v4950_v62   ;;  %v752_v21 = vadd.f32 %v751_v8, %v750_v17  ;;  %v1886_v50 = vand.u32 2147483647, %v1874_v18  ;;  %v514_v29 = vadd.f32 %v513_v61, %v512_v43  ;;  %v1887_v14 = vand.u32 2147483647, %v1875_v35  ;;  %v4951_v62 = vld [vmem:[#allocation2] sm:$0xff]  ;;  %v8007_v8 = vld [vmem:[#allocation13_spill] sm:$0xff] }
 0x3d0   :  { %v759_v20 = vadd.f32 %v758_v25, %v757_v38  ;;  %v958_v12 = vmax.f32 %v946_v13, 0.0  ;;  %v959_v30 = vmax.f32 %v947_v0, 0.0  ;;  %v521_v46 = vadd.f32 %v520_v27, %v519_v10  ;;  %v6943_v38 = vpop.permute.xlu1 %2107 }
 0x3d1   :  { %v753_v42 = vrot.slane %v752_v21, 2  ;;  %v1898_v47 = vsub.f32 1.0, %v1886_v50  ;;  %v1807_v45 = vrot.slane %v1806_v9, 1  ;;  %v1899_v53 = vsub.f32 1.0, %v1887_v14 }
 0x3d2   :  { %v760_v3 = vrot.slane %v759_v20, 2  ;;  %v990_v34 = vadd.f32 %v8005_v59, %v958_v12  ;;  %v997_v24 = vadd.f32 %v8006_v55, %v959_v30  ;;  %v1814_v31 = vrot.slane %v1813_v4, 1  ;;  %v8008_v12 = vld [vmem:[#allocation14_spill] sm:$0xff] }
 0x3d3   :  { %4539 = vperm.xlu1 %4911, %v4951_v62   ;;  %v6941_v25 = vadd.f32 %v1840_v60, %v1839_v52  ;;  %v754_v18 = vadd.f32 %v753_v42, %v752_v21  ;;  %v1910_v43 = vmax.f32 %v1898_v47, 0.0  ;;  %v1911_v17 = vmax.f32 %v1899_v53, 0.0  ;;  %v4952_v42 = vld [vmem:[#allocation2 + $0x8] sm:$0xff] }
 0x3d4   :  { %v761_v0 = vadd.f32 %v760_v3, %v759_v20  ;;  %v991_v28 = vrot.slane %v990_v34, 4  ;;  %v998_v10 = vrot.slane %v997_v24, 4  ;;  %v515_v61 = vrot.slane %v514_v29, 1 }
 0x3d5   :  { %v522_v27 = vrot.slane %v521_v46, 1  ;;  %v1922_v13 = vadd.f32 %v8007_v8, %v1910_v43  ;;  %v1880_v14 = vsub.f32 %v1864_v19, %v5679_v32  ;;  %v1929_v30 = vadd.f32 %v8008_v12, %v1911_v17  ;;  %v6958_v17 = vpop.permute.xlu1 %2871 }
 0x3d6   :  { %v992_v35 = vadd.f32 %v991_v28, %v990_v34  ;;  %v999_v50 = vadd.f32 %v998_v10, %v997_v24  ;;  %v1881_v60 = vsub.f32 %v1864_v19, %v5681_v39  ;;  %v1808_v47 = vadd.f32 %v1807_v45, %v1806_v9 }
 0x3d7   :  { %4543 = vperm.xlu1 %4911, %v4952_v42   ;;  %v1835_v52 = vrot.slane %v1834_v40, 1  ;;  %v755_v21 = vrot.slane %v754_v18, 1  ;;  %v1892_v53 = vand.u32 2147483647, %v1880_v14  ;;  %v762_v20 = vrot.slane %v761_v0, 1 }
 0x3d8   :  { %v993_v3 = vrot.slane %v992_v35, 2  ;;  %v1000_v59 = vrot.slane %v999_v50, 2  ;;  %v1893_v55 = vand.u32 2147483647, %v1881_v60  ;;  %v1815_v62 = vadd.f32 %v1814_v31, %v1813_v4 }
 0x3d9   :  { %v516_v43 = vadd.f32 %v515_v61, %v514_v29  ;;  %v8009_v8 = vsub.f32 1.0, %v6905_v6  ;;  %v8010_v24 = vsub.f32 1.0, %v6918_v26  ;;  %v1842_v19 = vrot.slane %v6941_v25, 1 }
 0x3da   :  { %v523_v9 = vadd.f32 %v522_v27, %v521_v46  ;;  %v1923_v45 = vrot.slane %v1922_v13, 4  ;;  %v1930_v10 = vrot.slane %v1929_v30, 4  ;;  %v6962_v4 = vadd.f32 %v1808_v47, %v6895_v33 }
 0x3db   :  { %v6951_v34 = vmax.f32 %v8009_v8, 0.0  ;;  %v6955_v28 = vmax.f32 %v8010_v24, 0.0  ;;  %4559 = vperm.xlu1 %4911, %v6881_v57   ;;  %v6964_v29 = vadd.f32 %v1835_v52, %v1834_v40  ;;  %v756_v6 = vadd.f32 %v755_v21, %v754_v18 }
 0x3dc   :  { %v1904_v31 = vsub.f32 1.0, %v1892_v53  ;;  %v763_v61 = vadd.f32 %v762_v20, %v761_v0  ;;  %v994_v26 = vadd.f32 %v993_v3, %v992_v35  ;;  %v1001_v14 = vadd.f32 %v1000_v59, %v999_v50 }
 0x3dd   :  { %v1905_v12 = vsub.f32 1.0, %v1893_v55  ;;  %v648_v60 = vadd.f32 %v6773_v54, %v516_v43  ;;  %v4090_v46 = vsub.f32 %v6907_v44, %v5679_v32  ;;  %v1162_v27 = vsub.f32 %v6879_v36, %v5679_v32  ;;  %v8011_v43 = vld [vmem:[#allocation26_spill] sm:$0xff] }
 0x3de   :  { %v1163_v57 = vsub.f32 %v6879_v36, %v5681_v39  ;;  %v649_v33 = vadd.f32 %v6775_v2, %v523_v9  ;;  %v4091_v40 = vsub.f32 %v6907_v44, %v5681_v39  ;;  %v1924_v18 = vadd.f32 %v1923_v45, %v1922_v13 }
 0x3df   :  { %v1931_v0 = vadd.f32 %v1930_v10, %v1929_v30  ;;  %v768_v35 = vadd.f32 %v756_v6, %v648_v60  ;;  %v1916_v50 = vmax.f32 %v1904_v31, 0.0  ;;  %v1174_v42 = vand.u32 2147483647, %v1162_v27  ;;  %v8012_v10 = vld [vmem:[#allocation27_spill] sm:$0xff] }
 0x3e0   :  { %v1175_v54 = vand.u32 2147483647, %v1163_v57  ;;  %v769_v47 = vadd.f32 %v763_v61, %v649_v33  ;;  %v995_v52 = vrot.slane %v994_v26, 1  ;;  %v1002_v21 = vrot.slane %v1001_v14, 1  ;;  %v8014_v61 = vld [vmem:[#allocation53_spill] sm:$0xff] }
 0x3e1   :  { %v1917_v53 = vmax.f32 %v1905_v12, 0.0  ;;  %v6977_v20 = vadd.f32 %v1815_v62, %v6911_v15  ;;  %v6979_v3 = vand.u32 2147483647, %v4090_v46  ;;  %v1186_v36 = vsub.f32 1.0, %v1174_v42 }
 0x3e2   :  { %v1187_v2 = vsub.f32 1.0, %v1175_v54  ;;  %v6982_v59 = vadd.f32 %v1842_v19, %v6941_v25  ;;  %v6984_v44 = vand.u32 2147483647, %v4091_v40  ;;  %v1925_v13 = vrot.slane %v1924_v18, 2  ;;  %v8013_v25 = vld [vmem:[#allocation52_spill] sm:$0xff] }
 0x3e3   :  { %v1932_v30 = vrot.slane %v1931_v0, 2  ;;  %v888_v55 = vadd.f32 %v6819_v41, %v768_v35  ;;  %v1936_v8 = vadd.f32 %v1916_v50, %v8011_v43  ;;  %v1198_v24 = vmax.f32 %v1186_v36, 0.0 }
 0x3e4   :  { %v1199_v9 = vmax.f32 %v1187_v2, 0.0  ;;  %v889_v15 = vadd.f32 %v6821_v1, %v769_v47  ;;  %v996_v62 = vadd.f32 %v995_v52, %v994_v26  ;;  %v1003_v45 = vadd.f32 %v1002_v21, %v1001_v14  ;;  %v1872_v1 = vpop.permute.xlu0 %1871  ;;  %v8015_v47 = vld [vmem:[#allocation41_spill] sm:$0xff] }
 0x3e5   :  { %v1943_v6 = vadd.f32 %v1917_v53, %v8012_v10  ;;  %v4114_v31 = vsub.f32 1.0, %v6979_v3  ;;  %v1230_v19 = vadd.f32 %v8013_v25, %v1198_v24  ;;  %v1402_v60 = vsub.f32 %v6899_v49, %v5679_v32  ;;  %v8016_v52 = vld [vmem:[#allocation21_spill] sm:$0xff]  ;;  %v8026_v3 = vld [vmem:[#allocation11_spill] sm:$0xff] }
 0x3e6   :  { %v1237_v12 = vadd.f32 %v8014_v61, %v1199_v9  ;;  %v6996_v46 = vadd.f32 %v1925_v13, %v1924_v18  ;;  %v6998_v27 = vadd.f32 %v1932_v30, %v1931_v0  ;;  %v1403_v26 = vsub.f32 %v6899_v49, %v5681_v39  ;;  %v8017_v49 = vld [vmem:[#allocation44_spill] sm:$0xff]  ;;  %v8018_v13 = vld [vmem:[#allocation22_spill] sm:$0xff] }
 0x3e7   :  { %v1937_v14 = vrot.slane %v1936_v8, 4  ;;  %v1231_v57 = vrot.slane %v1230_v19, 4  ;;  %v1414_v40 = vand.u32 2147483647, %v1402_v60  ;;  %v1008_v35 = vadd.f32 %v996_v62, %v888_v55  ;;  %v8019_v60 = vld [vmem:[#allocation65_spill] sm:$0xff] }
 0x3e8   :  { %v1238_v33 = vrot.slane %v1237_v12, 4  ;;  %v1009_v50 = vadd.f32 %v1003_v45, %v889_v15  ;;  %v1944_v42 = vrot.slane %v1943_v6, 4  ;;  %v1415_v54 = vand.u32 2147483647, %v1403_v26 }
 0x3e9   :  { %v7004_v21 = vadd.f32 %v8016_v52, %v8015_v47  ;;  %v1232_v18 = vadd.f32 %v1231_v57, %v1230_v19  ;;  %v1426_v0 = vsub.f32 1.0, %v1414_v40  ;;  %v7010_v30 = vadd.f32 %v8018_v13, %v8017_v49  ;;  %v7014_v19 = vpop.permute.xlu0 %4187 }
 0x3ea   :  { %v1239_v53 = vadd.f32 %v1238_v33, %v1237_v12  ;;  %v1427_v43 = vsub.f32 1.0, %v1415_v54  ;;  %v1938_v55 = vadd.f32 %v1937_v14, %v1936_v8  ;;  %v1945_v62 = vadd.f32 %v1944_v42, %v1943_v6  ;;  %v8020_v33 = vld [vmem:[#allocation36_spill] sm:$0xff] }
 0x3eb   :  { %v1233_v24 = vrot.slane %v1232_v18, 2  ;;  %v1438_v15 = vmax.f32 %v1426_v0, 0.0  ;;  %v1128_v45 = vadd.f32 %v6823_v22, %v1008_v35  ;;  %v1129_v10 = vadd.f32 %v6825_v7, %v1009_v50 }
 0x3ec   :  { %v1240_v9 = vrot.slane %v1239_v53, 2  ;;  %v1439_v25 = vmax.f32 %v1427_v43, 0.0  ;;  %v1642_v57 = vsub.f32 %v6924_v58, %v5679_v32  ;;  %v1884_v8 = vsub.f32 %v1872_v1, %v5679_v32 }
 0x3ed   :  { %v1234_v61 = vadd.f32 %v1233_v24, %v1232_v18  ;;  %v1470_v26 = vadd.f32 %v8019_v60, %v1438_v15  ;;  %v1885_v14 = vsub.f32 %v1872_v1, %v5681_v39  ;;  %v1643_v22 = vsub.f32 %v6924_v58, %v5681_v39 }
 0x3ee   :  { %v1241_v12 = vadd.f32 %v1240_v9, %v1239_v53  ;;  %v1477_v6 = vadd.f32 %v8020_v33, %v1439_v25  ;;  %v1654_v50 = vand.u32 2147483647, %v1642_v57  ;;  %v1939_v42 = vrot.slane %v1938_v55, 2  ;;  %v4184_v9 = vpop.permute.xlu0 %4183 }
 0x3ef   :  { %v1235_v7 = vrot.slane %v1234_v61, 1  ;;  %v1471_v35 = vrot.slane %v1470_v26, 4  ;;  %v1946_v54 = vrot.slane %v1945_v62, 2  ;;  %v1655_v52 = vand.u32 2147483647, %v1643_v22 }
 0x3f0   :  { %v1242_v40 = vrot.slane %v1241_v12, 1  ;;  %v1478_v47 = vrot.slane %v1477_v6, 4  ;;  %v1666_v49 = vsub.f32 1.0, %v1654_v50  ;;  %v1896_v13 = vand.u32 2147483647, %v1884_v8 }
 0x3f1   :  { %v1236_v18 = vadd.f32 %v1235_v7, %v1234_v61  ;;  %v1472_v0 = vadd.f32 %v1471_v35, %v1470_v26  ;;  %v1897_v43 = vand.u32 2147483647, %v1885_v14  ;;  %v1667_v24 = vsub.f32 1.0, %v1655_v52  ;;  %v8021_v26 = vld [vmem:[#allocation56_spill] sm:$0xff]  ;;  %v8022_v7 = vld [vmem:[#allocation57_spill] sm:$0xff] }
 0x3f2   :  { %v1243_v53 = vadd.f32 %v1242_v40, %v1241_v12  ;;  %v1479_v1 = vadd.f32 %v1478_v47, %v1477_v6  ;;  %v1678_v60 = vmax.f32 %v1666_v49, 0.0  ;;  %v1940_v33 = vadd.f32 %v1939_v42, %v1938_v55  ;;  %v4200_v42 = vpop.permute.xlu0 %4199 }
 0x3f3   :  { %v1248_v15 = vadd.f32 %v1236_v18, %v1128_v45  ;;  %v1473_v58 = vrot.slane %v1472_v0, 2  ;;  %v1947_v2 = vadd.f32 %v1946_v54, %v1945_v62  ;;  %v1679_v36 = vmax.f32 %v1667_v24, 0.0 }
 0x3f4   :  { %v1249_v25 = vadd.f32 %v1243_v53, %v1129_v10  ;;  %v1480_v57 = vrot.slane %v1479_v1, 2  ;;  %v1710_v22 = vadd.f32 %v8021_v26, %v1678_v60  ;;  %v1908_v8 = vsub.f32 1.0, %v1896_v13 }
 0x3f5   :  { %v1368_v41 = vadd.f32 %v6855_v16, %v1248_v15  ;;  %v1474_v12 = vadd.f32 %v1473_v58, %v1472_v0  ;;  %v1909_v14 = vsub.f32 1.0, %v1897_v43  ;;  %v1717_v40 = vadd.f32 %v8022_v7, %v1679_v36 }
 0x3f6   :  { %v1369_v61 = vadd.f32 %v6857_v23, %v1249_v25  ;;  %v1481_v6 = vadd.f32 %v1480_v57, %v1479_v1  ;;  %v4206_v10 = vsub.f32 %v7014_v19, %v5679_v32  ;;  %v1882_v55 = vsub.f32 %v6937_v5, %v5679_v32  ;;  %v1976_v7 = vpop.permute.xlu0 %1975 }
 0x3f7   :  { %v1475_v45 = vrot.slane %v1474_v12, 1  ;;  %v1883_v16 = vsub.f32 %v6937_v5, %v5681_v39  ;;  %v1941_v62 = vrot.slane %v1940_v33, 1  ;;  %v4207_v35 = vsub.f32 %v7014_v19, %v5681_v39 }
 0x3f8   :  { %v1482_v23 = vrot.slane %v1481_v6, 1  ;;  %v1711_v50 = vrot.slane %v1710_v22, 4  ;;  %v1718_v47 = vrot.slane %v1717_v40, 4  ;;  %v1894_v36 = vand.u32 2147483647, %v1882_v55 }
 0x3f9   :  { %v1476_v54 = vadd.f32 %v1475_v45, %v1474_v12  ;;  %v1895_v52 = vand.u32 2147483647, %v1883_v16  ;;  %v1948_v18 = vrot.slane %v1947_v2, 1  ;;  %v1920_v53 = vmax.f32 %v1908_v8, 0.0 }
 0x3fa   :  { %v1921_v0 = vmax.f32 %v1909_v14, 0.0  ;;  %v1483_v49 = vadd.f32 %v1482_v23, %v1481_v6  ;;  %v4218_v43 = vand.u32 2147483647, %v4206_v10  ;;  %v1906_v1 = vsub.f32 1.0, %v1894_v36 }
 0x3fb   :  { %v7036_v13 = vadd.f32 %v1476_v54, %v1368_v41  ;;  %v1907_v5 = vsub.f32 1.0, %v1895_v52  ;;  %v4219_v15 = vand.u32 2147483647, %v4207_v35  ;;  %v1712_v25 = vadd.f32 %v1711_v50, %v1710_v22 }
 0x3fc   :  { %v7038_v24 = vadd.f32 %v1483_v49, %v1369_v61  ;;  %v4204_v19 = vsub.f32 %v4184_v9, %v5679_v32  ;;  %v1719_v58 = vadd.f32 %v1718_v47, %v1717_v40  ;;  %v4205_v60 = vsub.f32 %v4184_v9, %v5681_v39 }
 0x3fd   :  { %v1918_v57 = vmax.f32 %v1906_v1, 0.0  ;;  %v1919_v12 = vmax.f32 %v1907_v5, 0.0  ;;  %v7044_v26 = vmax.f32 %v4114_v31, 0.0  ;;  %v8023_v41 = vsub.f32 1.0, %v6984_v44  ;;  %v8027_v44 = vld [vmem:[#allocation58_spill] sm:$0xff] }
 0x3fe   :  { %v8024_v61 = vrot.slane %v6996_v46, 1  ;;  %v8025_v22 = vrot.slane %v6998_v27, 1  ;;  %v1942_v9 = vadd.f32 %v1941_v62, %v1940_v33  ;;  %v1949_v40 = vadd.f32 %v1948_v18, %v1947_v2 }
 0x3ff   :  { %v7048_v8 = vmax.f32 %v8023_v41, 0.0  ;;  %v1950_v45 = vadd.f32 %v1920_v53, %v1918_v57  ;;  %v1957_v10 = vadd.f32 %v1921_v0, %v1919_v12  ;;  %v1846_v31 = vadd.f32 %v8026_v3, %v7004_v21  ;;  %v1988_v0 = vpop.permute.xlu0 %1987 }
 0x400   :  { %v1928_v14 = vadd.f32 %v8024_v61, %v6996_v46  ;;  %v1935_v6 = vadd.f32 %v8025_v22, %v6998_v27  ;;  %v1847_v55 = vadd.f32 %v8027_v44, %v7010_v30  ;;  %v4230_v16 = vsub.f32 1.0, %v4218_v43 }
 0x401   :  { %v1713_v23 = vrot.slane %v1712_v25, 2  ;;  %v4231_v35 = vsub.f32 1.0, %v4219_v15  ;;  %v1720_v50 = vrot.slane %v1719_v58, 2  ;;  %v4216_v46 = vand.u32 2147483647, %v4204_v19 }
 0x402   :  { %v4217_v54 = vand.u32 2147483647, %v4205_v60  ;;  %v7061_v47 = vadd.f32 %v1928_v14, %v6962_v4  ;;  %v7064_v27 = vadd.f32 %v1935_v6, %v6977_v20  ;;  %v1951_v2 = vrot.slane %v1950_v45, 4 }
 0x403   :  { %v1958_v33 = vrot.slane %v1957_v10, 4  ;;  %v7066_v62 = vadd.f32 %v1942_v9, %v1846_v31  ;;  %v7068_v21 = vadd.f32 %v1949_v40, %v1847_v55  ;;  %v4212_v30 = vsub.f32 %v4200_v42, %v5679_v32 }
 0x404   :  { %v4213_v36 = vsub.f32 %v4200_v42, %v5681_v39  ;;  %v7072_v52 = vmax.f32 %v4230_v16, 0.0  ;;  %v1714_v18 = vadd.f32 %v1713_v23, %v1712_v25  ;;  %v1996_v53 = vsub.f32 %v1976_v7, %v5679_v32 }
 0x405   :  { %v1997_v4 = vsub.f32 %v1976_v7, %v5681_v39  ;;  %v7076_v20 = vmax.f32 %v4231_v35, 0.0  ;;  %v1721_v49 = vadd.f32 %v1720_v50, %v1719_v58  ;;  %v4228_v43 = vsub.f32 1.0, %v4216_v46  ;;  %v8028_v50 = vld [vmem:[#allocation38_spill] sm:$0xff] }
 0x406   :  { %v4229_v1 = vsub.f32 1.0, %v4217_v54  ;;  %v1952_v5 = vadd.f32 %v1951_v2, %v1950_v45  ;;  %v1959_v15 = vadd.f32 %v1958_v33, %v1957_v10  ;;  %v2008_v19 = vand.u32 2147483647, %v1996_v53  ;;  %v8029_v54 = vld [vmem:[#allocation39_spill] sm:$0xff]  ;;  %v4312_v33 = vpop.permute.xlu0 %4311 }
 0x407   :  { %v2009_v60 = vand.u32 2147483647, %v1997_v4  ;;  %v4224_v57 = vand.u32 2147483647, %v4212_v30  ;;  %v4225_v12 = vand.u32 2147483647, %v4213_v36  ;;  %v2002_v42 = vsub.f32 %v1988_v0, %v5679_v32 }
 0x408   :  { %v2003_v25 = vsub.f32 %v1988_v0, %v5681_v39  ;;  %v1715_v41 = vrot.slane %v1714_v18, 1  ;;  %v2122_v61 = vsub.f32 %v6943_v38, %v5679_v32  ;;  %v2020_v14 = vsub.f32 1.0, %v2008_v19 }
 0x409   :  { %v2021_v22 = vsub.f32 1.0, %v2009_v60  ;;  %v1722_v6 = vrot.slane %v1721_v49, 1  ;;  %v7082_v58 = vmax.f32 %v4228_v43, 0.0  ;;  %v2014_v7 = vand.u32 2147483647, %v2002_v42  ;;  %v3112_v42 = vpop.permute.xlu1 %3111 }
 0x40a   :  { %v2015_v9 = vand.u32 2147483647, %v2003_v25  ;;  %v1953_v40 = vrot.slane %v1952_v5, 2  ;;  %v1960_v45 = vrot.slane %v1959_v15, 2  ;;  %v2032_v10 = vmax.f32 %v2020_v14, 0.0 }
 0x40b   :  { %v2033_v3 = vmax.f32 %v2021_v22, 0.0  ;;  %v1608_v31 = vadd.f32 %v6874_v51, %v7036_v13  ;;  %v2123_v44 = vsub.f32 %v6943_v38, %v5681_v39  ;;  %v2026_v55 = vsub.f32 1.0, %v2014_v7  ;;  %v7105_v22 = vpop.permute.xlu0 %4315 }
 0x40c   :  { %v2027_v16 = vsub.f32 1.0, %v2015_v9  ;;  %v1716_v23 = vadd.f32 %v1715_v41, %v1714_v18  ;;  %v2134_v35 = vand.u32 2147483647, %v2122_v61  ;;  %v2042_v46 = vadd.f32 %v2032_v10, %v8028_v50 }
 0x40d   :  { %v2049_v2 = vadd.f32 %v2033_v3, %v8029_v54  ;;  %v4236_v30 = vsub.f32 1.0, %v4224_v57  ;;  %v4237_v36 = vsub.f32 1.0, %v4225_v12  ;;  %v2038_v53 = vmax.f32 %v2026_v55, 0.0  ;;  %v2745_v55 = vpop.permute.xlu1 %2744 }
 0x40e   :  { %v2039_v4 = vmax.f32 %v2027_v16, 0.0  ;;  %v1609_v0 = vadd.f32 %v6884_v48, %v7038_v24  ;;  %v1723_v51 = vadd.f32 %v1722_v6, %v1721_v49  ;;  %v1954_v13 = vadd.f32 %v1953_v40, %v1952_v5 }
 0x40f   :  { %v1961_v43 = vadd.f32 %v1960_v45, %v1959_v15  ;;  %v7092_v38 = vmax.f32 %v4229_v1, 0.0  ;;  %v2043_v19 = vrot.slane %v2042_v46, 4  ;;  %v2050_v18 = vrot.slane %v2049_v2, 4 }
 0x410   :  { %v2888_v60 = vsub.f32 %v6958_v17, %v5679_v32  ;;  %v1728_v25 = vadd.f32 %v1716_v23, %v1608_v31  ;;  %v2135_v41 = vand.u32 2147483647, %v2123_v44  ;;  %v2146_v57 = vsub.f32 1.0, %v2134_v35 }
 0x411   :  { %v2070_v12 = vadd.f32 %v6914_v56, %v2038_v53  ;;  %v7097_v61 = vmax.f32 %v4236_v30, 0.0  ;;  %v7099_v14 = vmax.f32 %v4237_v36, 0.0  ;;  %v2077_v48 = vadd.f32 %v6916_v63, %v2039_v4  ;;  %v2092_v4 = vpop.permute.xlu0 %2091 }
 0x412   :  { %v2889_v24 = vsub.f32 %v6958_v17, %v5681_v39  ;;  %v1729_v49 = vadd.f32 %v1723_v51, %v1609_v0  ;;  %v1955_v1 = vrot.slane %v1954_v13, 1  ;;  %v1962_v5 = vrot.slane %v1961_v43, 1 }
 0x413   :  { %8030 = vst [vmem:[#allocation46_spill] sm:$0xff] %v7097_v61  ;;  %8031 = vst [vmem:[#allocation19_spill] sm:$0xff] %v7099_v14  ;;  %v4328_v15 = vsub.f32 %v4312_v33, %v5679_v32  ;;  %v2044_v6 = vadd.f32 %v2043_v19, %v2042_v46  ;;  %v2051_v7 = vadd.f32 %v2050_v18, %v2049_v2  ;;  %v2900_v9 = vand.u32 2147483647, %v2888_v60  ;;  %v8045_v61 = vld [vmem:[#allocation40_spill] sm:$0xff] }
 0x414   :  { %v4329_v56 = vsub.f32 %v4312_v33, %v5681_v39  ;;  %v1848_v40 = vadd.f32 %v6964_v29, %v1728_v25  ;;  %v2147_v45 = vsub.f32 1.0, %v2135_v41  ;;  %v7109_v10 = vmax.f32 %v2146_v57, 0.0 }
 0x415   :  { %v2071_v63 = vrot.slane %v2070_v12, 4  ;;  %v2078_v3 = vrot.slane %v2077_v48, 4  ;;  %v2901_v17 = vand.u32 2147483647, %v2889_v24  ;;  %v3128_v31 = vsub.f32 %v3112_v42, %v5679_v32 }
 0x416   :  { %v3129_v44 = vsub.f32 %v3112_v42, %v5681_v39  ;;  %v1849_v16 = vadd.f32 %v6982_v59, %v1729_v49  ;;  %v1956_v23 = vadd.f32 %v1955_v1, %v1954_v13  ;;  %v1963_v35 = vadd.f32 %v1962_v5, %v1961_v43  ;;  %v2868_v1 = vpop.permute.xlu1 %2867 }
 0x417   :  { %v4340_v50 = vand.u32 2147483647, %v4328_v15  ;;  %v2045_v46 = vrot.slane %v2044_v6, 2  ;;  %v2052_v54 = vrot.slane %v2051_v7, 2  ;;  %v2912_v2 = vsub.f32 1.0, %v2900_v9 }
 0x418   :  { %v4341_v29 = vand.u32 2147483647, %v4329_v56  ;;  %v7114_v33 = vmax.f32 %v2147_v45, 0.0  ;;  %v2072_v30 = vadd.f32 %v2071_v63, %v2070_v12  ;;  %v2766_v36 = vsub.f32 %v2745_v55, %v5679_v32  ;;  %v2104_v63 = vpop.permute.xlu0 %2103 }
 0x419   :  { %v2767_v53 = vsub.f32 %v2745_v55, %v5681_v39  ;;  %v2079_v0 = vadd.f32 %v2078_v3, %v2077_v48  ;;  %v2913_v51 = vsub.f32 1.0, %v2901_v17  ;;  %v3140_v19 = vand.u32 2147483647, %v3128_v31 }
 0x41a   :  { %v3141_v18 = vand.u32 2147483647, %v3129_v44  ;;  %v7118_v59 = vadd.f32 %v1956_v23, %v1848_v40  ;;  %v7120_v13 = vadd.f32 %v1963_v35, %v1849_v16  ;;  %v4352_v43 = vsub.f32 1.0, %v4340_v50 }
 0x41b   :  { %v2778_v60 = vand.u32 2147483647, %v2766_v36  ;;  %v2046_v42 = vadd.f32 %v2045_v46, %v2044_v6  ;;  %v2053_v25 = vadd.f32 %v2052_v54, %v2051_v7  ;;  %v7122_v41 = vmax.f32 %v2912_v2, 0.0 }
 0x41c   :  { %v4353_v57 = vsub.f32 1.0, %v4341_v29  ;;  %v2073_v12 = vrot.slane %v2072_v30, 2  ;;  %v2779_v24 = vand.u32 2147483647, %v2767_v53  ;;  %v2114_v49 = vsub.f32 %v2092_v4, %v5679_v32 }
 0x41d   :  { %v2115_v48 = vsub.f32 %v2092_v4, %v5681_v39  ;;  %v2080_v5 = vrot.slane %v2079_v0, 2  ;;  %v7126_v15 = vmax.f32 %v2913_v51, 0.0  ;;  %v3152_v9 = vsub.f32 1.0, %v3140_v19 }
 0x41e   :  { %v3153_v56 = vsub.f32 1.0, %v3141_v18  ;;  %v7128_v40 = vmax.f32 %v4352_v43, 0.0  ;;  %v2790_v45 = vsub.f32 1.0, %v2778_v60  ;;  %v2126_v6 = vand.u32 2147483647, %v2114_v49 }
 0x41f   :  { %v2127_v7 = vand.u32 2147483647, %v2115_v48  ;;  %v2047_v3 = vrot.slane %v2046_v42, 1  ;;  %v7130_v17 = vmax.f32 %v4353_v57, 0.0  ;;  %v2886_v31 = vsub.f32 %v2868_v1, %v5679_v32 }
 0x420   :  { %8032 = vst [vmem:[#allocation47_spill] sm:$0xff] %v7128_v40  ;;  %v2887_v44 = vsub.f32 %v2868_v1, %v5681_v39  ;;  %v2054_v55 = vrot.slane %v2053_v25, 1  ;;  %v2074_v16 = vadd.f32 %v2073_v12, %v2072_v30  ;;  %v2791_v23 = vsub.f32 1.0, %v2779_v24 }
 0x421   :  { %8033 = vst [vmem:[#allocation20_spill] sm:$0xff] %v7130_v17  ;;  %v2138_v35 = vsub.f32 1.0, %v2126_v6  ;;  %v2139_v50 = vsub.f32 1.0, %v2127_v7  ;;  %v2898_v46 = vand.u32 2147483647, %v2886_v31  ;;  %v2120_v54 = vsub.f32 %v2104_v63, %v5679_v32 }
 0x422   :  { %v2121_v2 = vsub.f32 %v2104_v63, %v5681_v39  ;;  %v7136_v29 = vmax.f32 %v3152_v9, 0.0  ;;  %v7138_v36 = vmax.f32 %v3153_v56, 0.0  ;;  %v2802_v53 = vmax.f32 %v2790_v45, 0.0  ;;  %v8034_v45 = vld [vmem:[#allocation68_spill] sm:$0xff]  ;;  %v8035_v63 = vld [vmem:[#allocation15_spill] sm:$0xff] }
 0x423   :  { %v2899_v4 = vand.u32 2147483647, %v2887_v44  ;;  %v2150_v51 = vmax.f32 %v2138_v35, 0.0  ;;  %v2910_v19 = vsub.f32 1.0, %v2898_v46  ;;  %v2132_v18 = vand.u32 2147483647, %v2120_v54 }
 0x424   :  { %v2133_v43 = vand.u32 2147483647, %v2121_v2  ;;  %v2075_v60 = vrot.slane %v2074_v16, 1  ;;  %v2081_v30 = vadd.f32 %v2080_v5, %v2079_v0  ;;  %v4330_v57 = vsub.f32 %v7105_v22, %v5679_v32 }
 0x425   :  { %v4331_v12 = vsub.f32 %v7105_v22, %v5681_v39  ;;  %v2803_v24 = vmax.f32 %v2791_v23, 0.0  ;;  %v2151_v49 = vmax.f32 %v2139_v50, 0.0  ;;  %v2144_v48 = vsub.f32 1.0, %v2132_v18  ;;  %v8036_v22 = vld [vmem:[#allocation69_spill] sm:$0xff]  ;;  %v8037_v50 = vld [vmem:[#allocation16_spill] sm:$0xff] }
 0x426   :  { %v2145_v1 = vsub.f32 1.0, %v2133_v43  ;;  %v2048_v9 = vadd.f32 %v2047_v3, %v2046_v42  ;;  %v2055_v56 = vadd.f32 %v2054_v55, %v2053_v25  ;;  %v2824_v6 = vadd.f32 %v8034_v45, %v2802_v53  ;;  %v8038_v42 = vld [vmem:[#allocation61_spill] sm:$0xff] }
 0x427   :  { %v2911_v7 = vsub.f32 1.0, %v2899_v4  ;;  %v2162_v31 = vadd.f32 %v8035_v63, %v2150_v51  ;;  %v2922_v44 = vmax.f32 %v2910_v19, 0.0  ;;  %v2156_v35 = vmax.f32 %v2144_v48, 0.0  ;;  %v8039_v3 = vld [vmem:[#allocation9_spill] sm:$0xff] }
 0x428   :  { %v2157_v0 = vmax.f32 %v2145_v1, 0.0  ;;  %v2076_v5 = vadd.f32 %v2075_v60, %v2074_v16  ;;  %v2082_v46 = vrot.slane %v2081_v30, 1  ;;  %v7146_v54 = vand.u32 2147483647, %v4330_v57 }
 0x429   :  { %v7148_v2 = vand.u32 2147483647, %v4331_v12  ;;  %v2831_v23 = vadd.f32 %v8036_v22, %v2803_v24  ;;  %v2169_v18 = vadd.f32 %v8037_v50, %v2151_v49  ;;  %v2176_v25 = vadd.f32 %v2156_v35, %v8038_v42  ;;  %v2988_v12 = vpop.permute.xlu1 %2987 }
 0x42a   :  { %v2183_v55 = vadd.f32 %v2157_v0, %v8039_v3  ;;  %v7155_v53 = vadd.f32 %v2048_v9, %v7061_v47  ;;  %v7158_v4 = vadd.f32 %v2055_v56, %v7064_v27  ;;  %v2825_v16 = vrot.slane %v2824_v6, 4  ;;  %v8040_v0 = vld [vmem:[#allocation10_spill] sm:$0xff] }
 0x42b   :  { %v2923_v51 = vmax.f32 %v2911_v7, 0.0  ;;  %v2163_v19 = vrot.slane %v2162_v31, 4  ;;  %v2944_v43 = vadd.f32 %v7122_v41, %v2922_v44  ;;  %v2177_v60 = vrot.slane %v2176_v25, 4 }
 0x42c   :  { %v2184_v57 = vrot.slane %v2183_v55, 4  ;;  %v7161_v24 = vadd.f32 %v2082_v46, %v2081_v30  ;;  %v7164_v49 = vadd.f32 %v2076_v5, %v7118_v59  ;;  %v2832_v1 = vrot.slane %v2831_v23, 4  ;;  %v8041_v46 = vld [vmem:[#allocation64_spill] sm:$0xff] }
 0x42d   :  { %v2170_v27 = vrot.slane %v2169_v18, 4  ;;  %v2178_v9 = vadd.f32 %v2177_v60, %v2176_v25  ;;  %v2826_v45 = vadd.f32 %v2825_v16, %v2824_v6  ;;  %v2951_v7 = vadd.f32 %v7126_v15, %v2923_v51 }
 0x42e   :  { %v2185_v56 = vadd.f32 %v2184_v57, %v2183_v55  ;;  %v3006_v41 = vsub.f32 %v2988_v12, %v5679_v32  ;;  %v3007_v63 = vsub.f32 %v2988_v12, %v5681_v39  ;;  %v2164_v30 = vadd.f32 %v2163_v19, %v2162_v31  ;;  %v2112_v55 = vpop.permute.xlu0 %2111 }
 0x42f   :  { %v2945_v44 = vrot.slane %v2944_v43, 4  ;;  %v2179_v35 = vrot.slane %v2178_v9, 2  ;;  %v2086_v5 = vadd.f32 %v8040_v0, %v7066_v62  ;;  %v2087_v22 = vadd.f32 %v8041_v46, %v7068_v21 }
 0x430   :  { %v2186_v59 = vrot.slane %v2185_v56, 2  ;;  %v3018_v50 = vand.u32 2147483647, %v3006_v41  ;;  %v3019_v42 = vand.u32 2147483647, %v3007_v63  ;;  %v2833_v25 = vadd.f32 %v2832_v1, %v2831_v23 }
 0x431   :  { %v2171_v6 = vadd.f32 %v2170_v27, %v2169_v18  ;;  %v2180_v3 = vadd.f32 %v2179_v35, %v2178_v9  ;;  %v2827_v16 = vrot.slane %v2826_v45, 2  ;;  %v2952_v51 = vrot.slane %v2951_v7, 4  ;;  %v8042_v27 = vld [vmem:[#allocation70_spill] sm:$0xff] }
 0x432   :  { %v2187_v15 = vadd.f32 %v2186_v59, %v2185_v56  ;;  %v3030_v60 = vsub.f32 1.0, %v3018_v50  ;;  %v3031_v31 = vsub.f32 1.0, %v3019_v42  ;;  %v2165_v19 = vrot.slane %v2164_v30, 2  ;;  %v8043_v56 = vld [vmem:[#allocation71_spill] sm:$0xff] }
 0x433   :  { %v2946_v57 = vadd.f32 %v2945_v44, %v2944_v43  ;;  %v2181_v12 = vrot.slane %v2180_v3, 1  ;;  %v2124_v0 = vsub.f32 %v2112_v55, %v5679_v32  ;;  %v2125_v21 = vsub.f32 %v2112_v55, %v5681_v39  ;;  %v8044_v55 = vld [vmem:[#allocation37_spill] sm:$0xff] }
 0x434   :  { %v2188_v47 = vrot.slane %v2187_v15, 1  ;;  %v3042_v48 = vmax.f32 %v3030_v60, 0.0  ;;  %v3043_v62 = vmax.f32 %v3031_v31, 0.0  ;;  %v2834_v41 = vrot.slane %v2833_v25, 2 }
 0x435   :  { %v2172_v23 = vrot.slane %v2171_v6, 2  ;;  %v2182_v18 = vadd.f32 %v2181_v12, %v2180_v3  ;;  %v2136_v35 = vand.u32 2147483647, %v2124_v0  ;;  %v2137_v59 = vand.u32 2147483647, %v2125_v21 }
 0x436   :  { %v2189_v1 = vadd.f32 %v2188_v47, %v2187_v15  ;;  %v3064_v9 = vadd.f32 %v8042_v27, %v3042_v48  ;;  %v3071_v63 = vadd.f32 %v8043_v56, %v3043_v62  ;;  %v2166_v46 = vadd.f32 %v2165_v19, %v2164_v30 }
 0x437   :  { %v2953_v43 = vadd.f32 %v2952_v51, %v2951_v7  ;;  %v2206_v44 = vadd.f32 %v2182_v18, %v2086_v5  ;;  %v2947_v42 = vrot.slane %v2946_v57, 2  ;;  %v2148_v31 = vsub.f32 1.0, %v2136_v35  ;;  %v4428_v18 = vpop.permute.xlu0 %4427 }
 0x438   :  { %v2207_v50 = vadd.f32 %v2189_v1, %v2087_v22  ;;  %v3065_v60 = vrot.slane %v3064_v9, 4  ;;  %v2149_v17 = vsub.f32 1.0, %v2137_v59  ;;  %v2828_v40 = vadd.f32 %v2827_v16, %v2826_v45  ;;  %v3108_v16 = vpop.permute.xlu1 %3107 }
 0x439   :  { %v2326_v14 = vadd.f32 %v8044_v55, %v2206_v44  ;;  %v3072_v47 = vrot.slane %v3071_v63, 4  ;;  %v2835_v15 = vadd.f32 %v2834_v41, %v2833_v25  ;;  %v2173_v48 = vadd.f32 %v2172_v23, %v2171_v6 }
 0x43a   :  { %v2327_v3 = vadd.f32 %v8045_v61, %v2207_v50  ;;  %v2160_v12 = vmax.f32 %v2148_v31, 0.0  ;;  %v2161_v62 = vmax.f32 %v2149_v17, 0.0  ;;  %v2167_v0 = vrot.slane %v2166_v46, 1 }
 0x43b   :  { %v2954_v21 = vrot.slane %v2953_v43, 2  ;;  %v7181_v30 = vmul.f32 0.00390625, %v2326_v14  ;;  %v2948_v5 = vadd.f32 %v2947_v42, %v2946_v57  ;;  %v3066_v22 = vadd.f32 %v3065_v60, %v3064_v9 }
 0x43c   :  { %v7183_v7 = vmul.f32 0.00390625, %v2327_v3  ;;  %v2190_v51 = vadd.f32 %v2160_v12, %v7109_v10  ;;  %v2197_v45 = vadd.f32 %v2161_v62, %v7114_v33  ;;  %v7189_v61 = vadd.f32 %v7161_v24, %v7120_v13 }
 0x43d   :  { %v2338_v25 = vmax.f32 %v7181_v30, 1e-30  ;;  %v3073_v6 = vadd.f32 %v3072_v47, %v3071_v63  ;;  %v8046_v14 = vsub.f32 1.0, %v7146_v54  ;;  %v8047_v57 = vsub.f32 1.0, %v7148_v2 }
 0x43e   :  { %v2339_v17 = vmax.f32 %v7183_v7, 1e-30  ;;  %v2829_v10 = vrot.slane %v2828_v40, 1  ;;  %v2174_v33 = vrot.slane %v2173_v48, 1  ;;  %v2836_v23 = vrot.slane %v2835_v15, 1 }
 0x43f   :  { %v7195_v19 = vmax.f32 %v8046_v14, 0.0  ;;  %v7199_v41 = vmax.f32 %v8047_v57, 0.0  ;;  %4912 = vlog2.f32 %v2338_v25  ;;  %v2191_v13 = vrot.slane %v2190_v51, 4 }
 0x440   :  { %v2198_v24 = vrot.slane %v2197_v45, 4  ;;  %v2168_v1 = vadd.f32 %v2167_v0, %v2166_v46  ;;  %v2949_v27 = vrot.slane %v2948_v5, 1  ;;  %v2955_v9 = vadd.f32 %v2954_v21, %v2953_v43  ;;  %v3228_v46 = vpop.permute.xlu1 %3227 }
 0x441   :  { %v3067_v56 = vrot.slane %v3066_v22, 2  ;;  %4914 = vlog2.f32 %v2339_v17  ;;  %v3074_v63 = vrot.slane %v3073_v6, 2  ;;  %v3126_v54 = vsub.f32 %v3108_v16, %v5679_v32 }
 0x442   :  { %v3127_v35 = vsub.f32 %v3108_v16, %v5681_v39  ;;  %v2830_v2 = vadd.f32 %v2829_v10, %v2828_v40  ;;  %v2175_v59 = vadd.f32 %v2174_v33, %v2173_v48  ;;  %v2192_v44 = vadd.f32 %v2191_v13, %v2190_v51  ;;  %v4424_v48 = vpop.permute.xlu0 %4423 }
 0x443   :  { %v2199_v50 = vadd.f32 %v2198_v24, %v2197_v45  ;;  %v4446_v42 = vsub.f32 %v4428_v18, %v5679_v32  ;;  %v4447_v60 = vsub.f32 %v4428_v18, %v5681_v39  ;;  %v3138_v31 = vand.u32 2147483647, %v3126_v54 }
 0x444   :  { %v3139_v55 = vand.u32 2147483647, %v3127_v35  ;;  %v2837_v3 = vadd.f32 %v2836_v23, %v2835_v15  ;;  %v7206_v43 = vadd.f32 %v2168_v1, %v7155_v53  ;;  %v2950_v47 = vadd.f32 %v2949_v27, %v2948_v5 }
 0x445   :  { %v2956_v12 = vrot.slane %v2955_v9, 1  ;;  %v3068_v62 = vadd.f32 %v3067_v56, %v3066_v22  ;;  %v3075_v0 = vadd.f32 %v3074_v63, %v3073_v6  ;;  %v3150_v21 = vsub.f32 1.0, %v3138_v31 }
 0x446   :  { %v3151_v40 = vsub.f32 1.0, %v3139_v55  ;;  %v2193_v51 = vrot.slane %v2192_v44, 2  ;;  %v2200_v45 = vrot.slane %v2199_v50, 2  ;;  %v3246_v25 = vsub.f32 %v3228_v46, %v5679_v32 }
 0x447   :  { %v3247_v17 = vsub.f32 %v3228_v46, %v5681_v39  ;;  %v7211_v16 = vadd.f32 %v2175_v59, %v7158_v4  ;;  %v4458_v15 = vand.u32 2147483647, %v4446_v42  ;;  %v4459_v14 = vand.u32 2147483647, %v4447_v60 }
 0x448   :  { %v3162_v53 = vmax.f32 %v3150_v21, 0.0  ;;  %v2957_v57 = vadd.f32 %v2956_v12, %v2955_v9  ;;  %v4444_v5 = vsub.f32 %v4424_v48, %v5679_v32  ;;  %v4445_v22 = vsub.f32 %v4424_v48, %v5681_v39 }
 0x449   :  { %v3258_v6 = vand.u32 2147483647, %v3246_v25  ;;  %v4913_v10 = vpop.eup %4912  ;;  %v3069_v33 = vrot.slane %v3068_v62, 1  ;;  %v3076_v23 = vrot.slane %v3075_v0, 1  ;;  %v3163_v13 = vmax.f32 %v3151_v40, 0.0  ;;  %v2880_v40 = vpop.permute.xlu1 %2879 }
 0x44a   :  { %v3259_v24 = vand.u32 2147483647, %v3247_v17  ;;  %v2974_v18 = vadd.f32 %v2950_v47, %v2830_v2  ;;  %v2194_v1 = vadd.f32 %v2193_v51, %v2192_v44  ;;  %v2201_v27 = vadd.f32 %v2200_v45, %v2199_v50  ;;  %v4440_v2 = vpop.permute.xlu0 %4439 }
 0x44b   :  { %v3184_v4 = vadd.f32 %v7136_v29, %v3162_v53  ;;  %v4915_v56 = vpop.eup %4914  ;;  %v2350_v63 = vsub.f32 0.0, %v7181_v30  ;;  %v4470_v54 = vsub.f32 1.0, %v4458_v15  ;;  %v4471_v9 = vsub.f32 1.0, %v4459_v14 }
 0x44c   :  { %v3270_v35 = vsub.f32 1.0, %v3258_v6  ;;  %v2975_v59 = vadd.f32 %v2957_v57, %v2837_v3  ;;  %v2359_v42 = vmul.f32 0.6931472, %v4913_v10  ;;  %v4456_v60 = vand.u32 2147483647, %v4444_v5  ;;  %v8048_v10 = vld [vmem:[#allocation72_spill] sm:$0xff] }
 0x44d   :  { %v4457_v31 = vand.u32 2147483647, %v4445_v22  ;;  %v3070_v55 = vadd.f32 %v3069_v33, %v3068_v62  ;;  %v3077_v46 = vadd.f32 %v3076_v23, %v3075_v0  ;;  %v3191_v12 = vadd.f32 %v7138_v36, %v3163_v13 }
 0x44e   :  { %v3271_v21 = vsub.f32 1.0, %v3259_v24  ;;  %v2361_v44 = vmul.f32 0.6931472, %v4915_v56  ;;  %v2195_v50 = vrot.slane %v2194_v1, 1  ;;  %v2202_v47 = vrot.slane %v2201_v27, 1 }
 0x44f   :  { %v3185_v29 = vrot.slane %v3184_v4, 4  ;;  %vm2344_vm1 = vcmp.gt.f32.partialorder %v7181_v30, 0.0  ;;  %v2351_v48 = vsub.f32 0.0, %v7183_v7  ;;  %v7220_v51 = vmax.f32 %v4470_v54, 0.0 }
 0x450   :  { %v7222_v3 = vmax.f32 %v4471_v9, 0.0  ;;  %v3282_v45 = vmax.f32 %v3270_v35, 0.0  ;;  %v2368_v62 = vmul.f32 %v2359_v42, %v2350_v63  ;;  %v4468_v0 = vsub.f32 1.0, %v4456_v60  ;;  %v2216_v9 = vpop.permute.xlu0 %2215  ;;  %v3120_v35 = vpop.permute.xlu1 %3119 }
 0x451   :  { %v4469_v25 = vsub.f32 1.0, %v4457_v31  ;;  %v4452_v36 = vsub.f32 %v4440_v2, %v5679_v32  ;;  %vm2345_vm2 = vcmp.gt.f32.partialorder %v7183_v7, 0.0  ;;  %v7226_v17 = vadd.f32 %v3070_v55, %v2974_v18 }
 0x452   :  { %v7228_v15 = vadd.f32 %v3077_v46, %v2975_v59  ;;  %v3192_v14 = vrot.slane %v3191_v12, 4  ;;  %v3283_v53 = vmax.f32 %v3271_v21, 0.0  ;;  %v2369_v57 = vmul.f32 %v2361_v44, %v2351_v48 }
 0x453   :  { %v2196_v5 = vadd.f32 %v2195_v50, %v2194_v1  ;;  %v2203_v22 = vadd.f32 %v2202_v47, %v2201_v27  ;;  %v3186_v6 = vadd.f32 %v3185_v29, %v3184_v4  ;;  %v3304_v33 = vadd.f32 %v8048_v10, %v3282_v45  ;;  %v8051_v27 = vld [vmem:[#allocation73_spill] sm:$0xff] }
 0x454   :  { %v4453_v23 = vsub.f32 %v4440_v2, %v5681_v39  ;;  %v2892_v13 = vsub.f32 %v2880_v40, %v5679_v32  ;;  %v2893_v24 = vsub.f32 %v2880_v40, %v5681_v39  ;;  %v2374_v56 = vmul.f32 1.442695, %v2368_v62 }
 0x455   :  { %v7234_v63 = vmax.f32 %v4468_v0, 0.0  ;;  %v7236_v18 = vmax.f32 %v4469_v25, 0.0  ;;  %v7238_v54 = vand.u32 2147483647, %v4452_v36  ;;  %v3193_v1 = vadd.f32 %v3192_v14, %v3191_v12  ;;  %v7258_v14 = vpop.permute.xlu1 %2754 }
 0x456   :  { %v3311_v4 = vadd.f32 %v8051_v27, %v3283_v53  ;;  %v2904_v59 = vand.u32 2147483647, %v2892_v13  ;;  %v2905_v42 = vand.u32 2147483647, %v2893_v24  ;;  %v2375_v60 = vmul.f32 1.442695, %v2369_v57  ;;  %v2228_v27 = vpop.permute.xlu0 %2227 }
 0x457   :  { %8049 = vst [vmem:[#allocation48_spill] sm:$0xff] %v7234_v63  ;;  %8050 = vst [vmem:[#allocation49_spill] sm:$0xff] %v7236_v18  ;;  %v7242_v31 = vadd.f32 %v2196_v5, %v7164_v49  ;;  %v7245_v55 = vadd.f32 %v2203_v22, %v7189_v61  ;;  %v3187_v46 = vrot.slane %v3186_v6, 2  ;;  %v3305_v21 = vrot.slane %v3304_v33, 4  ;;  %v8057_v22 = vld [vmem:[#allocation83_spill] sm:$0xff] }
 0x458   :  { %v7247_v2 = vand.u32 2147483647, %v4453_v23  ;;  %v2916_v44 = vsub.f32 1.0, %v2904_v59  ;;  %v2236_v50 = vsub.f32 %v2216_v9, %v5679_v32  ;;  %v2380_v12 = vsel %vm2344_vm1, %v2374_v56, 0.0 }
 0x459   :  { %v2917_v29 = vsub.f32 1.0, %v2905_v42  ;;  %v2237_v40 = vsub.f32 %v2216_v9, %v5681_v39  ;;  %v3194_v49 = vrot.slane %v3193_v1, 2  ;;  %v3312_v48 = vrot.slane %v3311_v4, 4 }
 0x45a   :  { %v2248_v45 = vand.u32 2147483647, %v2236_v50  ;;  %v3132_v61 = vsub.f32 %v3120_v35, %v5679_v32  ;;  %v2381_v62 = vsel %vm2345_vm2, %v2375_v60, 0.0  ;;  %v3188_v0 = vadd.f32 %v3187_v46, %v3186_v6  ;;  %v8052_v46 = vld [vmem:[#allocation80_spill] sm:$0xff] }
 0x45b   :  { %v2249_v25 = vand.u32 2147483647, %v2237_v40  ;;  %v3133_v36 = vsub.f32 %v3120_v35, %v5681_v39  ;;  %v3306_v30 = vadd.f32 %v3305_v21, %v3304_v33  ;;  %v2928_v53 = vmax.f32 %v2916_v44, 0.0  ;;  %v8053_v21 = vld [vmem:[#allocation42_spill] sm:$0xff]  ;;  %v8054_v40 = vld [vmem:[#allocation81_spill] sm:$0xff] }
 0x45c   :  { %v2260_v57 = vsub.f32 1.0, %v2248_v45  ;;  %v3144_v5 = vand.u32 2147483647, %v3132_v61  ;;  %v2929_v10 = vmax.f32 %v2917_v29, 0.0  ;;  %v2391_v24 = vcombine.low %v2380_v12, %v2381_v62  ;;  %v8055_v29 = vld [vmem:[#allocation43_spill] sm:$0xff] }
 0x45d   :  { %v2261_v23 = vsub.f32 1.0, %v2249_v25  ;;  %v3145_v13 = vand.u32 2147483647, %v3133_v36  ;;  %v3195_v56 = vadd.f32 %v3194_v49, %v3193_v1  ;;  %v3189_v6 = vrot.slane %v3188_v0, 1  ;;  %v7267_v49 = vpop.permute.xlu1 %2995 }
 0x45e   :  { %v2272_v9 = vmax.f32 %v2260_v57, 0.0  ;;  %v3156_v7 = vsub.f32 1.0, %v3144_v5  ;;  %v3313_v59 = vadd.f32 %v3312_v48, %v3311_v4  ;;  %v3307_v60 = vrot.slane %v3306_v30, 2 }
 0x45f   :  { %v2273_v42 = vmax.f32 %v2261_v23, 0.0  ;;  %v3157_v35 = vsub.f32 1.0, %v3145_v13  ;;  %v2958_v33 = vadd.f32 %v2928_v53, %v8052_v46  ;;  %v2965_v45 = vadd.f32 %v2929_v10, %v8054_v40  ;;  %v8056_v53 = vld [vmem:[#allocation82_spill] sm:$0xff] }
 0x460   :  { %v2282_v44 = vadd.f32 %v2272_v9, %v8053_v21  ;;  %v3168_v50 = vmax.f32 %v3156_v7, 0.0  ;;  %v2242_v12 = vsub.f32 %v2228_v27, %v5679_v32  ;;  %v2243_v1 = vsub.f32 %v2228_v27, %v5681_v39 }
 0x461   :  { %v2289_v61 = vadd.f32 %v2273_v42, %v8055_v29  ;;  %v7269_v62 = vrot.slane %v2391_v24, 7  ;;  %v3196_v4 = vrot.slane %v3195_v56, 1  ;;  %v3169_v25 = vmax.f32 %v3157_v35, 0.0 }
 0x462   :  { %v2283_v48 = vrot.slane %v2282_v44, 4  ;;  %v3198_v57 = vadd.f32 %v3168_v50, %v8056_v53  ;;  %v2254_v5 = vand.u32 2147483647, %v2242_v12  ;;  %v2255_v23 = vand.u32 2147483647, %v2243_v1  ;;  %v7277_v1 = vpop.permute.xlu1 %3235 }
 0x463   :  { %v2290_v36 = vrot.slane %v2289_v61, 4  ;;  %v3308_v13 = vadd.f32 %v3307_v60, %v3306_v30  ;;  %v3314_v10 = vrot.slane %v3313_v59, 2  ;;  %v2959_v9 = vrot.slane %v2958_v33, 4 }
 0x464   :  { %v2284_v7 = vadd.f32 %v2283_v48, %v2282_v44  ;;  %v2966_v42 = vrot.slane %v2965_v45, 4  ;;  %v2266_v21 = vsub.f32 1.0, %v2254_v5  ;;  %v2267_v27 = vsub.f32 1.0, %v2255_v23 }
 0x465   :  { %v2291_v46 = vadd.f32 %v2290_v36, %v2289_v61  ;;  %v7272_v40 = vadd.f32 %v3189_v6, %v3188_v0  ;;  %v7274_v24 = vadd.f32 %v3196_v4, %v3195_v56  ;;  %v3205_v35 = vadd.f32 %v3169_v25, %v8057_v22 }
 0x466   :  { %v2285_v29 = vrot.slane %v2284_v7, 2  ;;  %v3199_v18 = vrot.slane %v3198_v57, 4  ;;  %v2278_v50 = vmax.f32 %v2266_v21, 0.0  ;;  %v2279_v12 = vmax.f32 %v2267_v27, 0.0 }
 0x467   :  { %v2292_v47 = vrot.slane %v2291_v46, 2  ;;  %v3309_v30 = vrot.slane %v3308_v13, 1  ;;  %v3315_v60 = vadd.f32 %v3314_v10, %v3313_v59  ;;  %v2960_v44 = vadd.f32 %v2959_v9, %v2958_v33 }
 0x468   :  { %v2286_v48 = vadd.f32 %v2285_v29, %v2284_v7  ;;  %v2967_v61 = vadd.f32 %v2966_v42, %v2965_v45  ;;  %v2310_v0 = vadd.f32 %v6920_v11, %v2278_v50  ;;  %v2317_v56 = vadd.f32 %v6922_v37, %v2279_v12  ;;  %v7285_v42 = vpop.permute.xlu1 %3347 }
 0x469   :  { %v2293_v36 = vadd.f32 %v2292_v47, %v2291_v46  ;;  %v3206_v4 = vrot.slane %v3205_v35, 4  ;;  %v2770_v22 = vsub.f32 %v7258_v14, %v5679_v32  ;;  %v2771_v25 = vsub.f32 %v7258_v14, %v5681_v39 }
 0x46a   :  { %v2287_v6 = vrot.slane %v2286_v48, 1  ;;  %v3200_v5 = vadd.f32 %v3199_v18, %v3198_v57  ;;  %v2311_v23 = vrot.slane %v2310_v0, 4  ;;  %v2318_v59 = vrot.slane %v2317_v56, 4 }
 0x46b   :  { %v2294_v53 = vrot.slane %v2293_v36, 1  ;;  %v2961_v33 = vrot.slane %v2960_v44, 2  ;;  %v2782_v45 = vand.u32 2147483647, %v2770_v22  ;;  %v2783_v47 = vand.u32 2147483647, %v2771_v25 }
 0x46c   :  { %v2288_v10 = vadd.f32 %v2287_v6, %v2286_v48  ;;  %v2968_v9 = vrot.slane %v2967_v61, 2  ;;  %v2312_v7 = vadd.f32 %v2311_v23, %v2310_v0  ;;  %v2319_v37 = vadd.f32 %v2318_v59, %v2317_v56 }
 0x46d   :  { %v2295_v11 = vadd.f32 %v2294_v53, %v2293_v36  ;;  %v3207_v21 = vadd.f32 %v3206_v4, %v3205_v35  ;;  %v2794_v27 = vsub.f32 1.0, %v2782_v45  ;;  %v2795_v29 = vsub.f32 1.0, %v2783_v47  ;;  %v8058_v4 = vld [vmem:[#allocation74_spill] sm:$0xff]  ;;  %v7296_v47 = vpop.permute.xlu1 %3351 }
 0x46e   :  { %v2324_v46 = vadd.f32 %v2288_v10, %v7206_v43  ;;  %v3201_v18 = vrot.slane %v3200_v5, 2  ;;  %v2313_v57 = vrot.slane %v2312_v7, 2  ;;  %v2320_v50 = vrot.slane %v2319_v37, 2 }
 0x46f   :  { %v2325_v14 = vadd.f32 %v2295_v11, %v7211_v16  ;;  %v3316_v12 = vrot.slane %v3315_v60, 1  ;;  %v2806_v6 = vmax.f32 %v2794_v27, 0.0  ;;  %v2807_v22 = vmax.f32 %v2795_v29, 0.0 }
 0x470   :  { %v7289_v48 = vmul.f32 0.00390625, %v2324_v46  ;;  %v3310_v36 = vadd.f32 %v3309_v30, %v3308_v13  ;;  %v2314_v56 = vadd.f32 %v2313_v57, %v2312_v7  ;;  %v2321_v25 = vadd.f32 %v2320_v50, %v2319_v37  ;;  %v8059_v30 = vld [vmem:[#allocation75_spill] sm:$0xff] }
 0x471   :  { %v7291_v0 = vmul.f32 0.00390625, %v2325_v14  ;;  %v2962_v53 = vadd.f32 %v2961_v33, %v2960_v44  ;;  %v2969_v43 = vadd.f32 %v2968_v9, %v2967_v61  ;;  %v2838_v23 = vadd.f32 %v8058_v4, %v2806_v6 }
 0x472   :  { %v2336_v35 = vmax.f32 %v7289_v48, 1e-30  ;;  %v3202_v59 = vadd.f32 %v3201_v18, %v3200_v5  ;;  %v3208_v10 = vrot.slane %v3207_v21, 2  ;;  %v2315_v45 = vrot.slane %v2314_v56, 1  ;;  %v4552_v5 = vpop.permute.xlu0 %4551 }
 0x473   :  { %v2337_v16 = vmax.f32 %v7291_v0, 1e-30  ;;  %v2322_v11 = vrot.slane %v2321_v25, 1  ;;  %v2839_v13 = vrot.slane %v2838_v23, 4  ;;  %v2845_v46 = vadd.f32 %v8059_v30, %v2807_v22 }
 0x474   :  { %4916 = vlog2.f32 %v2336_v35  ;;  %v3214_v44 = vadd.f32 %v7272_v40, %v7226_v17  ;;  %v3317_v61 = vadd.f32 %v3316_v12, %v3315_v60  ;;  %v2316_v33 = vadd.f32 %v2315_v45, %v2314_v56 }
 0x475   :  { %4918 = vlog2.f32 %v2337_v16  ;;  %v2963_v9 = vrot.slane %v2962_v53, 1  ;;  %v2323_v7 = vadd.f32 %v2322_v11, %v2321_v25  ;;  %v2840_v37 = vadd.f32 %v2839_v13, %v2838_v23  ;;  %v7311_v25 = vpop.permute.xlu1 %3359 }
 0x476   :  { %v2846_v27 = vrot.slane %v2845_v46, 4  ;;  %v2970_v29 = vrot.slane %v2969_v43, 1  ;;  %v3203_v14 = vrot.slane %v3202_v59, 1  ;;  %v3209_v18 = vadd.f32 %v3208_v10, %v3207_v21 }
 0x477   :  { %v2328_v57 = vadd.f32 %v2316_v33, %v7242_v31  ;;  %v3215_v50 = vadd.f32 %v7274_v24, %v7228_v15  ;;  %v7304_v6 = vadd.f32 %v3310_v36, %v3214_v44  ;;  %v2329_v17 = vadd.f32 %v2323_v7, %v7245_v55 }
 0x478   :  { %v2847_v40 = vadd.f32 %v2846_v27, %v2845_v46  ;;  %v2841_v12 = vrot.slane %v2840_v37, 2  ;;  %v4568_v22 = vsub.f32 %v4552_v5, %v5679_v32  ;;  %v4569_v56 = vsub.f32 %v4552_v5, %v5681_v39 }
 0x479   :  { %v7307_v60 = vmul.f32 0.00390625, %v2328_v57  ;;  %v7313_v21 = vadd.f32 %v3317_v61, %v3215_v50  ;;  %v7315_v31 = vadd.f32 %v2963_v9, %v2962_v53  ;;  %v7317_v35 = vmul.f32 0.00390625, %v2329_v17  ;;  %v7342_v7 = vpop.permute.xlu1 %3463 }
 0x47a   :  { %v2848_v15 = vrot.slane %v2847_v40, 2  ;;  %v7319_v24 = vadd.f32 %v2970_v29, %v2969_v43  ;;  %v7321_v55 = vadd.f32 %v3203_v14, %v3202_v59  ;;  %v3210_v36 = vrot.slane %v3209_v18, 1 }
 0x47b   :  { %v2340_v4 = vmax.f32 %v7307_v60, 1e-30  ;;  %vm2342_vm3 = vcmp.gt.f32.partialorder %v7289_v48, 0.0  ;;  %v2348_v23 = vsub.f32 0.0, %v7289_v48  ;;  %v2349_v16 = vsub.f32 0.0, %v7291_v0 }
 0x47c   :  { %v2341_v10 = vmax.f32 %v7317_v35, 1e-30  ;;  %vm2343_vm4 = vcmp.gt.f32.partialorder %v7291_v0, 0.0  ;;  %v2842_v53 = vadd.f32 %v2841_v12, %v2840_v37  ;;  %v7329_v45 = vand.u32 2147483647, %v4568_v22 }
 0x47d   :  { %4920 = vlog2.f32 %v2340_v4  ;;  %v7331_v43 = vand.u32 2147483647, %v4569_v56  ;;  %v2849_v11 = vadd.f32 %v2848_v15, %v2847_v40  ;;  %v3010_v13 = vsub.f32 %v7267_v49, %v5679_v32 }
 0x47e   :  { %v4917_v59 = vpop.eup %4916  ;;  %4922 = vlog2.f32 %v2341_v10  ;;  %v3011_v30 = vsub.f32 %v7267_v49, %v5681_v39  ;;  %v2352_v61 = vsub.f32 0.0, %v7307_v60  ;;  %v3250_v33 = vsub.f32 %v7277_v1, %v5679_v32 }
 0x47f   :  { %v4919_v46 = vpop.eup %4918  ;;  %v2355_v44 = vmul.f32 0.6931472, %v4917_v59  ;;  %v3251_v9 = vsub.f32 %v7277_v1, %v5681_v39  ;;  %v7344_v27 = vadd.f32 %v3210_v36, %v3209_v18  ;;  %v3022_v5 = vand.u32 2147483647, %v3010_v13 }
 0x480   :  { %v2357_v37 = vmul.f32 0.6931472, %v4919_v46  ;;  %v3023_v29 = vand.u32 2147483647, %v3011_v30  ;;  %v2843_v49 = vrot.slane %v2842_v53, 1  ;;  %v2850_v40 = vrot.slane %v2849_v11, 1  ;;  %v7352_v30 = vpop.permute.xlu1 %3467 }
 0x481   :  { %v2366_v14 = vmul.f32 %v2355_v44, %v2348_v23  ;;  %v3262_v57 = vand.u32 2147483647, %v3250_v33  ;;  %v3263_v50 = vand.u32 2147483647, %v3251_v9  ;;  %v3034_v12 = vsub.f32 1.0, %v3022_v5  ;;  %v8060_v9 = vld [vmem:[#allocation76_spill] sm:$0xff] }
 0x482   :  { %v2367_v17 = vmul.f32 %v2357_v37, %v2349_v16  ;;  %v3035_v22 = vsub.f32 1.0, %v3023_v29  ;;  %v2353_v15 = vsub.f32 0.0, %v7317_v35  ;;  %v3366_v18 = vsub.f32 %v7285_v42, %v5679_v32  ;;  %v8061_v5 = vld [vmem:[#allocation77_spill] sm:$0xff] }
 0x483   :  { %v2372_v56 = vmul.f32 1.442695, %v2366_v14  ;;  %v3274_v4 = vsub.f32 1.0, %v3262_v57  ;;  %v3275_v1 = vsub.f32 1.0, %v3263_v50  ;;  %v3046_v59 = vmax.f32 %v3034_v12, 0.0  ;;  %v8062_v57 = vld [vmem:[#allocation78_spill] sm:$0xff] }
 0x484   :  { %v2373_v10 = vmul.f32 1.442695, %v2367_v17  ;;  %v3047_v46 = vmax.f32 %v3035_v22, 0.0  ;;  %vm2346_vm7 = vcmp.gt.f32.partialorder %v7307_v60, 0.0  ;;  %v2844_v23 = vadd.f32 %v2843_v49, %v2842_v53  ;;  %v8063_v17 = vld [vmem:[#allocation79_spill] sm:$0xff] }
 0x485   :  { %v2378_v36 = vsel %vm2342_vm3, %v2372_v56, 0.0  ;;  %v3286_v16 = vmax.f32 %v3274_v4, 0.0  ;;  %v3287_v13 = vmax.f32 %v3275_v1, 0.0  ;;  %vm2347_vm8 = vcmp.gt.f32.partialorder %v7317_v35, 0.0 }
 0x486   :  { %v2379_v44 = vsel %vm2343_vm4, %v2373_v10, 0.0  ;;  %v2851_v33 = vadd.f32 %v2850_v40, %v2849_v11  ;;  %v3078_v37 = vadd.f32 %v8060_v9, %v3046_v59  ;;  %v3085_v29 = vadd.f32 %v8061_v5, %v3047_v46  ;;  %v7367_v5 = vpop.permute.xlu1 %3475 }
 0x487   :  { %v4921_v14 = vpop.eup %4920  ;;  %v2390_v48 = vcombine.low %v2378_v36, %v2379_v44  ;;  %v3318_v50 = vadd.f32 %v8062_v57, %v3286_v16  ;;  %v3325_v53 = vadd.f32 %v8063_v17, %v3287_v13  ;;  %v3367_v49 = vsub.f32 %v7285_v42, %v5681_v39 }
 0x488   :  { %v4923_v12 = vpop.eup %4922  ;;  %v2363_v22 = vmul.f32 0.6931472, %v4921_v14  ;;  %v3079_v0 = vrot.slane %v3078_v37, 4  ;;  %v3086_v56 = vrot.slane %v3085_v29, 4  ;;  %v3378_v4 = vand.u32 2147483647, %v3366_v18 }
 0x489   :  { %v2395_v11 = vsel %vm2394_vm5, %v7269_v62, %v2390_v48  ;;  %v2365_v40 = vmul.f32 0.6931472, %v4923_v12  ;;  %v3319_v1 = vrot.slane %v3318_v50, 4  ;;  %v3326_v10 = vrot.slane %v3325_v53, 4 }
 0x48a   :  { %v2397_v59 = vsel %vm2396_vm6, %v7269_v62, %v2395_v11  ;;  %v2370_v46 = vmul.f32 %v2363_v22, %v2352_v61  ;;  %v3080_v36 = vadd.f32 %v3079_v0, %v3078_v37  ;;  %v3087_v16 = vadd.f32 %v3086_v56, %v3085_v29 }
 0x48b   :  { %v2371_v42 = vmul.f32 %v2365_v40, %v2353_v15  ;;  %v3320_v13 = vadd.f32 %v3319_v1, %v3318_v50  ;;  %v3327_v44 = vadd.f32 %v3326_v10, %v3325_v53  ;;  %v3379_v9 = vand.u32 2147483647, %v3367_v49 }
 0x48c   :  { %v2376_v18 = vmul.f32 1.442695, %v2370_v46  ;;  %v3081_v14 = vrot.slane %v3080_v36, 2  ;;  %v3088_v48 = vrot.slane %v3087_v16, 2  ;;  %v3390_v57 = vsub.f32 1.0, %v3378_v4  ;;  %v7381_v46 = vpop.permute.xlu1 %3579 }
 0x48d   :  { %v2377_v17 = vmul.f32 1.442695, %v2371_v42  ;;  %v3321_v12 = vrot.slane %v3320_v13, 2  ;;  %v3328_v63 = vrot.slane %v3327_v44, 2  ;;  %v3368_v62 = vsub.f32 %v7296_v47, %v5679_v32 }
 0x48e   :  { %v2382_v61 = vsel %vm2346_vm7, %v2376_v18, 0.0  ;;  %v3082_v37 = vadd.f32 %v3081_v14, %v3080_v36  ;;  %v3089_v15 = vadd.f32 %v3088_v48, %v3087_v16  ;;  %v3369_v29 = vsub.f32 %v7296_v47, %v5681_v39 }
 0x48f   :  { %v2383_v50 = vsel %vm2347_vm8, %v2377_v17, 0.0  ;;  %v3322_v53 = vadd.f32 %v3321_v12, %v3320_v13  ;;  %v3391_v49 = vsub.f32 1.0, %v3379_v9  ;;  %v3380_v22 = vand.u32 2147483647, %v3368_v62 }
 0x490   :  { %v2392_v0 = vcombine.low %v2382_v61, %v2383_v50  ;;  %v3083_v56 = vrot.slane %v3082_v37, 1  ;;  %v3329_v4 = vadd.f32 %v3328_v63, %v3327_v44  ;;  %v3381_v11 = vand.u32 2147483647, %v3369_v29  ;;  %v7394_v29 = vpop.permute.xlu1 %3587 }
 0x491   :  { %v2976_v40 = vadd.f32 %v7315_v31, %v2844_v23  ;;  %v2977_v60 = vadd.f32 %v7319_v24, %v2851_v33  ;;  %v3392_v1 = vsub.f32 1.0, %v3380_v22  ;;  %v3372_v10 = vsub.f32 %v7311_v25, %v5679_v32 }
 0x492   :  { %v2398_v47 = vrot.slane %v2392_v0, 6  ;;  %v3090_v35 = vrot.slane %v3089_v15, 1  ;;  %v3323_v36 = vrot.slane %v3322_v53, 1  ;;  %v3393_v16 = vsub.f32 1.0, %v3381_v11 }
 0x493   :  { %v3402_v42 = vmax.f32 %v3390_v57, 0.0  ;;  %v3403_v13 = vmax.f32 %v3391_v49, 0.0  ;;  %v3404_v9 = vmax.f32 %v3392_v1, 0.0  ;;  %v3373_v63 = vsub.f32 %v7311_v25, %v5681_v39 }
 0x494   :  { %v2400_v31 = vsel %vm2399_vm9, %v2398_v47, %v2397_v59  ;;  %v3084_v23 = vadd.f32 %v3083_v56, %v3082_v37  ;;  %v3330_v24 = vrot.slane %v3329_v4, 1  ;;  %v3405_v33 = vmax.f32 %v3393_v16, 0.0 }
 0x495   :  { %v2402_v44 = vsel %vm2401_vm10, %v2398_v47, %v2400_v31  ;;  %v3424_v18 = vadd.f32 %v3404_v9, %v3402_v42  ;;  %v3384_v14 = vand.u32 2147483647, %v3372_v10  ;;  %v3385_v48 = vand.u32 2147483647, %v3373_v63  ;;  %v8065_v42 = vld [vmem:[#allocation12_spill] sm:$0xff] }
 0x496   :  { %2404 = vst [vmem:[%s7779_s2] sm:$0x77] %v2402_v44  ;;  %v3091_v57 = vadd.f32 %v3090_v35, %v3089_v15  ;;  %v3324_v17 = vadd.f32 %v3323_v36, %v3322_v53  ;;  %v3431_v12 = vadd.f32 %v3405_v33, %v3403_v13  ;;  %v3484_v25 = vsub.f32 %v7342_v7, %v5679_v32 }
 0x497   :  { %v3425_v62 = vrot.slane %v3424_v18, 4  ;;  %v3396_v59 = vsub.f32 1.0, %v3384_v14  ;;  %v3397_v61 = vsub.f32 1.0, %v3385_v48  ;;  %v3485_v37 = vsub.f32 %v7342_v7, %v5681_v39  ;;  %v8064_v7 = vld [vmem:[#allocation25_spill] sm:$0xff]  ;;  %v8066_v48 = vld [vmem:[#allocation84_spill] sm:$0xff] }
 0x498   :  { %v3096_v50 = vadd.f32 %v3084_v23, %v2976_v40  ;;  %v3331_v49 = vadd.f32 %v3330_v24, %v3329_v4  ;;  %v3432_v22 = vrot.slane %v3431_v12, 4  ;;  %v3496_v0 = vand.u32 2147483647, %v3484_v25 }
 0x499   :  { %v3426_v56 = vadd.f32 %v3425_v62, %v3424_v18  ;;  %v3408_v11 = vmax.f32 %v3396_v59, 0.0  ;;  %v3409_v15 = vmax.f32 %v3397_v61, 0.0  ;;  %v3497_v53 = vand.u32 2147483647, %v3485_v37  ;;  %v7403_v18 = vpop.permute.xlu1 %3591  ;;  %v8067_v59 = vld [vmem:[#allocation85_spill] sm:$0xff] }
 0x49a   :  { %v3433_v1 = vadd.f32 %v3432_v22, %v3431_v12  ;;  %v3508_v10 = vsub.f32 1.0, %v3496_v0  ;;  %v3486_v47 = vsub.f32 %v7352_v30, %v5679_v32  ;;  %v3487_v35 = vsub.f32 %v7352_v30, %v5681_v39 }
 0x49b   :  { %v3097_v36 = vadd.f32 %v3091_v57, %v2977_v60  ;;  %v3438_v16 = vadd.f32 %v3408_v11, %v8064_v7  ;;  %v3445_v40 = vadd.f32 %v3409_v15, %v8065_v42  ;;  %v3509_v4 = vsub.f32 1.0, %v3497_v53  ;;  %v8069_v42 = vld [vmem:[#allocation55_spill] sm:$0xff] }
 0x49c   :  { %v3427_v13 = vrot.slane %v3426_v56, 2  ;;  %v3520_v9 = vmax.f32 %v3508_v10, 0.0  ;;  %v3498_v63 = vand.u32 2147483647, %v3486_v47  ;;  %v3499_v31 = vand.u32 2147483647, %v3487_v35 }
 0x49d   :  { %v3216_v23 = vadd.f32 %v7321_v55, %v3096_v50  ;;  %v3439_v24 = vrot.slane %v3438_v16, 4  ;;  %v3446_v33 = vrot.slane %v3445_v40, 4  ;;  %v3521_v44 = vmax.f32 %v3509_v4, 0.0  ;;  %v8068_v35 = vld [vmem:[#allocation54_spill] sm:$0xff] }
 0x49e   :  { %v3434_v14 = vrot.slane %v3433_v1, 2  ;;  %v3530_v30 = vadd.f32 %v3520_v9, %v8066_v48  ;;  %v3510_v60 = vsub.f32 1.0, %v3498_v63  ;;  %v3511_v57 = vsub.f32 1.0, %v3499_v31 }
 0x49f   :  { %v3217_v12 = vadd.f32 %v7344_v27, %v3097_v36  ;;  %v3440_v25 = vadd.f32 %v3439_v24, %v3438_v16  ;;  %v3447_v62 = vadd.f32 %v3446_v33, %v3445_v40  ;;  %v3537_v61 = vadd.f32 %v3521_v44, %v8067_v59  ;;  %v7410_v40 = vpop.permute.xlu1 %3599 }
 0x4a0   :  { %v3428_v37 = vadd.f32 %v3427_v13, %v3426_v56  ;;  %v3531_v22 = vrot.slane %v3530_v30, 4  ;;  %v3522_v0 = vmax.f32 %v3510_v60, 0.0  ;;  %v3523_v55 = vmax.f32 %v3511_v57, 0.0 }
 0x4a1   :  { %v3336_v50 = vadd.f32 %v3324_v17, %v3216_v23  ;;  %v3441_v11 = vrot.slane %v3440_v25, 2  ;;  %v3448_v15 = vrot.slane %v3447_v62, 2  ;;  %v3538_v53 = vrot.slane %v3537_v61, 4 }
 0x4a2   :  { %v3435_v10 = vadd.f32 %v3434_v14, %v3433_v1  ;;  %v3532_v47 = vadd.f32 %v3531_v22, %v3530_v30  ;;  %v3544_v7 = vadd.f32 %v8068_v35, %v3522_v0  ;;  %v3551_v4 = vadd.f32 %v8069_v42, %v3523_v55 }
 0x4a3   :  { %v3337_v9 = vadd.f32 %v3331_v49, %v3217_v12  ;;  %v3442_v27 = vadd.f32 %v3441_v11, %v3440_v25  ;;  %v3449_v36 = vadd.f32 %v3448_v15, %v3447_v62  ;;  %v3539_v16 = vadd.f32 %v3538_v53, %v3537_v61  ;;  %v7420_v11 = vpop.permute.xlu1 %3703 }
 0x4a4   :  { %v3429_v56 = vrot.slane %v3428_v37, 1  ;;  %v3533_v13 = vrot.slane %v3532_v47, 2  ;;  %v3545_v63 = vrot.slane %v3544_v7, 4  ;;  %v3552_v31 = vrot.slane %v3551_v4, 4 }
 0x4a5   :  { %v3443_v17 = vrot.slane %v3442_v27, 1  ;;  %v3450_v23 = vrot.slane %v3449_v36, 1  ;;  %v3540_v24 = vrot.slane %v3539_v16, 2  ;;  %v3490_v1 = vsub.f32 %v7367_v5, %v5679_v32 }
 0x4a6   :  { %v3436_v33 = vrot.slane %v3435_v10, 1  ;;  %v3534_v44 = vadd.f32 %v3533_v13, %v3532_v47  ;;  %v3546_v14 = vadd.f32 %v3545_v63, %v3544_v7  ;;  %v3491_v49 = vsub.f32 %v7367_v5, %v5681_v39  ;;  %v8071_v13 = vld [vmem:[#allocation30_spill] sm:$0xff] }
 0x4a7   :  { %v3444_v48 = vadd.f32 %v3443_v17, %v3442_v27  ;;  %v3451_v30 = vadd.f32 %v3450_v23, %v3449_v36  ;;  %v3541_v60 = vadd.f32 %v3540_v24, %v3539_v16  ;;  %v3502_v57 = vand.u32 2147483647, %v3490_v1 }
 0x4a8   :  { %v3535_v12 = vrot.slane %v3534_v44, 1  ;;  %v3547_v25 = vrot.slane %v3546_v14, 2  ;;  %v3553_v62 = vadd.f32 %v3552_v31, %v3551_v4  ;;  %v3503_v59 = vand.u32 2147483647, %v3491_v49 }
 0x4a9   :  { %v7416_v61 = vadd.f32 %v3444_v48, %v3336_v50  ;;  %v7418_v22 = vadd.f32 %v3451_v30, %v3337_v9  ;;  %v3542_v0 = vrot.slane %v3541_v60, 1  ;;  %v3514_v55 = vsub.f32 1.0, %v3502_v57  ;;  %v8070_v50 = vld [vmem:[#allocation63_spill] sm:$0xff]  ;;  %v7446_v48 = vpop.permute.xlu1 %3707 }
 0x4aa   :  { %v3430_v15 = vadd.f32 %v3429_v56, %v3428_v37  ;;  %v3437_v53 = vadd.f32 %v3436_v33, %v3435_v10  ;;  %v3536_v47 = vadd.f32 %v3535_v12, %v3534_v44  ;;  %v3515_v5 = vsub.f32 1.0, %v3503_v59  ;;  %v8072_v10 = vld [vmem:[#allocation59_spill] sm:$0xff] }
 0x4ab   :  { %v3543_v35 = vadd.f32 %v3542_v0, %v3541_v60  ;;  %v3526_v7 = vmax.f32 %v3514_v55, 0.0  ;;  %v3602_v42 = vsub.f32 %v7381_v46, %v5679_v32  ;;  %v3603_v4 = vsub.f32 %v7381_v46, %v5681_v39  ;;  %v8073_v46 = vld [vmem:[#allocation60_spill] sm:$0xff] }
 0x4ac   :  { %v7427_v27 = vadd.f32 %v3536_v47, %v8070_v50  ;;  %v7429_v9 = vadd.f32 %v3547_v25, %v3546_v14  ;;  %v3554_v36 = vrot.slane %v3553_v62, 2  ;;  %v3527_v16 = vmax.f32 %v3515_v5, 0.0  ;;  %v8074_v47 = vld [vmem:[#allocation29_spill] sm:$0xff] }
 0x4ad   :  { %v7432_v37 = vadd.f32 %v3543_v35, %v8071_v13  ;;  %v3558_v56 = vadd.f32 %v8072_v10, %v3526_v7  ;;  %v3614_v63 = vand.u32 2147483647, %v3602_v42  ;;  %v3615_v31 = vand.u32 2147483647, %v3603_v4  ;;  %v8075_v35 = vld [vmem:[#allocation17_spill] sm:$0xff] }
 0x4ae   :  { %v7436_v17 = vadd.f32 %v3430_v15, %v7304_v6  ;;  %v7439_v23 = vadd.f32 %v3437_v53, %v7313_v21  ;;  %v3565_v24 = vadd.f32 %v8073_v46, %v3527_v16  ;;  %v3606_v1 = vsub.f32 %v7394_v29, %v5679_v32 }
 0x4af   :  { %v3559_v33 = vrot.slane %v3558_v56, 4  ;;  %v3626_v44 = vsub.f32 1.0, %v3614_v63  ;;  %v3627_v14 = vsub.f32 1.0, %v3615_v31  ;;  %v3607_v49 = vsub.f32 %v7394_v29, %v5681_v39  ;;  %v7457_v63 = vpop.permute.xlu1 %3715 }
 0x4b0   :  { %v3549_v30 = vrot.slane %v7429_v9, 1  ;;  %v7449_v6 = vadd.f32 %v3554_v36, %v3553_v62  ;;  %v3566_v60 = vrot.slane %v3565_v24, 4  ;;  %v3618_v21 = vand.u32 2147483647, %v3606_v1 }
 0x4b1   :  { %v3560_v57 = vadd.f32 %v3559_v33, %v3558_v56  ;;  %v3638_v12 = vmax.f32 %v3626_v44, 0.0  ;;  %v3639_v25 = vmax.f32 %v3627_v14, 0.0  ;;  %v3619_v59 = vand.u32 2147483647, %v3607_v49 }
 0x4b2   :  { %v3567_v0 = vadd.f32 %v3566_v60, %v3565_v24  ;;  %v3630_v55 = vsub.f32 1.0, %v3618_v21  ;;  %v3608_v15 = vsub.f32 %v7403_v18, %v5679_v32  ;;  %v3609_v29 = vsub.f32 %v7403_v18, %v5681_v39 }
 0x4b3   :  { %v3561_v53 = vrot.slane %v3560_v57, 2  ;;  %v3650_v5 = vadd.f32 %v8074_v47, %v3638_v12  ;;  %v3657_v62 = vadd.f32 %v8075_v35, %v3639_v25  ;;  %v3631_v7 = vsub.f32 1.0, %v3619_v59 }
 0x4b4   :  { %v3568_v42 = vrot.slane %v3567_v0, 2  ;;  %v3642_v4 = vmax.f32 %v3630_v55, 0.0  ;;  %v3620_v50 = vand.u32 2147483647, %v3608_v15  ;;  %v3621_v36 = vand.u32 2147483647, %v3609_v29 }
 0x4b5   :  { %v3562_v16 = vadd.f32 %v3561_v53, %v3560_v57  ;;  %v3651_v13 = vrot.slane %v3650_v5, 4  ;;  %v3658_v10 = vrot.slane %v3657_v62, 4  ;;  %v3643_v56 = vmax.f32 %v3631_v7, 0.0  ;;  %v7466_v7 = vpop.permute.xlu1 %3819 }
 0x4b6   :  { %v3569_v31 = vadd.f32 %v3568_v42, %v3567_v0  ;;  %v3632_v46 = vsub.f32 1.0, %v3620_v50  ;;  %v3633_v24 = vsub.f32 1.0, %v3621_v36  ;;  %v3612_v18 = vsub.f32 %v7410_v40, %v5679_v32 }
 0x4b7   :  { %v3563_v1 = vrot.slane %v3562_v16, 1  ;;  %v3652_v33 = vadd.f32 %v3651_v13, %v3650_v5  ;;  %v3659_v44 = vadd.f32 %v3658_v10, %v3657_v62  ;;  %v3613_v14 = vsub.f32 %v7410_v40, %v5681_v39 }
 0x4b8   :  { %v3570_v49 = vrot.slane %v3569_v31, 1  ;;  %v3644_v60 = vmax.f32 %v3632_v46, 0.0  ;;  %v3645_v21 = vmax.f32 %v3633_v24, 0.0  ;;  %v3624_v57 = vand.u32 2147483647, %v3612_v18 }
 0x4b9   :  { %v3564_v12 = vadd.f32 %v3563_v1, %v3562_v16  ;;  %v3653_v25 = vrot.slane %v3652_v33, 2  ;;  %v3660_v59 = vrot.slane %v3659_v44, 2  ;;  %v3625_v55 = vand.u32 2147483647, %v3613_v14 }
 0x4ba   :  { %v3571_v0 = vadd.f32 %v3570_v49, %v3569_v31  ;;  %v3664_v15 = vadd.f32 %v3644_v60, %v3642_v4  ;;  %v3671_v29 = vadd.f32 %v3645_v21, %v3643_v56  ;;  %v3636_v53 = vsub.f32 1.0, %v3624_v57  ;;  %v8076_v31 = vld [vmem:[#allocation18_spill] sm:$0xff] }
 0x4bb   :  { %v7464_v47 = vadd.f32 %v3564_v12, %v7416_v61  ;;  %v3654_v5 = vadd.f32 %v3653_v25, %v3652_v33  ;;  %v3661_v35 = vadd.f32 %v3660_v59, %v3659_v44  ;;  %v3637_v62 = vsub.f32 1.0, %v3625_v55  ;;  %v7483_v55 = vpop.permute.xlu1 %3827 }
 0x4bc   :  { %v7469_v40 = vadd.f32 %v3571_v0, %v7418_v22  ;;  %v3665_v42 = vrot.slane %v3664_v15, 4  ;;  %v3672_v50 = vrot.slane %v3671_v29, 4  ;;  %v3648_v36 = vmax.f32 %v3636_v53, 0.0  ;;  %v8077_v22 = vld [vmem:[#allocation32_spill] sm:$0xff] }
 0x4bd   :  { %v3655_v16 = vrot.slane %v3654_v5, 1  ;;  %v3662_v13 = vrot.slane %v3661_v35, 1  ;;  %v3649_v10 = vmax.f32 %v3637_v62, 0.0  ;;  %v3724_v4 = vsub.f32 %v7420_v11, %v5679_v32 }
 0x4be   :  { %v3666_v56 = vadd.f32 %v3665_v42, %v3664_v15  ;;  %v3673_v61 = vadd.f32 %v3672_v50, %v3671_v29  ;;  %v3678_v46 = vadd.f32 %v3648_v36, %v8076_v31  ;;  %v3725_v24 = vsub.f32 %v7420_v11, %v5681_v39 }
 0x4bf   :  { %v3656_v18 = vadd.f32 %v3655_v16, %v3654_v5  ;;  %v3663_v1 = vadd.f32 %v3662_v13, %v3661_v35  ;;  %v3685_v33 = vadd.f32 %v3649_v10, %v8077_v22  ;;  %v3736_v44 = vand.u32 2147483647, %v3724_v4  ;;  %v8078_v16 = vld [vmem:[#allocation45_spill] sm:$0xff] }
 0x4c0   :  { %v3667_v14 = vrot.slane %v3666_v56, 2  ;;  %v3674_v49 = vrot.slane %v3673_v61, 2  ;;  %v3679_v60 = vrot.slane %v3678_v46, 4  ;;  %v3737_v21 = vand.u32 2147483647, %v3725_v24  ;;  %v8079_v24 = vld [vmem:[#allocation23_spill] sm:$0xff] }
 0x4c1   :  { %v7478_v57 = vadd.f32 %v3656_v18, %v7427_v27  ;;  %v7481_v12 = vadd.f32 %v3663_v1, %v7432_v37  ;;  %v3686_v25 = vrot.slane %v3685_v33, 4  ;;  %v3748_v59 = vsub.f32 1.0, %v3736_v44 }
 0x4c2   :  { %v3556_v11 = vrot.slane %v7449_v6, 1  ;;  %v3668_v0 = vadd.f32 %v3667_v14, %v3666_v56  ;;  %v3680_v15 = vadd.f32 %v3679_v60, %v3678_v46  ;;  %v3749_v29 = vsub.f32 1.0, %v3737_v21 }
 0x4c3   :  { %v3687_v53 = vadd.f32 %v3686_v25, %v3685_v33  ;;  %v3760_v5 = vmax.f32 %v3748_v59, 0.0  ;;  %v3726_v35 = vsub.f32 %v7446_v48, %v5679_v32  ;;  %v3727_v27 = vsub.f32 %v7446_v48, %v5681_v39  ;;  %v7498_v33 = vpop.permute.xlu1 %3831 }
 0x4c4   :  { %v3669_v62 = vrot.slane %v3668_v0, 1  ;;  %v3675_v37 = vadd.f32 %v3674_v49, %v3673_v61  ;;  %v3681_v42 = vrot.slane %v3680_v15, 2  ;;  %v3761_v50 = vmax.f32 %v3749_v29, 0.0 }
 0x4c5   :  { %v3688_v36 = vrot.slane %v3687_v53, 2  ;;  %v3770_v13 = vadd.f32 %v3760_v5, %v8078_v16  ;;  %v3738_v10 = vand.u32 2147483647, %v3726_v35  ;;  %v3739_v4 = vand.u32 2147483647, %v3727_v27  ;;  %v8080_v5 = vld [vmem:[#allocation24_spill] sm:$0xff] }
 0x4c6   :  { %v3550_v56 = vadd.f32 %v3549_v30, %v7429_v9  ;;  %v7495_v31 = vadd.f32 %v3556_v11, %v7449_v6  ;;  %v3682_v46 = vadd.f32 %v3681_v42, %v3680_v15  ;;  %v3777_v18 = vadd.f32 %v3761_v50, %v8079_v24 }
 0x4c7   :  { %v3689_v48 = vadd.f32 %v3688_v36, %v3687_v53  ;;  %v3771_v1 = vrot.slane %v3770_v13, 4  ;;  %v3750_v61 = vsub.f32 1.0, %v3738_v10  ;;  %v3751_v22 = vsub.f32 1.0, %v3739_v4 }
 0x4c8   :  { %v3670_v44 = vadd.f32 %v3669_v62, %v3668_v0  ;;  %v3676_v14 = vrot.slane %v3675_v37, 1  ;;  %v3683_v49 = vrot.slane %v3682_v46, 1  ;;  %v3778_v60 = vrot.slane %v3777_v18, 4  ;;  %v8081_v0 = vld [vmem:[#allocation28_spill] sm:$0xff] }
 0x4c9   :  { %v3690_v21 = vrot.slane %v3689_v48, 1  ;;  %v3772_v25 = vadd.f32 %v3771_v1, %v3770_v13  ;;  %v3762_v59 = vmax.f32 %v3750_v61, 0.0  ;;  %v3763_v9 = vmax.f32 %v3751_v22, 0.0 }
 0x4ca   :  { %v3684_v30 = vadd.f32 %v3683_v49, %v3682_v46  ;;  %v3779_v6 = vadd.f32 %v3778_v60, %v3777_v18  ;;  %v3730_v11 = vsub.f32 %v7457_v63, %v5679_v32  ;;  %v3731_v15 = vsub.f32 %v7457_v63, %v5681_v39  ;;  %v7512_v46 = vpop.permute.xlu1 %3839 }
 0x4cb   :  { %v3691_v29 = vadd.f32 %v3690_v21, %v3689_v48  ;;  %v3773_v53 = vrot.slane %v3772_v25, 2  ;;  %v3784_v35 = vadd.f32 %v8080_v5, %v3762_v59  ;;  %v3791_v27 = vadd.f32 %v8081_v0, %v3763_v9  ;;  %v4556_v0 = vpop.permute.xlu0 %4555 }
 0x4cc   :  { %v7507_v62 = vadd.f32 %v3684_v30, %v7464_v47  ;;  %v3780_v42 = vrot.slane %v3779_v6, 2  ;;  %v3742_v50 = vand.u32 2147483647, %v3730_v11  ;;  %v3743_v36 = vand.u32 2147483647, %v3731_v15  ;;  %v8082_v15 = vld [vmem:[#allocation33_spill] sm:$0xff] }
 0x4cd   :  { %v7510_v16 = vadd.f32 %v3691_v29, %v7469_v40  ;;  %v3774_v13 = vadd.f32 %v3773_v53, %v3772_v25  ;;  %v3785_v10 = vrot.slane %v3784_v35, 4  ;;  %v3792_v4 = vrot.slane %v3791_v27, 4  ;;  %v8083_v53 = vld [vmem:[#allocation62_spill] sm:$0xff] }
 0x4ce   :  { %v3781_v63 = vadd.f32 %v3780_v42, %v3779_v6  ;;  %v3754_v24 = vsub.f32 1.0, %v3742_v50  ;;  %v3755_v18 = vsub.f32 1.0, %v3743_v36  ;;  %v3842_v48 = vsub.f32 %v7466_v7, %v5679_v32  ;;  %v7523_v50 = vpop.permute.xlu1 %3943 }
 0x4cf   :  { %v3775_v1 = vrot.slane %v3774_v13, 1  ;;  %v3786_v47 = vadd.f32 %v3785_v10, %v3784_v35  ;;  %v3793_v61 = vadd.f32 %v3792_v4, %v3791_v27  ;;  %v3843_v22 = vsub.f32 %v7466_v7, %v5681_v39 }
 0x4d0   :  { %v3782_v49 = vrot.slane %v3781_v63, 1  ;;  %v3766_v40 = vmax.f32 %v3754_v24, 0.0  ;;  %v3767_v60 = vmax.f32 %v3755_v18, 0.0  ;;  %v3854_v21 = vand.u32 2147483647, %v3842_v48 }
 0x4d1   :  { %v3776_v25 = vadd.f32 %v3775_v1, %v3774_v13  ;;  %v3787_v59 = vrot.slane %v3786_v47, 2  ;;  %v3794_v9 = vrot.slane %v3793_v61, 2  ;;  %v3855_v30 = vand.u32 2147483647, %v3843_v22 }
 0x4d2   :  { %v3677_v6 = vadd.f32 %v3676_v14, %v3675_v37  ;;  %v3783_v11 = vadd.f32 %v3782_v49, %v3781_v63  ;;  %v3798_v29 = vadd.f32 %v8082_v15, %v3766_v40  ;;  %v3805_v5 = vadd.f32 %v8083_v53, %v3767_v60 }
 0x4d3   :  { %v7521_v35 = vadd.f32 %v3776_v25, %v7478_v57  ;;  %v3788_v27 = vadd.f32 %v3787_v59, %v3786_v47  ;;  %v3795_v7 = vadd.f32 %v3794_v9, %v3793_v61  ;;  %v3866_v42 = vsub.f32 1.0, %v3854_v21  ;;  %v7545_v25 = vpop.permute.xlu1 %3947 }
 0x4d4   :  { %v3574_v36 = vadd.f32 %v3550_v56, %v7436_v17  ;;  %v7527_v13 = vadd.f32 %v3783_v11, %v7481_v12  ;;  %v3799_v37 = vrot.slane %v3798_v29, 4  ;;  %v3867_v14 = vsub.f32 1.0, %v3855_v30 }
 0x4d5   :  { %v3575_v10 = vadd.f32 %v7495_v31, %v7439_v23  ;;  %v3789_v4 = vrot.slane %v3788_v27, 1  ;;  %v3796_v63 = vrot.slane %v3795_v7, 1  ;;  %v3846_v57 = vsub.f32 %v7483_v55, %v5679_v32 }
 0x4d6   :  { %v4570_v24 = vsub.f32 %v4556_v0, %v5679_v32  ;;  %v3694_v18 = vadd.f32 %v3670_v44, %v3574_v36  ;;  %v3806_v48 = vrot.slane %v3805_v5, 4  ;;  %v3847_v17 = vsub.f32 %v7483_v55, %v5681_v39 }
 0x4d7   :  { %v3695_v56 = vadd.f32 %v3677_v6, %v3575_v10  ;;  %v3790_v12 = vadd.f32 %v3789_v4, %v3788_v27  ;;  %v3797_v1 = vadd.f32 %v3796_v63, %v3795_v7  ;;  %v3878_v47 = vmax.f32 %v3866_v42, 0.0  ;;  %v8087_v27 = vld [vmem:[#allocation66_spill] sm:$0xff] }
 0x4d8   :  { %v4592_v61 = vsub.f32 1.0, %v7329_v45  ;;  %v3800_v22 = vadd.f32 %v3799_v37, %v3798_v29  ;;  %v3879_v23 = vmax.f32 %v3867_v14, 0.0  ;;  %v3858_v31 = vand.u32 2147483647, %v3846_v57 }
 0x4d9   :  { %v8084_v49 = vsub.f32 1.0, %v7238_v54  ;;  %v7541_v60 = vadd.f32 %v3790_v12, %v3694_v18  ;;  %v7543_v44 = vadd.f32 %v3797_v1, %v3695_v56  ;;  %v3859_v21 = vand.u32 2147483647, %v3847_v17  ;;  %v8086_v54 = vld [vmem:[#allocation31_spill] sm:$0xff]  ;;  %v7571_v18 = vpop.permute.xlu1 %3955 }
 0x4da   :  { %v8085_v55 = vsub.f32 1.0, %v7247_v2  ;;  %v4593_v45 = vsub.f32 1.0, %v7331_v43  ;;  %v4571_v9 = vsub.f32 %v4556_v0, %v5681_v39  ;;  %v3807_v30 = vadd.f32 %v3806_v48, %v3805_v5 }
 0x4db   :  { %v7539_v40 = vmax.f32 %v8084_v49, 0.0  ;;  %v7553_v6 = vand.u32 2147483647, %v4570_v24  ;;  %v3890_v11 = vadd.f32 %v8086_v54, %v3878_v47  ;;  %v3848_v15 = vsub.f32 %v7498_v33, %v5679_v32 }
 0x4dc   :  { %v7549_v59 = vmax.f32 %v8085_v55, 0.0  ;;  %v3849_v29 = vsub.f32 %v7498_v33, %v5681_v39  ;;  %v7560_v53 = vmax.f32 %v4592_v61, 0.0  ;;  %v3801_v2 = vrot.slane %v3800_v22, 2 }
 0x4dd   :  { %v3897_v7 = vadd.f32 %v8087_v27, %v3879_v23  ;;  %v3870_v42 = vsub.f32 1.0, %v3858_v31  ;;  %v3871_v43 = vsub.f32 1.0, %v3859_v21  ;;  %v3860_v36 = vand.u32 2147483647, %v3848_v15 }
 0x4de   :  { %v3861_v0 = vand.u32 2147483647, %v3849_v29  ;;  %v3852_v5 = vsub.f32 %v7512_v46, %v5679_v32  ;;  %v7565_v37 = vmax.f32 %v4593_v45, 0.0  ;;  %v7567_v14 = vand.u32 2147483647, %v4571_v9 }
 0x4df   :  { %v3808_v10 = vrot.slane %v3807_v30, 2  ;;  %v3853_v33 = vsub.f32 %v7512_v46, %v5681_v39  ;;  %v3891_v4 = vrot.slane %v3890_v11, 4  ;;  %v3872_v63 = vsub.f32 1.0, %v3860_v36  ;;  %v8089_v36 = vld [vmem:[#allocation67_spill] sm:$0xff] }
 0x4e0   :  { %8088 = vst [vmem:[#allocation50_spill] sm:$0xff] %v7565_v37  ;;  %v3873_v57 = vsub.f32 1.0, %v3861_v0  ;;  %v3864_v24 = vand.u32 2147483647, %v3852_v5  ;;  %v3802_v48 = vadd.f32 %v3801_v2, %v3800_v22  ;;  %v3898_v17 = vrot.slane %v3897_v7, 4  ;;  %v7578_v0 = vpop.permute.xlu1 %4067 }
 0x4e1   :  { %v3882_v56 = vmax.f32 %v3870_v42, 0.0  ;;  %v3865_v12 = vand.u32 2147483647, %v3853_v33  ;;  %v3883_v1 = vmax.f32 %v3871_v43, 0.0  ;;  %v3884_v47 = vmax.f32 %v3872_v63, 0.0  ;;  %v8090_v63 = vld [vmem:[#allocation86_spill] sm:$0xff] }
 0x4e2   :  { %v3885_v61 = vmax.f32 %v3873_v57, 0.0  ;;  %v3876_v23 = vsub.f32 1.0, %v3864_v24  ;;  %v3809_v31 = vadd.f32 %v3808_v10, %v3807_v30  ;;  %v3964_v21 = vsub.f32 %v7523_v50, %v5679_v32 }
 0x4e3   :  { %v3877_v49 = vsub.f32 1.0, %v3865_v12  ;;  %v3965_v46 = vsub.f32 %v7523_v50, %v5681_v39  ;;  %v3892_v55 = vadd.f32 %v3891_v4, %v3890_v11  ;;  %v3904_v45 = vadd.f32 %v3884_v47, %v3882_v56 }
 0x4e4   :  { %v3911_v9 = vadd.f32 %v3885_v61, %v3883_v1  ;;  %v3888_v54 = vmax.f32 %v3876_v23, 0.0  ;;  %v3899_v22 = vadd.f32 %v3898_v17, %v3897_v7  ;;  %v3976_v29 = vand.u32 2147483647, %v3964_v21  ;;  %v8091_v21 = vld [vmem:[#allocation87_spill] sm:$0xff] }
 0x4e5   :  { %v3889_v15 = vmax.f32 %v3877_v49, 0.0  ;;  %v3977_v2 = vand.u32 2147483647, %v3965_v46  ;;  %v3803_v27 = vrot.slane %v3802_v48, 1  ;;  %v3905_v42 = vrot.slane %v3904_v45, 4 }
 0x4e6   :  { %v3912_v43 = vrot.slane %v3911_v9, 4  ;;  %v3918_v30 = vadd.f32 %v3888_v54, %v8089_v36  ;;  %v3810_v5 = vrot.slane %v3809_v31, 1  ;;  %v3988_v10 = vsub.f32 1.0, %v3976_v29  ;;  %v8092_v54 = vld [vmem:[#allocation88_spill] sm:$0xff] }
 0x4e7   :  { %v3989_v33 = vsub.f32 1.0, %v3977_v2  ;;  %v3966_v50 = vsub.f32 %v7545_v25, %v5679_v32  ;;  %v3906_v11 = vadd.f32 %v3905_v42, %v3904_v45  ;;  %v3925_v7 = vadd.f32 %v3889_v15, %v8090_v63  ;;  %v7589_v42 = vpop.permute.xlu1 %4059 }
 0x4e8   :  { %v3913_v4 = vadd.f32 %v3912_v43, %v3911_v9  ;;  %v3967_v57 = vsub.f32 %v7545_v25, %v5681_v39  ;;  %v3919_v24 = vrot.slane %v3918_v30, 4  ;;  %v4000_v17 = vmax.f32 %v3988_v10, 0.0 }
 0x4e9   :  { %v4001_v56 = vmax.f32 %v3989_v33, 0.0  ;;  %v3978_v12 = vand.u32 2147483647, %v3966_v50  ;;  %v3893_v1 = vrot.slane %v3892_v55, 2  ;;  %v3907_v47 = vrot.slane %v3906_v11, 2 }
 0x4ea   :  { %v3914_v61 = vrot.slane %v3913_v4, 2  ;;  %v3979_v23 = vand.u32 2147483647, %v3967_v57  ;;  %v3900_v49 = vrot.slane %v3899_v22, 2  ;;  %v4010_v46 = vadd.f32 %v4000_v17, %v8091_v21 }
 0x4eb   :  { %v4017_v29 = vadd.f32 %v4001_v56, %v8092_v54  ;;  %v3990_v45 = vsub.f32 1.0, %v3978_v12  ;;  %v4594_v9 = vsub.f32 1.0, %v7553_v6  ;;  %v4595_v15 = vsub.f32 1.0, %v7567_v14  ;;  %v8093_v6 = vld [vmem:[#allocation89_spill] sm:$0xff] }
 0x4ec   :  { %v3926_v2 = vrot.slane %v3925_v7, 4  ;;  %v3991_v25 = vsub.f32 1.0, %v3979_v23  ;;  %v3908_v43 = vadd.f32 %v3907_v47, %v3906_v11  ;;  %v3915_v36 = vadd.f32 %v3914_v61, %v3913_v4  ;;  %v8095_v11 = vld [vmem:[#allocation90_spill] sm:$0xff] }
 0x4ed   :  { %v3920_v10 = vadd.f32 %v3919_v24, %v3918_v30  ;;  %v4002_v33 = vmax.f32 %v3990_v45, 0.0  ;;  %v3804_v50 = vadd.f32 %v3803_v27, %v3802_v48  ;;  %v3811_v63 = vadd.f32 %v3810_v5, %v3809_v31 }
 0x4ee   :  { %v7591_v57 = vadd.f32 %v3893_v1, %v3892_v55  ;;  %v4003_v17 = vmax.f32 %v3991_v25, 0.0  ;;  %v7593_v21 = vadd.f32 %v3900_v49, %v3899_v22  ;;  %v4011_v56 = vrot.slane %v4010_v46, 4  ;;  %v7608_v1 = vpop.permute.xlu1 %4063 }
 0x4ef   :  { %v4018_v12 = vrot.slane %v4017_v29, 4  ;;  %v4024_v54 = vadd.f32 %v8093_v6, %v4002_v33  ;;  %v7596_v14 = vmax.f32 %v4594_v9, 0.0  ;;  %v7598_v23 = vmax.f32 %v4595_v15, 0.0 }
 0x4f0   :  { %v3927_v37 = vadd.f32 %v3926_v2, %v3925_v7  ;;  %v4031_v4 = vadd.f32 %v8095_v11, %v4003_v17  ;;  %v3909_v30 = vrot.slane %v3908_v43, 1  ;;  %v3916_v24 = vrot.slane %v3915_v36, 1 }
 0x4f1   :  { %8094 = vst [vmem:[#allocation51_spill] sm:$0xff] %v7598_v23  ;;  %v3921_v48 = vrot.slane %v3920_v10, 2  ;;  %v4025_v31 = vrot.slane %v4024_v54, 4  ;;  %v7602_v55 = vadd.f32 %v3804_v50, %v7507_v62  ;;  %v7605_v22 = vadd.f32 %v3811_v63, %v7510_v16 }
 0x4f2   :  { %v3895_v27 = vrot.slane %v7591_v57, 1  ;;  %v4032_v5 = vrot.slane %v4031_v4, 4  ;;  %v3902_v47 = vrot.slane %v7593_v21, 1  ;;  %v4012_v7 = vadd.f32 %v4011_v56, %v4010_v46 }
 0x4f3   :  { %v4019_v61 = vadd.f32 %v4018_v12, %v4017_v29  ;;  %v4026_v49 = vadd.f32 %v4025_v31, %v4024_v54  ;;  %v3928_v45 = vrot.slane %v3927_v37, 2  ;;  %v3970_v15 = vsub.f32 %v7571_v18, %v5679_v32 }
 0x4f4   :  { %v4033_v9 = vadd.f32 %v4032_v5, %v4031_v4  ;;  %v3971_v62 = vsub.f32 %v7571_v18, %v5681_v39  ;;  %v3910_v16 = vadd.f32 %v3909_v30, %v3908_v43  ;;  %v3917_v2 = vadd.f32 %v3916_v24, %v3915_v36  ;;  %v4080_v43 = vpop.permute.xlu1 %4079 }
 0x4f5   :  { %v3922_v25 = vadd.f32 %v3921_v48, %v3920_v10  ;;  %v4027_v33 = vrot.slane %v4026_v49, 2  ;;  %v3982_v63 = vand.u32 2147483647, %v3970_v15  ;;  %v4086_v46 = vsub.f32 %v7578_v0, %v5679_v32 }
 0x4f6   :  { %v4034_v50 = vrot.slane %v4033_v9, 2  ;;  %v3983_v17 = vand.u32 2147483647, %v3971_v62  ;;  %v4013_v29 = vrot.slane %v4012_v7, 2  ;;  %v4020_v56 = vrot.slane %v4019_v61, 2 }
 0x4f7   :  { %v4028_v12 = vadd.f32 %v4027_v33, %v4026_v49  ;;  %v4087_v6 = vsub.f32 %v7578_v0, %v5681_v39  ;;  %v3994_v11 = vsub.f32 1.0, %v3982_v63  ;;  %v4098_v18 = vand.u32 2147483647, %v4086_v46 }
 0x4f8   :  { %v4035_v54 = vadd.f32 %v4034_v50, %v4033_v9  ;;  %v3995_v4 = vsub.f32 1.0, %v3983_v17  ;;  %v3934_v36 = vadd.f32 %v3910_v16, %v7541_v60  ;;  %v3935_v10 = vadd.f32 %v3917_v2, %v7543_v44  ;;  %v8096_v50 = vld [vmem:[#allocation34_spill] sm:$0xff]  ;;  %v8097_v60 = vld [vmem:[#allocation35_spill] sm:$0xff] }
 0x4f9   :  { %v4029_v30 = vrot.slane %v4028_v12, 1  ;;  %v4099_v24 = vand.u32 2147483647, %v4087_v6  ;;  %v4006_v31 = vmax.f32 %v3994_v11, 0.0  ;;  %v4110_v15 = vsub.f32 1.0, %v4098_v18 }
 0x4fa   :  { %v4036_v48 = vrot.slane %v4035_v54, 1  ;;  %v4007_v5 = vmax.f32 %v3995_v4, 0.0  ;;  %v4082_v0 = vsub.f32 %v7589_v42, %v5679_v32  ;;  %v4083_v9 = vsub.f32 %v7589_v42, %v5681_v39 }
 0x4fb   :  { %v4030_v62 = vadd.f32 %v4029_v30, %v4028_v12  ;;  %v4111_v49 = vsub.f32 1.0, %v4099_v24  ;;  %v4038_v63 = vadd.f32 %v8096_v50, %v4006_v31  ;;  %v4122_v44 = vmax.f32 %v4110_v15, 0.0  ;;  %v7631_v30 = vpop.permute.xlu1 %4191 }
 0x4fc   :  { %v4037_v33 = vadd.f32 %v4036_v48, %v4035_v54  ;;  %v4045_v16 = vadd.f32 %v8097_v60, %v4007_v5  ;;  %v3923_v2 = vrot.slane %v3922_v25, 1  ;;  %v3929_v17 = vadd.f32 %v3928_v45, %v3927_v37 }
 0x4fd   :  { %v7627_v46 = vadd.f32 %v4030_v62, %v3934_v36  ;;  %v4094_v6 = vand.u32 2147483647, %v4082_v0  ;;  %v4014_v11 = vadd.f32 %v4013_v29, %v4012_v7  ;;  %v4123_v4 = vmax.f32 %v4111_v49, 0.0 }
 0x4fe   :  { %v7629_v12 = vadd.f32 %v4037_v33, %v3935_v10  ;;  %v4095_v18 = vand.u32 2147483647, %v4083_v9  ;;  %v3896_v42 = vadd.f32 %v3895_v27, %v7591_v57  ;;  %v3903_v54 = vadd.f32 %v3902_v47, %v7593_v21 }
 0x4ff   :  { %v4039_v24 = vrot.slane %v4038_v63, 4  ;;  %v4084_v48 = vsub.f32 %v7608_v1, %v5679_v32  ;;  %v4021_v31 = vadd.f32 %v4020_v56, %v4019_v61  ;;  %v4046_v37 = vrot.slane %v4045_v16, 4 }
 0x500   :  { %v4144_v45 = vadd.f32 %v6951_v34, %v4122_v44  ;;  %v4085_v7 = vsub.f32 %v7608_v1, %v5681_v39  ;;  %v3924_v29 = vadd.f32 %v3923_v2, %v3922_v25  ;;  %v3930_v36 = vrot.slane %v3929_v17, 1  ;;  %v4180_v1 = vpop.permute.xlu1 %4179 }
 0x501   :  { %v4106_v10 = vsub.f32 1.0, %v4094_v6  ;;  %v4096_v5 = vand.u32 2147483647, %v4084_v48  ;;  %v4015_v15 = vrot.slane %v4014_v11, 1  ;;  %v4151_v57 = vadd.f32 %v6955_v28, %v4123_v4 }
 0x502   :  { %v4107_v27 = vsub.f32 1.0, %v4095_v18  ;;  %v4097_v21 = vand.u32 2147483647, %v4085_v7  ;;  %v4040_v47 = vadd.f32 %v4039_v24, %v4038_v63  ;;  %v4092_v49 = vsub.f32 %v4080_v43, %v5679_v32 }
 0x503   :  { %v4108_v62 = vsub.f32 1.0, %v4096_v5  ;;  %v4093_v61 = vsub.f32 %v4080_v43, %v5681_v39  ;;  %v4022_v56 = vrot.slane %v4021_v31, 1  ;;  %v4047_v34 = vadd.f32 %v4046_v37, %v4045_v16 }
 0x504   :  { %v4145_v0 = vrot.slane %v4144_v45, 4  ;;  %v4109_v9 = vsub.f32 1.0, %v4097_v21  ;;  %v4118_v25 = vmax.f32 %v4106_v10, 0.0  ;;  %v4104_v50 = vand.u32 2147483647, %v4092_v49 }
 0x505   :  { %v4120_v33 = vmax.f32 %v4108_v62, 0.0  ;;  %v4105_v60 = vand.u32 2147483647, %v4093_v61  ;;  %v3931_v44 = vadd.f32 %v3930_v36, %v3929_v17  ;;  %v4152_v2 = vrot.slane %v4151_v57, 4 }
 0x506   :  { %v4119_v28 = vmax.f32 %v4107_v27, 0.0  ;;  %v4121_v6 = vmax.f32 %v4109_v9, 0.0  ;;  %v4041_v4 = vrot.slane %v4040_v47, 2  ;;  %v4116_v18 = vsub.f32 1.0, %v4104_v50  ;;  %v7648_v27 = vpop.permute.xlu1 %4195 }
 0x507   :  { %v4130_v63 = vadd.f32 %v4120_v33, %v4118_v25  ;;  %v4117_v24 = vsub.f32 1.0, %v4105_v60  ;;  %v4016_v48 = vadd.f32 %v4015_v15, %v4014_v11  ;;  %v4023_v7 = vadd.f32 %v4022_v56, %v4021_v31 }
 0x508   :  { %v4048_v43 = vrot.slane %v4047_v34, 2  ;;  %v4137_v5 = vadd.f32 %v4121_v6, %v4119_v28  ;;  %v4146_v16 = vadd.f32 %v4145_v0, %v4144_v45  ;;  %v4128_v21 = vmax.f32 %v4116_v18, 0.0 }
 0x509   :  { %v4131_v37 = vrot.slane %v4130_v63, 4  ;;  %v4129_v23 = vmax.f32 %v4117_v24, 0.0  ;;  %v3932_v10 = vadd.f32 %v3896_v42, %v7521_v35  ;;  %v3933_v62 = vadd.f32 %v3903_v54, %v7527_v13 }
 0x50a   :  { %v7646_v17 = vadd.f32 %v3924_v29, %v7602_v55  ;;  %v4138_v36 = vrot.slane %v4137_v5, 4  ;;  %v7651_v49 = vadd.f32 %v3931_v44, %v7605_v22  ;;  %v4042_v11 = vadd.f32 %v4041_v4, %v4040_v47 }
 0x50b   :  { %v4153_v31 = vadd.f32 %v4152_v2, %v4151_v57  ;;  %v4158_v45 = vadd.f32 %v4128_v21, %v7044_v26  ;;  %v7654_v15 = vadd.f32 %v4016_v48, %v3932_v10  ;;  %v4165_v61 = vadd.f32 %v4129_v23, %v7048_v8 }
 0x50c   :  { %v4208_v35 = vsub.f32 %v7631_v30, %v5679_v32  ;;  %v4209_v13 = vsub.f32 %v7631_v30, %v5681_v39  ;;  %v7661_v55 = vadd.f32 %v4023_v7, %v3933_v62  ;;  %v4049_v42 = vadd.f32 %v4048_v43, %v4047_v34  ;;  %v4308_v30 = vpop.permute.xlu1 %4307 }
 0x50d   :  { %v4147_v54 = vrot.slane %v4146_v16, 2  ;;  %v4132_v22 = vadd.f32 %v4131_v37, %v4130_v63  ;;  %v4139_v29 = vadd.f32 %v4138_v36, %v4137_v5  ;;  %v4202_v26 = vsub.f32 %v4180_v1, %v5679_v32 }
 0x50e   :  { %v4220_v47 = vand.u32 2147483647, %v4208_v35  ;;  %v4221_v57 = vand.u32 2147483647, %v4209_v13  ;;  %v4043_v56 = vrot.slane %v4042_v11, 1  ;;  %v4154_v0 = vrot.slane %v4153_v31, 2 }
 0x50f   :  { %v4159_v9 = vrot.slane %v4158_v45, 4  ;;  %v4203_v8 = vsub.f32 %v4180_v1, %v5681_v39  ;;  %v4166_v23 = vrot.slane %v4165_v61, 4  ;;  %v4214_v50 = vand.u32 2147483647, %v4202_v26 }
 0x510   :  { %v4232_v25 = vsub.f32 1.0, %v4220_v47  ;;  %v4233_v33 = vsub.f32 1.0, %v4221_v57  ;;  %v4050_v60 = vrot.slane %v4049_v42, 1  ;;  %v4148_v44 = vadd.f32 %v4147_v54, %v4146_v16  ;;  %v7668_v47 = vpop.permute.xlu1 %4299 }
 0x511   :  { %v4133_v34 = vrot.slane %v4132_v22, 2  ;;  %v4215_v2 = vand.u32 2147483647, %v4203_v8  ;;  %v4140_v28 = vrot.slane %v4139_v29, 2  ;;  %v4226_v63 = vsub.f32 1.0, %v4214_v50 }
 0x512   :  { %v4244_v6 = vmax.f32 %v4232_v25, 0.0  ;;  %v4245_v4 = vmax.f32 %v4233_v33, 0.0  ;;  %v4044_v18 = vadd.f32 %v4043_v56, %v4042_v11  ;;  %v4155_v24 = vadd.f32 %v4154_v0, %v4153_v31 }
 0x513   :  { %v4160_v48 = vadd.f32 %v4159_v9, %v4158_v45  ;;  %v4227_v7 = vsub.f32 1.0, %v4215_v2  ;;  %v4167_v43 = vadd.f32 %v4166_v23, %v4165_v61  ;;  %v4238_v37 = vmax.f32 %v4226_v63, 0.0 }
 0x514   :  { %v4264_v1 = vadd.f32 %v4244_v6, %v7072_v52  ;;  %v4271_v5 = vadd.f32 %v4245_v4, %v7076_v20  ;;  %v4051_v21 = vadd.f32 %v4050_v60, %v4049_v42  ;;  %v4149_v10 = vrot.slane %v4148_v44, 1 }
 0x515   :  { %v4134_v62 = vadd.f32 %v4133_v34, %v4132_v22  ;;  %v4239_v16 = vmax.f32 %v4227_v7, 0.0  ;;  %v4141_v36 = vadd.f32 %v4140_v28, %v4139_v29  ;;  %v4250_v54 = vadd.f32 %v7082_v58, %v4238_v37  ;;  %v4304_v28 = vpop.permute.xlu1 %4303 }
 0x516   :  { %v4265_v35 = vrot.slane %v4264_v1, 4  ;;  %v4272_v13 = vrot.slane %v4271_v5, 4  ;;  %v4156_v11 = vrot.slane %v4155_v24, 1  ;;  %v4161_v31 = vrot.slane %v4160_v48, 2 }
 0x517   :  { %v4257_v45 = vadd.f32 %v7092_v38, %v4239_v16  ;;  %v4210_v52 = vsub.f32 %v7648_v27, %v5679_v32  ;;  %v4168_v20 = vrot.slane %v4167_v43, 2  ;;  %v4211_v22 = vsub.f32 %v7648_v27, %v5681_v39 }
 0x518   :  { %v4266_v61 = vadd.f32 %v4265_v35, %v4264_v1  ;;  %v4273_v42 = vadd.f32 %v4272_v13, %v4271_v5  ;;  %v4135_v29 = vrot.slane %v4134_v62, 1  ;;  %v4251_v57 = vrot.slane %v4250_v54, 4 }
 0x519   :  { %v4258_v26 = vrot.slane %v4257_v45, 4  ;;  %v4222_v56 = vand.u32 2147483647, %v4210_v52  ;;  %v4142_v58 = vrot.slane %v4141_v36, 1  ;;  %v4223_v8 = vand.u32 2147483647, %v4211_v22 }
 0x51a   :  { %v4267_v0 = vrot.slane %v4266_v61, 2  ;;  %v4274_v9 = vrot.slane %v4273_v42, 2  ;;  %v4150_v23 = vadd.f32 %v4149_v10, %v4148_v44  ;;  %v4326_v38 = vsub.f32 %v4308_v30, %v5679_v32 }
 0x51b   :  { %v4234_v25 = vsub.f32 1.0, %v4222_v56  ;;  %v4327_v33 = vsub.f32 %v4308_v30, %v5681_v39  ;;  %v4157_v50 = vadd.f32 %v4156_v11, %v4155_v24  ;;  %v4162_v60 = vadd.f32 %v4161_v31, %v4160_v48 }
 0x51c   :  { %v4169_v34 = vadd.f32 %v4168_v20, %v4167_v43  ;;  %v4235_v2 = vsub.f32 1.0, %v4223_v8  ;;  %v4252_v27 = vadd.f32 %v4251_v57, %v4250_v54  ;;  %v4259_v6 = vadd.f32 %v4258_v26, %v4257_v45  ;;  %v4320_v20 = vpop.permute.xlu1 %4319  ;;  %v8100_v26 = vld [vmem:[#allocation47_spill] sm:$0xff] }
 0x51d   :  { %v4338_v4 = vand.u32 2147483647, %v4326_v38  ;;  %v4339_v63 = vand.u32 2147483647, %v4327_v33  ;;  %v4136_v7 = vadd.f32 %v4135_v29, %v4134_v62  ;;  %v4143_v1 = vadd.f32 %v4142_v58, %v4141_v36 }
 0x51e   :  { %v4268_v5 = vadd.f32 %v4267_v0, %v4266_v61  ;;  %v4275_v37 = vadd.f32 %v4274_v9, %v4273_v42  ;;  %v4246_v16 = vmax.f32 %v4234_v25, 0.0  ;;  %v4247_v44 = vmax.f32 %v4235_v2, 0.0 }
 0x51f   :  { %v4350_v10 = vsub.f32 1.0, %v4338_v4  ;;  %v4351_v35 = vsub.f32 1.0, %v4339_v63  ;;  %v4056_v13 = vadd.f32 %v4044_v18, %v7646_v17  ;;  %v4057_v30 = vadd.f32 %v4051_v21, %v7651_v49  ;;  %v8098_v49 = vld [vmem:[#allocation46_spill] sm:$0xff]  ;;  %v8099_v21 = vld [vmem:[#allocation19_spill] sm:$0xff] }
 0x520   :  { %v4163_v24 = vrot.slane %v4162_v60, 1  ;;  %v4170_v48 = vrot.slane %v4169_v34, 1  ;;  %v4253_v43 = vrot.slane %v4252_v27, 2  ;;  %v4260_v11 = vrot.slane %v4259_v6, 2 }
 0x521   :  { %v4362_v54 = vmax.f32 %v4350_v10, 0.0  ;;  %v4363_v31 = vmax.f32 %v4351_v35, 0.0  ;;  %v4174_v45 = vadd.f32 %v4150_v23, %v7627_v46  ;;  %v4175_v62 = vadd.f32 %v4157_v50, %v7629_v12 }
 0x522   :  { %v7682_v36 = vadd.f32 %v4136_v7, %v7654_v15  ;;  %v4269_v52 = vrot.slane %v4268_v5, 1  ;;  %v7685_v61 = vadd.f32 %v4143_v1, %v7661_v55  ;;  %v4276_v17 = vrot.slane %v4275_v37, 1  ;;  %v8101_v55 = vld [vmem:[#allocation20_spill] sm:$0xff] }
 0x523   :  { %v4278_v18 = vadd.f32 %v8098_v49, %v4246_v16  ;;  %v4285_v42 = vadd.f32 %v8099_v21, %v4247_v44  ;;  %v4164_v22 = vadd.f32 %v4163_v24, %v4162_v60  ;;  %v4171_v29 = vadd.f32 %v4170_v48, %v4169_v34 }
 0x524   :  { %v4322_v46 = vsub.f32 %v7668_v47, %v5679_v32  ;;  %v4323_v12 = vsub.f32 %v7668_v47, %v5681_v39  ;;  %v4254_v15 = vadd.f32 %v4253_v43, %v4252_v27  ;;  %v7693_v57 = vadd.f32 %v4260_v11, %v4259_v6  ;;  %v4432_v27 = vpop.permute.xlu1 %4431 }
 0x525   :  { %v4384_v56 = vadd.f32 %v8100_v26, %v4362_v54  ;;  %v4391_v58 = vadd.f32 %v8101_v55, %v4363_v31  ;;  %v4270_v0 = vadd.f32 %v4269_v52, %v4268_v5  ;;  %v4324_v23 = vsub.f32 %v4304_v28, %v5679_v32 }
 0x526   :  { %v4334_v9 = vand.u32 2147483647, %v4322_v46  ;;  %v4335_v8 = vand.u32 2147483647, %v4323_v12  ;;  %v4277_v25 = vadd.f32 %v4276_v17, %v4275_v37  ;;  %v4279_v38 = vrot.slane %v4278_v18, 4 }
 0x527   :  { %v4286_v33 = vrot.slane %v4285_v42, 4  ;;  %v4325_v50 = vsub.f32 %v4304_v28, %v5681_v39  ;;  %v7699_v60 = vadd.f32 %v4164_v22, %v4056_v13  ;;  %v7701_v47 = vadd.f32 %v4171_v29, %v4057_v30 }
 0x528   :  { %v4346_v34 = vsub.f32 1.0, %v4334_v9  ;;  %v4336_v2 = vand.u32 2147483647, %v4324_v23  ;;  %v4385_v6 = vrot.slane %v4384_v56, 4  ;;  %v4392_v4 = vrot.slane %v4391_v58, 4  ;;  %v4420_v21 = vpop.permute.xlu1 %4419 }
 0x529   :  { %v4347_v63 = vsub.f32 1.0, %v4335_v8  ;;  %v4337_v7 = vand.u32 2147483647, %v4325_v50  ;;  %v7703_v1 = vadd.f32 %v4270_v0, %v4174_v45  ;;  %v4255_v5 = vrot.slane %v4254_v15, 1 }
 0x52a   :  { %v4262_v37 = vrot.slane %v7693_v57, 1  ;;  %v4348_v16 = vsub.f32 1.0, %v4336_v2  ;;  %v7706_v44 = vadd.f32 %v4277_v25, %v4175_v62  ;;  %v4280_v28 = vadd.f32 %v4279_v38, %v4278_v18 }
 0x52b   :  { %v4287_v10 = vadd.f32 %v4286_v33, %v4285_v42  ;;  %v4349_v35 = vsub.f32 1.0, %v4337_v7  ;;  %v4358_v13 = vmax.f32 %v4346_v34, 0.0  ;;  %v4332_v24 = vsub.f32 %v4320_v20, %v5679_v32 }
 0x52c   :  { %v4360_v30 = vmax.f32 %v4348_v16, 0.0  ;;  %v4333_v48 = vsub.f32 %v4320_v20, %v5681_v39  ;;  %v4386_v43 = vadd.f32 %v4385_v6, %v4384_v56  ;;  %v4393_v11 = vadd.f32 %v4392_v4, %v4391_v58 }
 0x52d   :  { %v4359_v54 = vmax.f32 %v4347_v63, 0.0  ;;  %v4361_v31 = vmax.f32 %v4349_v35, 0.0  ;;  %v4256_v45 = vadd.f32 %v4255_v5, %v4254_v15  ;;  %v4344_v17 = vand.u32 2147483647, %v4332_v24 }
 0x52e   :  { %v4370_v52 = vadd.f32 %v4360_v30, %v4358_v13  ;;  %v4345_v49 = vand.u32 2147483647, %v4333_v48  ;;  %v4281_v62 = vrot.slane %v4280_v28, 2  ;;  %v4288_v22 = vrot.slane %v4287_v10, 2 }
 0x52f   :  { %v4377_v18 = vadd.f32 %v4361_v31, %v4359_v54  ;;  %v4448_v42 = vsub.f32 %v4432_v27, %v5679_v32  ;;  %v4356_v46 = vsub.f32 1.0, %v4344_v17  ;;  %v4449_v26 = vsub.f32 %v4432_v27, %v5681_v39  ;;  %v4436_v27 = vpop.permute.xlu1 %4435 }
 0x530   :  { %v4371_v29 = vrot.slane %v4370_v52, 4  ;;  %v4357_v12 = vsub.f32 1.0, %v4345_v49  ;;  %v4387_v20 = vrot.slane %v4386_v43, 2  ;;  %v4394_v56 = vrot.slane %v4393_v11, 2 }
 0x531   :  { %v4378_v55 = vrot.slane %v4377_v18, 4  ;;  %v4460_v58 = vand.u32 2147483647, %v4448_v42  ;;  %v4368_v15 = vmax.f32 %v4356_v46, 0.0  ;;  %v4461_v8 = vand.u32 2147483647, %v4449_v26 }
 0x532   :  { %v4372_v0 = vadd.f32 %v4371_v29, %v4370_v52  ;;  %v4369_v9 = vmax.f32 %v4357_v12, 0.0  ;;  %v4442_v38 = vsub.f32 %v4420_v21, %v5679_v32  ;;  %v4443_v33 = vsub.f32 %v4420_v21, %v5681_v39  ;;  %v8102_v26 = vld [vmem:[#allocation48_spill] sm:$0xff] }
 0x533   :  { %v4379_v23 = vadd.f32 %v4378_v55, %v4377_v18  ;;  %v4472_v25 = vsub.f32 1.0, %v4460_v58  ;;  %v4282_v50 = vadd.f32 %v4281_v62, %v4280_v28  ;;  %v4398_v2 = vadd.f32 %v4368_v15, %v7195_v19  ;;  %v4548_v29 = vpop.permute.xlu1 %4547 }
 0x534   :  { %v4373_v34 = vrot.slane %v4372_v0, 2  ;;  %v4473_v6 = vsub.f32 1.0, %v4461_v8  ;;  %v4405_v4 = vadd.f32 %v4369_v9, %v7199_v41  ;;  %v4454_v7 = vand.u32 2147483647, %v4442_v38 }
 0x535   :  { %v4484_v63 = vmax.f32 %v4472_v25, 0.0  ;;  %v4455_v5 = vand.u32 2147483647, %v4443_v33  ;;  %v4388_v16 = vadd.f32 %v4387_v20, %v4386_v43  ;;  %v4395_v35 = vadd.f32 %v4394_v56, %v4393_v11 }
 0x536   :  { %v4380_v13 = vrot.slane %v4379_v23, 2  ;;  %v4485_v30 = vmax.f32 %v4473_v6, 0.0  ;;  %v4399_v24 = vrot.slane %v4398_v2, 4  ;;  %v4466_v54 = vsub.f32 1.0, %v4454_v7 }
 0x537   :  { %v4504_v48 = vadd.f32 %v4484_v63, %v7220_v51  ;;  %v4467_v31 = vsub.f32 1.0, %v4455_v5  ;;  %v4263_v28 = vadd.f32 %v4262_v37, %v7693_v57  ;;  %v4289_v52 = vadd.f32 %v4288_v22, %v4287_v10  ;;  %v8103_v22 = vld [vmem:[#allocation49_spill] sm:$0xff]  ;;  %v4540_v63 = vpop.permute.xlu1 %4539 }
 0x538   :  { %v4374_v19 = vadd.f32 %v4373_v34, %v4372_v0  ;;  %v4511_v17 = vadd.f32 %v4485_v30, %v7222_v3  ;;  %v4406_v49 = vrot.slane %v4405_v4, 4  ;;  %v4478_v21 = vmax.f32 %v4466_v54, 0.0 }
 0x539   :  { %v4505_v41 = vrot.slane %v4504_v48, 4  ;;  %v4479_v62 = vmax.f32 %v4467_v31, 0.0  ;;  %v4283_v18 = vrot.slane %v4282_v50, 1  ;;  %v4389_v43 = vrot.slane %v4388_v16, 1 }
 0x53a   :  { %v4381_v11 = vadd.f32 %v4380_v13, %v4379_v23  ;;  %v4512_v42 = vrot.slane %v4511_v17, 4  ;;  %v4396_v46 = vrot.slane %v4395_v35, 1  ;;  %v4400_v12 = vadd.f32 %v4399_v24, %v4398_v2 }
 0x53b   :  { %v4506_v51 = vadd.f32 %v4505_v41, %v4504_v48  ;;  %v4490_v20 = vadd.f32 %v8102_v26, %v4478_v21  ;;  %v4292_v57 = vadd.f32 %v4256_v45, %v7682_v36  ;;  %v4290_v37 = vrot.slane %v4289_v52, 1 }
 0x53c   :  { %v4375_v10 = vrot.slane %v4374_v19, 1  ;;  %v4497_v3 = vadd.f32 %v8103_v22, %v4479_v62  ;;  %v4293_v56 = vadd.f32 %v4263_v28, %v7685_v61  ;;  %v4407_v55 = vadd.f32 %v4406_v49, %v4405_v4  ;;  %v4544_v62 = vpop.permute.xlu1 %4543 }
 0x53d   :  { %v4507_v58 = vrot.slane %v4506_v51, 2  ;;  %v4513_v0 = vadd.f32 %v4512_v42, %v4511_v17  ;;  %v4284_v15 = vadd.f32 %v4283_v18, %v4282_v50  ;;  %v4390_v9 = vadd.f32 %v4389_v43, %v4388_v16 }
 0x53e   :  { %v4382_v8 = vrot.slane %v4381_v11, 1  ;;  %v4450_v23 = vsub.f32 %v4436_v27, %v5679_v32  ;;  %v4397_v25 = vadd.f32 %v4396_v46, %v4395_v35  ;;  %v4401_v38 = vrot.slane %v4400_v12, 2 }
 0x53f   :  { %v4491_v33 = vrot.slane %v4490_v20, 4  ;;  %v4451_v34 = vsub.f32 %v4436_v27, %v5681_v39  ;;  %v7725_v36 = vadd.f32 %v4290_v37, %v4289_v52  ;;  %v4376_v45 = vadd.f32 %v4375_v10, %v4374_v19 }
 0x540   :  { %v4498_v2 = vrot.slane %v4497_v3, 4  ;;  %v4462_v6 = vand.u32 2147483647, %v4450_v23  ;;  %v4408_v61 = vrot.slane %v4407_v55, 2  ;;  %v4508_v4 = vadd.f32 %v4507_v58, %v4506_v51 }
 0x541   :  { %v4514_v7 = vrot.slane %v4513_v0, 2  ;;  %v4463_v5 = vand.u32 2147483647, %v4451_v34  ;;  %v7728_v50 = vadd.f32 %v4284_v15, %v7699_v60  ;;  %v4414_v16 = vadd.f32 %v4390_v9, %v7703_v1 }
 0x542   :  { %v4383_v35 = vadd.f32 %v4382_v8, %v4381_v11  ;;  %v4474_v13 = vsub.f32 1.0, %v4462_v6  ;;  %v7732_v30 = vadd.f32 %v4397_v25, %v7706_v44  ;;  %v7734_v27 = vadd.f32 %v4401_v38, %v4400_v12  ;;  %v8104_v8 = vld [vmem:[#allocation50_spill] sm:$0xff]  ;;  %v4560_v38 = vpop.permute.xlu1 %4559 }
 0x543   :  { %v4492_v24 = vadd.f32 %v4491_v33, %v4490_v20  ;;  %v4475_v48 = vsub.f32 1.0, %v4463_v5  ;;  %v4499_v54 = vadd.f32 %v4498_v2, %v4497_v3  ;;  %v4566_v28 = vsub.f32 %v4548_v29, %v5679_v32 }
 0x544   :  { %v4486_v31 = vmax.f32 %v4474_v13, 0.0  ;;  %v4567_v52 = vsub.f32 %v4548_v29, %v5681_v39  ;;  %v7738_v19 = vadd.f32 %v4376_v45, %v4292_v57  ;;  %v7740_v60 = vadd.f32 %v4408_v61, %v4407_v55 }
 0x545   :  { %v4509_v1 = vrot.slane %v4508_v4, 1  ;;  %v4515_v17 = vadd.f32 %v4514_v7, %v4513_v0  ;;  %v7742_v49 = vadd.f32 %v4383_v35, %v4293_v56  ;;  %v4487_v44 = vmax.f32 %v4475_v48, 0.0 }
 0x546   :  { %v4578_v41 = vand.u32 2147483647, %v4566_v28  ;;  %v4579_v21 = vand.u32 2147483647, %v4567_v52  ;;  %v4403_v18 = vrot.slane %v7734_v27, 1  ;;  %v4493_v43 = vrot.slane %v4492_v24, 2 }
 0x547   :  { %v4518_v11 = vadd.f32 %v7539_v40, %v4486_v31  ;;  %v4562_v42 = vsub.f32 %v4540_v63, %v5679_v32  ;;  %v4500_v29 = vrot.slane %v4499_v54, 2  ;;  %v4563_v51 = vsub.f32 %v4540_v63, %v5681_v39 }
 0x548   :  { %v4590_v46 = vsub.f32 1.0, %v4578_v41  ;;  %v4591_v12 = vsub.f32 1.0, %v4579_v21  ;;  %v4410_v26 = vrot.slane %v7740_v60, 1  ;;  %v4510_v20 = vadd.f32 %v4509_v1, %v4508_v4 }
 0x549   :  { %v4516_v57 = vrot.slane %v4515_v17, 1  ;;  %v4574_v37 = vand.u32 2147483647, %v4562_v42  ;;  %v4525_v10 = vadd.f32 %v7549_v59, %v4487_v44  ;;  %v4575_v56 = vand.u32 2147483647, %v4563_v51 }
 0x54a   :  { %v4602_v22 = vmax.f32 %v4590_v46, 0.0  ;;  %v4603_v3 = vmax.f32 %v4591_v12, 0.0  ;;  %v4494_v55 = vadd.f32 %v4493_v43, %v4492_v24  ;;  %v4519_v58 = vrot.slane %v4518_v11, 4 }
 0x54b   :  { %v4564_v40 = vsub.f32 %v4544_v62, %v5679_v32  ;;  %v4565_v0 = vsub.f32 %v4544_v62, %v5681_v39  ;;  %v4501_v15 = vadd.f32 %v4500_v29, %v4499_v54  ;;  %v4586_v25 = vsub.f32 1.0, %v4574_v37 }
 0x54c   :  { %v4624_v9 = vadd.f32 %v7560_v53, %v4602_v22  ;;  %v4631_v23 = vadd.f32 %v8104_v8, %v4603_v3  ;;  %v4517_v33 = vadd.f32 %v4516_v57, %v4515_v17  ;;  %v4587_v34 = vsub.f32 1.0, %v4575_v56  ;;  %v8105_v8 = vld [vmem:[#allocation51_spill] sm:$0xff] }
 0x54d   :  { %v4576_v45 = vand.u32 2147483647, %v4564_v40  ;;  %v4577_v59 = vand.u32 2147483647, %v4565_v0  ;;  %v4534_v2 = vadd.f32 %v4510_v20, %v4414_v16  ;;  %v4526_v6 = vrot.slane %v4525_v10, 4 }
 0x54e   :  { %v4625_v63 = vrot.slane %v4624_v9, 4  ;;  %v4632_v61 = vrot.slane %v4631_v23, 4  ;;  %v4520_v4 = vadd.f32 %v4519_v58, %v4518_v11  ;;  %v4572_v35 = vsub.f32 %v4560_v38, %v5679_v32 }
 0x54f   :  { %v4588_v7 = vsub.f32 1.0, %v4576_v45  ;;  %v4589_v5 = vsub.f32 1.0, %v4577_v59  ;;  %v4598_v53 = vmax.f32 %v4586_v25, 0.0  ;;  %v4573_v48 = vsub.f32 %v4560_v38, %v5681_v39 }
 0x550   :  { %v4626_v13 = vadd.f32 %v4625_v63, %v4624_v9  ;;  %v4633_v24 = vadd.f32 %v4632_v61, %v4631_v23  ;;  %v4599_v54 = vmax.f32 %v4587_v34, 0.0  ;;  %v4584_v52 = vand.u32 2147483647, %v4572_v35 }
 0x551   :  { %v4600_v31 = vmax.f32 %v4588_v7, 0.0  ;;  %v4601_v28 = vmax.f32 %v4589_v5, 0.0  ;;  %v4527_v1 = vadd.f32 %v4526_v6, %v4525_v10  ;;  %v4585_v44 = vand.u32 2147483647, %v4573_v48 }
 0x552   :  { %v4627_v17 = vrot.slane %v4626_v13, 2  ;;  %v4634_v16 = vrot.slane %v4633_v24, 2  ;;  %v4495_v41 = vrot.slane %v4494_v55, 1  ;;  %v4596_v43 = vsub.f32 1.0, %v4584_v52 }
 0x553   :  { %v4610_v21 = vadd.f32 %v4600_v31, %v4598_v53  ;;  %v4617_v62 = vadd.f32 %v4601_v28, %v4599_v54  ;;  %v4521_v11 = vrot.slane %v4520_v4, 2  ;;  %v4597_v29 = vsub.f32 1.0, %v4585_v44 }
 0x554   :  { %v4628_v42 = vadd.f32 %v4627_v17, %v4626_v13  ;;  %v4635_v32 = vadd.f32 %v4634_v16, %v4633_v24  ;;  %v4502_v46 = vrot.slane %v4501_v15, 1  ;;  %v4608_v39 = vmax.f32 %v4596_v43, 0.0 }
 0x555   :  { %v4611_v12 = vrot.slane %v4610_v21, 4  ;;  %v4618_v51 = vrot.slane %v4617_v62, 4  ;;  %v4528_v20 = vrot.slane %v4527_v1, 2  ;;  %v4609_v22 = vmax.f32 %v4597_v29, 0.0 }
 0x556   :  { %v4629_v57 = vrot.slane %v4628_v42, 1  ;;  %v4636_v37 = vrot.slane %v4635_v32, 1  ;;  %v4535_v10 = vadd.f32 %v4517_v33, %v7732_v30  ;;  %v4638_v58 = vadd.f32 %v4608_v39, %v7596_v14 }
 0x557   :  { %v4612_v3 = vadd.f32 %v4611_v12, %v4610_v21  ;;  %v4619_v56 = vadd.f32 %v4618_v51, %v4617_v62  ;;  %v4522_v40 = vadd.f32 %v4521_v11, %v4520_v4  ;;  %v4645_v23 = vadd.f32 %v4609_v22, %v8105_v8 }
 0x558   :  { %v4630_v0 = vadd.f32 %v4629_v57, %v4628_v42  ;;  %v4637_v9 = vadd.f32 %v4636_v37, %v4635_v32  ;;  %v4496_v25 = vadd.f32 %v4495_v41, %v4494_v55  ;;  %v4639_v45 = vrot.slane %v4638_v58, 4 }
 0x559   :  { %v4613_v38 = vrot.slane %v4612_v3, 2  ;;  %v4620_v34 = vrot.slane %v4619_v56, 2  ;;  %v4529_v59 = vadd.f32 %v4528_v20, %v4527_v1  ;;  %v4646_v61 = vrot.slane %v4645_v23, 4 }
 0x55a   :  { %v4654_v6 = vadd.f32 %v4630_v0, %v4534_v2  ;;  %v4655_v63 = vadd.f32 %v4637_v9, %v4535_v10  ;;  %v4503_v7 = vadd.f32 %v4502_v46, %v4501_v15  ;;  %v4640_v33 = vadd.f32 %v4639_v45, %v4638_v58 }
 0x55b   :  { %v4614_v5 = vadd.f32 %v4613_v38, %v4612_v3  ;;  %v4621_v30 = vadd.f32 %v4620_v34, %v4619_v56  ;;  %v4523_v35 = vrot.slane %v4522_v40, 1  ;;  %v4647_v4 = vadd.f32 %v4646_v61, %v4645_v23 }
 0x55c   :  { %v4660_v13 = vmul.f32 0.00390625, %v4654_v6  ;;  %v4661_v14 = vmul.f32 0.00390625, %v4655_v63  ;;  %v4404_v24 = vadd.f32 %v4403_v18, %v7734_v27  ;;  %v4641_v48 = vrot.slane %v4640_v33, 2 }
 0x55d   :  { %v4615_v55 = vrot.slane %v4614_v5, 1  ;;  %v4622_v53 = vrot.slane %v4621_v30, 1  ;;  %v4411_v2 = vadd.f32 %v4410_v26, %v7740_v60  ;;  %v4530_v54 = vrot.slane %v4529_v59, 1 }
 0x55e   :  { %v4666_v15 = vmax.f32 %v4660_v13, 1e-30  ;;  %v4667_v31 = vmax.f32 %v4661_v14, 1e-30  ;;  %v4532_v28 = vadd.f32 %v4496_v25, %v7738_v19  ;;  %v4533_v52 = vadd.f32 %v4503_v7, %v7742_v49 }
 0x55f   :  { %v4616_v1 = vadd.f32 %v4615_v55, %v4614_v5  ;;  %v4623_v17 = vadd.f32 %v4622_v53, %v4621_v30  ;;  %v4524_v16 = vadd.f32 %v4523_v35, %v4522_v40  ;;  %v4642_v44 = vadd.f32 %v4641_v48, %v4640_v33 }
 0x560   :  { %4924 = vlog2.f32 %v4666_v15  ;;  %v4648_v27 = vrot.slane %v4647_v4, 2  ;;  %v4297_v18 = vadd.f32 %v7725_v36, %v7701_v47  ;;  %v4416_v60 = vadd.f32 %v4404_v24, %v7728_v50 }
 0x561   :  { %4926 = vlog2.f32 %v4667_v31  ;;  %v4652_v41 = vadd.f32 %v4616_v1, %v4532_v28  ;;  %v4653_v21 = vadd.f32 %v4623_v17, %v4533_v52  ;;  %v4531_v26 = vadd.f32 %v4530_v54, %v4529_v59 }
 0x562   :  { %v4643_v62 = vrot.slane %v4642_v44, 1  ;;  %v4649_v43 = vadd.f32 %v4648_v27, %v4647_v4  ;;  %v4417_v49 = vadd.f32 %v4411_v2, %v4297_v18  ;;  %v4536_v42 = vadd.f32 %v4524_v16, %v4416_v60 }
 0x563   :  { %v4658_v19 = vmul.f32 0.00390625, %v4652_v41  ;;  %v4659_v11 = vmul.f32 0.00390625, %v4653_v21  ;;  %v4678_v10 = vsub.f32 0.0, %v4660_v13  ;;  %v4679_v56 = vsub.f32 0.0, %v4661_v14 }
 0x564   :  { %v4644_v32 = vadd.f32 %v4643_v62, %v4642_v44  ;;  %v4650_v29 = vrot.slane %v4649_v43, 1  ;;  %v4537_v51 = vadd.f32 %v4531_v26, %v4417_v49  ;;  %vm4672_vm11 = vcmp.gt.f32.partialorder %v4660_v13, 0.0 }
 0x565   :  { %v4664_v46 = vmax.f32 %v4658_v19, 1e-30  ;;  %v4665_v12 = vmax.f32 %v4659_v11, 1e-30  ;;  %vm4673_vm12 = vcmp.gt.f32.partialorder %v4661_v14, 0.0  ;;  %v4676_v59 = vsub.f32 0.0, %v4658_v19 }
 0x566   :  { %v4651_v39 = vadd.f32 %v4650_v29, %v4649_v43  ;;  %v4656_v20 = vadd.f32 %v4644_v32, %v4536_v42  ;;  %v4677_v61 = vsub.f32 0.0, %v4659_v11  ;;  %vm4670_vm13 = vcmp.gt.f32.partialorder %v4658_v19, 0.0 }
 0x567   :  { %4928 = vlog2.f32 %v4664_v46  ;;  %vm4671_vm14 = vcmp.gt.f32.partialorder %v4659_v11, 0.0 }
 0x568   :  { %4930 = vlog2.f32 %v4665_v12  ;;  %v4657_v47 = vadd.f32 %v4651_v39, %v4537_v51  ;;  %v4662_v36 = vmul.f32 0.00390625, %v4656_v20 }
 0x56a   :  { %v4925_v57 = vpop.eup %4924  ;;  %v4663_v50 = vmul.f32 0.00390625, %v4657_v47  ;;  %v4668_v37 = vmax.f32 %v4662_v36, 1e-30  ;;  %v4680_v55 = vsub.f32 0.0, %v4662_v36  ;;  %vm4674_vm15 = vcmp.gt.f32.partialorder %v4662_v36, 0.0 }
 0x56b   :  { %v4927_v22 = vpop.eup %4926  ;;  %v4687_v3 = vmul.f32 0.6931472, %v4925_v57 }
 0x56c   :  { %v4689_v58 = vmul.f32 0.6931472, %v4927_v22  ;;  %v4669_v40 = vmax.f32 %v4663_v50, 1e-30  ;;  %4932 = vlog2.f32 %v4668_v37  ;;  %v4681_v48 = vsub.f32 0.0, %v4663_v50 }
 0x56d   :  { %v4696_v0 = vmul.f32 %v4687_v3, %v4678_v10  ;;  %vm4675_vm0 = vcmp.gt.f32.partialorder %v4663_v50, 0.0 }
 0x56e   :  { %v4697_v9 = vmul.f32 %v4689_v58, %v4679_v56  ;;  %4934 = vlog2.f32 %v4669_v40 }
 0x56f   :  { %v4702_v8 = vmul.f32 1.442695, %v4696_v0 }
 0x570   :  { %v4703_v23 = vmul.f32 1.442695, %v4697_v9 }
 0x571   :  { %v4929_v25 = vpop.eup %4928  ;;  %v4708_v38 = vsel %vm4672_vm11, %v4702_v8, 0.0 }
 0x572   :  { %v4931_v34 = vpop.eup %4930  ;;  %v4709_v45 = vsel %vm4673_vm12, %v4703_v23, 0.0  ;;  %v4683_v6 = vmul.f32 0.6931472, %v4929_v25 }
 0x573   :  { %v4719_v63 = vcombine.low %v4708_v38, %v4709_v45  ;;  %v4685_v7 = vmul.f32 0.6931472, %v4931_v34 }
 0x574   :  { %v4694_v5 = vmul.f32 %v4683_v6, %v4676_v59 }
 0x575   :  { %v4695_v30 = vmul.f32 %v4685_v7, %v4677_v61  ;;  %v4721_v54 = vrot.slane %v4719_v63, 7 }
 0x576   :  { %v4700_v33 = vmul.f32 1.442695, %v4694_v5  ;;  %v4933_v35 = vpop.eup %4932 }
 0x577   :  { %v4701_v4 = vmul.f32 1.442695, %v4695_v30  ;;  %v4691_v53 = vmul.f32 0.6931472, %v4933_v35 }
 0x578   :  { %v4935_v24 = vpop.eup %4934  ;;  %v4706_v13 = vsel %vm4670_vm13, %v4700_v33, 0.0 }
 0x579   :  { %v4707_v14 = vsel %vm4671_vm14, %v4701_v4, 0.0  ;;  %v4693_v2 = vmul.f32 0.6931472, %v4935_v24  ;;  %v4698_v31 = vmul.f32 %v4691_v53, %v4680_v55 }
 0x57a   :  { %v4718_v15 = vcombine.low %v4706_v13, %v4707_v14 }
 0x57b   :  { %v4699_v28 = vmul.f32 %v4693_v2, %v4681_v48  ;;  %v4704_v1 = vmul.f32 1.442695, %v4698_v31 }
 0x57c   :  { %v4722_v52 = vsel %vm2394_vm5, %v4721_v54, %v4718_v15 }
 0x57d   :  { %v4723_v17 = vsel %vm2396_vm6, %v4721_v54, %v4722_v52  ;;  %v4705_v16 = vmul.f32 1.442695, %v4699_v28  ;;  %v4710_v44 = vsel %vm4674_vm15, %v4704_v1, 0.0 }
 0x57f   :  { %v4711_v27 = vsel %vm4675_vm0, %v4705_v16, 0.0 }
 0x580   :  { %v4720_v18 = vcombine.low %v4710_v44, %v4711_v27 }
 0x582   :  { %v4724_v41 = vrot.slane %v4720_v18, 6 }
 0x584   :  { %v4725_v21 = vsel %vm2399_vm9, %v4724_v41, %v4723_v17 }
 0x585   :  { %v4726_v60 = vsel %vm2401_vm10, %v4724_v41, %v4725_v21 }
 0x586   :  { %4759 = vst [vmem:[%s7779_s2 + $0x8] sm:$0x77] %v4726_v60 }
 0x587   :  { %4734 = vsyncpa [#allocation4], 1 }
 0x588   :  { %4735 = vsyncpa [#allocation5], 1 }

</bundles_post_ra>
